<compile_context>
chip_gen: v6e
topology: v6e:2x2x1
jax: 0.10.0
libtpu: 0.0.40
codegen_flags: <defaults>
</compile_context>

<pallas_src>
import functools

import jax
import jax.numpy as jnp
from jax.experimental import pallas as pl
from jax.experimental.pallas import tpu as pltpu


def _selective_cell_kernel(x_ref, wbig_ref, bhb_ref, bwt_ref, we_ref, be_ref,
                           y_ref, prevf_ref, *, pool_size):
    bB, T, C = x_ref.shape
    H = y_ref.shape[-1]
    HH = H * H
    P = pool_size

    # Re-zero the recurrent state at the start of each batch chunk's sequence.
    @pl.when(pl.program_id(1) == 0)
    def _():
        prevf_ref[...] = jnp.zeros_like(prevf_ref)

    # Hoisted loads / broadcasts (outside the unrolled time loop — JAX does not
    # CSE broadcast_in_dim inside the loop body).
    w_big = wbig_ref[...]                                          # (C, HH+2H) bf16
    b_hb = jnp.broadcast_to(bhb_ref[...], (bB, 2 * H))             # [b_h | b_bt]
    b_wt = jnp.broadcast_to(bwt_ref[...].reshape(1, H, H), (bB, H, H))
    w_e = we_ref[...]                                              # (H//P, H) f32
    b_e = jnp.broadcast_to(be_ref[...], (bB, H))

    def maxpool(v):                                                # MaxPool1d(P) on last dim
        # TODO(synk): a roll/strided max-tree would keep this purely on the VPU,
        # but reshape+max is the robustly-lowered form for H < 128.
        return jnp.max(v.reshape(bB, H // P, P), axis=-1)

    prev_f = prevf_ref[...]                                        # (bB, H) f32 carry

    # Statically unrolled time loop: every ref index is static, one fused MXU
    # matmul per timestep, grid overhead amortized over T steps.
    for t in range(T):
        x_t = x_ref[:, t, :]                                       # (bB, C) bf16
        # [ x@W_wt_2d | x@W_h | x@W_bt ]  ->  (bB, HH + 2H), f32 accumulation.
        proj = jnp.dot(x_t, w_big, preferred_element_type=jnp.float32)
        dyn = proj[:, :HH].reshape(bB, H, H) + b_wt                # Wf_t[b,h,k]
        tail = proj[:, HH:] + b_hb                                 # (bB, 2H)
        h_pre = tail[:, :H] + prev_f                               # x@W_h + b_h + f_{t-1}
        bias_f = tail[:, H:]                                       # x@W_bt + b_bt

        h = jnp.maximum(h_pre, 0.0)
        # TODO(synk): nn.Dropout(0.1) omitted — inference (eval-mode) identity.
        h = jnp.dot(maxpool(h), w_e, preferred_element_type=jnp.float32) + b_e

        # f_pre[b,k] = sum_h h[b,h] * Wf_t[b,h,k] + bias_f[b,k]
        f = jnp.sum(h[:, :, None] * dyn, axis=1) + bias_f
        f = jnp.maximum(f, 0.0)
        f = jnp.dot(maxpool(f), w_e, preferred_element_type=jnp.float32) + b_e

        y_ref[:, t:t + 1, :] = h[:, None, :].astype(y_ref.dtype)
        prev_f = f

    prevf_ref[...] = prev_f
    # TODO(synk): the final f state is not emitted (the torch module does not
    # return it); add a second output if a caller ever needs it.


def _weight_spec(shape, single_buffer):
    imap = lambda b, s: (0,) * len(shape)
    if single_buffer:
        # Constant-index weights: one VMEM buffer instead of two.
        return pl.BlockSpec(shape, imap, pipeline_mode=pl.Buffered(1))
    return pl.BlockSpec(shape, imap)


def _pick_time_chunk(seq_len):
    for t in (16, 8):      # second-minor block dims must be multiples of 8
        if seq_len % t == 0:
            return t
    return seq_len         # whole sequence per grid step (block == full dim)


def selective_cell_forward(x, params, pool_size, *, time_chunk=None,
                           batch_chunk=None, param_dtype=jnp.bfloat16):
    """x: (B, S, C) -> y: (B, S, H) float32."""
    wh, bh, wwt, bwt, wbt, bbt, we, be = params
    B, S, C = x.shape
    H = wh.shape[1]
    P = pool_size
    assert H % P == 0

    T = _pick_time_chunk(S) if time_chunk is None else time_chunk
    assert S % T == 0 and (T == S or T % 8 == 0), \
        "time_chunk must divide S and be a multiple of 8 (or equal S)"
    # On v7x pass batch_chunk = B // 2 to split the batch across the 2 TensorCores.
    bB = B if batch_chunk is None else batch_chunk
    assert B % bB == 0

    HH = H * H
    # ---- Fused / pre-laid-out weights (host-side, once). ----
    wwt2 = wwt.reshape(C, HH)                                    # col index = h*H + k
    w_big = jnp.concatenate([wwt2, wh, wbt], axis=1).astype(param_dtype)  # (C, HH+2H)
    b_hb = jnp.concatenate([bh, bbt]).reshape(1, 2 * H).astype(jnp.float32)
    bwt32 = bwt.astype(jnp.float32)
    we32 = we.astype(jnp.float32)
    be2 = be.reshape(1, H).astype(jnp.float32)
    x_in = x.astype(param_dtype)          # bf16 stream: halves activation HBM reads

    # ---- Explicit VMEM budget (v7x: 64 MiB physical / 32 MiB scoped default). ----
    # TODO(synk): if the fused C*(H*H+2H) weight ever exceeds ~48 MiB, stream it
    # from HBM (memory_space=pl.ANY + pltpu.emit_pipeline over output-H chunks).
    w_bytes = 2 * (w_big.size * w_big.dtype.itemsize
                   + (b_hb.size + bwt32.size + we32.size + be2.size) * 4)
    act_bytes = 2 * (bB * T * C * x_in.dtype.itemsize + bB * T * H * 4) + bB * H * 4
    vmem_limit = int(min(max(2 * (w_bytes + act_bytes), 16 * 1024 * 1024),
                         56 * 1024 * 1024))

    kernel = functools.partial(_selective_cell_kernel, pool_size=P)
    out_shape = jax.ShapeDtypeStruct((B, S, H), jnp.float32)

    def build(single_buffer_weights):
        return pl.pallas_call(
            kernel,
            out_shape=out_shape,
            grid_spec=pltpu.PrefetchScalarGridSpec(
                num_scalar_prefetch=0,
                grid=(B // bB, S // T),
                in_specs=[
                    pl.BlockSpec((bB, T, C), lambda b, s: (b, s, 0)),      # x slab
                    _weight_spec((C, HH + 2 * H), single_buffer_weights),  # [W_wt|W_h|W_bt]
                    _weight_spec((1, 2 * H), single_buffer_weights),       # [b_h|b_bt]
                    _weight_spec((H, H), single_buffer_weights),           # b_wt
                    _weight_spec((H // P, H), single_buffer_weights),      # expand weight
                    _weight_spec((1, H), single_buffer_weights),           # expand bias
                ],
                out_specs=pl.BlockSpec((bB, T, H), lambda b, s: (b, s, 0)),
                scratch_shapes=[pltpu.VMEM((bB, H), jnp.float32)],         # prev_f carry
            ),
            compiler_params=pltpu.CompilerParams(
                dimension_semantics=("parallel", "arbitrary"),  # batch || , time sequential
                vmem_limit_bytes=vmem_limit,
            ),
        )

    args = (x_in, w_big, b_hb, bwt32, we32, be2)
    try:
        return jax.block_until_ready(build(True)(*args))
    except Exception:
        # This JAX build rejected pl.Buffered(1) single-buffering of the
        # constant-index weights; fall back to default double-buffering.
        return jax.block_until_ready(build(False)(*args))


def selective_cell_ref(x, params, pool_size):
    """Pure-JAX reference of the intended per-timestep recurrence (f32)."""
    wh, bh, wwt, bwt, wbt, bbt, we, be = params
    B, S, C = x.shape
    H = wh.shape[1]

    def step(prev_f, x_t):
        h = jnp.maximum(x_t @ wh + bh + prev_f, 0.0)
        h = jnp.max(h.reshape(B, H // pool_size, pool_size), axis=-1) @ we + be
        wf = jnp.einsum('bc,chk->bhk', x_t, wwt) + bwt
        bias_f = x_t @ wbt + bbt
        f = jnp.maximum(jnp.einsum('bh,bhk->bk', h, wf) + bias_f, 0.0)
        f = jnp.max(f.reshape(B, H // pool_size, pool_size), axis=-1) @ we + be
        return f, h

    prev_f0 = jnp.zeros((B, H), jnp.float32)
    _, ys = jax.lax.scan(step, prev_f0, jnp.transpose(x, (1, 0, 2)))
    return jnp.transpose(ys, (1, 0, 2))


if __name__ == "__main__":
    B, S, C, H, P = 2, 16, 16, 32, 4   # batch, seq_len, input_size, hidden_size, pool
    assert H % P == 0

    key = jax.random.PRNGKey(0)
    ks = jax.random.split(key, 9)
    wh = jax.random.normal(ks[0], (C, H), jnp.float32) / jnp.sqrt(C)
    bh = jax.random.normal(ks[1], (H,), jnp.float32) * 0.1
    wwt = jax.random.normal(ks[2], (C, H, H), jnp.float32) / jnp.sqrt(C * H)
    bwt = jax.random.normal(ks[3], (H, H), jnp.float32) / jnp.sqrt(H)
    wbt = jax.random.normal(ks[4], (C, H), jnp.float32) / jnp.sqrt(C)
    bbt = jax.random.normal(ks[5], (H,), jnp.float32) * 0.1
    we = jax.random.normal(ks[6], (H // P, H), jnp.float32) / jnp.sqrt(H // P)
    be = jax.random.normal(ks[7], (H,), jnp.float32) * 0.1
    x = jax.random.normal(ks[8], (B, S, C), jnp.float32)
    params = (wh, bh, wwt, bwt, wbt, bbt, we, be)

    # time_chunk=8  -> 2 sequential time chunks (exercises the cross-chunk f carry);
    # batch_chunk=1 -> 2 parallel batch chunks (exercises the megacore axis).
    y = selective_cell_forward(x, params, P, time_chunk=8, batch_chunk=1)
    y = jax.block_until_ready(y)

    # Reference uses the same bf16 rounding of the MXU operands (x, W_h, W_bt,
    # W_wt) so the check isolates kernel fidelity rather than quantization.
    q = lambda a: a.astype(jnp.bfloat16).astype(jnp.float32)
    ref_params = (q(wh), bh, q(wwt), bwt, q(wbt), bbt, we, be)
    y_ref = selective_cell_ref(q(x), ref_params, P)

    assert y.shape == (B, S, H)
    assert bool(jnp.all(jnp.isfinite(y)))
    if not bool(jnp.allclose(y, y_ref, rtol=2e-2, atol=2e-2)):
        err = float(jnp.max(jnp.abs(y - y_ref)))
        raise SystemExit(f"Pallas kernel does not match JAX reference (max err {err:.3e})")
    print("KERNEL_OK")
</pallas_src>

<mosaic_0001>
module attributes {stable_mosaic.version = 11 : i64} {
  func.func @_selective_cell_kernel(%arg0: i32, %arg1: i32, %arg2: memref<1x8x16xbf16, #tpu.memory_space<vmem>>, %arg3: memref<16x1088xbf16, #tpu.memory_space<vmem>>, %arg4: memref<1x64xf32, #tpu.memory_space<vmem>>, %arg5: memref<32x32xf32, #tpu.memory_space<vmem>>, %arg6: memref<8x32xf32, #tpu.memory_space<vmem>>, %arg7: memref<1x32xf32, #tpu.memory_space<vmem>>, %arg8: memref<1x8x32xf32, #tpu.memory_space<vmem>>, %arg9: memref<1x32xf32, #tpu.memory_space<vmem>>) attributes {dimension_semantics = [#tpu.dimension_semantics<parallel>, #tpu.dimension_semantics<arbitrary>], iteration_bounds = array<i64: 2, 2>, scalar_prefetch = 0 : i64, scratch_operands = 1 : i64, tpu.core_type = #tpu.core_type<tc>, window_params = [{transform_indices = @transform_0, window_bounds = array<i64: 1, 8, 16>}, {pipeline_mode = #tpu.pipeline_mode<synchronous>, transform_indices = @transform_1, window_bounds = array<i64: 16, 1088>}, {pipeline_mode = #tpu.pipeline_mode<synchronous>, transform_indices = @transform_2, window_bounds = array<i64: 1, 64>}, {pipeline_mode = #tpu.pipeline_mode<synchronous>, transform_indices = @transform_3, window_bounds = array<i64: 32, 32>}, {pipeline_mode = #tpu.pipeline_mode<synchronous>, transform_indices = @transform_4, window_bounds = array<i64: 8, 32>}, {pipeline_mode = #tpu.pipeline_mode<synchronous>, transform_indices = @transform_5, window_bounds = array<i64: 1, 32>}, {transform_indices = @transform_6, window_bounds = array<i64: 1, 8, 32>}]} {
    %c0_i32 = arith.constant 0 : i32
    %0 = arith.cmpi eq, %arg1, %c0_i32 : i32
    %1 = arith.extui %0 : i1 to i32
    %c0_i32_0 = arith.constant 0 : i32
    %2 = arith.cmpi ne, %1, %c0_i32_0 : i32
    scf.if %2 {
      %cst_118 = arith.constant 0.000000e+00 : f32
      %251 = vector.broadcast %cst_118 : f32 to vector<1x32xf32>
      %c0_119 = arith.constant 0 : index
      %c0_120 = arith.constant 0 : index
      %252 = vector.load %arg9[%c0_119, %c0_120] : memref<1x32xf32, #tpu.memory_space<vmem>>, vector<1x32xf32>
      tpu.vector_store %arg9[%c0_119, %c0_120], %251 {strides = array<i32>} : memref<1x32xf32, #tpu.memory_space<vmem>>, vector<1x32xf32>,
    } else {
    }
    %c0 = arith.constant 0 : index
    %c0_1 = arith.constant 0 : index
    %3 = vector.load %arg3[%c0, %c0_1] : memref<16x1088xbf16, #tpu.memory_space<vmem>>, vector<16x1088xbf16>
    %c0_2 = arith.constant 0 : index
    %c0_3 = arith.constant 0 : index
    %4 = vector.load %arg4[%c0_2, %c0_3] : memref<1x64xf32, #tpu.memory_space<vmem>>, vector<1x64xf32>
    %c0_4 = arith.constant 0 : index
    %c0_5 = arith.constant 0 : index
    %5 = vector.load %arg5[%c0_4, %c0_5] : memref<32x32xf32, #tpu.memory_space<vmem>>, vector<32x32xf32>
    %6 = vector.shape_cast %5 : vector<32x32xf32> to vector<1x32x32xf32>
    %c0_6 = arith.constant 0 : index
    %c0_7 = arith.constant 0 : index
    %7 = vector.load %arg6[%c0_6, %c0_7] : memref<8x32xf32, #tpu.memory_space<vmem>>, vector<8x32xf32>
    %c0_8 = arith.constant 0 : index
    %c0_9 = arith.constant 0 : index
    %8 = vector.load %arg7[%c0_8, %c0_9] : memref<1x32xf32, #tpu.memory_space<vmem>>, vector<1x32xf32>
    %c0_10 = arith.constant 0 : index
    %c0_11 = arith.constant 0 : index
    %9 = vector.load %arg9[%c0_10, %c0_11] : memref<1x32xf32, #tpu.memory_space<vmem>>, vector<1x32xf32>
    %c0_12 = arith.constant 0 : index
    %c0_13 = arith.constant 0 : index
    %c0_14 = arith.constant 0 : index
    %10 = vector.load %arg2[%c0_12, %c0_13, %c0_14] : memref<1x8x16xbf16, #tpu.memory_space<vmem>>, vector<1x1x16xbf16>
    %11 = vector.shape_cast %10 : vector<1x1x16xbf16> to vector<1x16xbf16>
    %cst = arith.constant dense<0.000000e+00> : vector<1x1088xf32>
    %12 = tpu.matmul %11, %3, %cst {dimension_numbers = #tpu.dot_dimension_numbers<[1], [0], [0], [1], [0, 0, 1, 1], [], []>} : vector<1x16xbf16>, vector<16x1088xbf16>, vector<1x1088xf32> -> vector<1x1088xf32>
    %13 = vector.extract_strided_slice %12 {offsets = [0, 0], sizes = [1, 1024], strides = [1, 1]} : vector<1x1088xf32> to vector<1x1024xf32>
    %14 = vector.shape_cast %13 : vector<1x1024xf32> to vector<1x32x32xf32>
    %15 = arith.addf %14, %6 : vector<1x32x32xf32>
    %16 = vector.extract_strided_slice %12 {offsets = [0, 1024], sizes = [1, 64], strides = [1, 1]} : vector<1x1088xf32> to vector<1x64xf32>
    %17 = arith.addf %16, %4 : vector<1x64xf32>
    %18 = vector.extract_strided_slice %17 {offsets = [0, 0], sizes = [1, 32], strides = [1, 1]} : vector<1x64xf32> to vector<1x32xf32>
    %19 = arith.addf %18, %9 : vector<1x32xf32>
    %20 = vector.extract_strided_slice %17 {offsets = [0, 32], sizes = [1, 32], strides = [1, 1]} : vector<1x64xf32> to vector<1x32xf32>
    %cst_15 = arith.constant 0.000000e+00 : f32
    %21 = vector.broadcast %cst_15 : f32 to vector<1x32xf32>
    %22 = arith.maximumf %19, %21 : vector<1x32xf32>
    %23 = vector.shape_cast %22 : vector<1x32xf32> to vector<1x8x4xf32>
    %cst_16 = arith.constant dense<0xFF800000> : vector<1x8xf32>
    %24 = vector.multi_reduction <maximumf>, %23, %cst_16 [2] : vector<1x8x4xf32> to vector<1x8xf32>
    %cst_17 = arith.constant dense<0.000000e+00> : vector<1x32xf32>
    %25 = tpu.matmul %24, %7, %cst_17 {dimension_numbers = #tpu.dot_dimension_numbers<[1], [0], [0], [1], [0, 0, 1, 1], [], []>} : vector<1x8xf32>, vector<8x32xf32>, vector<1x32xf32> -> vector<1x32xf32>
    %26 = arith.addf %25, %8 : vector<1x32xf32>
    %27 = vector.shape_cast %26 : vector<1x32xf32> to vector<1x32x1xf32>
    %28 = vector.broadcast %27 : vector<1x32x1xf32> to vector<1x32x32xf32>
    %29 = arith.mulf %28, %15 : vector<1x32x32xf32>
    %cst_18 = arith.constant dense<0.000000e+00> : vector<1x32xf32>
    %30 = vector.multi_reduction <add>, %29, %cst_18 [1] : vector<1x32x32xf32> to vector<1x32xf32>
    %31 = arith.addf %30, %20 : vector<1x32xf32>
    %cst_19 = arith.constant 0.000000e+00 : f32
    %32 = vector.broadcast %cst_19 : f32 to vector<1x32xf32>
    %33 = arith.maximumf %31, %32 : vector<1x32xf32>
    %34 = vector.shape_cast %33 : vector<1x32xf32> to vector<1x8x4xf32>
    %cst_20 = arith.constant dense<0xFF800000> : vector<1x8xf32>
    %35 = vector.multi_reduction <maximumf>, %34, %cst_20 [2] : vector<1x8x4xf32> to vector<1x8xf32>
    %cst_21 = arith.constant dense<0.000000e+00> : vector<1x32xf32>
    %36 = tpu.matmul %35, %7, %cst_21 {dimension_numbers = #tpu.dot_dimension_numbers<[1], [0], [0], [1], [0, 0, 1, 1], [], []>} : vector<1x8xf32>, vector<8x32xf32>, vector<1x32xf32> -> vector<1x32xf32>
    %37 = arith.addf %36, %8 : vector<1x32xf32>
    %38 = vector.shape_cast %26 : vector<1x32xf32> to vector<1x1x32xf32>
    %c0_22 = arith.constant 0 : index
    %c0_23 = arith.constant 0 : index
    %c0_24 = arith.constant 0 : index
    %39 = vector.load %arg8[%c0_22, %c0_23, %c0_24] : memref<1x8x32xf32, #tpu.memory_space<vmem>>, vector<1x1x32xf32>
    tpu.vector_store %arg8[%c0_22, %c0_23, %c0_24], %38 {strides = array<i32>} : memref<1x8x32xf32, #tpu.memory_space<vmem>>, vector<1x1x32xf32>,
    %c0_25 = arith.constant 0 : index
    %c1 = arith.constant 1 : index
    %c0_26 = arith.constant 0 : index
    %40 = vector.load %arg2[%c0_25, %c1, %c0_26] : memref<1x8x16xbf16, #tpu.memory_space<vmem>>, vector<1x1x16xbf16>
    %41 = vector.shape_cast %40 : vector<1x1x16xbf16> to vector<1x16xbf16>
    %cst_27 = arith.constant dense<0.000000e+00> : vector<1x1088xf32>
    %42 = tpu.matmul %41, %3, %cst_27 {dimension_numbers = #tpu.dot_dimension_numbers<[1], [0], [0], [1], [0, 0, 1, 1], [], []>} : vector<1x16xbf16>, vector<16x1088xbf16>, vector<1x1088xf32> -> vector<1x1088xf32>
    %43 = vector.extract_strided_slice %42 {offsets = [0, 0], sizes = [1, 1024], strides = [1, 1]} : vector<1x1088xf32> to vector<1x1024xf32>
    %44 = vector.shape_cast %43 : vector<1x1024xf32> to vector<1x32x32xf32>
    %45 = arith.addf %44, %6 : vector<1x32x32xf32>
    %46 = vector.extract_strided_slice %42 {offsets = [0, 1024], sizes = [1, 64], strides = [1, 1]} : vector<1x1088xf32> to vector<1x64xf32>
    %47 = arith.addf %46, %4 : vector<1x64xf32>
    %48 = vector.extract_strided_slice %47 {offsets = [0, 0], sizes = [1, 32], strides = [1, 1]} : vector<1x64xf32> to vector<1x32xf32>
    %49 = arith.addf %48, %37 : vector<1x32xf32>
    %50 = vector.extract_strided_slice %47 {offsets = [0, 32], sizes = [1, 32], strides = [1, 1]} : vector<1x64xf32> to vector<1x32xf32>
    %cst_28 = arith.constant 0.000000e+00 : f32
    %51 = vector.broadcast %cst_28 : f32 to vector<1x32xf32>
    %52 = arith.maximumf %49, %51 : vector<1x32xf32>
    %53 = vector.shape_cast %52 : vector<1x32xf32> to vector<1x8x4xf32>
    %cst_29 = arith.constant dense<0xFF800000> : vector<1x8xf32>
    %54 = vector.multi_reduction <maximumf>, %53, %cst_29 [2] : vector<1x8x4xf32> to vector<1x8xf32>
    %cst_30 = arith.constant dense<0.000000e+00> : vector<1x32xf32>
    %55 = tpu.matmul %54, %7, %cst_30 {dimension_numbers = #tpu.dot_dimension_numbers<[1], [0], [0], [1], [0, 0, 1, 1], [], []>} : vector<1x8xf32>, vector<8x32xf32>, vector<1x32xf32> -> vector<1x32xf32>
    %56 = arith.addf %55, %8 : vector<1x32xf32>
    %57 = vector.shape_cast %56 : vector<1x32xf32> to vector<1x32x1xf32>
    %58 = vector.broadcast %57 : vector<1x32x1xf32> to vector<1x32x32xf32>
    %59 = arith.mulf %58, %45 : vector<1x32x32xf32>
    %cst_31 = arith.constant dense<0.000000e+00> : vector<1x32xf32>
    %60 = vector.multi_reduction <add>, %59, %cst_31 [1] : vector<1x32x32xf32> to vector<1x32xf32>
    %61 = arith.addf %60, %50 : vector<1x32xf32>
    %cst_32 = arith.constant 0.000000e+00 : f32
    %62 = vector.broadcast %cst_32 : f32 to vector<1x32xf32>
    %63 = arith.maximumf %61, %62 : vector<1x32xf32>
    %64 = vector.shape_cast %63 : vector<1x32xf32> to vector<1x8x4xf32>
    %cst_33 = arith.constant dense<0xFF800000> : vector<1x8xf32>
    %65 = vector.multi_reduction <maximumf>, %64, %cst_33 [2] : vector<1x8x4xf32> to vector<1x8xf32>
    %cst_34 = arith.constant dense<0.000000e+00> : vector<1x32xf32>
    %66 = tpu.matmul %65, %7, %cst_34 {dimension_numbers = #tpu.dot_dimension_numbers<[1], [0], [0], [1], [0, 0, 1, 1], [], []>} : vector<1x8xf32>, vector<8x32xf32>, vector<1x32xf32> -> vector<1x32xf32>
    %67 = arith.addf %66, %8 : vector<1x32xf32>
    %68 = vector.shape_cast %56 : vector<1x32xf32> to vector<1x1x32xf32>
    %c0_35 = arith.constant 0 : index
    %c1_36 = arith.constant 1 : index
    %c0_37 = arith.constant 0 : index
    %69 = vector.load %arg8[%c0_35, %c1_36, %c0_37] : memref<1x8x32xf32, #tpu.memory_space<vmem>>, vector<1x1x32xf32>
    tpu.vector_store %arg8[%c0_35, %c1_36, %c0_37], %68 {strides = array<i32>} : memref<1x8x32xf32, #tpu.memory_space<vmem>>, vector<1x1x32xf32>,
    %c0_38 = arith.constant 0 : index
    %c2 = arith.constant 2 : index
    %c0_39 = arith.constant 0 : index
    %70 = vector.load %arg2[%c0_38, %c2, %c0_39] : memref<1x8x16xbf16, #tpu.memory_space<vmem>>, vector<1x1x16xbf16>
    %71 = vector.shape_cast %70 : vector<1x1x16xbf16> to vector<1x16xbf16>
    %cst_40 = arith.constant dense<0.000000e+00> : vector<1x1088xf32>
    %72 = tpu.matmul %71, %3, %cst_40 {dimension_numbers = #tpu.dot_dimension_numbers<[1], [0], [0], [1], [0, 0, 1, 1], [], []>} : vector<1x16xbf16>, vector<16x1088xbf16>, vector<1x1088xf32> -> vector<1x1088xf32>
    %73 = vector.extract_strided_slice %72 {offsets = [0, 0], sizes = [1, 1024], strides = [1, 1]} : vector<1x1088xf32> to vector<1x1024xf32>
    %74 = vector.shape_cast %73 : vector<1x1024xf32> to vector<1x32x32xf32>
    %75 = arith.addf %74, %6 : vector<1x32x32xf32>
    %76 = vector.extract_strided_slice %72 {offsets = [0, 1024], sizes = [1, 64], strides = [1, 1]} : vector<1x1088xf32> to vector<1x64xf32>
    %77 = arith.addf %76, %4 : vector<1x64xf32>
    %78 = vector.extract_strided_slice %77 {offsets = [0, 0], sizes = [1, 32], strides = [1, 1]} : vector<1x64xf32> to vector<1x32xf32>
    %79 = arith.addf %78, %67 : vector<1x32xf32>
    %80 = vector.extract_strided_slice %77 {offsets = [0, 32], sizes = [1, 32], strides = [1, 1]} : vector<1x64xf32> to vector<1x32xf32>
    %cst_41 = arith.constant 0.000000e+00 : f32
    %81 = vector.broadcast %cst_41 : f32 to vector<1x32xf32>
    %82 = arith.maximumf %79, %81 : vector<1x32xf32>
    %83 = vector.shape_cast %82 : vector<1x32xf32> to vector<1x8x4xf32>
    %cst_42 = arith.constant dense<0xFF800000> : vector<1x8xf32>
    %84 = vector.multi_reduction <maximumf>, %83, %cst_42 [2] : vector<1x8x4xf32> to vector<1x8xf32>
    %cst_43 = arith.constant dense<0.000000e+00> : vector<1x32xf32>
    %85 = tpu.matmul %84, %7, %cst_43 {dimension_numbers = #tpu.dot_dimension_numbers<[1], [0], [0], [1], [0, 0, 1, 1], [], []>} : vector<1x8xf32>, vector<8x32xf32>, vector<1x32xf32> -> vector<1x32xf32>
    %86 = arith.addf %85, %8 : vector<1x32xf32>
    %87 = vector.shape_cast %86 : vector<1x32xf32> to vector<1x32x1xf32>
    %88 = vector.broadcast %87 : vector<1x32x1xf32> to vector<1x32x32xf32>
    %89 = arith.mulf %88, %75 : vector<1x32x32xf32>
    %cst_44 = arith.constant dense<0.000000e+00> : vector<1x32xf32>
    %90 = vector.multi_reduction <add>, %89, %cst_44 [1] : vector<1x32x32xf32> to vector<1x32xf32>
    %91 = arith.addf %90, %80 : vector<1x32xf32>
    %cst_45 = arith.constant 0.000000e+00 : f32
    %92 = vector.broadcast %cst_45 : f32 to vector<1x32xf32>
    %93 = arith.maximumf %91, %92 : vector<1x32xf32>
    %94 = vector.shape_cast %93 : vector<1x32xf32> to vector<1x8x4xf32>
    %cst_46 = arith.constant dense<0xFF800000> : vector<1x8xf32>
    %95 = vector.multi_reduction <maximumf>, %94, %cst_46 [2] : vector<1x8x4xf32> to vector<1x8xf32>
    %cst_47 = arith.constant dense<0.000000e+00> : vector<1x32xf32>
    %96 = tpu.matmul %95, %7, %cst_47 {dimension_numbers = #tpu.dot_dimension_numbers<[1], [0], [0], [1], [0, 0, 1, 1], [], []>} : vector<1x8xf32>, vector<8x32xf32>, vector<1x32xf32> -> vector<1x32xf32>
    %97 = arith.addf %96, %8 : vector<1x32xf32>
    %98 = vector.shape_cast %86 : vector<1x32xf32> to vector<1x1x32xf32>
    %c0_48 = arith.constant 0 : index
    %c2_49 = arith.constant 2 : index
    %c0_50 = arith.constant 0 : index
    %99 = vector.load %arg8[%c0_48, %c2_49, %c0_50] : memref<1x8x32xf32, #tpu.memory_space<vmem>>, vector<1x1x32xf32>
    tpu.vector_store %arg8[%c0_48, %c2_49, %c0_50], %98 {strides = array<i32>} : memref<1x8x32xf32, #tpu.memory_space<vmem>>, vector<1x1x32xf32>,
    %c0_51 = arith.constant 0 : index
    %c3 = arith.constant 3 : index
    %c0_52 = arith.constant 0 : index
    %100 = vector.load %arg2[%c0_51, %c3, %c0_52] : memref<1x8x16xbf16, #tpu.memory_space<vmem>>, vector<1x1x16xbf16>
    %101 = vector.shape_cast %100 : vector<1x1x16xbf16> to vector<1x16xbf16>
    %cst_53 = arith.constant dense<0.000000e+00> : vector<1x1088xf32>
    %102 = tpu.matmul %101, %3, %cst_53 {dimension_numbers = #tpu.dot_dimension_numbers<[1], [0], [0], [1], [0, 0, 1, 1], [], []>} : vector<1x16xbf16>, vector<16x1088xbf16>, vector<1x1088xf32> -> vector<1x1088xf32>
    %103 = vector.extract_strided_slice %102 {offsets = [0, 0], sizes = [1, 1024], strides = [1, 1]} : vector<1x1088xf32> to vector<1x1024xf32>
    %104 = vector.shape_cast %103 : vector<1x1024xf32> to vector<1x32x32xf32>
    %105 = arith.addf %104, %6 : vector<1x32x32xf32>
    %106 = vector.extract_strided_slice %102 {offsets = [0, 1024], sizes = [1, 64], strides = [1, 1]} : vector<1x1088xf32> to vector<1x64xf32>
    %107 = arith.addf %106, %4 : vector<1x64xf32>
    %108 = vector.extract_strided_slice %107 {offsets = [0, 0], sizes = [1, 32], strides = [1, 1]} : vector<1x64xf32> to vector<1x32xf32>
    %109 = arith.addf %108, %97 : vector<1x32xf32>
    %110 = vector.extract_strided_slice %107 {offsets = [0, 32], sizes = [1, 32], strides = [1, 1]} : vector<1x64xf32> to vector<1x32xf32>
    %cst_54 = arith.constant 0.000000e+00 : f32
    %111 = vector.broadcast %cst_54 : f32 to vector<1x32xf32>
    %112 = arith.maximumf %109, %111 : vector<1x32xf32>
    %113 = vector.shape_cast %112 : vector<1x32xf32> to vector<1x8x4xf32>
    %cst_55 = arith.constant dense<0xFF800000> : vector<1x8xf32>
    %114 = vector.multi_reduction <maximumf>, %113, %cst_55 [2] : vector<1x8x4xf32> to vector<1x8xf32>
    %cst_56 = arith.constant dense<0.000000e+00> : vector<1x32xf32>
    %115 = tpu.matmul %114, %7, %cst_56 {dimension_numbers = #tpu.dot_dimension_numbers<[1], [0], [0], [1], [0, 0, 1, 1], [], []>} : vector<1x8xf32>, vector<8x32xf32>, vector<1x32xf32> -> vector<1x32xf32>
    %116 = arith.addf %115, %8 : vector<1x32xf32>
    %117 = vector.shape_cast %116 : vector<1x32xf32> to vector<1x32x1xf32>
    %118 = vector.broadcast %117 : vector<1x32x1xf32> to vector<1x32x32xf32>
    %119 = arith.mulf %118, %105 : vector<1x32x32xf32>
    %cst_57 = arith.constant dense<0.000000e+00> : vector<1x32xf32>
    %120 = vector.multi_reduction <add>, %119, %cst_57 [1] : vector<1x32x32xf32> to vector<1x32xf32>
    %121 = arith.addf %120, %110 : vector<1x32xf32>
    %cst_58 = arith.constant 0.000000e+00 : f32
    %122 = vector.broadcast %cst_58 : f32 to vector<1x32xf32>
    %123 = arith.maximumf %121, %122 : vector<1x32xf32>
    %124 = vector.shape_cast %123 : vector<1x32xf32> to vector<1x8x4xf32>
    %cst_59 = arith.constant dense<0xFF800000> : vector<1x8xf32>
    %125 = vector.multi_reduction <maximumf>, %124, %cst_59 [2] : vector<1x8x4xf32> to vector<1x8xf32>
    %cst_60 = arith.constant dense<0.000000e+00> : vector<1x32xf32>
    %126 = tpu.matmul %125, %7, %cst_60 {dimension_numbers = #tpu.dot_dimension_numbers<[1], [0], [0], [1], [0, 0, 1, 1], [], []>} : vector<1x8xf32>, vector<8x32xf32>, vector<1x32xf32> -> vector<1x32xf32>
    %127 = arith.addf %126, %8 : vector<1x32xf32>
    %128 = vector.shape_cast %116 : vector<1x32xf32> to vector<1x1x32xf32>
    %c0_61 = arith.constant 0 : index
    %c3_62 = arith.constant 3 : index
    %c0_63 = arith.constant 0 : index
    %129 = vector.load %arg8[%c0_61, %c3_62, %c0_63] : memref<1x8x32xf32, #tpu.memory_space<vmem>>, vector<1x1x32xf32>
    tpu.vector_store %arg8[%c0_61, %c3_62, %c0_63], %128 {strides = array<i32>} : memref<1x8x32xf32, #tpu.memory_space<vmem>>, vector<1x1x32xf32>,
    %c0_64 = arith.constant 0 : index
    %c4 = arith.constant 4 : index
    %c0_65 = arith.constant 0 : index
    %130 = vector.load %arg2[%c0_64, %c4, %c0_65] : memref<1x8x16xbf16, #tpu.memory_space<vmem>>, vector<1x1x16xbf16>
    %131 = vector.shape_cast %130 : vector<1x1x16xbf16> to vector<1x16xbf16>
    %cst_66 = arith.constant dense<0.000000e+00> : vector<1x1088xf32>
    %132 = tpu.matmul %131, %3, %cst_66 {dimension_numbers = #tpu.dot_dimension_numbers<[1], [0], [0], [1], [0, 0, 1, 1], [], []>} : vector<1x16xbf16>, vector<16x1088xbf16>, vector<1x1088xf32> -> vector<1x1088xf32>
    %133 = vector.extract_strided_slice %132 {offsets = [0, 0], sizes = [1, 1024], strides = [1, 1]} : vector<1x1088xf32> to vector<1x1024xf32>
    %134 = vector.shape_cast %133 : vector<1x1024xf32> to vector<1x32x32xf32>
    %135 = arith.addf %134, %6 : vector<1x32x32xf32>
    %136 = vector.extract_strided_slice %132 {offsets = [0, 1024], sizes = [1, 64], strides = [1, 1]} : vector<1x1088xf32> to vector<1x64xf32>
    %137 = arith.addf %136, %4 : vector<1x64xf32>
    %138 = vector.extract_strided_slice %137 {offsets = [0, 0], sizes = [1, 32], strides = [1, 1]} : vector<1x64xf32> to vector<1x32xf32>
    %139 = arith.addf %138, %127 : vector<1x32xf32>
    %140 = vector.extract_strided_slice %137 {offsets = [0, 32], sizes = [1, 32], strides = [1, 1]} : vector<1x64xf32> to vector<1x32xf32>
    %cst_67 = arith.constant 0.000000e+00 : f32
    %141 = vector.broadcast %cst_67 : f32 to vector<1x32xf32>
    %142 = arith.maximumf %139, %141 : vector<1x32xf32>
    %143 = vector.shape_cast %142 : vector<1x32xf32> to vector<1x8x4xf32>
    %cst_68 = arith.constant dense<0xFF800000> : vector<1x8xf32>
    %144 = vector.multi_reduction <maximumf>, %143, %cst_68 [2] : vector<1x8x4xf32> to vector<1x8xf32>
    %cst_69 = arith.constant dense<0.000000e+00> : vector<1x32xf32>
    %145 = tpu.matmul %144, %7, %cst_69 {dimension_numbers = #tpu.dot_dimension_numbers<[1], [0], [0], [1], [0, 0, 1, 1], [], []>} : vector<1x8xf32>, vector<8x32xf32>, vector<1x32xf32> -> vector<1x32xf32>
    %146 = arith.addf %145, %8 : vector<1x32xf32>
    %147 = vector.shape_cast %146 : vector<1x32xf32> to vector<1x32x1xf32>
    %148 = vector.broadcast %147 : vector<1x32x1xf32> to vector<1x32x32xf32>
    %149 = arith.mulf %148, %135 : vector<1x32x32xf32>
    %cst_70 = arith.constant dense<0.000000e+00> : vector<1x32xf32>
    %150 = vector.multi_reduction <add>, %149, %cst_70 [1] : vector<1x32x32xf32> to vector<1x32xf32>
    %151 = arith.addf %150, %140 : vector<1x32xf32>
    %cst_71 = arith.constant 0.000000e+00 : f32
    %152 = vector.broadcast %cst_71 : f32 to vector<1x32xf32>
    %153 = arith.maximumf %151, %152 : vector<1x32xf32>
    %154 = vector.shape_cast %153 : vector<1x32xf32> to vector<1x8x4xf32>
    %cst_72 = arith.constant dense<0xFF800000> : vector<1x8xf32>
    %155 = vector.multi_reduction <maximumf>, %154, %cst_72 [2] : vector<1x8x4xf32> to vector<1x8xf32>
    %cst_73 = arith.constant dense<0.000000e+00> : vector<1x32xf32>
    %156 = tpu.matmul %155, %7, %cst_73 {dimension_numbers = #tpu.dot_dimension_numbers<[1], [0], [0], [1], [0, 0, 1, 1], [], []>} : vector<1x8xf32>, vector<8x32xf32>, vector<1x32xf32> -> vector<1x32xf32>
    %157 = arith.addf %156, %8 : vector<1x32xf32>
    %158 = vector.shape_cast %146 : vector<1x32xf32> to vector<1x1x32xf32>
    %c0_74 = arith.constant 0 : index
    %c4_75 = arith.constant 4 : index
    %c0_76 = arith.constant 0 : index
    %159 = vector.load %arg8[%c0_74, %c4_75, %c0_76] : memref<1x8x32xf32, #tpu.memory_space<vmem>>, vector<1x1x32xf32>
    tpu.vector_store %arg8[%c0_74, %c4_75, %c0_76], %158 {strides = array<i32>} : memref<1x8x32xf32, #tpu.memory_space<vmem>>, vector<1x1x32xf32>,
    %c0_77 = arith.constant 0 : index
    %c5 = arith.constant 5 : index
    %c0_78 = arith.constant 0 : index
    %160 = vector.load %arg2[%c0_77, %c5, %c0_78] : memref<1x8x16xbf16, #tpu.memory_space<vmem>>, vector<1x1x16xbf16>
    %161 = vector.shape_cast %160 : vector<1x1x16xbf16> to vector<1x16xbf16>
    %cst_79 = arith.constant dense<0.000000e+00> : vector<1x1088xf32>
    %162 = tpu.matmul %161, %3, %cst_79 {dimension_numbers = #tpu.dot_dimension_numbers<[1], [0], [0], [1], [0, 0, 1, 1], [], []>} : vector<1x16xbf16>, vector<16x1088xbf16>, vector<1x1088xf32> -> vector<1x1088xf32>
    %163 = vector.extract_strided_slice %162 {offsets = [0, 0], sizes = [1, 1024], strides = [1, 1]} : vector<1x1088xf32> to vector<1x1024xf32>
    %164 = vector.shape_cast %163 : vector<1x1024xf32> to vector<1x32x32xf32>
    %165 = arith.addf %164, %6 : vector<1x32x32xf32>
    %166 = vector.extract_strided_slice %162 {offsets = [0, 1024], sizes = [1, 64], strides = [1, 1]} : vector<1x1088xf32> to vector<1x64xf32>
    %167 = arith.addf %166, %4 : vector<1x64xf32>
    %168 = vector.extract_strided_slice %167 {offsets = [0, 0], sizes = [1, 32], strides = [1, 1]} : vector<1x64xf32> to vector<1x32xf32>
    %169 = arith.addf %168, %157 : vector<1x32xf32>
    %170 = vector.extract_strided_slice %167 {offsets = [0, 32], sizes = [1, 32], strides = [1, 1]} : vector<1x64xf32> to vector<1x32xf32>
    %cst_80 = arith.constant 0.000000e+00 : f32
    %171 = vector.broadcast %cst_80 : f32 to vector<1x32xf32>
    %172 = arith.maximumf %169, %171 : vector<1x32xf32>
    %173 = vector.shape_cast %172 : vector<1x32xf32> to vector<1x8x4xf32>
    %cst_81 = arith.constant dense<0xFF800000> : vector<1x8xf32>
    %174 = vector.multi_reduction <maximumf>, %173, %cst_81 [2] : vector<1x8x4xf32> to vector<1x8xf32>
    %cst_82 = arith.constant dense<0.000000e+00> : vector<1x32xf32>
    %175 = tpu.matmul %174, %7, %cst_82 {dimension_numbers = #tpu.dot_dimension_numbers<[1], [0], [0], [1], [0, 0, 1, 1], [], []>} : vector<1x8xf32>, vector<8x32xf32>, vector<1x32xf32> -> vector<1x32xf32>
    %176 = arith.addf %175, %8 : vector<1x32xf32>
    %177 = vector.shape_cast %176 : vector<1x32xf32> to vector<1x32x1xf32>
    %178 = vector.broadcast %177 : vector<1x32x1xf32> to vector<1x32x32xf32>
    %179 = arith.mulf %178, %165 : vector<1x32x32xf32>
    %cst_83 = arith.constant dense<0.000000e+00> : vector<1x32xf32>
    %180 = vector.multi_reduction <add>, %179, %cst_83 [1] : vector<1x32x32xf32> to vector<1x32xf32>
    %181 = arith.addf %180, %170 : vector<1x32xf32>
    %cst_84 = arith.constant 0.000000e+00 : f32
    %182 = vector.broadcast %cst_84 : f32 to vector<1x32xf32>
    %183 = arith.maximumf %181, %182 : vector<1x32xf32>
    %184 = vector.shape_cast %183 : vector<1x32xf32> to vector<1x8x4xf32>
    %cst_85 = arith.constant dense<0xFF800000> : vector<1x8xf32>
    %185 = vector.multi_reduction <maximumf>, %184, %cst_85 [2] : vector<1x8x4xf32> to vector<1x8xf32>
    %cst_86 = arith.constant dense<0.000000e+00> : vector<1x32xf32>
    %186 = tpu.matmul %185, %7, %cst_86 {dimension_numbers = #tpu.dot_dimension_numbers<[1], [0], [0], [1], [0, 0, 1, 1], [], []>} : vector<1x8xf32>, vector<8x32xf32>, vector<1x32xf32> -> vector<1x32xf32>
    %187 = arith.addf %186, %8 : vector<1x32xf32>
    %188 = vector.shape_cast %176 : vector<1x32xf32> to vector<1x1x32xf32>
    %c0_87 = arith.constant 0 : index
    %c5_88 = arith.constant 5 : index
    %c0_89 = arith.constant 0 : index
    %189 = vector.load %arg8[%c0_87, %c5_88, %c0_89] : memref<1x8x32xf32, #tpu.memory_space<vmem>>, vector<1x1x32xf32>
    tpu.vector_store %arg8[%c0_87, %c5_88, %c0_89], %188 {strides = array<i32>} : memref<1x8x32xf32, #tpu.memory_space<vmem>>, vector<1x1x32xf32>,
    %c0_90 = arith.constant 0 : index
    %c6 = arith.constant 6 : index
    %c0_91 = arith.constant 0 : index
    %190 = vector.load %arg2[%c0_90, %c6, %c0_91] : memref<1x8x16xbf16, #tpu.memory_space<vmem>>, vector<1x1x16xbf16>
    %191 = vector.shape_cast %190 : vector<1x1x16xbf16> to vector<1x16xbf16>
    %cst_92 = arith.constant dense<0.000000e+00> : vector<1x1088xf32>
    %192 = tpu.matmul %191, %3, %cst_92 {dimension_numbers = #tpu.dot_dimension_numbers<[1], [0], [0], [1], [0, 0, 1, 1], [], []>} : vector<1x16xbf16>, vector<16x1088xbf16>, vector<1x1088xf32> -> vector<1x1088xf32>
    %193 = vector.extract_strided_slice %192 {offsets = [0, 0], sizes = [1, 1024], strides = [1, 1]} : vector<1x1088xf32> to vector<1x1024xf32>
    %194 = vector.shape_cast %193 : vector<1x1024xf32> to vector<1x32x32xf32>
    %195 = arith.addf %194, %6 : vector<1x32x32xf32>
    %196 = vector.extract_strided_slice %192 {offsets = [0, 1024], sizes = [1, 64], strides = [1, 1]} : vector<1x1088xf32> to vector<1x64xf32>
    %197 = arith.addf %196, %4 : vector<1x64xf32>
    %198 = vector.extract_strided_slice %197 {offsets = [0, 0], sizes = [1, 32], strides = [1, 1]} : vector<1x64xf32> to vector<1x32xf32>
    %199 = arith.addf %198, %187 : vector<1x32xf32>
    %200 = vector.extract_strided_slice %197 {offsets = [0, 32], sizes = [1, 32], strides = [1, 1]} : vector<1x64xf32> to vector<1x32xf32>
    %cst_93 = arith.constant 0.000000e+00 : f32
    %201 = vector.broadcast %cst_93 : f32 to vector<1x32xf32>
    %202 = arith.maximumf %199, %201 : vector<1x32xf32>
    %203 = vector.shape_cast %202 : vector<1x32xf32> to vector<1x8x4xf32>
    %cst_94 = arith.constant dense<0xFF800000> : vector<1x8xf32>
    %204 = vector.multi_reduction <maximumf>, %203, %cst_94 [2] : vector<1x8x4xf32> to vector<1x8xf32>
    %cst_95 = arith.constant dense<0.000000e+00> : vector<1x32xf32>
    %205 = tpu.matmul %204, %7, %cst_95 {dimension_numbers = #tpu.dot_dimension_numbers<[1], [0], [0], [1], [0, 0, 1, 1], [], []>} : vector<1x8xf32>, vector<8x32xf32>, vector<1x32xf32> -> vector<1x32xf32>
    %206 = arith.addf %205, %8 : vector<1x32xf32>
    %207 = vector.shape_cast %206 : vector<1x32xf32> to vector<1x32x1xf32>
    %208 = vector.broadcast %207 : vector<1x32x1xf32> to vector<1x32x32xf32>
    %209 = arith.mulf %208, %195 : vector<1x32x32xf32>
    %cst_96 = arith.constant dense<0.000000e+00> : vector<1x32xf32>
    %210 = vector.multi_reduction <add>, %209, %cst_96 [1] : vector<1x32x32xf32> to vector<1x32xf32>
    %211 = arith.addf %210, %200 : vector<1x32xf32>
    %cst_97 = arith.constant 0.000000e+00 : f32
    %212 = vector.broadcast %cst_97 : f32 to vector<1x32xf32>
    %213 = arith.maximumf %211, %212 : vector<1x32xf32>
    %214 = vector.shape_cast %213 : vector<1x32xf32> to vector<1x8x4xf32>
    %cst_98 = arith.constant dense<0xFF800000> : vector<1x8xf32>
    %215 = vector.multi_reduction <maximumf>, %214, %cst_98 [2] : vector<1x8x4xf32> to vector<1x8xf32>
    %cst_99 = arith.constant dense<0.000000e+00> : vector<1x32xf32>
    %216 = tpu.matmul %215, %7, %cst_99 {dimension_numbers = #tpu.dot_dimension_numbers<[1], [0], [0], [1], [0, 0, 1, 1], [], []>} : vector<1x8xf32>, vector<8x32xf32>, vector<1x32xf32> -> vector<1x32xf32>
    %217 = arith.addf %216, %8 : vector<1x32xf32>
    %218 = vector.shape_cast %206 : vector<1x32xf32> to vector<1x1x32xf32>
    %c0_100 = arith.constant 0 : index
    %c6_101 = arith.constant 6 : index
    %c0_102 = arith.constant 0 : index
    %219 = vector.load %arg8[%c0_100, %c6_101, %c0_102] : memref<1x8x32xf32, #tpu.memory_space<vmem>>, vector<1x1x32xf32>
    tpu.vector_store %arg8[%c0_100, %c6_101, %c0_102], %218 {strides = array<i32>} : memref<1x8x32xf32, #tpu.memory_space<vmem>>, vector<1x1x32xf32>,
    %c0_103 = arith.constant 0 : index
    %c7 = arith.constant 7 : index
    %c0_104 = arith.constant 0 : index
    %220 = vector.load %arg2[%c0_103, %c7, %c0_104] : memref<1x8x16xbf16, #tpu.memory_space<vmem>>, vector<1x1x16xbf16>
    %221 = vector.shape_cast %220 : vector<1x1x16xbf16> to vector<1x16xbf16>
    %cst_105 = arith.constant dense<0.000000e+00> : vector<1x1088xf32>
    %222 = tpu.matmul %221, %3, %cst_105 {dimension_numbers = #tpu.dot_dimension_numbers<[1], [0], [0], [1], [0, 0, 1, 1], [], []>} : vector<1x16xbf16>, vector<16x1088xbf16>, vector<1x1088xf32> -> vector<1x1088xf32>
    %223 = vector.extract_strided_slice %222 {offsets = [0, 0], sizes = [1, 1024], strides = [1, 1]} : vector<1x1088xf32> to vector<1x1024xf32>
    %224 = vector.shape_cast %223 : vector<1x1024xf32> to vector<1x32x32xf32>
    %225 = arith.addf %224, %6 : vector<1x32x32xf32>
    %226 = vector.extract_strided_slice %222 {offsets = [0, 1024], sizes = [1, 64], strides = [1, 1]} : vector<1x1088xf32> to vector<1x64xf32>
    %227 = arith.addf %226, %4 : vector<1x64xf32>
    %228 = vector.extract_strided_slice %227 {offsets = [0, 0], sizes = [1, 32], strides = [1, 1]} : vector<1x64xf32> to vector<1x32xf32>
    %229 = arith.addf %228, %217 : vector<1x32xf32>
    %230 = vector.extract_strided_slice %227 {offsets = [0, 32], sizes = [1, 32], strides = [1, 1]} : vector<1x64xf32> to vector<1x32xf32>
    %cst_106 = arith.constant 0.000000e+00 : f32
    %231 = vector.broadcast %cst_106 : f32 to vector<1x32xf32>
    %232 = arith.maximumf %229, %231 : vector<1x32xf32>
    %233 = vector.shape_cast %232 : vector<1x32xf32> to vector<1x8x4xf32>
    %cst_107 = arith.constant dense<0xFF800000> : vector<1x8xf32>
    %234 = vector.multi_reduction <maximumf>, %233, %cst_107 [2] : vector<1x8x4xf32> to vector<1x8xf32>
    %cst_108 = arith.constant dense<0.000000e+00> : vector<1x32xf32>
    %235 = tpu.matmul %234, %7, %cst_108 {dimension_numbers = #tpu.dot_dimension_numbers<[1], [0], [0], [1], [0, 0, 1, 1], [], []>} : vector<1x8xf32>, vector<8x32xf32>, vector<1x32xf32> -> vector<1x32xf32>
    %236 = arith.addf %235, %8 : vector<1x32xf32>
    %237 = vector.shape_cast %236 : vector<1x32xf32> to vector<1x32x1xf32>
    %238 = vector.broadcast %237 : vector<1x32x1xf32> to vector<1x32x32xf32>
    %239 = arith.mulf %238, %225 : vector<1x32x32xf32>
    %cst_109 = arith.constant dense<0.000000e+00> : vector<1x32xf32>
    %240 = vector.multi_reduction <add>, %239, %cst_109 [1] : vector<1x32x32xf32> to vector<1x32xf32>
    %241 = arith.addf %240, %230 : vector<1x32xf32>
    %cst_110 = arith.constant 0.000000e+00 : f32
    %242 = vector.broadcast %cst_110 : f32 to vector<1x32xf32>
    %243 = arith.maximumf %241, %242 : vector<1x32xf32>
    %244 = vector.shape_cast %243 : vector<1x32xf32> to vector<1x8x4xf32>
    %cst_111 = arith.constant dense<0xFF800000> : vector<1x8xf32>
    %245 = vector.multi_reduction <maximumf>, %244, %cst_111 [2] : vector<1x8x4xf32> to vector<1x8xf32>
    %cst_112 = arith.constant dense<0.000000e+00> : vector<1x32xf32>
    %246 = tpu.matmul %245, %7, %cst_112 {dimension_numbers = #tpu.dot_dimension_numbers<[1], [0], [0], [1], [0, 0, 1, 1], [], []>} : vector<1x8xf32>, vector<8x32xf32>, vector<1x32xf32> -> vector<1x32xf32>
    %247 = arith.addf %246, %8 : vector<1x32xf32>
    %248 = vector.shape_cast %236 : vector<1x32xf32> to vector<1x1x32xf32>
    %c0_113 = arith.constant 0 : index
    %c7_114 = arith.constant 7 : index
    %c0_115 = arith.constant 0 : index
    %249 = vector.load %arg8[%c0_113, %c7_114, %c0_115] : memref<1x8x32xf32, #tpu.memory_space<vmem>>, vector<1x1x32xf32>
    tpu.vector_store %arg8[%c0_113, %c7_114, %c0_115], %248 {strides = array<i32>} : memref<1x8x32xf32, #tpu.memory_space<vmem>>, vector<1x1x32xf32>,
    %c0_116 = arith.constant 0 : index
    %c0_117 = arith.constant 0 : index
    %250 = vector.load %arg9[%c0_116, %c0_117] : memref<1x32xf32, #tpu.memory_space<vmem>>, vector<1x32xf32>
    tpu.vector_store %arg9[%c0_116, %c0_117], %247 {strides = array<i32>} : memref<1x32xf32, #tpu.memory_space<vmem>>, vector<1x32xf32>,
    return
  }
  func.func @transform_0(%arg0: i32, %arg1: i32) -> (i32, i32, i32) {
    %c0_i32 = arith.constant 0 : i32
    %c0_i32_0 = arith.constant 0 : i32
    return %arg0, %arg1, %c0_i32 : i32, i32, i32
  }
  func.func @transform_1(%arg0: i32, %arg1: i32) -> (i32, i32) {
    %c0_i32 = arith.constant 0 : i32
    %c0_i32_0 = arith.constant 0 : i32
    %c0_i32_1 = arith.constant 0 : i32
    return %c0_i32, %c0_i32_0 : i32, i32
  }
  func.func @transform_2(%arg0: i32, %arg1: i32) -> (i32, i32) {
    %c0_i32 = arith.constant 0 : i32
    %c0_i32_0 = arith.constant 0 : i32
    %c0_i32_1 = arith.constant 0 : i32
    return %c0_i32, %c0_i32_0 : i32, i32
  }
  func.func @transform_3(%arg0: i32, %arg1: i32) -> (i32, i32) {
    %c0_i32 = arith.constant 0 : i32
    %c0_i32_0 = arith.constant 0 : i32
    %c0_i32_1 = arith.constant 0 : i32
    return %c0_i32, %c0_i32_0 : i32, i32
  }
  func.func @transform_4(%arg0: i32, %arg1: i32) -> (i32, i32) {
    %c0_i32 = arith.constant 0 : i32
    %c0_i32_0 = arith.constant 0 : i32
    %c0_i32_1 = arith.constant 0 : i32
    return %c0_i32, %c0_i32_0 : i32, i32
  }
  func.func @transform_5(%arg0: i32, %arg1: i32) -> (i32, i32) {
    %c0_i32 = arith.constant 0 : i32
    %c0_i32_0 = arith.constant 0 : i32
    %c0_i32_1 = arith.constant 0 : i32
    return %c0_i32, %c0_i32_0 : i32, i32
  }
  func.func @transform_6(%arg0: i32, %arg1: i32) -> (i32, i32, i32) {
    %c0_i32 = arith.constant 0 : i32
    %c0_i32_0 = arith.constant 0 : i32
    return %arg0, %arg1, %c0_i32 : i32, i32, i32
  }
}

module attributes {stable_mosaic.version = 11 : i64} {
  func.func @_selective_cell_kernel(%arg0: i32, %arg1: i32, %arg2: memref<1x8x16xbf16, #tpu.memory_space<vmem>>, %arg3: memref<16x1088xbf16, #tpu.memory_space<vmem>>, %arg4: memref<1x64xf32, #tpu.memory_space<vmem>>, %arg5: memref<32x32xf32, #tpu.memory_space<vmem>>, %arg6: memref<8x32xf32, #tpu.memory_space<vmem>>, %arg7: memref<1x32xf32, #tpu.memory_space<vmem>>, %arg8: memref<1x8x32xf32, #tpu.memory_space<vmem>>, %arg9: memref<1x32xf32, #tpu.memory_space<vmem>>) attributes {dimension_semantics = [#tpu.dimension_semantics<parallel>, #tpu.dimension_semantics<arbitrary>], iteration_bounds = array<i64: 2, 2>, scalar_prefetch = 0 : i64, scratch_operands = 1 : i64, tpu.core_type = #tpu.core_type<tc>, window_params = [{transform_indices = @transform_0, window_bounds = array<i64: 1, 8, 16>}, {pipeline_mode = #tpu.pipeline_mode<synchronous>, transform_indices = @transform_1, window_bounds = array<i64: 16, 1088>}, {pipeline_mode = #tpu.pipeline_mode<synchronous>, transform_indices = @transform_2, window_bounds = array<i64: 1, 64>}, {pipeline_mode = #tpu.pipeline_mode<synchronous>, transform_indices = @transform_3, window_bounds = array<i64: 32, 32>}, {pipeline_mode = #tpu.pipeline_mode<synchronous>, transform_indices = @transform_4, window_bounds = array<i64: 8, 32>}, {pipeline_mode = #tpu.pipeline_mode<synchronous>, transform_indices = @transform_5, window_bounds = array<i64: 1, 32>}, {transform_indices = @transform_6, window_bounds = array<i64: 1, 8, 32>}]} {
    %c0_i32 = arith.constant 0 : i32
    %0 = arith.cmpi eq, %arg1, %c0_i32 : i32
    %1 = arith.extui %0 : i1 to i32
    %c0_i32_0 = arith.constant 0 : i32
    %2 = arith.cmpi ne, %1, %c0_i32_0 : i32
    scf.if %2 {
      %cst_118 = arith.constant 0.000000e+00 : f32
      %251 = vector.broadcast %cst_118 : f32 to vector<1x32xf32>
      %c0_119 = arith.constant 0 : index
      %c0_120 = arith.constant 0 : index
      %252 = vector.load %arg9[%c0_119, %c0_120] : memref<1x32xf32, #tpu.memory_space<vmem>>, vector<1x32xf32>
      tpu.vector_store %arg9[%c0_119, %c0_120], %251 {strides = array<i32>} : memref<1x32xf32, #tpu.memory_space<vmem>>, vector<1x32xf32>,
    } else {
    }
    %c0 = arith.constant 0 : index
    %c0_1 = arith.constant 0 : index
    %3 = vector.load %arg3[%c0, %c0_1] : memref<16x1088xbf16, #tpu.memory_space<vmem>>, vector<16x1088xbf16>
    %c0_2 = arith.constant 0 : index
    %c0_3 = arith.constant 0 : index
    %4 = vector.load %arg4[%c0_2, %c0_3] : memref<1x64xf32, #tpu.memory_space<vmem>>, vector<1x64xf32>
    %c0_4 = arith.constant 0 : index
    %c0_5 = arith.constant 0 : index
    %5 = vector.load %arg5[%c0_4, %c0_5] : memref<32x32xf32, #tpu.memory_space<vmem>>, vector<32x32xf32>
    %6 = vector.shape_cast %5 : vector<32x32xf32> to vector<1x32x32xf32>
    %c0_6 = arith.constant 0 : index
    %c0_7 = arith.constant 0 : index
    %7 = vector.load %arg6[%c0_6, %c0_7] : memref<8x32xf32, #tpu.memory_space<vmem>>, vector<8x32xf32>
    %c0_8 = arith.constant 0 : index
    %c0_9 = arith.constant 0 : index
    %8 = vector.load %arg7[%c0_8, %c0_9] : memref<1x32xf32, #tpu.memory_space<vmem>>, vector<1x32xf32>
    %c0_10 = arith.constant 0 : index
    %c0_11 = arith.constant 0 : index
    %9 = vector.load %arg9[%c0_10, %c0_11] : memref<1x32xf32, #tpu.memory_space<vmem>>, vector<1x32xf32>
    %c0_12 = arith.constant 0 : index
    %c0_13 = arith.constant 0 : index
    %c0_14 = arith.constant 0 : index
    %10 = vector.load %arg2[%c0_12, %c0_13, %c0_14] : memref<1x8x16xbf16, #tpu.memory_space<vmem>>, vector<1x1x16xbf16>
    %11 = vector.shape_cast %10 : vector<1x1x16xbf16> to vector<1x16xbf16>
    %cst = arith.constant dense<0.000000e+00> : vector<1x1088xf32>
    %12 = tpu.matmul %11, %3, %cst {dimension_numbers = #tpu.dot_dimension_numbers<[1], [0], [0], [1], [0, 0, 1, 1], [], []>} : vector<1x16xbf16>, vector<16x1088xbf16>, vector<1x1088xf32> -> vector<1x1088xf32>
    %13 = vector.extract_strided_slice %12 {offsets = [0, 0], sizes = [1, 1024], strides = [1, 1]} : vector<1x1088xf32> to vector<1x1024xf32>
    %14 = vector.shape_cast %13 : vector<1x1024xf32> to vector<1x32x32xf32>
    %15 = arith.addf %14, %6 : vector<1x32x32xf32>
    %16 = vector.extract_strided_slice %12 {offsets = [0, 1024], sizes = [1, 64], strides = [1, 1]} : vector<1x1088xf32> to vector<1x64xf32>
    %17 = arith.addf %16, %4 : vector<1x64xf32>
    %18 = vector.extract_strided_slice %17 {offsets = [0, 0], sizes = [1, 32], strides = [1, 1]} : vector<1x64xf32> to vector<1x32xf32>
    %19 = arith.addf %18, %9 : vector<1x32xf32>
    %20 = vector.extract_strided_slice %17 {offsets = [0, 32], sizes = [1, 32], strides = [1, 1]} : vector<1x64xf32> to vector<1x32xf32>
    %cst_15 = arith.constant 0.000000e+00 : f32
    %21 = vector.broadcast %cst_15 : f32 to vector<1x32xf32>
    %22 = arith.maximumf %19, %21 : vector<1x32xf32>
    %23 = vector.shape_cast %22 : vector<1x32xf32> to vector<1x8x4xf32>
    %cst_16 = arith.constant dense<0xFF800000> : vector<1x8xf32>
    %24 = vector.multi_reduction <maximumf>, %23, %cst_16 [2] : vector<1x8x4xf32> to vector<1x8xf32>
    %cst_17 = arith.constant dense<0.000000e+00> : vector<1x32xf32>
    %25 = tpu.matmul %24, %7, %cst_17 {dimension_numbers = #tpu.dot_dimension_numbers<[1], [0], [0], [1], [0, 0, 1, 1], [], []>} : vector<1x8xf32>, vector<8x32xf32>, vector<1x32xf32> -> vector<1x32xf32>
    %26 = arith.addf %25, %8 : vector<1x32xf32>
    %27 = vector.shape_cast %26 : vector<1x32xf32> to vector<1x32x1xf32>
    %28 = vector.broadcast %27 : vector<1x32x1xf32> to vector<1x32x32xf32>
    %29 = arith.mulf %28, %15 : vector<1x32x32xf32>
    %cst_18 = arith.constant dense<0.000000e+00> : vector<1x32xf32>
    %30 = vector.multi_reduction <add>, %29, %cst_18 [1] : vector<1x32x32xf32> to vector<1x32xf32>
    %31 = arith.addf %30, %20 : vector<1x32xf32>
    %cst_19 = arith.constant 0.000000e+00 : f32
    %32 = vector.broadcast %cst_19 : f32 to vector<1x32xf32>
    %33 = arith.maximumf %31, %32 : vector<1x32xf32>
    %34 = vector.shape_cast %33 : vector<1x32xf32> to vector<1x8x4xf32>
    %cst_20 = arith.constant dense<0xFF800000> : vector<1x8xf32>
    %35 = vector.multi_reduction <maximumf>, %34, %cst_20 [2] : vector<1x8x4xf32> to vector<1x8xf32>
    %cst_21 = arith.constant dense<0.000000e+00> : vector<1x32xf32>
    %36 = tpu.matmul %35, %7, %cst_21 {dimension_numbers = #tpu.dot_dimension_numbers<[1], [0], [0], [1], [0, 0, 1, 1], [], []>} : vector<1x8xf32>, vector<8x32xf32>, vector<1x32xf32> -> vector<1x32xf32>
    %37 = arith.addf %36, %8 : vector<1x32xf32>
    %38 = vector.shape_cast %26 : vector<1x32xf32> to vector<1x1x32xf32>
    %c0_22 = arith.constant 0 : index
    %c0_23 = arith.constant 0 : index
    %c0_24 = arith.constant 0 : index
    %39 = vector.load %arg8[%c0_22, %c0_23, %c0_24] : memref<1x8x32xf32, #tpu.memory_space<vmem>>, vector<1x1x32xf32>
    tpu.vector_store %arg8[%c0_22, %c0_23, %c0_24], %38 {strides = array<i32>} : memref<1x8x32xf32, #tpu.memory_space<vmem>>, vector<1x1x32xf32>,
    %c0_25 = arith.constant 0 : index
    %c1 = arith.constant 1 : index
    %c0_26 = arith.constant 0 : index
    %40 = vector.load %arg2[%c0_25, %c1, %c0_26] : memref<1x8x16xbf16, #tpu.memory_space<vmem>>, vector<1x1x16xbf16>
    %41 = vector.shape_cast %40 : vector<1x1x16xbf16> to vector<1x16xbf16>
    %cst_27 = arith.constant dense<0.000000e+00> : vector<1x1088xf32>
    %42 = tpu.matmul %41, %3, %cst_27 {dimension_numbers = #tpu.dot_dimension_numbers<[1], [0], [0], [1], [0, 0, 1, 1], [], []>} : vector<1x16xbf16>, vector<16x1088xbf16>, vector<1x1088xf32> -> vector<1x1088xf32>
    %43 = vector.extract_strided_slice %42 {offsets = [0, 0], sizes = [1, 1024], strides = [1, 1]} : vector<1x1088xf32> to vector<1x1024xf32>
    %44 = vector.shape_cast %43 : vector<1x1024xf32> to vector<1x32x32xf32>
    %45 = arith.addf %44, %6 : vector<1x32x32xf32>
    %46 = vector.extract_strided_slice %42 {offsets = [0, 1024], sizes = [1, 64], strides = [1, 1]} : vector<1x1088xf32> to vector<1x64xf32>
    %47 = arith.addf %46, %4 : vector<1x64xf32>
    %48 = vector.extract_strided_slice %47 {offsets = [0, 0], sizes = [1, 32], strides = [1, 1]} : vector<1x64xf32> to vector<1x32xf32>
    %49 = arith.addf %48, %37 : vector<1x32xf32>
    %50 = vector.extract_strided_slice %47 {offsets = [0, 32], sizes = [1, 32], strides = [1, 1]} : vector<1x64xf32> to vector<1x32xf32>
    %cst_28 = arith.constant 0.000000e+00 : f32
    %51 = vector.broadcast %cst_28 : f32 to vector<1x32xf32>
    %52 = arith.maximumf %49, %51 : vector<1x32xf32>
    %53 = vector.shape_cast %52 : vector<1x32xf32> to vector<1x8x4xf32>
    %cst_29 = arith.constant dense<0xFF800000> : vector<1x8xf32>
    %54 = vector.multi_reduction <maximumf>, %53, %cst_29 [2] : vector<1x8x4xf32> to vector<1x8xf32>
    %cst_30 = arith.constant dense<0.000000e+00> : vector<1x32xf32>
    %55 = tpu.matmul %54, %7, %cst_30 {dimension_numbers = #tpu.dot_dimension_numbers<[1], [0], [0], [1], [0, 0, 1, 1], [], []>} : vector<1x8xf32>, vector<8x32xf32>, vector<1x32xf32> -> vector<1x32xf32>
    %56 = arith.addf %55, %8 : vector<1x32xf32>
    %57 = vector.shape_cast %56 : vector<1x32xf32> to vector<1x32x1xf32>
    %58 = vector.broadcast %57 : vector<1x32x1xf32> to vector<1x32x32xf32>
    %59 = arith.mulf %58, %45 : vector<1x32x32xf32>
    %cst_31 = arith.constant dense<0.000000e+00> : vector<1x32xf32>
    %60 = vector.multi_reduction <add>, %59, %cst_31 [1] : vector<1x32x32xf32> to vector<1x32xf32>
    %61 = arith.addf %60, %50 : vector<1x32xf32>
    %cst_32 = arith.constant 0.000000e+00 : f32
    %62 = vector.broadcast %cst_32 : f32 to vector<1x32xf32>
    %63 = arith.maximumf %61, %62 : vector<1x32xf32>
    %64 = vector.shape_cast %63 : vector<1x32xf32> to vector<1x8x4xf32>
    %cst_33 = arith.constant dense<0xFF800000> : vector<1x8xf32>
    %65 = vector.multi_reduction <maximumf>, %64, %cst_33 [2] : vector<1x8x4xf32> to vector<1x8xf32>
    %cst_34 = arith.constant dense<0.000000e+00> : vector<1x32xf32>
    %66 = tpu.matmul %65, %7, %cst_34 {dimension_numbers = #tpu.dot_dimension_numbers<[1], [0], [0], [1], [0, 0, 1, 1], [], []>} : vector<1x8xf32>, vector<8x32xf32>, vector<1x32xf32> -> vector<1x32xf32>
    %67 = arith.addf %66, %8 : vector<1x32xf32>
    %68 = vector.shape_cast %56 : vector<1x32xf32> to vector<1x1x32xf32>
    %c0_35 = arith.constant 0 : index
    %c1_36 = arith.constant 1 : index
    %c0_37 = arith.constant 0 : index
    %69 = vector.load %arg8[%c0_35, %c1_36, %c0_37] : memref<1x8x32xf32, #tpu.memory_space<vmem>>, vector<1x1x32xf32>
    tpu.vector_store %arg8[%c0_35, %c1_36, %c0_37], %68 {strides = array<i32>} : memref<1x8x32xf32, #tpu.memory_space<vmem>>, vector<1x1x32xf32>,
    %c0_38 = arith.constant 0 : index
    %c2 = arith.constant 2 : index
    %c0_39 = arith.constant 0 : index
    %70 = vector.load %arg2[%c0_38, %c2, %c0_39] : memref<1x8x16xbf16, #tpu.memory_space<vmem>>, vector<1x1x16xbf16>
    %71 = vector.shape_cast %70 : vector<1x1x16xbf16> to vector<1x16xbf16>
    %cst_40 = arith.constant dense<0.000000e+00> : vector<1x1088xf32>
    %72 = tpu.matmul %71, %3, %cst_40 {dimension_numbers = #tpu.dot_dimension_numbers<[1], [0], [0], [1], [0, 0, 1, 1], [], []>} : vector<1x16xbf16>, vector<16x1088xbf16>, vector<1x1088xf32> -> vector<1x1088xf32>
    %73 = vector.extract_strided_slice %72 {offsets = [0, 0], sizes = [1, 1024], strides = [1, 1]} : vector<1x1088xf32> to vector<1x1024xf32>
    %74 = vector.shape_cast %73 : vector<1x1024xf32> to vector<1x32x32xf32>
    %75 = arith.addf %74, %6 : vector<1x32x32xf32>
    %76 = vector.extract_strided_slice %72 {offsets = [0, 1024], sizes = [1, 64], strides = [1, 1]} : vector<1x1088xf32> to vector<1x64xf32>
    %77 = arith.addf %76, %4 : vector<1x64xf32>
    %78 = vector.extract_strided_slice %77 {offsets = [0, 0], sizes = [1, 32], strides = [1, 1]} : vector<1x64xf32> to vector<1x32xf32>
    %79 = arith.addf %78, %67 : vector<1x32xf32>
    %80 = vector.extract_strided_slice %77 {offsets = [0, 32], sizes = [1, 32], strides = [1, 1]} : vector<1x64xf32> to vector<1x32xf32>
    %cst_41 = arith.constant 0.000000e+00 : f32
    %81 = vector.broadcast %cst_41 : f32 to vector<1x32xf32>
    %82 = arith.maximumf %79, %81 : vector<1x32xf32>
    %83 = vector.shape_cast %82 : vector<1x32xf32> to vector<1x8x4xf32>
    %cst_42 = arith.constant dense<0xFF800000> : vector<1x8xf32>
    %84 = vector.multi_reduction <maximumf>, %83, %cst_42 [2] : vector<1x8x4xf32> to vector<1x8xf32>
    %cst_43 = arith.constant dense<0.000000e+00> : vector<1x32xf32>
    %85 = tpu.matmul %84, %7, %cst_43 {dimension_numbers = #tpu.dot_dimension_numbers<[1], [0], [0], [1], [0, 0, 1, 1], [], []>} : vector<1x8xf32>, vector<8x32xf32>, vector<1x32xf32> -> vector<1x32xf32>
    %86 = arith.addf %85, %8 : vector<1x32xf32>
    %87 = vector.shape_cast %86 : vector<1x32xf32> to vector<1x32x1xf32>
    %88 = vector.broadcast %87 : vector<1x32x1xf32> to vector<1x32x32xf32>
    %89 = arith.mulf %88, %75 : vector<1x32x32xf32>
    %cst_44 = arith.constant dense<0.000000e+00> : vector<1x32xf32>
    %90 = vector.multi_reduction <add>, %89, %cst_44 [1] : vector<1x32x32xf32> to vector<1x32xf32>
    %91 = arith.addf %90, %80 : vector<1x32xf32>
    %cst_45 = arith.constant 0.000000e+00 : f32
    %92 = vector.broadcast %cst_45 : f32 to vector<1x32xf32>
    %93 = arith.maximumf %91, %92 : vector<1x32xf32>
    %94 = vector.shape_cast %93 : vector<1x32xf32> to vector<1x8x4xf32>
    %cst_46 = arith.constant dense<0xFF800000> : vector<1x8xf32>
    %95 = vector.multi_reduction <maximumf>, %94, %cst_46 [2] : vector<1x8x4xf32> to vector<1x8xf32>
    %cst_47 = arith.constant dense<0.000000e+00> : vector<1x32xf32>
    %96 = tpu.matmul %95, %7, %cst_47 {dimension_numbers = #tpu.dot_dimension_numbers<[1], [0], [0], [1], [0, 0, 1, 1], [], []>} : vector<1x8xf32>, vector<8x32xf32>, vector<1x32xf32> -> vector<1x32xf32>
    %97 = arith.addf %96, %8 : vector<1x32xf32>
    %98 = vector.shape_cast %86 : vector<1x32xf32> to vector<1x1x32xf32>
    %c0_48 = arith.constant 0 : index
    %c2_49 = arith.constant 2 : index
    %c0_50 = arith.constant 0 : index
    %99 = vector.load %arg8[%c0_48, %c2_49, %c0_50] : memref<1x8x32xf32, #tpu.memory_space<vmem>>, vector<1x1x32xf32>
    tpu.vector_store %arg8[%c0_48, %c2_49, %c0_50], %98 {strides = array<i32>} : memref<1x8x32xf32, #tpu.memory_space<vmem>>, vector<1x1x32xf32>,
    %c0_51 = arith.constant 0 : index
    %c3 = arith.constant 3 : index
    %c0_52 = arith.constant 0 : index
    %100 = vector.load %arg2[%c0_51, %c3, %c0_52] : memref<1x8x16xbf16, #tpu.memory_space<vmem>>, vector<1x1x16xbf16>
    %101 = vector.shape_cast %100 : vector<1x1x16xbf16> to vector<1x16xbf16>
    %cst_53 = arith.constant dense<0.000000e+00> : vector<1x1088xf32>
    %102 = tpu.matmul %101, %3, %cst_53 {dimension_numbers = #tpu.dot_dimension_numbers<[1], [0], [0], [1], [0, 0, 1, 1], [], []>} : vector<1x16xbf16>, vector<16x1088xbf16>, vector<1x1088xf32> -> vector<1x1088xf32>
    %103 = vector.extract_strided_slice %102 {offsets = [0, 0], sizes = [1, 1024], strides = [1, 1]} : vector<1x1088xf32> to vector<1x1024xf32>
    %104 = vector.shape_cast %103 : vector<1x1024xf32> to vector<1x32x32xf32>
    %105 = arith.addf %104, %6 : vector<1x32x32xf32>
    %106 = vector.extract_strided_slice %102 {offsets = [0, 1024], sizes = [1, 64], strides = [1, 1]} : vector<1x1088xf32> to vector<1x64xf32>
    %107 = arith.addf %106, %4 : vector<1x64xf32>
    %108 = vector.extract_strided_slice %107 {offsets = [0, 0], sizes = [1, 32], strides = [1, 1]} : vector<1x64xf32> to vector<1x32xf32>
    %109 = arith.addf %108, %97 : vector<1x32xf32>
    %110 = vector.extract_strided_slice %107 {offsets = [0, 32], sizes = [1, 32], strides = [1, 1]} : vector<1x64xf32> to vector<1x32xf32>
    %cst_54 = arith.constant 0.000000e+00 : f32
    %111 = vector.broadcast %cst_54 : f32 to vector<1x32xf32>
    %112 = arith.maximumf %109, %111 : vector<1x32xf32>
    %113 = vector.shape_cast %112 : vector<1x32xf32> to vector<1x8x4xf32>
    %cst_55 = arith.constant dense<0xFF800000> : vector<1x8xf32>
    %114 = vector.multi_reduction <maximumf>, %113, %cst_55 [2] : vector<1x8x4xf32> to vector<1x8xf32>
    %cst_56 = arith.constant dense<0.000000e+00> : vector<1x32xf32>
    %115 = tpu.matmul %114, %7, %cst_56 {dimension_numbers = #tpu.dot_dimension_numbers<[1], [0], [0], [1], [0, 0, 1, 1], [], []>} : vector<1x8xf32>, vector<8x32xf32>, vector<1x32xf32> -> vector<1x32xf32>
    %116 = arith.addf %115, %8 : vector<1x32xf32>
    %117 = vector.shape_cast %116 : vector<1x32xf32> to vector<1x32x1xf32>
    %118 = vector.broadcast %117 : vector<1x32x1xf32> to vector<1x32x32xf32>
    %119 = arith.mulf %118, %105 : vector<1x32x32xf32>
    %cst_57 = arith.constant dense<0.000000e+00> : vector<1x32xf32>
    %120 = vector.multi_reduction <add>, %119, %cst_57 [1] : vector<1x32x32xf32> to vector<1x32xf32>
    %121 = arith.addf %120, %110 : vector<1x32xf32>
    %cst_58 = arith.constant 0.000000e+00 : f32
    %122 = vector.broadcast %cst_58 : f32 to vector<1x32xf32>
    %123 = arith.maximumf %121, %122 : vector<1x32xf32>
    %124 = vector.shape_cast %123 : vector<1x32xf32> to vector<1x8x4xf32>
    %cst_59 = arith.constant dense<0xFF800000> : vector<1x8xf32>
    %125 = vector.multi_reduction <maximumf>, %124, %cst_59 [2] : vector<1x8x4xf32> to vector<1x8xf32>
    %cst_60 = arith.constant dense<0.000000e+00> : vector<1x32xf32>
    %126 = tpu.matmul %125, %7, %cst_60 {dimension_numbers = #tpu.dot_dimension_numbers<[1], [0], [0], [1], [0, 0, 1, 1], [], []>} : vector<1x8xf32>, vector<8x32xf32>, vector<1x32xf32> -> vector<1x32xf32>
    %127 = arith.addf %126, %8 : vector<1x32xf32>
    %128 = vector.shape_cast %116 : vector<1x32xf32> to vector<1x1x32xf32>
    %c0_61 = arith.constant 0 : index
    %c3_62 = arith.constant 3 : index
    %c0_63 = arith.constant 0 : index
    %129 = vector.load %arg8[%c0_61, %c3_62, %c0_63] : memref<1x8x32xf32, #tpu.memory_space<vmem>>, vector<1x1x32xf32>
    tpu.vector_store %arg8[%c0_61, %c3_62, %c0_63], %128 {strides = array<i32>} : memref<1x8x32xf32, #tpu.memory_space<vmem>>, vector<1x1x32xf32>,
    %c0_64 = arith.constant 0 : index
    %c4 = arith.constant 4 : index
    %c0_65 = arith.constant 0 : index
    %130 = vector.load %arg2[%c0_64, %c4, %c0_65] : memref<1x8x16xbf16, #tpu.memory_space<vmem>>, vector<1x1x16xbf16>
    %131 = vector.shape_cast %130 : vector<1x1x16xbf16> to vector<1x16xbf16>
    %cst_66 = arith.constant dense<0.000000e+00> : vector<1x1088xf32>
    %132 = tpu.matmul %131, %3, %cst_66 {dimension_numbers = #tpu.dot_dimension_numbers<[1], [0], [0], [1], [0, 0, 1, 1], [], []>} : vector<1x16xbf16>, vector<16x1088xbf16>, vector<1x1088xf32> -> vector<1x1088xf32>
    %133 = vector.extract_strided_slice %132 {offsets = [0, 0], sizes = [1, 1024], strides = [1, 1]} : vector<1x1088xf32> to vector<1x1024xf32>
    %134 = vector.shape_cast %133 : vector<1x1024xf32> to vector<1x32x32xf32>
    %135 = arith.addf %134, %6 : vector<1x32x32xf32>
    %136 = vector.extract_strided_slice %132 {offsets = [0, 1024], sizes = [1, 64], strides = [1, 1]} : vector<1x1088xf32> to vector<1x64xf32>
    %137 = arith.addf %136, %4 : vector<1x64xf32>
    %138 = vector.extract_strided_slice %137 {offsets = [0, 0], sizes = [1, 32], strides = [1, 1]} : vector<1x64xf32> to vector<1x32xf32>
    %139 = arith.addf %138, %127 : vector<1x32xf32>
    %140 = vector.extract_strided_slice %137 {offsets = [0, 32], sizes = [1, 32], strides = [1, 1]} : vector<1x64xf32> to vector<1x32xf32>
    %cst_67 = arith.constant 0.000000e+00 : f32
    %141 = vector.broadcast %cst_67 : f32 to vector<1x32xf32>
    %142 = arith.maximumf %139, %141 : vector<1x32xf32>
    %143 = vector.shape_cast %142 : vector<1x32xf32> to vector<1x8x4xf32>
    %cst_68 = arith.constant dense<0xFF800000> : vector<1x8xf32>
    %144 = vector.multi_reduction <maximumf>, %143, %cst_68 [2] : vector<1x8x4xf32> to vector<1x8xf32>
    %cst_69 = arith.constant dense<0.000000e+00> : vector<1x32xf32>
    %145 = tpu.matmul %144, %7, %cst_69 {dimension_numbers = #tpu.dot_dimension_numbers<[1], [0], [0], [1], [0, 0, 1, 1], [], []>} : vector<1x8xf32>, vector<8x32xf32>, vector<1x32xf32> -> vector<1x32xf32>
    %146 = arith.addf %145, %8 : vector<1x32xf32>
    %147 = vector.shape_cast %146 : vector<1x32xf32> to vector<1x32x1xf32>
    %148 = vector.broadcast %147 : vector<1x32x1xf32> to vector<1x32x32xf32>
    %149 = arith.mulf %148, %135 : vector<1x32x32xf32>
    %cst_70 = arith.constant dense<0.000000e+00> : vector<1x32xf32>
    %150 = vector.multi_reduction <add>, %149, %cst_70 [1] : vector<1x32x32xf32> to vector<1x32xf32>
    %151 = arith.addf %150, %140 : vector<1x32xf32>
    %cst_71 = arith.constant 0.000000e+00 : f32
    %152 = vector.broadcast %cst_71 : f32 to vector<1x32xf32>
    %153 = arith.maximumf %151, %152 : vector<1x32xf32>
    %154 = vector.shape_cast %153 : vector<1x32xf32> to vector<1x8x4xf32>
    %cst_72 = arith.constant dense<0xFF800000> : vector<1x8xf32>
    %155 = vector.multi_reduction <maximumf>, %154, %cst_72 [2] : vector<1x8x4xf32> to vector<1x8xf32>
    %cst_73 = arith.constant dense<0.000000e+00> : vector<1x32xf32>
    %156 = tpu.matmul %155, %7, %cst_73 {dimension_numbers = #tpu.dot_dimension_numbers<[1], [0], [0], [1], [0, 0, 1, 1], [], []>} : vector<1x8xf32>, vector<8x32xf32>, vector<1x32xf32> -> vector<1x32xf32>
    %157 = arith.addf %156, %8 : vector<1x32xf32>
    %158 = vector.shape_cast %146 : vector<1x32xf32> to vector<1x1x32xf32>
    %c0_74 = arith.constant 0 : index
    %c4_75 = arith.constant 4 : index
    %c0_76 = arith.constant 0 : index
    %159 = vector.load %arg8[%c0_74, %c4_75, %c0_76] : memref<1x8x32xf32, #tpu.memory_space<vmem>>, vector<1x1x32xf32>
    tpu.vector_store %arg8[%c0_74, %c4_75, %c0_76], %158 {strides = array<i32>} : memref<1x8x32xf32, #tpu.memory_space<vmem>>, vector<1x1x32xf32>,
    %c0_77 = arith.constant 0 : index
    %c5 = arith.constant 5 : index
    %c0_78 = arith.constant 0 : index
    %160 = vector.load %arg2[%c0_77, %c5, %c0_78] : memref<1x8x16xbf16, #tpu.memory_space<vmem>>, vector<1x1x16xbf16>
    %161 = vector.shape_cast %160 : vector<1x1x16xbf16> to vector<1x16xbf16>
    %cst_79 = arith.constant dense<0.000000e+00> : vector<1x1088xf32>
    %162 = tpu.matmul %161, %3, %cst_79 {dimension_numbers = #tpu.dot_dimension_numbers<[1], [0], [0], [1], [0, 0, 1, 1], [], []>} : vector<1x16xbf16>, vector<16x1088xbf16>, vector<1x1088xf32> -> vector<1x1088xf32>
    %163 = vector.extract_strided_slice %162 {offsets = [0, 0], sizes = [1, 1024], strides = [1, 1]} : vector<1x1088xf32> to vector<1x1024xf32>
    %164 = vector.shape_cast %163 : vector<1x1024xf32> to vector<1x32x32xf32>
    %165 = arith.addf %164, %6 : vector<1x32x32xf32>
    %166 = vector.extract_strided_slice %162 {offsets = [0, 1024], sizes = [1, 64], strides = [1, 1]} : vector<1x1088xf32> to vector<1x64xf32>
    %167 = arith.addf %166, %4 : vector<1x64xf32>
    %168 = vector.extract_strided_slice %167 {offsets = [0, 0], sizes = [1, 32], strides = [1, 1]} : vector<1x64xf32> to vector<1x32xf32>
    %169 = arith.addf %168, %157 : vector<1x32xf32>
    %170 = vector.extract_strided_slice %167 {offsets = [0, 32], sizes = [1, 32], strides = [1, 1]} : vector<1x64xf32> to vector<1x32xf32>
    %cst_80 = arith.constant 0.000000e+00 : f32
    %171 = vector.broadcast %cst_80 : f32 to vector<1x32xf32>
    %172 = arith.maximumf %169, %171 : vector<1x32xf32>
    %173 = vector.shape_cast %172 : vector<1x32xf32> to vector<1x8x4xf32>
    %cst_81 = arith.constant dense<0xFF800000> : vector<1x8xf32>
    %174 = vector.multi_reduction <maximumf>, %173, %cst_81 [2] : vector<1x8x4xf32> to vector<1x8xf32>
    %cst_82 = arith.constant dense<0.000000e+00> : vector<1x32xf32>
    %175 = tpu.matmul %174, %7, %cst_82 {dimension_numbers = #tpu.dot_dimension_numbers<[1], [0], [0], [1], [0, 0, 1, 1], [], []>} : vector<1x8xf32>, vector<8x32xf32>, vector<1x32xf32> -> vector<1x32xf32>
    %176 = arith.addf %175, %8 : vector<1x32xf32>
    %177 = vector.shape_cast %176 : vector<1x32xf32> to vector<1x32x1xf32>
    %178 = vector.broadcast %177 : vector<1x32x1xf32> to vector<1x32x32xf32>
    %179 = arith.mulf %178, %165 : vector<1x32x32xf32>
    %cst_83 = arith.constant dense<0.000000e+00> : vector<1x32xf32>
    %180 = vector.multi_reduction <add>, %179, %cst_83 [1] : vector<1x32x32xf32> to vector<1x32xf32>
    %181 = arith.addf %180, %170 : vector<1x32xf32>
    %cst_84 = arith.constant 0.000000e+00 : f32
    %182 = vector.broadcast %cst_84 : f32 to vector<1x32xf32>
    %183 = arith.maximumf %181, %182 : vector<1x32xf32>
    %184 = vector.shape_cast %183 : vector<1x32xf32> to vector<1x8x4xf32>
    %cst_85 = arith.constant dense<0xFF800000> : vector<1x8xf32>
    %185 = vector.multi_reduction <maximumf>, %184, %cst_85 [2] : vector<1x8x4xf32> to vector<1x8xf32>
    %cst_86 = arith.constant dense<0.000000e+00> : vector<1x32xf32>
    %186 = tpu.matmul %185, %7, %cst_86 {dimension_numbers = #tpu.dot_dimension_numbers<[1], [0], [0], [1], [0, 0, 1, 1], [], []>} : vector<1x8xf32>, vector<8x32xf32>, vector<1x32xf32> -> vector<1x32xf32>
    %187 = arith.addf %186, %8 : vector<1x32xf32>
    %188 = vector.shape_cast %176 : vector<1x32xf32> to vector<1x1x32xf32>
    %c0_87 = arith.constant 0 : index
    %c5_88 = arith.constant 5 : index
    %c0_89 = arith.constant 0 : index
    %189 = vector.load %arg8[%c0_87, %c5_88, %c0_89] : memref<1x8x32xf32, #tpu.memory_space<vmem>>, vector<1x1x32xf32>
    tpu.vector_store %arg8[%c0_87, %c5_88, %c0_89], %188 {strides = array<i32>} : memref<1x8x32xf32, #tpu.memory_space<vmem>>, vector<1x1x32xf32>,
    %c0_90 = arith.constant 0 : index
    %c6 = arith.constant 6 : index
    %c0_91 = arith.constant 0 : index
    %190 = vector.load %arg2[%c0_90, %c6, %c0_91] : memref<1x8x16xbf16, #tpu.memory_space<vmem>>, vector<1x1x16xbf16>
    %191 = vector.shape_cast %190 : vector<1x1x16xbf16> to vector<1x16xbf16>
    %cst_92 = arith.constant dense<0.000000e+00> : vector<1x1088xf32>
    %192 = tpu.matmul %191, %3, %cst_92 {dimension_numbers = #tpu.dot_dimension_numbers<[1], [0], [0], [1], [0, 0, 1, 1], [], []>} : vector<1x16xbf16>, vector<16x1088xbf16>, vector<1x1088xf32> -> vector<1x1088xf32>
    %193 = vector.extract_strided_slice %192 {offsets = [0, 0], sizes = [1, 1024], strides = [1, 1]} : vector<1x1088xf32> to vector<1x1024xf32>
    %194 = vector.shape_cast %193 : vector<1x1024xf32> to vector<1x32x32xf32>
    %195 = arith.addf %194, %6 : vector<1x32x32xf32>
    %196 = vector.extract_strided_slice %192 {offsets = [0, 1024], sizes = [1, 64], strides = [1, 1]} : vector<1x1088xf32> to vector<1x64xf32>
    %197 = arith.addf %196, %4 : vector<1x64xf32>
    %198 = vector.extract_strided_slice %197 {offsets = [0, 0], sizes = [1, 32], strides = [1, 1]} : vector<1x64xf32> to vector<1x32xf32>
    %199 = arith.addf %198, %187 : vector<1x32xf32>
    %200 = vector.extract_strided_slice %197 {offsets = [0, 32], sizes = [1, 32], strides = [1, 1]} : vector<1x64xf32> to vector<1x32xf32>
    %cst_93 = arith.constant 0.000000e+00 : f32
    %201 = vector.broadcast %cst_93 : f32 to vector<1x32xf32>
    %202 = arith.maximumf %199, %201 : vector<1x32xf32>
    %203 = vector.shape_cast %202 : vector<1x32xf32> to vector<1x8x4xf32>
    %cst_94 = arith.constant dense<0xFF800000> : vector<1x8xf32>
    %204 = vector.multi_reduction <maximumf>, %203, %cst_94 [2] : vector<1x8x4xf32> to vector<1x8xf32>
    %cst_95 = arith.constant dense<0.000000e+00> : vector<1x32xf32>
    %205 = tpu.matmul %204, %7, %cst_95 {dimension_numbers = #tpu.dot_dimension_numbers<[1], [0], [0], [1], [0, 0, 1, 1], [], []>} : vector<1x8xf32>, vector<8x32xf32>, vector<1x32xf32> -> vector<1x32xf32>
    %206 = arith.addf %205, %8 : vector<1x32xf32>
    %207 = vector.shape_cast %206 : vector<1x32xf32> to vector<1x32x1xf32>
    %208 = vector.broadcast %207 : vector<1x32x1xf32> to vector<1x32x32xf32>
    %209 = arith.mulf %208, %195 : vector<1x32x32xf32>
    %cst_96 = arith.constant dense<0.000000e+00> : vector<1x32xf32>
    %210 = vector.multi_reduction <add>, %209, %cst_96 [1] : vector<1x32x32xf32> to vector<1x32xf32>
    %211 = arith.addf %210, %200 : vector<1x32xf32>
    %cst_97 = arith.constant 0.000000e+00 : f32
    %212 = vector.broadcast %cst_97 : f32 to vector<1x32xf32>
    %213 = arith.maximumf %211, %212 : vector<1x32xf32>
    %214 = vector.shape_cast %213 : vector<1x32xf32> to vector<1x8x4xf32>
    %cst_98 = arith.constant dense<0xFF800000> : vector<1x8xf32>
    %215 = vector.multi_reduction <maximumf>, %214, %cst_98 [2] : vector<1x8x4xf32> to vector<1x8xf32>
    %cst_99 = arith.constant dense<0.000000e+00> : vector<1x32xf32>
    %216 = tpu.matmul %215, %7, %cst_99 {dimension_numbers = #tpu.dot_dimension_numbers<[1], [0], [0], [1], [0, 0, 1, 1], [], []>} : vector<1x8xf32>, vector<8x32xf32>, vector<1x32xf32> -> vector<1x32xf32>
    %217 = arith.addf %216, %8 : vector<1x32xf32>
    %218 = vector.shape_cast %206 : vector<1x32xf32> to vector<1x1x32xf32>
    %c0_100 = arith.constant 0 : index
    %c6_101 = arith.constant 6 : index
    %c0_102 = arith.constant 0 : index
    %219 = vector.load %arg8[%c0_100, %c6_101, %c0_102] : memref<1x8x32xf32, #tpu.memory_space<vmem>>, vector<1x1x32xf32>
    tpu.vector_store %arg8[%c0_100, %c6_101, %c0_102], %218 {strides = array<i32>} : memref<1x8x32xf32, #tpu.memory_space<vmem>>, vector<1x1x32xf32>,
    %c0_103 = arith.constant 0 : index
    %c7 = arith.constant 7 : index
    %c0_104 = arith.constant 0 : index
    %220 = vector.load %arg2[%c0_103, %c7, %c0_104] : memref<1x8x16xbf16, #tpu.memory_space<vmem>>, vector<1x1x16xbf16>
    %221 = vector.shape_cast %220 : vector<1x1x16xbf16> to vector<1x16xbf16>
    %cst_105 = arith.constant dense<0.000000e+00> : vector<1x1088xf32>
    %222 = tpu.matmul %221, %3, %cst_105 {dimension_numbers = #tpu.dot_dimension_numbers<[1], [0], [0], [1], [0, 0, 1, 1], [], []>} : vector<1x16xbf16>, vector<16x1088xbf16>, vector<1x1088xf32> -> vector<1x1088xf32>
    %223 = vector.extract_strided_slice %222 {offsets = [0, 0], sizes = [1, 1024], strides = [1, 1]} : vector<1x1088xf32> to vector<1x1024xf32>
    %224 = vector.shape_cast %223 : vector<1x1024xf32> to vector<1x32x32xf32>
    %225 = arith.addf %224, %6 : vector<1x32x32xf32>
    %226 = vector.extract_strided_slice %222 {offsets = [0, 1024], sizes = [1, 64], strides = [1, 1]} : vector<1x1088xf32> to vector<1x64xf32>
    %227 = arith.addf %226, %4 : vector<1x64xf32>
    %228 = vector.extract_strided_slice %227 {offsets = [0, 0], sizes = [1, 32], strides = [1, 1]} : vector<1x64xf32> to vector<1x32xf32>
    %229 = arith.addf %228, %217 : vector<1x32xf32>
    %230 = vector.extract_strided_slice %227 {offsets = [0, 32], sizes = [1, 32], strides = [1, 1]} : vector<1x64xf32> to vector<1x32xf32>
    %cst_106 = arith.constant 0.000000e+00 : f32
    %231 = vector.broadcast %cst_106 : f32 to vector<1x32xf32>
    %232 = arith.maximumf %229, %231 : vector<1x32xf32>
    %233 = vector.shape_cast %232 : vector<1x32xf32> to vector<1x8x4xf32>
    %cst_107 = arith.constant dense<0xFF800000> : vector<1x8xf32>
    %234 = vector.multi_reduction <maximumf>, %233, %cst_107 [2] : vector<1x8x4xf32> to vector<1x8xf32>
    %cst_108 = arith.constant dense<0.000000e+00> : vector<1x32xf32>
    %235 = tpu.matmul %234, %7, %cst_108 {dimension_numbers = #tpu.dot_dimension_numbers<[1], [0], [0], [1], [0, 0, 1, 1], [], []>} : vector<1x8xf32>, vector<8x32xf32>, vector<1x32xf32> -> vector<1x32xf32>
    %236 = arith.addf %235, %8 : vector<1x32xf32>
    %237 = vector.shape_cast %236 : vector<1x32xf32> to vector<1x32x1xf32>
    %238 = vector.broadcast %237 : vector<1x32x1xf32> to vector<1x32x32xf32>
    %239 = arith.mulf %238, %225 : vector<1x32x32xf32>
    %cst_109 = arith.constant dense<0.000000e+00> : vector<1x32xf32>
    %240 = vector.multi_reduction <add>, %239, %cst_109 [1] : vector<1x32x32xf32> to vector<1x32xf32>
    %241 = arith.addf %240, %230 : vector<1x32xf32>
    %cst_110 = arith.constant 0.000000e+00 : f32
    %242 = vector.broadcast %cst_110 : f32 to vector<1x32xf32>
    %243 = arith.maximumf %241, %242 : vector<1x32xf32>
    %244 = vector.shape_cast %243 : vector<1x32xf32> to vector<1x8x4xf32>
    %cst_111 = arith.constant dense<0xFF800000> : vector<1x8xf32>
    %245 = vector.multi_reduction <maximumf>, %244, %cst_111 [2] : vector<1x8x4xf32> to vector<1x8xf32>
    %cst_112 = arith.constant dense<0.000000e+00> : vector<1x32xf32>
    %246 = tpu.matmul %245, %7, %cst_112 {dimension_numbers = #tpu.dot_dimension_numbers<[1], [0], [0], [1], [0, 0, 1, 1], [], []>} : vector<1x8xf32>, vector<8x32xf32>, vector<1x32xf32> -> vector<1x32xf32>
    %247 = arith.addf %246, %8 : vector<1x32xf32>
    %248 = vector.shape_cast %236 : vector<1x32xf32> to vector<1x1x32xf32>
    %c0_113 = arith.constant 0 : index
    %c7_114 = arith.constant 7 : index
    %c0_115 = arith.constant 0 : index
    %249 = vector.load %arg8[%c0_113, %c7_114, %c0_115] : memref<1x8x32xf32, #tpu.memory_space<vmem>>, vector<1x1x32xf32>
    tpu.vector_store %arg8[%c0_113, %c7_114, %c0_115], %248 {strides = array<i32>} : memref<1x8x32xf32, #tpu.memory_space<vmem>>, vector<1x1x32xf32>,
    %c0_116 = arith.constant 0 : index
    %c0_117 = arith.constant 0 : index
    %250 = vector.load %arg9[%c0_116, %c0_117] : memref<1x32xf32, #tpu.memory_space<vmem>>, vector<1x32xf32>
    tpu.vector_store %arg9[%c0_116, %c0_117], %247 {strides = array<i32>} : memref<1x32xf32, #tpu.memory_space<vmem>>, vector<1x32xf32>,
    return
  }
  func.func @transform_0(%arg0: i32, %arg1: i32) -> (i32, i32, i32) {
    %c0_i32 = arith.constant 0 : i32
    %c0_i32_0 = arith.constant 0 : i32
    return %arg0, %arg1, %c0_i32 : i32, i32, i32
  }
  func.func @transform_1(%arg0: i32, %arg1: i32) -> (i32, i32) {
    %c0_i32 = arith.constant 0 : i32
    %c0_i32_0 = arith.constant 0 : i32
    %c0_i32_1 = arith.constant 0 : i32
    return %c0_i32, %c0_i32_0 : i32, i32
  }
  func.func @transform_2(%arg0: i32, %arg1: i32) -> (i32, i32) {
    %c0_i32 = arith.constant 0 : i32
    %c0_i32_0 = arith.constant 0 : i32
    %c0_i32_1 = arith.constant 0 : i32
    return %c0_i32, %c0_i32_0 : i32, i32
  }
  func.func @transform_3(%arg0: i32, %arg1: i32) -> (i32, i32) {
    %c0_i32 = arith.constant 0 : i32
    %c0_i32_0 = arith.constant 0 : i32
    %c0_i32_1 = arith.constant 0 : i32
    return %c0_i32, %c0_i32_0 : i32, i32
  }
  func.func @transform_4(%arg0: i32, %arg1: i32) -> (i32, i32) {
    %c0_i32 = arith.constant 0 : i32
    %c0_i32_0 = arith.constant 0 : i32
    %c0_i32_1 = arith.constant 0 : i32
    return %c0_i32, %c0_i32_0 : i32, i32
  }
  func.func @transform_5(%arg0: i32, %arg1: i32) -> (i32, i32) {
    %c0_i32 = arith.constant 0 : i32
    %c0_i32_0 = arith.constant 0 : i32
    %c0_i32_1 = arith.constant 0 : i32
    return %c0_i32, %c0_i32_0 : i32, i32
  }
  func.func @transform_6(%arg0: i32, %arg1: i32) -> (i32, i32, i32) {
    %c0_i32 = arith.constant 0 : i32
    %c0_i32_0 = arith.constant 0 : i32
    return %arg0, %arg1, %c0_i32 : i32, i32, i32
  }
}

</mosaic_0001>

<bundles_post_ra>
// kernel: tpu_custom_call.1
= control target key start
LH: loop header
LB: loop body
LE: loop exit
PB: predicated region body
PF: predicated region fallthrough
CT: control target
= control target key end

     0   :  { %s9837_s0 = inlined_call_operand.hbm [shape: bf16[2,16,16], index: 0, kind: input, shape index: {}]   ;;  %s9838_s1 = inlined_call_operand.hbm [shape: bf16[16,1088], index: 1, kind: input, shape index: {}]   ;;  %s9839_s2 = inlined_call_operand.vmem [shape: f32[1,64], index: 2, kind: input, shape index: {}]   ;;  %s9840_s3 = inlined_call_operand.hbm [shape: f32[32,32], index: 3, kind: input, shape index: {}]   ;;  %s9841_s4 = inlined_call_operand.hbm [shape: f32[8,32], index: 4, kind: input, shape index: {}]   ;;  %s9842_s5 = inlined_call_operand.vmem [shape: f32[1,32], index: 5, kind: input, shape index: {}]   ;;  %s9843_s6 = inlined_call_operand.hbm [shape: f32[2,16,32], index: 6, kind: output, shape index: {}]  }
   0x1   :  { %9853 = sst [smem:[#allocation20_spill]] %s9838_s1 }
   0x2   :  { %9854 = sst [smem:[#allocation21_spill]] %s9840_s3 }
   0x3   :  { %9855 = sst [smem:[#allocation22_spill]] %s9841_s4 }
   0x4   :  { %9856 = sst [smem:[#allocation23_spill]] %s9843_s6 }
   0x5   :  { %11 = vsyncpa [#allocation4], 0 }
   0x6   :  { %13 = vsyncpa [#allocation4 + $0x1], 0 }
   0x7   :  { %14 = vsyncpa [#allocation7], 0 }
   0x8   :  { %15 = vsyncpa [#allocation10], 0 }
   0x9   :  { %16 = vsyncpa [#allocation5], 0 }
   0xa   :  { %18 = vsyncpa [#allocation5 + $0x1], 0  ;;  %s8002_s21 = smov 0   ;;  %s8004_s22 = smov 0  }
   0xb   :  { %s8006_s23 = smov 0   ;;  %s8008_s24 = smov 0  }
   0xc   :  { %s8010_s25 = smov 0   ;;  %s8012_s26 = smov 0  }
   0xd   :  { %s8014_s27 = smov 0   ;;  %s8016_s28 = smov 0  }
   0xe LB: > { %9857 = sst [smem:[#allocation16_spill]] %s7912_s21  ;;  %s7263_s29 = sadd.s32 4294967295, %s7940_s28   ;;  %s7940_s28 = sphi %s8016_s28, %s24_s28   ;;  %s7936_s27 = sphi %s8014_s27, %s9887_s27   ;;  %s7932_s26 = sphi %s8012_s26, %s9886_s26   ;;  %s7928_s25 = sphi %s8010_s25, %s9885_s25   ;;  %s7924_s24 = sphi %s8008_s24, %s9884_s24   ;;  %s7920_s23 = sphi %s8006_s23, %s9883_s23   ;;  %s7916_s22 = sphi %s8004_s22, %s9882_s22   ;;  %s7912_s21 = sphi %s8002_s21, %s9881_s21  }
   0xf   : > { %s7264_s30 = sadd.s32 4294967294, %s7940_s28   ;;  %p58_p0 = scmp.ne.s32.totalorder %s7916_s22, %s7912_s21 }
  0x10   : > { %p8046_p1 = scmp.eq.s32.totalorder %s7263_s29, 0  ;;  %p8050_p2 = scmp.eq.s32.totalorder %s7263_s29, 3 }
  0x11   : > { %p195_p3 = scmp.eq.s32.totalorder %s7264_s30, 3  ;;  %p7265_p5 = scmp.ge.s32.totalorder %s7940_s28, 1 }
  0x12   : > { %s9858_s7 = scalar_select %p8046_p1, 1, 0 }
  0x13   : > { %p8056_p4 = por %p8046_p1, %p58_p0  ;;  %p8061_p6 = por %p195_p3, %p58_p0 }
  0x14   : > { %p202_p7 = scmp.lt.s32.totalorder %s7940_s28, 5  ;;  %s7942_s12 = smov [#allocation6]  }
  0x15   : > { %s9860_s9 = scalar_select %p8056_p4, 1, 0 }
  0x16   : > { %s9861_s10 = scalar_select %p8061_p6, 1, 0 }
  0x17   : > { %p8066_p8 = pnand %p7265_p5, %p202_p7  ;;  %s214_s13 = sshll.u32 %s7942_s12, 4  ;;  %s215_s13 = int_to_ptr.vmem [resolvable:$true] %s214_s13 }
  0x18   : > { %9862 = sst [smem:[#allocation17_spill]] %s9861_s10  ;;  %s7943_s15 = smov [#allocation8]  }
  0x19   : > { %p7549_p9 = pneg %p8066_p8  ;;  %s230_s16 = sshll.u32 %s7943_s15, 4  ;;  %s231_s16 = int_to_ptr.vmem [resolvable:$true] %s230_s16 }
  0x1a   : > { %s7741_s17 = scalar_lea.vmem %s215_s13, 1152  ;;  %p7749_p3 = scmp.lt.s32.totalorder %s215_s13, %s215_s13 }
  0x1b   : > { %p8074_p10 = pnand %p7549_p9, %p8046_p1  ;;  %p7742_p12 = scmp.ne.s32.totalorder %s215_s13, %s7741_s17 }
  0x1c   : > { %p7750_p5 = scmp.lt.s32.totalorder %s7741_s17, %s7741_s17 }
  0x1d   : > { %p7732_p11 = pneg %p8074_p10 }
  0x1e   : > { %p7751_p7 = por %p7750_p5, %p7749_p3 }
  0x1f   : > { %p7744_p13 = pnand %p7742_p12, %p7732_p11 }
  0x21   : > { %p7745_p0 = pneg %p7744_p13 }
  0x23   : > { %p7752_p9 = pnand %p7751_p7, %p7745_p0 }
  0x25   : > { %7755 = shalt.err (!%p7752_p9)
}
  0x26   : > { %s7944_s18 = smov 576   ;;  %s7945_s19 = smov 36  }
  0x27   : > { %s9865_s1 = sld [smem:[#allocation20_spill]]  ;;  %s7767_s30 = scalar_lea.vmem %s231_s16, 512 }
  0x28   : > { %p7768_p6 = scmp.ne.s32.totalorder %s231_s16, %s7767_s30  ;;  %p7775_p1 = scmp.lt.s32.totalorder %s231_s16, %s231_s16 }
  0x29   : > { %p7776_p4 = scmp.lt.s32.totalorder %s7767_s30, %s7767_s30 }
  0x2a   : > { %p7770_p12 = pnand %p7768_p6, %p7732_p11 }
  0x2b   : > { %p7777_p3 = por %p7776_p4, %p7775_p1 }
  0x2c   : > { %p7771_p13 = pneg %p7770_p12 }
  0x2d   : > { %7552 = dma.hbm_to_vmem [thread:$0]  (!%p8074_p10), %s9865_s1, 1152, %s215_s13, [#allocation7], %s7944_s18, %s7944_s18, %s7945_s19  }
  0x2e   : > { %p7778_p0 = pnand %p7777_p3, %p7771_p13 }
  0x30   : > { %7781 = shalt.err (!%p7778_p0)
}
  0x31   : > { %s7946_s12 = smov 128   ;;  %s7947_s15 = smov 8  }
  0x32   : > { %s9866_s3 = sld [smem:[#allocation21_spill]]  ;;  %s7948_s13 = smov [#allocation9]  }
  0x33   : > { %s244_s18 = sshll.u32 %s7948_s13, 4  ;;  %s245_s18 = int_to_ptr.vmem [resolvable:$true] %s244_s18 }
  0x34   : > { %s7793_s19 = scalar_lea.vmem %s245_s18, 128  ;;  %p7801_p4 = scmp.lt.s32.totalorder %s245_s18, %s245_s18 }
  0x35   : > { %p7794_p6 = scmp.ne.s32.totalorder %s245_s18, %s7793_s19  ;;  %p7802_p7 = scmp.lt.s32.totalorder %s7793_s19, %s7793_s19 }
  0x37   : > { %p7796_p5 = pnand %p7794_p6, %p7732_p11  ;;  %p7803_p9 = por %p7802_p7, %p7801_p4 }
  0x38   : > { %7555 = dma.hbm_to_vmem [thread:$0]  (!%p8074_p10), %s9866_s3, 512, %s231_s16, [#allocation7], %s7946_s12, %s7946_s12, %s7947_s15  }
  0x39   : > { %p7797_p1 = pneg %p7796_p5 }
  0x3b   : > { %p7804_p12 = pnand %p7803_p9, %p7797_p1 }
  0x3d   : > { %7807 = shalt.err (!%p7804_p12)
}
  0x3e   : > { %s9867_s4 = sld [smem:[#allocation22_spill]]  ;;  %s33_s10 = sadd.s32 1, %s7932_s26 }
  0x3f   : > { %p34_p11 = scmp.ge.s32.totalorder %s33_s10, 2  ;;  %s36_s14 = sadd.s32 1, %s7936_s27 }
  0x40   : > { %s45_s16 = sadd.s32 1, %s7920_s23  ;;  %p52_p13 = scmp.ne.s32.totalorder %s7920_s23, %s7916_s22 }
  0x41   : > { %s9889_s10 = smov (%p34_p11, %s33_s10), 0  ;;  %s9891_s14 = smov (!%p34_p11, %s36_s14), %s7936_s27 }
  0x42   : > { %9868 = sst [smem:[#allocation18_spill]] %s9889_s10  ;;  %s41_s30 = ssub.s32 %s7932_s26, %s9889_s10 }
  0x43   : > { %p53_p3 = scmp.eq.s32.totalorder %s7940_s28, 0  ;;  %p38_p0 = scmp.ge.s32.totalorder %s9891_s14, 2 }
  0x44   : > { %7558 = dma.hbm_to_vmem [thread:$0]  (!%p8074_p10), %s9867_s4, 128, %s245_s18, [#allocation10]  }
  0x45   : > { %p8117_p6 = por %p8050_p2, %p52_p13  ;;  %p8121_p10 = por %p53_p3, %p52_p13 }
  0x46   : > { %p7570_p5 = scmp.lt.s32.totalorder %s7940_s28, 4  ;;  %s9893_s14 = smov (%p38_p0, %s9891_s14), 0 }
  0x47   : > { %s9869_s12 = scalar_select %p8117_p6, 1, 0 }
  0x48   : > { %s258_s17 = sand.u32 1, %s7920_s23   ;;  %s7271_s13 = sshll.u32 %s7936_s27, 1 }
  0x49   : > { %9870 = sst [smem:[#allocation19_spill]] %s9869_s12  ;;  %s40_s18 = ssub.s32 %s7936_s27, %s9893_s14 }
  0x4a   : > { %s42_s19 = sor.u32 %s41_s30, %s40_s18  ;;  %s7270_s20 = sshll.u32 %s258_s17, 2 }
  0x4b   : > { %p43_p1 = scmp.eq.s32.totalorder %s42_s19, 0  ;;  %s267_s8 = sadd.s32 %s7932_s26, %s7271_s13 }
  0x4c   : > { %s262_s29 = scalar_lea.vmem [#allocation3], %s7270_s20  ;;  %s7272_s4 = sshll.u32 %s267_s8, 6 }
  0x4d   : > { %s271_s1 = sshll.u32 %s262_s29, 4  ;;  %s269_s6 = scalar_lea.hbm %s9837_s0, %s7272_s4  ;;  %s272_s1 = int_to_ptr.vmem [resolvable:$true] %s271_s1 }
  0x4e   : > { %s8134_s3 = scalar_select %p43_p1, %s7920_s23, %s45_s16  }
  0x4f   : > { %p8143_p2 = pnand %p7570_p5, %p8121_p10  ;;  %s259_s30 = scalar_lea.sflag [#allocation4], %s258_s17 }
  0x50   : > { %s7821_s13 = scalar_lea.vmem %s272_s1, 64  ;;  %s7949_s16 = smov [#allocation3]  }
  0x51   : > { %p7810_p4 = pneg %p8143_p2  ;;  %p7822_p7 = scmp.ne.s32.totalorder %s272_s1, %s7821_s13 }
  0x52   : > { %s7826_s18 = sshll.u32 %s7949_s16, 4  ;;  %s7827_s18 = int_to_ptr.vmem [resolvable:$false] %s7826_s18 }
  0x53   : > { %p7824_p9 = pnand %p7822_p7, %p7810_p4  ;;  %s7828_s19 = scalar_lea.vmem %s7827_s18, 128 }
  0x54   : > { %p7829_p11 = scmp.lt.s32.totalorder %s272_s1, %s7827_s18  ;;  %p7830_p13 = scmp.lt.s32.totalorder %s7828_s19, %s7821_s13 }
  0x55   : > { %p7825_p12 = pneg %p7824_p9 }
  0x56   : > { %p7831_p3 = por %p7830_p13, %p7829_p11 }
  0x58   : > { %p7832_p0 = pnand %p7831_p3, %p7825_p12 }
  0x5a   : > { %7835 = shalt.err (!%p7832_p0)
}
  0x5b   : > { %7562 = dma.hbm_to_vmem [thread:$0]  (!%p8143_p2), %s269_s6, 64, %s272_s1, %s259_s30  }
  0x5c   : > { %280 = sbr.rel (%p8066_p8) target bundleno = 9166 (0x23ce), region = 44  ;;  %s8154_s4 = sand.u32 (!%p8066_p8), 1, %s7916_s22  }
  0x5d   : > { %s7274_s21 = sshll.u32 (!%p8066_p8), %s8154_s4, 2  ;;  %s283_s10 = scalar_lea.sflag (!%p8066_p8), [#allocation4], %s8154_s4 }
  0x5e   : > { %s8158_s15 = scalar_lea.vmem (!%p8066_p8), [#allocation3], %s7274_s21  ;;  %p9873_p10 = scmp.ne.s32.totalorder (!%p8066_p8), %s9860_s9, 0 }
  0x61   : > { %7895 = dma.done.wait (%p9873_p10), %s283_s10, 64  }
  0x62   : > { %7897 = vsyncadd (%p9873_p10), %s283_s10, 4294967232  ;;  %p9874_p5 = scmp.ne.s32.totalorder %s9858_s7, 0 }
  0x64   : > { %7899 = dma.done.wait (%p9874_p5), [#allocation7], 1664  }
  0x65   : > { %7901 = vsyncadd (%p9874_p5), [#allocation7], 4294965632 }
  0x66   : > { %7903 = dma.done.wait (%p9874_p5), [#allocation10], 128  }
  0x67   : > { %7905 = vsyncadd (%p9874_p5), [#allocation10], 4294967168  ;;  %s7278_s1 = sshll.u32 %s8154_s4, 3  ;;  %p7279_p8 = scmp.ne.s32.totalorder %s7924_s24, 0 }
  0x68   : > { %s8173_s6 = scalar_lea.vmem [#allocation11], %s7278_s1 }
  0x69   : > { %331 = sbr.rel (%p7279_p8) target bundleno = 112 (0x70), region = 64 }
  0x6e   : > { %vm332_vm0 = vcmask 253952   ;;  %v7950_v0 = vmov 0.0  }
  0x6f   : > { %333 = vst.msk [vmem:[#allocation2] sm:$0x1] %vm332_vm0, %v7950_v0 }
  0x70 PF: > { %v8176_v1 = vld [vmem:[#allocation6 + $0x4] ss:$36 sps:$4 sm:$0xff]   ;;  %v7951_v3 = vmov 0   ;;  %v8184_v4 = vld [vmem:[%s8158_s15] sm:$0x1]  ;;  %vm399_vm1 = vcmask 130048   ;;  %v691_v39 = vlaneseq }
  0x71   : > { %v8178_v2 = vld [vmem:[#allocation6] ss:$36 sps:$4 sm:$0xff]   ;;  %435 = vmatprep.mubr.bf16.mxu0 %v7951_v3  ;;  %476 = vmatprep.mubr.bf16.mxu1 %v7951_v3  ;;  %v8186_v5 = vld [vmem:[#allocation6 + $0x14] ss:$36 sps:$4 sm:$0xff]   ;;  %v8192_v7 = vld [vmem:[#allocation6 + $0xc] ss:$36 sps:$4 sm:$0xff]  }
  0x72   : > { %417 = vmatprep.subr.bf16.mxu0 %v8176_v1  ;;  %v8189_v6 = vld [vmem:[#allocation6 + $0x10] ss:$36 sps:$4 sm:$0xff]   ;;  %v8194_v8 = vld [vmem:[#allocation6 + $0x8] ss:$36 sps:$4 sm:$0xff]   ;;  %458 = vmatprep.subr.bf16.mxu1 %v8192_v7  ;;  %v7952_v9 = vmov 0.0   ;;  %vm7953_vm2 = vmmov 0  }
  0x73   : > { %418 = vmatpush1.bf16.msra.mxu0 %v8178_v2  ;;  %459 = vmatpush1.bf16.msra.mxu1 %v8194_v8  ;;  %v8203_v10 = vld [vmem:[#allocation6 + $0x20] ss:$36 sps:$4 sm:$0xff]   ;;  %v8234_v23 = vld [vmem:[%s9839_s2] sm:$0x1]  ;;  %s7954_s11 = smov 116   ;;  %s7955_s12 = smov 124  }
  0x74   : > { %499 = vmatprep.subr.bf16.mxu0 %v8186_v5  ;;  %s7956_s17 = smov 112   ;;  %s7957_s20 = smov 120   ;;  %v8246_v32 = vld [vmem:[#allocation6 + $0x1c] ss:$36 sps:$4 sm:$0xff]   ;;  %v8282_v34 = vld [vmem:[#allocation9] sm:$0xff]  ;;  %v692_v43 = vshrl.u32 %v691_v39, 7 }
  0x75   : > { %s7958_s8 = smov 104   ;;  %s7959_s29 = smov 108   ;;  %v8249_v33 = vld [vmem:[#allocation6 + $0x18] ss:$36 sps:$4 sm:$0xff]   ;;  %540 = vmatprep.subr.bf16.mxu1 %v8246_v32  ;;  %v7964_v37 = vmov 1983009808  }
  0x76   : > { %7289 = vmatmul.mubr.msk.bf16.vlgmr.msra.gmra.mxu0 %vm399_vm1, %v8184_v4  ;;  %7290 = vmatmul.mubr.msk.bf16.vlgmr.msra.gmra.mxu1 %vm399_vm1, %v8184_v4  ;;  %v351_v24 = vld [vmem:[#allocation2] sm:$0x1]  ;;  %s7960_s30 = smov 100   ;;  %s7961_s13 = smov 96   ;;  %v689_v38 = vunpack.c.l.s4 %v7964_v37  ;;  %v7965_v45 = vmov 1934713408  }
  0x77   : > { %500 = vmatpush1.bf16.msra.mxu0 %v8189_v6  ;;  %517 = vmatprep.mubr.bf16.mxu0 %v7951_v3  ;;  %s7962_s16 = smov 64   ;;  %s7963_s18 = smov 32   ;;  %v721_v46 = vunpack.c.l.s4 %v7965_v45  ;;  %vm961_vm3 = vcmask 31744   ;;  %vm972_vm4 = vcmask 64512   ;;  %vm1239_vm5 = vcmask 253952  }
  0x78   : > { %7405 = vmatprep.subr.bf16.mxu0 %v7952_v9  ;;  %558 = vmatprep.mubr.bf16.mxu1 %v7951_v3  ;;  %v690_v42 = vunpack.c.0.s8 %v689_v38  ;;  %vm1068_vm6 = vcmask 261120   ;;  %s7966_s10 = smov [#allocation11]  }
  0x79   : > { %541 = vmatpush1.bf16.msra.mxu1 %v8249_v33  ;;  %v722_v53 = vunpack.c.0.s8 %v721_v46  ;;  %s7840_s1 = sshll.u32 %s7966_s10, 4  ;;  %s7841_s1 = int_to_ptr.vmem [resolvable:$false] %s7840_s1 }
  0x7a   : > { %7411 = vmatprep.subr.mxu1 %v7952_v9  ;;  %v8292_v49 = vsub.s32 %v690_v42, %v692_v43  ;;  %s7842_s7 = scalar_lea.vmem %s7841_s1, 256 }
  0x7b   : > { %v8298_v60 = vsub.s32 %v722_v53, %v692_v43 }
  0x7e   : > { %7291 = vmatmul.mubr.msk.bf16.vlgmr.msra.gmra.mxu0 %vm399_vm1, %v8184_v4  ;;  %7292 = vmatmul.mubr.msk.bf16.vlgmr.msra.gmra.mxu1 %vm399_vm1, %v8184_v4 }
  0x7f   : > { %7406 = vmatpush3.bf16.msra.mxu0 %v8203_v10  ;;  %7407 = vmatprep.mubr.msk.bf16.mxu0 %vm7953_vm2, %v7952_v9 }
  0x80   : > { %1265 = vmatprep.subr.bf16.mxu0 %v8176_v1  ;;  %7413 = vmatprep.mubr.msk.f32.mxu1 %vm7953_vm2, %v7952_v9 }
  0x81   : > { %7412 = vmatpush3.msra.mxu1 %v8282_v34 }
  0x82   : > { %7416 = vmatprep.subr.mxu1 %v7952_v9 }
  0x86   : > { %7408 = vmatmul.mubr.msk.bf16.vlgmr.msra.gmra.mxu0 %vm399_vm1, %v8184_v4 }
  0x87   : > { %1266 = vmatpush1.bf16.msra.mxu0 %v8178_v2  ;;  %1283 = vmatprep.mubr.bf16.mxu0 %v7951_v3 }
  0x88   : > { %1347 = vmatprep.subr.bf16.mxu0 %v8186_v5 }
 0x136   : > { %v8219_v11 = vpop.f32.mrf.mxu0  ;;  %v8223_v14 = vpop.f32.mrf.mxu1 }
 0x138   : > { %v8221_v12 = vpop.f32.mrf.mxu0  ;;  %v8225_v16 = vpop.f32.mrf.mxu1 }
 0x13a   : > { %v441_v13 = vpop.f32.mrf.mxu0  ;;  %v482_v18 = vpop.f32.mrf.mxu1 }
 0x13c   : > { %v442_v15 = vpop.f32.mrf.mxu0  ;;  %v483_v20 = vpop.f32.mrf.mxu1 }
 0x13e   : > { %v8227_v17 = vpop.f32.mrf.mxu0  ;;  %v8309_v13 = vpop.f32.mrf.mxu1 }
 0x140   : > { %v8229_v19 = vpop.f32.mrf.mxu0  ;;  %v8315_v15 = vpop.f32.mrf.mxu1 }
 0x142   : > { %v523_v21 = vpop.f32.mrf.mxu0  ;;  %v564_v18 = vpop.f32.mrf.mxu1 }
 0x143   : > { %v967_v21 = vand.u32 127, %v691_v39 }
 0x144   : > { %v524_v22 = vpop.f32.mrf.mxu0  ;;  %v565_v20 = vpop.f32.mrf.mxu1 }
 0x145   : > { %v8325_v22 = vsub.s32 %v967_v21, %v692_v43 }
 0x146   : > { %v601_v25 = vpop.f32.mrf.mxu0 }
 0x147   : > { %v8237_v26 = vadd.f32 %v601_v25, %v8234_v23 }
 0x148   : > { %v7409_v27 = vpop.f32.mrf.mxu0 }
 0x149   : > { %v888_v28 = vadd.f32 %v8237_v26, %v351_v24  ;;  %v8336_v27 = vld [vmem:[%s9842_s5] sm:$0x1] }
 0x14a   : > { %v604_v29 = vpop.f32.mrf.mxu0 }
 0x14b   : > { %v889_v30 = vmax.f32 %v888_v28, 0.0  ;;  %v8338_v29 = vsub.s32 0, %v692_v43 }
 0x14c   : > { %v7410_v31 = vpop.f32.mrf.mxu0 }
 0x14d   : > { %897 = vrot.lane.b32.xlu1 %v889_v30, %s7954_s11  ;;  %891 = vrot.lane.b32.xlu0 %v889_v30, %s7955_s12 }
 0x151   : > { %900 = vrot.lane.b32.xlu1 %v889_v30, %s7956_s17  ;;  %894 = vrot.lane.b32.xlu0 %v889_v30, %s7957_s20 }
 0x155   : > { %906 = vrot.lane.b32.xlu1 %v889_v30, %s7958_s8  ;;  %903 = vrot.lane.b32.xlu0 %v889_v30, %s7959_s29 }
 0x159   : > { %909 = vrot.lane.b32.xlu0 %v889_v30, %s7960_s30 }
 0x15d   : > { %608 = vrot.lane.b32.xlu0 %v8219_v11, %s7961_s13 }
 0x161   : > { %611 = vrot.lane.b32.xlu0 %v8219_v11, %s7962_s16 }
 0x165   : > { %614 = vrot.lane.b32.xlu0 %v8219_v11, %s7963_s18 }
 0x169   : > { %618 = vrot.lane.b32.xlu0 %v8221_v12, %s7961_s13 }
 0x16d   : > { %621 = vrot.lane.b32.xlu0 %v8221_v12, %s7962_s16 }
 0x171   : > { %624 = vrot.lane.b32.xlu0 %v8221_v12, %s7963_s18 }
 0x175   : > { %628 = vrot.lane.b32.xlu0 %v8223_v14, %s7961_s13 }
 0x179   : > { %631 = vrot.lane.b32.xlu0 %v8223_v14, %s7962_s16 }
 0x17d   : > { %634 = vrot.lane.b32.xlu0 %v8223_v14, %s7963_s18 }
 0x181   : > { %641 = vrot.lane.b32.xlu0 %v8225_v16, %s7962_s16 }
 0x185   : > { %644 = vrot.lane.b32.xlu0 %v8225_v16, %s7963_s18 }
 0x189   : > { %648 = vrot.lane.b32.xlu0 %v8227_v17, %s7961_s13 }
 0x18d   : > { %651 = vrot.lane.b32.xlu0 %v8227_v17, %s7962_s16 }
 0x191   : > { %658 = vrot.lane.b32.xlu0 %v8229_v19, %s7961_s13 }
 0x195   : > { %664 = vrot.lane.b32.xlu0 %v8229_v19, %s7963_s18 }
 0x199   : > { %671 = vrot.lane.b32.xlu0 %v8309_v13, %s7962_s16 }
 0x19d   : > { %678 = vrot.lane.b32.xlu0 %v8315_v15, %s7961_s13 }
 0x1a1   : > { %684 = vrot.lane.b32.xlu0 %v8315_v15, %s7963_s18 }
 0x1bf   : > { %v898_v35 = vpop.permute.xlu1 %897  ;;  %v892_v36 = vpop.permute.xlu0 %891 }
 0x1c0   : > { %v920_v50 = vcombine.low %v892_v36, %v898_v35 }
 0x1c2   : > { %v927_v55 = vrot.slane %v920_v50, %v8292_v49 }
 0x1c3   : > { %v901_v40 = vpop.permute.xlu1 %900  ;;  %v895_v41 = vpop.permute.xlu0 %894 }
 0x1c4   : > { %v912_v44 = vcombine.low %v889_v30, %v895_v41 }
 0x1c6   : > { %v919_v51 = vrot.slane %v912_v44, %v8292_v49 }
 0x1c7   : > { %v907_v47 = vpop.permute.xlu1 %906  ;;  %v904_v48 = vpop.permute.xlu0 %903 }
 0x1c8   : > { %v928_v52 = vcombine.low %v901_v40, %v907_v47  ;;  %v944_v57 = vcombine.low %v919_v51, %v927_v55 }
 0x1ca   : > { %v935_v58 = vrot.slane %v928_v52, %v8292_v49  ;;  %v951_v62 = vrot.slane %v944_v57, %v8298_v60 }
 0x1cb   : > { %v910_v54 = vpop.permute.xlu0 %909 }
 0x1cc   : > { %v936_v56 = vcombine.low %v904_v48, %v910_v54 }
 0x1ce   : > { %v943_v59 = vrot.slane %v936_v56, %v8292_v49 }
 0x1cf   : > { %v609_v28 = vpop.permute.xlu0 %608 }
 0x1d0   : > { %v952_v61 = vcombine.low %v935_v58, %v943_v59 }
 0x1d2   : > { %v959_v63 = vrot.slane %v952_v61, %v8298_v60 }
 0x1d3   : > { %v612_v37 = vpop.permute.xlu0 %611 }
 0x1d4   : > { %v960_v0 = vcombine.low %v951_v62, %v959_v63  ;;  %v687_v21 = vcombine.low %v8219_v11, %v612_v37 }
 0x1d6   : > { %v962_v4 = vsel %vm961_vm3, %v960_v0, -inf }
 0x1d7   : > { %963 = vmax.xlane.f32.xlu1 %v962_v4  ;;  %v615_v38 = vpop.permute.xlu0 %614 }
 0x1d8   : > { %v695_v4 = vcombine.low %v609_v28, %v615_v38 }
 0x1da   : > { %v702_v37 = vrot.slane %v695_v4, %v8292_v49  ;;  %v8379_v4 = vld [vmem:[#allocation8 + $0x8] sm:$0xff] }
 0x1db   : > { %v619_v39 = vpop.permute.xlu0 %618 }
 0x1df   : > { %v622_v40 = vpop.permute.xlu0 %621 }
 0x1e3   : > { %v625_v41 = vpop.permute.xlu0 %624 }
 0x1e4   : > { %v711_v59 = vcombine.low %v619_v39, %v625_v41  ;;  %v694_v39 = vrot.slane %v687_v21, %v8292_v49 }
 0x1e7   : > { %v629_v42 = vpop.permute.xlu0 %628 }
 0x1e8   : > { %638 = vrot.lane.b32.xlu1 %v8225_v16, %s7961_s13 }
 0x1eb   : > { %v632_v43 = vpop.permute.xlu0 %631 }
 0x1ec   : > { %654 = vrot.lane.b32.xlu1 %v8227_v17, %s7963_s18  ;;  %v736_v61 = vcombine.low %v8223_v14, %v632_v43 }
 0x1ef   : > { %v635_v44 = vpop.permute.xlu0 %634 }
 0x1f0   : > { %661 = vrot.lane.b32.xlu1 %v8229_v19, %s7962_s16  ;;  %v744_v62 = vcombine.low %v629_v42, %v635_v44 }
 0x1f3   : > { %v642_v45 = vpop.permute.xlu0 %641 }
 0x1f4   : > { %668 = vrot.lane.b32.xlu1 %v8309_v13, %s7961_s13  ;;  %v752_v63 = vcombine.low %v8225_v16, %v642_v45 }
 0x1f7   : > { %v645_v46 = vpop.permute.xlu0 %644 }
 0x1f8   : > { %674 = vrot.lane.b32.xlu1 %v8309_v13, %s7963_s18 }
 0x1fb   : > { %v649_v47 = vpop.permute.xlu0 %648 }
 0x1fc   : > { %681 = vrot.lane.b32.xlu1 %v8315_v15, %s7962_s16 }
 0x1ff   : > { %v652_v48 = vpop.permute.xlu0 %651 }
 0x200   : > { %v785_v43 = vcombine.low %v8227_v17, %v652_v48 }
 0x203   : > { %v659_v51 = vpop.permute.xlu0 %658 }
 0x207   : > { %v665_v53 = vpop.permute.xlu0 %664 }
 0x208   : > { %v809_v38 = vcombine.low %v659_v51, %v665_v53 }
 0x20a   : > { %v816_v51 = vrot.slane %v809_v38, %v8292_v49 }
 0x20b   : > { %v672_v56 = vpop.permute.xlu0 %671 }
 0x20c   : > { %v834_v28 = vcombine.low %v8309_v13, %v672_v56 }
 0x20f   : > { %v679_v58 = vpop.permute.xlu0 %678 }
 0x213   : > { %v685_v20 = vpop.permute.xlu0 %684 }
 0x214   : > { %v858_v11 = vcombine.low %v679_v58, %v685_v20 }
 0x260   : > { %v964_v24 = vpop.xlane.xlu1 %963 }
 0x261   : > { %v971_v25 = vrot.slane %v964_v24, %v8325_v22 }
 0x263   : > { %7414 = vmatmul.mubr.msk.f32.vlgmr.msra.gmra.mxu1 %vm972_vm4, %v971_v25  ;;  %v718_v25 = vrot.slane %v711_v59, %v8292_v49 }
 0x264   : > { %7417 = vmatpush3.msra.mxu1 %v8282_v34  ;;  %7418 = vmatprep.mubr.msk.f32.mxu1 %vm7953_vm2, %v7952_v9  ;;  %v639_v50 = vpop.permute.xlu1 %638 }
 0x265   : > { %1306 = vmatprep.subr.bf16.mxu1 %v8192_v7  ;;  %v760_v0 = vcombine.low %v639_v50, %v645_v46  ;;  %v865_v46 = vrot.slane %v858_v11, %v8292_v49  ;;  %v719_v50 = vcombine.low %v694_v39, %v702_v37 }
 0x267   : > { %v767_v14 = vrot.slane %v760_v0, %v8292_v49  ;;  %v8377_v0 = vld [vmem:[#allocation8] sm:$0xff] }
 0x268   : > { %v655_v52 = vpop.permute.xlu1 %654 }
 0x269   : > { %v793_v41 = vcombine.low %v649_v47, %v655_v52  ;;  %v792_v47 = vrot.slane %v785_v43, %v8292_v49 }
 0x26b   : > { %v800_v53 = vrot.slane %v793_v41, %v8292_v49 }
 0x26c   : > { %v662_v54 = vpop.permute.xlu1 %661 }
 0x26d   : > { %v801_v16 = vcombine.low %v8229_v19, %v662_v54  ;;  %v841_v19 = vrot.slane %v834_v28, %v8292_v49  ;;  %v817_v58 = vcombine.low %v792_v47, %v800_v53 }
 0x26f   : > { %v808_v45 = vrot.slane %v801_v16, %v8292_v49 }
 0x270   : > { %v669_v55 = vpop.permute.xlu1 %668 }
 0x271   : > { %v825_v52 = vcombine.low %v808_v45, %v816_v51 }
 0x274   : > { %v675_v57 = vpop.permute.xlu1 %674 }
 0x278   : > { %v682_v18 = vpop.permute.xlu1 %681 }
 0x323   : > { %v1041_v30 = vpop.f32.mrf.mxu1 }
 0x324   : > { %v1042_v31 = vadd.f32 %v1041_v30, %v8336_v27  ;;  %v743_v30 = vrot.slane %v736_v61, %v8292_v49  ;;  %v832_v61 = vrot.slane %v825_v52, %v8298_v60 }
 0x325   : > { %v7415_v35 = vpop.f32.mrf.mxu1 }
 0x326   : > { %v1048_v36 = vrot.slane %v1042_v31, %v8338_v29  ;;  %1240 = vst.msk [vmem:[%s8173_s6] sm:$0x1] %vm1239_vm5, %v1042_v31  ;;  %v759_v31 = vrot.slane %v752_v63, %v8292_v49  ;;  %v842_v35 = vcombine.low %v669_v55, %v675_v57  ;;  %v726_v57 = vrot.slane %v719_v50, %v8298_v60 }
 0x328   : > { %1054 = vbcast.lane.b32.xlu0 %v1048_v36, 264  ;;  %1050 = vbcast.lane.b32.xlu1 %v1048_v36, 256  ;;  %v776_v44 = vcombine.low %v759_v31, %v767_v14  ;;  %v849_v13 = vrot.slane %v842_v35, %v8292_v49  ;;  %v8384_v31 = vld [vmem:[#allocation8 + $0x10] sm:$0xff]  ;;  %v8386_v14 = vld [vmem:[#allocation8 + $0x18] sm:$0xff] }
 0x32a   : > { %v866_v48 = vcombine.low %v841_v19, %v849_v13  ;;  %v783_v56 = vrot.slane %v776_v44, %v8298_v60 }
 0x32c   : > { %1062 = vbcast.lane.b32.xlu0 %v1048_v36, 280  ;;  %1058 = vbcast.lane.b32.xlu1 %v1048_v36, 272  ;;  %v850_v36 = vcombine.low %v8315_v15, %v682_v18  ;;  %v824_v18 = vrot.slane %v817_v58, %v8298_v60 }
 0x32e   : > { %v857_v15 = vrot.slane %v850_v36, %v8292_v49 }
 0x330   : > { %1083 = vrot.lane.b32.xlu1 %v8237_v26, %s7961_s13  ;;  %v703_v26 = vcombine.low %v8221_v12, %v622_v40  ;;  %v751_v12 = vrot.slane %v744_v62, %v8292_v49  ;;  %v874_v54 = vcombine.low %v857_v15, %v865_v46  ;;  %v873_v62 = vrot.slane %v866_v48, %v8298_v60  ;;  %v7675_v48 = vld [vmem:[%s8158_s15] ss:$0 sps:$4 sm:$0x11]  }
 0x332   : > { %v710_v24 = vrot.slane %v703_v26, %v8292_v49  ;;  %v768_v42 = vcombine.low %v743_v30, %v751_v12  ;;  %v881_v63 = vrot.slane %v874_v54, %v8298_v60  ;;  %v8401_v54 = vshrl.u32 %v7675_v48, 16 }
 0x334   : > { %v727_v40 = vcombine.low %v710_v24, %v718_v25  ;;  %v775_v55 = vrot.slane %v768_v42, %v8298_v60  ;;  %v833_v24 = vcombine.low %v824_v18, %v832_v61  ;;  %v882_v25 = vcombine.low %v873_v62, %v881_v63  ;;  %7297 = vmatmul.mubr.msk.bf16.vlgmr.msra.gmra.mxu0 %vm399_vm1, %v8401_v54 }
 0x335   : > { %1348 = vmatpush1.bf16.msra.mxu0 %v8189_v6  ;;  %1365 = vmatprep.mubr.bf16.mxu0 %v7951_v3 }
 0x336   : > { %v734_v17 = vrot.slane %v727_v40, %v8298_v60  ;;  %v784_v59 = vcombine.low %v775_v55, %v783_v56  ;;  %v885_v11 = vadd.f32 %v833_v24, %v8384_v31  ;;  %v886_v37 = vadd.f32 %v882_v25, %v8386_v14  ;;  %7421 = vmatprep.subr.bf16.mxu0 %v7952_v9 }
 0x338   : > { %v735_v26 = vcombine.low %v726_v57, %v734_v17  ;;  %v884_v21 = vadd.f32 %v784_v59, %v8379_v4 }
 0x33a   : > { %v883_v20 = vadd.f32 %v735_v26, %v8377_v0 }
 0x33c   : > { %7299 = vmatmul.mubr.msk.bf16.vlgmr.msra.gmra.mxu0 %vm399_vm1, %v8401_v54 }
 0x33d   : > { %7422 = vmatpush3.bf16.msra.mxu0 %v8203_v10  ;;  %7423 = vmatprep.mubr.msk.bf16.mxu0 %vm7953_vm2, %v7952_v9 }
 0x33e   : > { %2105 = vmatprep.subr.bf16.mxu0 %v8176_v1 }
 0x344   : > { %7424 = vmatmul.mubr.msk.bf16.vlgmr.msra.gmra.mxu0 %vm399_vm1, %v8401_v54 }
 0x345   : > { %2106 = vmatpush1.bf16.msra.mxu0 %v8178_v2  ;;  %2123 = vmatprep.mubr.bf16.mxu0 %v7951_v3 }
 0x346   : > { %2187 = vmatprep.subr.bf16.mxu0 %v8186_v5 }
 0x39a   : > { %v1051_v30 = vpop.permute.xlu1 %1050  ;;  %v1055_v12 = vpop.permute.xlu0 %1054 }
 0x39b   : > { %v1064_v16 = vmul.f32 %v1051_v30, %v883_v20  ;;  %v1065_v28 = vmul.f32 %v1055_v12, %v884_v21 }
 0x39d   : > { %v1069_v35 = vsel %vm1068_vm6, %v1064_v16, 0.0  ;;  %v1070_v36 = vsel %vm1068_vm6, %v1065_v28, 0.0 }
 0x39e   : > { %v1059_v38 = vpop.permute.xlu1 %1058  ;;  %v1063_v39 = vpop.permute.xlu0 %1062  ;;  %v1071_v42 = vadd.f32 %v1070_v36, %v1069_v35 }
 0x39f   : > { %v1066_v40 = vmul.f32 %v1059_v38, %v885_v11  ;;  %v1067_v41 = vmul.f32 %v1063_v39, %v886_v37 }
 0x3a1   : > { %v1072_v43 = vsel %vm1068_vm6, %v1066_v40, 0.0  ;;  %v1074_v45 = vsel %vm1068_vm6, %v1067_v41, 0.0 }
 0x3a2   : > { %v1073_v44 = vadd.f32 %v1072_v43, %v1071_v42  ;;  %v1084_v47 = vpop.permute.xlu1 %1083 }
 0x3a4   : > { %v1075_v19 = vadd.f32 %v1074_v45, %v1073_v44 }
 0x3a6   : > { %v1076_v13 = vrot.slane %v1075_v19, 4 }
 0x3a8   : > { %v1077_v15 = vadd.f32 %v1076_v13, %v1075_v19 }
 0x3aa   : > { %v1078_v46 = vrot.slane %v1077_v15, 2 }
 0x3ac   : > { %v1079_v50 = vadd.f32 %v1078_v46, %v1077_v15 }
 0x3ae   : > { %v1080_v51 = vrot.slane %v1079_v50, 1 }
 0x3b0   : > { %v1081_v53 = vadd.f32 %v1080_v51, %v1079_v50 }
 0x3b2   : > { %v1086_v52 = vadd.f32 %v1084_v47, %v1081_v53 }
 0x3b4   : > { %v1087_v17 = vmax.f32 %v1086_v52, 0.0 }
 0x3b6   : > { %1092 = vrot.lane.b32.xlu1 %v1087_v17, %s7957_s20  ;;  %1089 = vrot.lane.b32.xlu0 %v1087_v17, %s7955_s12 }
 0x3ba   : > { %1098 = vrot.lane.b32.xlu1 %v1087_v17, %s7956_s17  ;;  %1095 = vrot.lane.b32.xlu0 %v1087_v17, %s7954_s11 }
 0x3be   : > { %1104 = vrot.lane.b32.xlu1 %v1087_v17, %s7958_s8  ;;  %1101 = vrot.lane.b32.xlu0 %v1087_v17, %s7959_s29 }
 0x3c2   : > { %1107 = vrot.lane.b32.xlu0 %v1087_v17, %s7960_s30 }
 0x3f4   : > { %v8427_v16 = vpop.f32.mrf.mxu0 }
 0x3f6   : > { %v8431_v28 = vpop.f32.mrf.mxu0 }
 0x3f8   : > { %v1289_v35 = vpop.f32.mrf.mxu0 }
 0x3fa   : > { %v1290_v36 = vpop.f32.mrf.mxu0 }
 0x3fc   : > { %v8435_v11 = vpop.f32.mrf.mxu0 }
 0x3fe   : > { %v8439_v37 = vpop.f32.mrf.mxu0 }
 0x400   : > { %v1371_v38 = vpop.f32.mrf.mxu0 }
 0x402   : > { %v1372_v39 = vpop.f32.mrf.mxu0 }
 0x404   : > { %v1449_v40 = vpop.f32.mrf.mxu0 }
 0x406   : > { %v7425_v41 = vpop.f32.mrf.mxu0 }
 0x408   : > { %v1452_v42 = vpop.f32.mrf.mxu0 }
 0x40a   : > { %v7426_v43 = vpop.f32.mrf.mxu0 }
 0x428   : > { %v1093_v6 = vpop.permute.xlu1 %1092  ;;  %v1090_v55 = vpop.permute.xlu0 %1089 }
 0x429   : > { %v1110_v59 = vcombine.low %v1087_v17, %v1093_v6 }
 0x42b   : > { %v1117_v63 = vrot.slane %v1110_v59, %v8292_v49 }
 0x42c   : > { %v1099_v56 = vpop.permute.xlu1 %1098  ;;  %v1096_v57 = vpop.permute.xlu0 %1095 }
 0x42d   : > { %v1118_v58 = vcombine.low %v1090_v55, %v1096_v57 }
 0x42f   : > { %v1125_v61 = vrot.slane %v1118_v58, %v8292_v49 }
 0x430   : > { %v1105_v10 = vpop.permute.xlu1 %1104  ;;  %v1102_v26 = vpop.permute.xlu0 %1101 }
 0x431   : > { %v1126_v1 = vcombine.low %v1099_v56, %v1105_v10  ;;  %v1142_v2 = vcombine.low %v1117_v63, %v1125_v61 }
 0x433   : > { %v1133_v20 = vrot.slane %v1126_v1, %v8292_v49  ;;  %v1149_v24 = vrot.slane %v1142_v2, %v8298_v60 }
 0x434   : > { %v1108_v62 = vpop.permute.xlu0 %1107 }
 0x435   : > { %v1134_v18 = vcombine.low %v1102_v26, %v1108_v62 }
 0x437   : > { %v1141_v5 = vrot.slane %v1134_v18, %v8292_v49 }
 0x439   : > { %v1150_v21 = vcombine.low %v1133_v20, %v1141_v5 }
 0x43b   : > { %v1157_v25 = vrot.slane %v1150_v21, %v8298_v60 }
 0x43d   : > { %v1158_v30 = vcombine.low %v1149_v24, %v1157_v25 }
 0x43f   : > { %v1159_v12 = vsel %vm961_vm3, %v1158_v30, -inf }
 0x440   : > { %1160 = vmax.xlane.f32.xlu1 %v1159_v12 }
 0x451   : > { %1456 = vrot.lane.b32.xlu1 %v8427_v16, %s7961_s13 }
 0x455   : > { %1459 = vrot.lane.b32.xlu1 %v8427_v16, %s7962_s16 }
 0x459   : > { %1462 = vrot.lane.b32.xlu1 %v8427_v16, %s7963_s18 }
 0x45d   : > { %1466 = vrot.lane.b32.xlu1 %v8431_v28, %s7961_s13 }
 0x461   : > { %1472 = vrot.lane.b32.xlu1 %v8431_v28, %s7963_s18 }
 0x4c9   : > { %v1161_v44 = vpop.xlane.xlu1 %1160 }
 0x4ca   : > { %v1166_v45 = vrot.slane %v1161_v44, %v8325_v22 }
 0x4cc   : > { %7419 = vmatmul.mubr.msk.f32.vlgmr.msra.gmra.mxu1 %vm972_vm4, %v1166_v45 }
 0x4cd   : > { %1307 = vmatpush1.bf16.msra.mxu1 %v8194_v8  ;;  %1324 = vmatprep.mubr.bf16.mxu1 %v7951_v3  ;;  %v8462_v8 = vadd.f32 %v1449_v40, %v8234_v23  ;;  %v1457_v40 = vpop.permute.xlu1 %1456 }
 0x4ce   : > { %1388 = vmatprep.subr.bf16.mxu1 %v8246_v32 }
 0x4d0   : > { %7298 = vmatmul.mubr.msk.bf16.vlgmr.msra.gmra.mxu1 %vm399_vm1, %v8401_v54 }
 0x4d1   : > { %1389 = vmatpush1.bf16.msra.mxu1 %v8249_v33  ;;  %1406 = vmatprep.mubr.bf16.mxu1 %v7951_v3  ;;  %v1460_v41 = vpop.permute.xlu1 %1459 }
 0x4d2   : > { %7427 = vmatprep.subr.mxu1 %v7952_v9 }
 0x4d5   : > { %v1463_v42 = vpop.permute.xlu1 %1462 }
 0x4d8   : > { %7300 = vmatmul.mubr.msk.bf16.vlgmr.msra.gmra.mxu1 %vm399_vm1, %v8401_v54 }
 0x4d9   : > { %7428 = vmatpush3.msra.mxu1 %v8282_v34  ;;  %7429 = vmatprep.mubr.msk.f32.mxu1 %vm7953_vm2, %v7952_v9  ;;  %v1467_v43 = vpop.permute.xlu1 %1466 }
 0x4da   : > { %7432 = vmatprep.subr.mxu1 %v7952_v9 }
 0x58c   : > { %v1235_v32 = vpop.f32.mrf.mxu1 }
 0x58d   : > { %v1236_v33 = vadd.f32 %v1235_v32, %v8336_v27 }
 0x58e   : > { %v7420_v19 = vpop.f32.mrf.mxu1 }
 0x58f   : > { %v1736_v13 = vadd.f32 %v8462_v8, %v1236_v33 }
 0x590   : > { %v8466_v15 = vpop.f32.mrf.mxu1 }
 0x591   : > { %v1737_v46 = vmax.f32 %v1736_v13, 0.0  ;;  %1476 = vrot.lane.b32.xlu1 %v8466_v15, %s7961_s13 }
 0x592   : > { %v8470_v50 = vpop.f32.mrf.mxu1 }
 0x593   : > { %1739 = vrot.lane.b32.xlu0 %v1737_v46, %s7955_s12 }
 0x594   : > { %v1330_v51 = vpop.f32.mrf.mxu1 }
 0x595   : > { %1479 = vrot.lane.b32.xlu1 %v8466_v15, %s7962_s16 }
 0x596   : > { %v1331_v23 = vpop.f32.mrf.mxu1 }
 0x597   : > { %1742 = vrot.lane.b32.xlu0 %v1737_v46, %s7957_s20 }
 0x598   : > { %v8508_v5 = vpop.f32.mrf.mxu1 }
 0x599   : > { %1482 = vrot.lane.b32.xlu1 %v8466_v15, %s7963_s18 }
 0x59a   : > { %v8512_v21 = vpop.f32.mrf.mxu1 }
 0x59b   : > { %1745 = vrot.lane.b32.xlu0 %v1737_v46, %s7954_s11 }
 0x59c   : > { %v1412_v24 = vpop.f32.mrf.mxu1 }
 0x59d   : > { %1486 = vrot.lane.b32.xlu1 %v8470_v50, %s7961_s13 }
 0x59e   : > { %v1413_v25 = vpop.f32.mrf.mxu1 }
 0x59f   : > { %1748 = vrot.lane.b32.xlu0 %v1737_v46, %s7956_s17 }
 0x5a1   : > { %1492 = vrot.lane.b32.xlu1 %v8470_v50, %s7963_s18 }
 0x5a3   : > { %1751 = vrot.lane.b32.xlu0 %v1737_v46, %s7959_s29 }
 0x5a5   : > { %1499 = vrot.lane.b32.xlu1 %v8435_v11, %s7962_s16 }
 0x5a7   : > { %1754 = vrot.lane.b32.xlu0 %v1737_v46, %s7958_s8 }
 0x5a9   : > { %1506 = vrot.lane.b32.xlu1 %v8439_v37, %s7961_s13 }
 0x5ab   : > { %1757 = vrot.lane.b32.xlu0 %v1737_v46, %s7960_s30 }
 0x5ad   : > { %1512 = vrot.lane.b32.xlu1 %v8439_v37, %s7963_s18 }
 0x5b1   : > { %1519 = vrot.lane.b32.xlu1 %v8508_v5, %s7962_s16 }
 0x5b5   : > { %1526 = vrot.lane.b32.xlu1 %v8512_v21, %s7961_s13 }
 0x5b9   : > { %1532 = vrot.lane.b32.xlu1 %v8512_v21, %s7963_s18 }
 0x605   : > { %v1740_v53 = vpop.permute.xlu0 %1739 }
 0x609   : > { %v1743_v47 = vpop.permute.xlu0 %1742 }
 0x60a   : > { %v1760_v55 = vcombine.low %v1737_v46, %v1743_v47 }
 0x60c   : > { %v1767_v10 = vrot.slane %v1760_v55, %v8292_v49 }
 0x60d   : > { %v1746_v52 = vpop.permute.xlu0 %1745 }
 0x60e   : > { %v1768_v54 = vcombine.low %v1740_v53, %v1746_v52 }
 0x610   : > { %v1775_v56 = vrot.slane %v1768_v54, %v8292_v49 }
 0x611   : > { %v1749_v17 = vpop.permute.xlu0 %1748 }
 0x612   : > { %v1792_v59 = vcombine.low %v1767_v10, %v1775_v56 }
 0x614   : > { %v1799_v63 = vrot.slane %v1792_v59, %v8298_v60  ;;  %v1543_v59 = vcombine.low %v1457_v40, %v1463_v42 }
 0x615   : > { %v1752_v48 = vpop.permute.xlu0 %1751 }
 0x619   : > { %v1755_v6 = vpop.permute.xlu0 %1754 }
 0x61a   : > { %v1776_v57 = vcombine.low %v1749_v17, %v1755_v6 }
 0x61c   : > { %v1783_v61 = vrot.slane %v1776_v57, %v8292_v49 }
 0x61d   : > { %v1758_v58 = vpop.permute.xlu0 %1757 }
 0x61e   : > { %v1784_v26 = vcombine.low %v1752_v48, %v1758_v58 }
 0x620   : > { %v1791_v1 = vrot.slane %v1784_v26, %v8292_v49  ;;  %v1535_v26 = vcombine.low %v8427_v16, %v1460_v41 }
 0x622   : > { %v1800_v62 = vcombine.low %v1783_v61, %v1791_v1 }
 0x624   : > { %v1807_v18 = vrot.slane %v1800_v62, %v8298_v60 }
 0x626   : > { %v1808_v2 = vcombine.low %v1799_v63, %v1807_v18 }
 0x628   : > { %v1809_v20 = vsel %vm961_vm3, %v1808_v2, -inf }
 0x629   : > { %1810 = vmax.xlane.f32.xlu0 %v1809_v20 }
 0x63f   : > { %1469 = vrot.lane.b32.xlu0 %v8431_v28, %s7962_s16 }
 0x643   : > { %1489 = vrot.lane.b32.xlu0 %v8470_v50, %s7962_s16 }
 0x647   : > { %1496 = vrot.lane.b32.xlu0 %v8435_v11, %s7961_s13 }
 0x64b   : > { %1502 = vrot.lane.b32.xlu0 %v8435_v11, %s7963_s18 }
 0x64f   : > { %1509 = vrot.lane.b32.xlu0 %v8439_v37, %s7962_s16 }
 0x653   : > { %1516 = vrot.lane.b32.xlu0 %v8508_v5, %s7961_s13 }
 0x657   : > { %1522 = vrot.lane.b32.xlu0 %v8508_v5, %s7963_s18 }
 0x65b   : > { %1529 = vrot.lane.b32.xlu0 %v8512_v21, %s7962_s16 }
 0x6b2   : > { %v1811_v30 = vpop.xlane.xlu0 %1810 }
 0x6b3   : > { %v1816_v12 = vrot.slane %v1811_v30, %v8325_v22  ;;  %v1542_v30 = vrot.slane %v1535_v26, %v8292_v49 }
 0x6b5   : > { %7430 = vmatmul.mubr.msk.f32.vlgmr.msra.gmra.mxu1 %vm972_vm4, %v1816_v12  ;;  %v1550_v12 = vrot.slane %v1543_v59, %v8292_v49 }
 0x6b6   : > { %7433 = vmatpush3.msra.mxu1 %v8282_v34  ;;  %7434 = vmatprep.mubr.msk.f32.mxu1 %vm7953_vm2, %v7952_v9  ;;  %v1470_v19 = vpop.permute.xlu0 %1469 }
 0x6b7   : > { %2146 = vmatprep.subr.bf16.mxu1 %v8192_v7  ;;  %v1473_v7 = vpop.permute.xlu1 %1472  ;;  %v1551_v58 = vcombine.low %v8431_v28, %v1470_v19 }
 0x6b8   : > { %v1559_v61 = vcombine.low %v1467_v43, %v1473_v7 }
 0x6ba   : > { %v1490_v46 = vpop.permute.xlu0 %1489 }
 0x6bb   : > { %v1477_v44 = vpop.permute.xlu1 %1476  ;;  %v1600_v10 = vcombine.low %v8470_v50, %v1490_v46 }
 0x6bd   : > { %v1607_v20 = vrot.slane %v1600_v10, %v8292_v49 }
 0x6be   : > { %v1497_v23 = vpop.permute.xlu0 %1496 }
 0x6bf   : > { %v1480_v45 = vpop.permute.xlu1 %1479 }
 0x6c0   : > { %v1584_v55 = vcombine.low %v8466_v15, %v1480_v45  ;;  %v1558_v15 = vrot.slane %v1551_v58, %v8292_v49 }
 0x6c2   : > { %v1503_v47 = vpop.permute.xlu0 %1502  ;;  %v1591_v63 = vrot.slane %v1584_v55, %v8292_v49 }
 0x6c3   : > { %v1483_v32 = vpop.permute.xlu1 %1482 }
 0x6c4   : > { %v1592_v56 = vcombine.low %v1477_v44, %v1483_v32  ;;  %v1567_v44 = vcombine.low %v1542_v30, %v1550_v12 }
 0x6c6   : > { %v1510_v17 = vpop.permute.xlu0 %1509  ;;  %v1599_v18 = vrot.slane %v1592_v56, %v8292_v49 }
 0x6c7   : > { %v1487_v33 = vpop.permute.xlu1 %1486  ;;  %v1649_v28 = vcombine.low %v8439_v37, %v1510_v17 }
 0x6c9   : > { %v1656_v37 = vrot.slane %v1649_v28, %v8292_v49 }
 0x6cb   : > { %v1493_v13 = vpop.permute.xlu1 %1492 }
 0x6cc   : > { %v1608_v57 = vcombine.low %v1487_v33, %v1493_v13 }
 0x6ce   : > { %v1615_v2 = vrot.slane %v1608_v57, %v8292_v49 }
 0x6cf   : > { %v1500_v51 = vpop.permute.xlu1 %1499 }
 0x6d0   : > { %v1633_v40 = vcombine.low %v8435_v11, %v1500_v51  ;;  %v1624_v42 = vcombine.low %v1607_v20, %v1615_v2 }
 0x6d2   : > { %v1640_v33 = vrot.slane %v1633_v40, %v8292_v49  ;;  %v7676_v40 = vld [vmem:[%s8158_s15] ss:$0 sps:$4 sm:$0x22]  }
 0x6d3   : > { %v1507_v53 = vpop.permute.xlu1 %1506 }
 0x6d7   : > { %v1513_v52 = vpop.permute.xlu1 %1512 }
 0x6db   : > { %v1520_v48 = vpop.permute.xlu1 %1519 }
 0x6dc   : > { %v1682_v50 = vcombine.low %v8508_v5, %v1520_v48 }
 0x6de   : > { %v1689_v5 = vrot.slane %v1682_v50, %v8292_v49 }
 0x6df   : > { %v1527_v54 = vpop.permute.xlu1 %1526 }
 0x6e3   : > { %v1533_v1 = vpop.permute.xlu1 %1532 }
 0x6e4   : > { %v1706_v16 = vcombine.low %v1527_v54, %v1533_v1 }
 0x775   : > { %v1885_v35 = vpop.f32.mrf.mxu1 }
 0x776   : > { %v1886_v36 = vadd.f32 %v1885_v35, %v8336_v27  ;;  %v1566_v35 = vrot.slane %v1559_v61, %v8292_v49 }
 0x777   : > { %v7431_v38 = vpop.f32.mrf.mxu1 }
 0x778   : > { %v1892_v39 = vrot.slane %v1886_v36, %v8338_v29  ;;  %2082 = vst.msk [vmem:[%s8173_s6 + $0x1] sm:$0x1] %vm1239_vm5, %v1886_v36  ;;  %v1657_v36 = vcombine.low %v1507_v53, %v1513_v52  ;;  %v1616_v38 = vcombine.low %v1591_v63, %v1599_v18  ;;  %v1575_v41 = vcombine.low %v1558_v15, %v1566_v35 }
 0x779   : > { %v1574_v53 = vrot.slane %v1567_v44, %v8298_v60 }
 0x77a   : > { %1898 = vbcast.lane.b32.xlu1 %v1892_v39, 264  ;;  %1894 = vbcast.lane.b32.xlu0 %v1892_v39, 256  ;;  %v1664_v45 = vrot.slane %v1657_v36, %v8292_v49  ;;  %v1582_v19 = vrot.slane %v1575_v41, %v8298_v60  ;;  %v1623_v51 = vrot.slane %v1616_v38, %v8298_v60  ;;  %v8581_v41 = vrot.slane %v7676_v40, 1 }
 0x77c   : > { %v1673_v11 = vcombine.low %v1656_v37, %v1664_v45  ;;  %v1583_v52 = vcombine.low %v1574_v53, %v1582_v19  ;;  %7305 = vmatmul.mubr.msk.bf16.vlgmr.msra.gmra.mxu0 %vm399_vm1, %v8581_v41  ;;  %v8597_v37 = vld [vmem:[#allocation6 + $0x20] ss:$36 sps:$4 sm:$0xff]  }
 0x77d   : > { %2205 = vmatprep.mubr.bf16.mxu0 %v7951_v3 }
 0x77e   : > { %1906 = vbcast.lane.b32.xlu1 %v1892_v39, 280  ;;  %1902 = vbcast.lane.b32.xlu0 %v1892_v39, 272  ;;  %v1641_v39 = vcombine.low %v1497_v23, %v1503_v47  ;;  %v1631_v23 = vrot.slane %v1624_v42, %v8298_v60  ;;  %v1680_v54 = vrot.slane %v1673_v11, %v8298_v60  ;;  %v8587_v42 = vld [vmem:[#allocation6 + $0x10] ss:$36 sps:$4 sm:$0xff]  }
 0x77f   : > { %v1731_v56 = vadd.f32 %v1583_v52, %v8377_v0  ;;  %2188 = vmatpush1.bf16.msra.mxu0 %v8587_v42 }
 0x780   : > { %v1648_v32 = vrot.slane %v1641_v39, %v8292_v49  ;;  %v1632_v17 = vcombine.low %v1623_v51, %v1631_v23  ;;  %7437 = vmatprep.subr.bf16.mxu0 %v7952_v9 }
 0x782   : > { %1926 = vrot.lane.b32.xlu0 %v8462_v8, %s7961_s13  ;;  %v1517_v8 = vpop.permute.xlu0 %1516  ;;  %v1665_v47 = vcombine.low %v1640_v33, %v1648_v32  ;;  %v1732_v55 = vadd.f32 %v1632_v17, %v8379_v4 }
 0x784   : > { %7307 = vmatmul.mubr.msk.bf16.vlgmr.msra.gmra.mxu0 %vm399_vm1, %v8581_v41 }
 0x785   : > { %7438 = vmatpush3.bf16.msra.mxu0 %v8597_v37  ;;  %7439 = vmatprep.mubr.msk.bf16.mxu0 %vm7953_vm2, %v7952_v9 }
 0x786   : > { %v1523_v6 = vpop.permute.xlu0 %1522 }
 0x787   : > { %v1690_v24 = vcombine.low %v1517_v8, %v1523_v6  ;;  %v1672_v6 = vrot.slane %v1665_v47, %v8298_v60 }
 0x789   : > { %v1697_v43 = vrot.slane %v1690_v24, %v8292_v49  ;;  %v1681_v58 = vcombine.low %v1672_v6, %v1680_v54 }
 0x78a   : > { %v1530_v62 = vpop.permute.xlu0 %1529 }
 0x78b   : > { %v1698_v25 = vcombine.low %v8512_v21, %v1530_v62  ;;  %v1713_v21 = vrot.slane %v1706_v16, %v8292_v49  ;;  %v1714_v13 = vcombine.low %v1689_v5, %v1697_v43  ;;  %v1733_v18 = vadd.f32 %v1681_v58, %v8384_v31  ;;  %v8602_v5 = vld [vmem:[#allocation6 + $0x4] ss:$36 sps:$4 sm:$0xff]  }
 0x78c   : > { %2948 = vmatprep.subr.bf16.mxu0 %v8602_v5  ;;  %7440 = vmatmul.mubr.msk.bf16.vlgmr.msra.gmra.mxu0 %vm399_vm1, %v8581_v41  ;;  %v8607_v43 = vld [vmem:[#allocation6] ss:$36 sps:$4 sm:$0xff]  }
 0x78d   : > { %v1705_v7 = vrot.slane %v1698_v25, %v8292_v49  ;;  %v1721_v48 = vrot.slane %v1714_v13, %v8298_v60  ;;  %2949 = vmatpush1.bf16.msra.mxu0 %v8607_v43  ;;  %2966 = vmatprep.mubr.bf16.mxu0 %v7951_v3 }
 0x78f   : > { %v1722_v46 = vcombine.low %v1705_v7, %v1713_v21  ;;  %v8611_v21 = vld [vmem:[#allocation6 + $0x14] ss:$36 sps:$4 sm:$0xff]  }
 0x790   : > { %3030 = vmatprep.subr.bf16.mxu0 %v8611_v21 }
 0x791   : > { %v1729_v8 = vrot.slane %v1722_v46, %v8298_v60 }
 0x793   : > { %v1730_v57 = vcombine.low %v1721_v48, %v1729_v8 }
 0x795   : > { %v1734_v63 = vadd.f32 %v1730_v57, %v8386_v14 }
 0x7ec   : > { %v1899_v10 = vpop.permute.xlu1 %1898  ;;  %v1895_v26 = vpop.permute.xlu0 %1894 }
 0x7ed   : > { %v1909_v59 = vmul.f32 %v1899_v10, %v1732_v55  ;;  %v1908_v61 = vmul.f32 %v1895_v26, %v1731_v56 }
 0x7ef   : > { %v1913_v1 = vsel %vm1068_vm6, %v1909_v59, 0.0  ;;  %v1912_v62 = vsel %vm1068_vm6, %v1908_v61, 0.0 }
 0x7f0   : > { %v1907_v2 = vpop.permute.xlu1 %1906  ;;  %v1903_v15 = vpop.permute.xlu0 %1902  ;;  %v1914_v0 = vadd.f32 %v1913_v1, %v1912_v62 }
 0x7f1   : > { %v1911_v20 = vmul.f32 %v1907_v2, %v1734_v63  ;;  %v1910_v4 = vmul.f32 %v1903_v15, %v1733_v18 }
 0x7f3   : > { %v1915_v28 = vsel %vm1068_vm6, %v1910_v4, 0.0  ;;  %v1917_v24 = vsel %vm1068_vm6, %v1911_v20, 0.0 }
 0x7f4   : > { %v1916_v50 = vadd.f32 %v1915_v28, %v1914_v0  ;;  %v1927_v38 = vpop.permute.xlu0 %1926  ;;  %v8641_v0 = vld [vmem:[#allocation6 + $0x8] ss:$36 sps:$4 sm:$0xff]   ;;  %v8645_v28 = vld [vmem:[#allocation6 + $0x1c] ss:$36 sps:$4 sm:$0xff]  }
 0x7f6   : > { %v1918_v16 = vadd.f32 %v1917_v24, %v1916_v50  ;;  %v8650_v50 = vld [vmem:[#allocation6 + $0x18] ss:$36 sps:$4 sm:$0xff]   ;;  %v8664_v24 = vld [vmem:[%s9839_s2] sm:$0x1] }
 0x7f8   : > { %v1919_v25 = vrot.slane %v1918_v16, 4 }
 0x7fa   : > { %v1920_v30 = vadd.f32 %v1919_v25, %v1918_v16 }
 0x7fc   : > { %v1921_v12 = vrot.slane %v1920_v30, 2 }
 0x7fe   : > { %v1922_v35 = vadd.f32 %v1921_v12, %v1920_v30 }
 0x800   : > { %v1923_v36 = vrot.slane %v1922_v35, 1 }
 0x802   : > { %v1924_v14 = vadd.f32 %v1923_v36, %v1922_v35 }
 0x804   : > { %v1929_v31 = vadd.f32 %v1927_v38, %v1924_v14 }
 0x806   : > { %v1930_v39 = vmax.f32 %v1929_v31, 0.0 }
 0x808   : > { %1935 = vrot.lane.b32.xlu0 %v1930_v39, %s7957_s20  ;;  %1932 = vrot.lane.b32.xlu1 %v1930_v39, %s7955_s12 }
 0x80c   : > { %1941 = vrot.lane.b32.xlu0 %v1930_v39, %s7956_s17  ;;  %1938 = vrot.lane.b32.xlu1 %v1930_v39, %s7954_s11 }
 0x810   : > { %1947 = vrot.lane.b32.xlu0 %v1930_v39, %s7958_s8  ;;  %1944 = vrot.lane.b32.xlu1 %v1930_v39, %s7959_s29 }
 0x814   : > { %1950 = vrot.lane.b32.xlu1 %v1930_v39, %s7960_s30 }
 0x83c   : > { %v8621_v57 = vpop.f32.mrf.mxu0 }
 0x83e   : > { %v8625_v58 = vpop.f32.mrf.mxu0 }
 0x840   : > { %v2129_v10 = vpop.f32.mrf.mxu0 }
 0x842   : > { %v2130_v26 = vpop.f32.mrf.mxu0 }
 0x844   : > { %v8629_v59 = vpop.f32.mrf.mxu0 }
 0x846   : > { %v8633_v61 = vpop.f32.mrf.mxu0 }
 0x848   : > { %v2211_v1 = vpop.f32.mrf.mxu0 }
 0x849   : > { %v8733_v1 = vld [vmem:[#allocation9] sm:$0xff] }
 0x84a   : > { %v2212_v62 = vpop.f32.mrf.mxu0 }
 0x84b   : > { %v8738_v62 = vld [vmem:[#allocation6 + $0xc] ss:$36 sps:$4 sm:$0xff]  }
 0x84c   : > { %v2289_v63 = vpop.f32.mrf.mxu0 }
 0x84d   : > { %v8667_v16 = vadd.f32 %v8664_v24, %v2289_v63 }
 0x84e   : > { %v7441_v18 = vpop.f32.mrf.mxu0 }
 0x84f   : > { %v8744_v18 = vld [vmem:[%s9842_s5] sm:$0x1] }
 0x850   : > { %v2292_v2 = vpop.f32.mrf.mxu0 }
 0x852   : > { %v7442_v15 = vpop.f32.mrf.mxu0 }
 0x87a   : > { %v1936_v7 = vpop.permute.xlu0 %1935  ;;  %v1933_v44 = vpop.permute.xlu1 %1932 }
 0x87b   : > { %v1953_v13 = vcombine.low %v1930_v39, %v1936_v7 }
 0x87d   : > { %v1960_v53 = vrot.slane %v1953_v13, %v8292_v49 }
 0x87e   : > { %v1942_v45 = vpop.permute.xlu0 %1941  ;;  %v1939_v32 = vpop.permute.xlu1 %1938 }
 0x87f   : > { %v1961_v33 = vcombine.low %v1933_v44, %v1939_v32 }
 0x881   : > { %v1968_v46 = vrot.slane %v1961_v33, %v8292_v49 }
 0x882   : > { %v1948_v11 = vpop.permute.xlu0 %1947  ;;  %v1945_v19 = vpop.permute.xlu1 %1944 }
 0x883   : > { %v1969_v51 = vcombine.low %v1942_v45, %v1948_v11  ;;  %v1985_v52 = vcombine.low %v1960_v53, %v1968_v46 }
 0x885   : > { %v1976_v17 = vrot.slane %v1969_v51, %v8292_v49  ;;  %v1992_v54 = vrot.slane %v1985_v52, %v8298_v60 }
 0x886   : > { %v1951_v23 = vpop.permute.xlu1 %1950 }
 0x887   : > { %v1977_v47 = vcombine.low %v1945_v19, %v1951_v23 }
 0x889   : > { %v1984_v48 = vrot.slane %v1977_v47, %v8292_v49 }
 0x88b   : > { %v1993_v8 = vcombine.low %v1976_v17, %v1984_v48 }
 0x88d   : > { %v2000_v6 = vrot.slane %v1993_v8, %v8298_v60 }
 0x88f   : > { %v2001_v55 = vcombine.low %v1992_v54, %v2000_v6 }
 0x891   : > { %v2002_v56 = vsel %vm961_vm3, %v2001_v55, -inf }
 0x892   : > { %2003 = vmax.xlane.f32.xlu0 %v2002_v56 }
 0x8a8   : > { %2296 = vrot.lane.b32.xlu0 %v8621_v57, %s7961_s13 }
 0x8ac   : > { %2299 = vrot.lane.b32.xlu0 %v8621_v57, %s7962_s16 }
 0x8b0   : > { %2302 = vrot.lane.b32.xlu0 %v8621_v57, %s7963_s18 }
 0x8b4   : > { %2306 = vrot.lane.b32.xlu0 %v8625_v58, %s7961_s13 }
 0x8b8   : > { %2309 = vrot.lane.b32.xlu0 %v8625_v58, %s7962_s16 }
 0x91b   : > { %v2004_v20 = vpop.xlane.xlu0 %2003 }
 0x91c   : > { %v2009_v4 = vrot.slane %v2004_v20, %v8325_v22 }
 0x91e   : > { %7435 = vmatmul.mubr.msk.f32.vlgmr.msra.gmra.mxu1 %vm972_vm4, %v2009_v4 }
 0x91f   : > { %2147 = vmatpush1.bf16.msra.mxu1 %v8641_v0  ;;  %2164 = vmatprep.mubr.bf16.mxu1 %v7951_v3  ;;  %v2297_v4 = vpop.permute.xlu0 %2296 }
 0x920   : > { %2228 = vmatprep.subr.bf16.mxu1 %v8645_v28 }
 0x922   : > { %7306 = vmatmul.mubr.msk.bf16.vlgmr.msra.gmra.mxu1 %vm399_vm1, %v8581_v41 }
 0x923   : > { %2229 = vmatpush1.bf16.msra.mxu1 %v8650_v50  ;;  %2246 = vmatprep.mubr.bf16.mxu1 %v7951_v3 }
 0x924   : > { %7443 = vmatprep.subr.mxu1 %v7952_v9 }
 0x92a   : > { %7308 = vmatmul.mubr.msk.bf16.vlgmr.msra.gmra.mxu1 %vm399_vm1, %v8581_v41 }
 0x92b   : > { %7444 = vmatpush3.msra.mxu1 %v8282_v34  ;;  %7445 = vmatprep.mubr.msk.f32.mxu1 %vm7953_vm2, %v7952_v9 }
 0x92c   : > { %7448 = vmatprep.subr.mxu1 %v7952_v9 }
 0x9de   : > { %v2078_v25 = vpop.f32.mrf.mxu1 }
 0x9df   : > { %v2079_v30 = vadd.f32 %v2078_v25, %v8336_v27  ;;  %v2300_v25 = vpop.permute.xlu0 %2299 }
 0x9e0   : > { %v7436_v12 = vpop.f32.mrf.mxu1 }
 0x9e1   : > { %v2576_v35 = vadd.f32 %v8667_v16, %v2079_v30 }
 0x9e2   : > { %v8671_v34 = vpop.f32.mrf.mxu1 }
 0x9e3   : > { %v2577_v36 = vmax.f32 %v2576_v35, 0.0  ;;  %2316 = vrot.lane.b32.xlu0 %v8671_v34, %s7961_s13  ;;  %v2303_v30 = vpop.permute.xlu0 %2302 }
 0x9e4   : > { %v8675_v14 = vpop.f32.mrf.mxu1 }
 0x9e5   : > { %2579 = vrot.lane.b32.xlu1 %v2577_v36, %s7955_s12 }
 0x9e6   : > { %v2170_v38 = vpop.f32.mrf.mxu1 }
 0x9e7   : > { %2319 = vrot.lane.b32.xlu0 %v8671_v34, %s7962_s16  ;;  %v2307_v12 = vpop.permute.xlu0 %2306 }
 0x9e8   : > { %v2171_v31 = vpop.f32.mrf.mxu1 }
 0x9e9   : > { %2582 = vrot.lane.b32.xlu1 %v2577_v36, %s7957_s20 }
 0x9ea   : > { %v8715_v54 = vpop.f32.mrf.mxu1 }
 0x9eb   : > { %2322 = vrot.lane.b32.xlu0 %v8671_v34, %s7963_s18  ;;  %v2310_v35 = vpop.permute.xlu0 %2309 }
 0x9ec   : > { %v8719_v6 = vpop.f32.mrf.mxu1 }
 0x9ed   : > { %2585 = vrot.lane.b32.xlu1 %v2577_v36, %s7954_s11 }
 0x9ee   : > { %v2252_v55 = vpop.f32.mrf.mxu1 }
 0x9ef   : > { %2326 = vrot.lane.b32.xlu0 %v8675_v14, %s7961_s13 }
 0x9f0   : > { %v2253_v56 = vpop.f32.mrf.mxu1 }
 0x9f1   : > { %2588 = vrot.lane.b32.xlu1 %v2577_v36, %s7956_s17 }
 0x9f3   : > { %2332 = vrot.lane.b32.xlu0 %v8675_v14, %s7963_s18 }
 0x9f5   : > { %2591 = vrot.lane.b32.xlu1 %v2577_v36, %s7959_s29 }
 0x9f7   : > { %2339 = vrot.lane.b32.xlu0 %v8629_v59, %s7962_s16 }
 0x9f9   : > { %2594 = vrot.lane.b32.xlu1 %v2577_v36, %s7958_s8 }
 0x9fb   : > { %2346 = vrot.lane.b32.xlu0 %v8633_v61, %s7961_s13 }
 0x9fd   : > { %2597 = vrot.lane.b32.xlu1 %v2577_v36, %s7960_s30 }
 0x9ff   : > { %2352 = vrot.lane.b32.xlu0 %v8633_v61, %s7963_s18 }
 0xa03   : > { %2359 = vrot.lane.b32.xlu0 %v8715_v54, %s7962_s16 }
 0xa07   : > { %2366 = vrot.lane.b32.xlu0 %v8719_v6, %s7961_s13 }
 0xa0b   : > { %2372 = vrot.lane.b32.xlu0 %v8719_v6, %s7963_s18 }
 0xa57   : > { %v2580_v27 = vpop.permute.xlu1 %2579 }
 0xa5b   : > { %v2583_v39 = vpop.permute.xlu1 %2582 }
 0xa5c   : > { %v2600_v32 = vcombine.low %v2577_v36, %v2583_v39  ;;  %v2317_v36 = vpop.permute.xlu0 %2316 }
 0xa5e   : > { %v2607_v13 = vrot.slane %v2600_v32, %v8292_v49 }
 0xa5f   : > { %v2586_v40 = vpop.permute.xlu1 %2585 }
 0xa60   : > { %v2608_v44 = vcombine.low %v2580_v27, %v2586_v40  ;;  %v2320_v38 = vpop.permute.xlu0 %2319 }
 0xa62   : > { %v2615_v33 = vrot.slane %v2608_v44, %v8292_v49 }
 0xa63   : > { %v2589_v41 = vpop.permute.xlu1 %2588 }
 0xa64   : > { %v2632_v51 = vcombine.low %v2607_v13, %v2615_v33  ;;  %v2323_v31 = vpop.permute.xlu0 %2322 }
 0xa66   : > { %v2639_v52 = vrot.slane %v2632_v51, %v8298_v60  ;;  %v2424_v51 = vcombine.low %v8671_v34, %v2320_v38 }
 0xa67   : > { %v2592_v7 = vpop.permute.xlu1 %2591 }
 0xa68   : > { %v2327_v27 = vpop.permute.xlu0 %2326 }
 0xa6b   : > { %v2595_v45 = vpop.permute.xlu1 %2594 }
 0xa6c   : > { %v2616_v11 = vcombine.low %v2589_v41, %v2595_v45  ;;  %v2333_v40 = vpop.permute.xlu0 %2332 }
 0xa6e   : > { %v2623_v23 = vrot.slane %v2616_v11, %v8292_v49 }
 0xa6f   : > { %v2598_v19 = vpop.permute.xlu1 %2597 }
 0xa70   : > { %v2624_v46 = vcombine.low %v2592_v7, %v2598_v19  ;;  %v2340_v7 = vpop.permute.xlu0 %2339 }
 0xa71   : > { %v2473_v38 = vcombine.low %v8629_v59, %v2340_v7 }
 0xa72   : > { %v2631_v53 = vrot.slane %v2624_v46, %v8292_v49 }
 0xa74   : > { %v2640_v47 = vcombine.low %v2623_v23, %v2631_v53  ;;  %v2347_v45 = vpop.permute.xlu0 %2346  ;;  %v2432_v23 = vcombine.low %v2317_v36, %v2323_v31  ;;  %v2448_v53 = vcombine.low %v2327_v27, %v2333_v40 }
 0xa76   : > { %v2647_v17 = vrot.slane %v2640_v47, %v8298_v60 }
 0xa78   : > { %v2648_v48 = vcombine.low %v2639_v52, %v2647_v17  ;;  %v2353_v33 = vpop.permute.xlu0 %2352  ;;  %v2375_v17 = vcombine.low %v8621_v57, %v2300_v25 }
 0xa7a   : > { %v2649_v8 = vsel %vm961_vm3, %v2648_v48, -inf  ;;  %v2383_v48 = vcombine.low %v2297_v4, %v2303_v30  ;;  %v2382_v4 = vrot.slane %v2375_v17, %v8292_v49 }
 0xa7b   : > { %2650 = vmax.xlane.f32.xlu1 %v2649_v8  ;;  %v2391_v8 = vcombine.low %v8625_v58, %v2310_v35 }
 0xa7c   : > { %v2360_v19 = vpop.permute.xlu0 %2359  ;;  %v2390_v25 = vrot.slane %v2383_v48, %v8292_v49  ;;  %v8784_v48 = vld [vmem:[#allocation8 + $0x8] sm:$0xff] }
 0xa7d   : > { %v2398_v30 = vrot.slane %v2391_v8, %v8292_v49 }
 0xa8c   : > { %2312 = vrot.lane.b32.xlu1 %v8625_v58, %s7963_s18 }
 0xa90   : > { %2329 = vrot.lane.b32.xlu1 %v8675_v14, %s7962_s16 }
 0xa94   : > { %2336 = vrot.lane.b32.xlu1 %v8629_v59, %s7961_s13 }
 0xa98   : > { %2342 = vrot.lane.b32.xlu1 %v8629_v59, %s7963_s18 }
 0xa9c   : > { %2349 = vrot.lane.b32.xlu1 %v8633_v61, %s7962_s16 }
 0xaa0   : > { %2356 = vrot.lane.b32.xlu1 %v8715_v54, %s7961_s13 }
 0xaa4   : > { %2362 = vrot.lane.b32.xlu1 %v8715_v54, %s7963_s18 }
 0xaa8   : > { %2369 = vrot.lane.b32.xlu1 %v8719_v6, %s7962_s16 }
 0xb04   : > { %v2651_v10 = vpop.xlane.xlu1 %2650 }
 0xb05   : > { %v2656_v26 = vrot.slane %v2651_v10, %v8325_v22  ;;  %v2431_v10 = vrot.slane %v2424_v51, %v8292_v49 }
 0xb07   : > { %7446 = vmatmul.mubr.msk.f32.vlgmr.msra.gmra.mxu1 %vm972_vm4, %v2656_v26  ;;  %v2439_v26 = vrot.slane %v2432_v23, %v8292_v49 }
 0xb08   : > { %7449 = vmatpush3.msra.mxu1 %v8733_v1  ;;  %7450 = vmatprep.mubr.msk.f32.mxu1 %vm7953_vm2, %v7952_v9  ;;  %v2313_v39 = vpop.permute.xlu1 %2312 }
 0xb09   : > { %2989 = vmatprep.subr.bf16.mxu1 %v8738_v62  ;;  %v2399_v47 = vcombine.low %v2307_v12, %v2313_v39  ;;  %v2497_v12 = vcombine.low %v2347_v45, %v2353_v33  ;;  %v2456_v35 = vcombine.low %v2431_v10, %v2439_v26 }
 0xb0b   : > { %v2406_v34 = vrot.slane %v2399_v47, %v8292_v49 }
 0xb0c   : > { %v2330_v41 = vpop.permute.xlu1 %2329 }
 0xb0d   : > { %v2440_v52 = vcombine.low %v8675_v14, %v2330_v41  ;;  %v2522_v14 = vcombine.low %v8715_v54, %v2360_v19  ;;  %v2415_v31 = vcombine.low %v2398_v30, %v2406_v34  ;;  %v2407_v41 = vcombine.low %v2382_v4, %v2390_v25  ;;  %v8795_v4 = vld [vmem:[#allocation8 + $0x10] sm:$0xff] }
 0xb0e   : > { %v2463_v19 = vrot.slane %v2456_v35, %v8298_v60 }
 0xb0f   : > { %v2529_v54 = vrot.slane %v2522_v14, %v8292_v49  ;;  %v2422_v7 = vrot.slane %v2415_v31, %v8298_v60 }
 0xb10   : > { %v2337_v44 = vpop.permute.xlu1 %2336 }
 0xb14   : > { %v2343_v32 = vpop.permute.xlu1 %2342 }
 0xb15   : > { %v2481_v36 = vcombine.low %v2337_v44, %v2343_v32  ;;  %v2480_v44 = vrot.slane %v2473_v38, %v8292_v49 }
 0xb17   : > { %v2488_v45 = vrot.slane %v2481_v36, %v8292_v49 }
 0xb18   : > { %v2350_v11 = vpop.permute.xlu1 %2349 }
 0xb1c   : > { %v2357_v13 = vpop.permute.xlu1 %2356 }
 0xb20   : > { %v2363_v46 = vpop.permute.xlu1 %2362 }
 0xb21   : > { %v2530_v57 = vcombine.low %v2357_v13, %v2363_v46  ;;  %v2505_v46 = vcombine.low %v2480_v44, %v2488_v45 }
 0xb23   : > { %v2537_v39 = vrot.slane %v2530_v57, %v8292_v49  ;;  %v2512_v17 = vrot.slane %v2505_v46, %v8298_v60 }
 0xb24   : > { %v2370_v56 = vpop.permute.xlu1 %2369 }
 0xb25   : > { %v2538_v58 = vcombine.low %v8719_v6, %v2370_v56  ;;  %v2554_v32 = vcombine.low %v2529_v54, %v2537_v39 }
 0xb27   : > { %v2545_v40 = vrot.slane %v2538_v58, %v8292_v49 }
 0xbc7   : > { %v2725_v63 = vpop.f32.mrf.mxu1 }
 0xbc8   : > { %v2726_v2 = vadd.f32 %v8744_v18, %v2725_v63  ;;  %v2455_v63 = vrot.slane %v2448_v53, %v8292_v49  ;;  %v2561_v53 = vrot.slane %v2554_v32, %v8298_v60  ;;  %v7677_v32 = vld [vmem:[%s8158_s15] ss:$0 sps:$4 sm:$0x22]  }
 0xbc9   : > { %v7447_v15 = vpop.f32.mrf.mxu1 }
 0xbca   : > { %v2732_v20 = vrot.slane %v2726_v2, %v8338_v29  ;;  %2922 = vst.msk [vmem:[%s8173_s6 + $0x2] sm:$0x1] %vm1239_vm5, %v2726_v2  ;;  %v2447_v2 = vrot.slane %v2440_v52, %v8292_v49  ;;  %v2489_v15 = vcombine.low %v8633_v61, %v2350_v11  ;;  %v2504_v11 = vrot.slane %v2497_v12, %v8292_v49 }
 0xbcc   : > { %2738 = vbcast.lane.b32.xlu0 %v2732_v20, 264  ;;  %2734 = vbcast.lane.b32.xlu1 %v2732_v20, 256  ;;  %v2464_v27 = vcombine.low %v2447_v2, %v2455_v63  ;;  %v2496_v61 = vrot.slane %v2489_v15, %v8292_v49 }
 0xbce   : > { %v2513_v59 = vcombine.low %v2496_v61, %v2504_v11  ;;  %v2471_v13 = vrot.slane %v2464_v27, %v8298_v60 }
 0xbd0   : > { %2746 = vbcast.lane.b32.xlu0 %v2732_v20, 280  ;;  %2742 = vbcast.lane.b32.xlu1 %v2732_v20, 272  ;;  %v2472_v23 = vcombine.low %v2463_v19, %v2471_v13  ;;  %v2520_v52 = vrot.slane %v2513_v59, %v8298_v60 }
 0xbd2   : > { %v2572_v8 = vadd.f32 %v8784_v48, %v2472_v23  ;;  %v2521_v26 = vcombine.low %v2512_v17, %v2520_v52 }
 0xbd4   : > { %2766 = vrot.lane.b32.xlu1 %v8667_v16, %s7961_s13  ;;  %v2367_v16 = vpop.permute.xlu0 %2366  ;;  %v2573_v25 = vadd.f32 %v8795_v4, %v2521_v26 }
 0xbd8   : > { %v2373_v55 = vpop.permute.xlu0 %2372 }
 0xbd9   : > { %v2546_v20 = vcombine.low %v2367_v16, %v2373_v55  ;;  %v2414_v16 = vrot.slane %v2407_v41, %v8298_v60  ;;  %v8787_v55 = vld [vmem:[#allocation8] sm:$0xff] }
 0xbdb   : > { %v2553_v6 = vrot.slane %v2546_v20, %v8292_v49  ;;  %v2423_v51 = vcombine.low %v2414_v16, %v2422_v7  ;;  %v8792_v20 = vld [vmem:[#allocation8 + $0x18] sm:$0xff] }
 0xbdd   : > { %v2562_v33 = vcombine.low %v2545_v40, %v2553_v6  ;;  %v2571_v56 = vadd.f32 %v8787_v55, %v2423_v51 }
 0xbdf   : > { %v2569_v47 = vrot.slane %v2562_v33, %v8298_v60  ;;  %v2928_v33 = vshrl.u32 %v7677_v32, 16 }
 0xbe1   : > { %v2570_v10 = vcombine.low %v2561_v53, %v2569_v47  ;;  %v8807_v19 = vrot.slane %v2928_v33, 1 }
 0xbe3   : > { %v2574_v58 = vadd.f32 %v8792_v20, %v2570_v10  ;;  %7313 = vmatmul.mubr.msk.bf16.vlgmr.msra.gmra.mxu0 %vm399_vm1, %v8807_v19 }
 0xbe4   : > { %3031 = vmatpush1.bf16.msra.mxu0 %v8587_v42  ;;  %3048 = vmatprep.mubr.bf16.mxu0 %v7951_v3 }
 0xbe5   : > { %7453 = vmatprep.subr.bf16.mxu0 %v7952_v9 }
 0xbeb   : > { %7315 = vmatmul.mubr.msk.bf16.vlgmr.msra.gmra.mxu0 %vm399_vm1, %v8807_v19 }
 0xbec   : > { %7454 = vmatpush3.bf16.msra.mxu0 %v8597_v37  ;;  %7455 = vmatprep.mubr.msk.bf16.mxu0 %vm7953_vm2, %v7952_v9 }
 0xbed   : > { %3788 = vmatprep.subr.bf16.mxu0 %v8602_v5 }
 0xbf3   : > { %7456 = vmatmul.mubr.msk.bf16.vlgmr.msra.gmra.mxu0 %vm399_vm1, %v8807_v19 }
 0xbf4   : > { %3789 = vmatpush1.bf16.msra.mxu0 %v8607_v43  ;;  %3806 = vmatprep.mubr.bf16.mxu0 %v7951_v3 }
 0xbf5   : > { %3870 = vmatprep.subr.bf16.mxu0 %v8611_v21 }
 0xc3e   : > { %v2739_v63 = vpop.permute.xlu0 %2738  ;;  %v2735_v34 = vpop.permute.xlu1 %2734 }
 0xc3f   : > { %v2749_v2 = vmul.f32 %v2739_v63, %v2572_v8  ;;  %v2748_v15 = vmul.f32 %v2735_v34, %v2571_v56 }
 0xc41   : > { %v2753_v14 = vsel %vm1068_vm6, %v2749_v2, 0.0  ;;  %v2752_v57 = vsel %vm1068_vm6, %v2748_v15, 0.0 }
 0xc42   : > { %v2747_v30 = vpop.permute.xlu0 %2746  ;;  %v2743_v12 = vpop.permute.xlu1 %2742  ;;  %v2754_v38 = vadd.f32 %v2753_v14, %v2752_v57 }
 0xc43   : > { %v2751_v35 = vmul.f32 %v2747_v30, %v2574_v58  ;;  %v2750_v36 = vmul.f32 %v2743_v12, %v2573_v25 }
 0xc45   : > { %v2755_v31 = vsel %vm1068_vm6, %v2750_v36, 0.0  ;;  %v2757_v61 = vsel %vm1068_vm6, %v2751_v35, 0.0 }
 0xc46   : > { %v2756_v27 = vadd.f32 %v2755_v31, %v2754_v38  ;;  %v2767_v44 = vpop.permute.xlu1 %2766 }
 0xc48   : > { %v2758_v54 = vadd.f32 %v2757_v61, %v2756_v27 }
 0xc4a   : > { %v2759_v39 = vrot.slane %v2758_v54, 4 }
 0xc4c   : > { %v2760_v6 = vadd.f32 %v2759_v39, %v2758_v54 }
 0xc4e   : > { %v2761_v40 = vrot.slane %v2760_v6, 2 }
 0xc50   : > { %v2762_v41 = vadd.f32 %v2761_v40, %v2760_v6 }
 0xc52   : > { %v2763_v11 = vrot.slane %v2762_v41, 1 }
 0xc54   : > { %v2764_v45 = vadd.f32 %v2763_v11, %v2762_v41 }
 0xc56   : > { %v2769_v59 = vadd.f32 %v2767_v44, %v2764_v45 }
 0xc58   : > { %v2770_v7 = vmax.f32 %v2769_v59, 0.0 }
 0xc5a   : > { %2775 = vrot.lane.b32.xlu1 %v2770_v7, %s7957_s20  ;;  %2772 = vrot.lane.b32.xlu0 %v2770_v7, %s7955_s12 }
 0xc5e   : > { %2781 = vrot.lane.b32.xlu1 %v2770_v7, %s7956_s17  ;;  %2778 = vrot.lane.b32.xlu0 %v2770_v7, %s7954_s11 }
 0xc62   : > { %2787 = vrot.lane.b32.xlu1 %v2770_v7, %s7958_s8  ;;  %2784 = vrot.lane.b32.xlu0 %v2770_v7, %s7959_s29 }
 0xc66   : > { %2790 = vrot.lane.b32.xlu0 %v2770_v7, %s7960_s30 }
 0xca3   : > { %v8833_v15 = vpop.f32.mrf.mxu0 }
 0xca5   : > { %v8837_v14 = vpop.f32.mrf.mxu0 }
 0xca7   : > { %v2972_v57 = vpop.f32.mrf.mxu0 }
 0xca9   : > { %v2973_v58 = vpop.f32.mrf.mxu0 }
 0xcab   : > { %v8841_v25 = vpop.f32.mrf.mxu0 }
 0xcad   : > { %v8845_v30 = vpop.f32.mrf.mxu0 }
 0xcaf   : > { %v3054_v12 = vpop.f32.mrf.mxu0 }
 0xcb1   : > { %v3055_v35 = vpop.f32.mrf.mxu0 }
 0xcb3   : > { %v3132_v36 = vpop.f32.mrf.mxu0 }
 0xcb5   : > { %v7457_v38 = vpop.f32.mrf.mxu0 }
 0xcb7   : > { %v3135_v31 = vpop.f32.mrf.mxu0 }
 0xcb9   : > { %v7458_v27 = vpop.f32.mrf.mxu0 }
 0xccc   : > { %v2776_v42 = vpop.permute.xlu1 %2775  ;;  %v2773_v13 = vpop.permute.xlu0 %2772 }
 0xccd   : > { %v2793_v53 = vcombine.low %v2770_v7, %v2776_v42 }
 0xccf   : > { %v2800_v17 = vrot.slane %v2793_v53, %v8292_v49 }
 0xcd0   : > { %v2782_v16 = vpop.permute.xlu1 %2781  ;;  %v2779_v46 = vpop.permute.xlu0 %2778 }
 0xcd1   : > { %v2801_v51 = vcombine.low %v2773_v13, %v2779_v46 }
 0xcd3   : > { %v2808_v47 = vrot.slane %v2801_v51, %v8292_v49 }
 0xcd4   : > { %v2788_v37 = vpop.permute.xlu1 %2787  ;;  %v2785_v23 = vpop.permute.xlu0 %2784 }
 0xcd5   : > { %v2809_v5 = vcombine.low %v2782_v16, %v2788_v37  ;;  %v2825_v43 = vcombine.low %v2800_v17, %v2808_v47 }
 0xcd7   : > { %v2816_v56 = vrot.slane %v2809_v5, %v8292_v49  ;;  %v2832_v26 = vrot.slane %v2825_v43, %v8298_v60 }
 0xcd8   : > { %v2791_v52 = vpop.permute.xlu0 %2790 }
 0xcd9   : > { %v2817_v8 = vcombine.low %v2785_v23, %v2791_v52 }
 0xcdb   : > { %v2824_v21 = vrot.slane %v2817_v8, %v8292_v49 }
 0xcdd   : > { %v2833_v10 = vcombine.low %v2816_v56, %v2824_v21 }
 0xcdf   : > { %v2840_v63 = vrot.slane %v2833_v10, %v8298_v60 }
 0xce1   : > { %v2841_v34 = vcombine.low %v2832_v26, %v2840_v63 }
 0xce3   : > { %v2842_v2 = vsel %vm961_vm3, %v2841_v34, -inf }
 0xce4   : > { %2843 = vmax.xlane.f32.xlu1 %v2842_v2 }
 0xcf5   : > { %3139 = vrot.lane.b32.xlu1 %v8833_v15, %s7961_s13 }
 0xcf9   : > { %3142 = vrot.lane.b32.xlu1 %v8833_v15, %s7962_s16 }
 0xcfd   : > { %3145 = vrot.lane.b32.xlu1 %v8833_v15, %s7963_s18 }
 0xd01   : > { %3149 = vrot.lane.b32.xlu1 %v8837_v14, %s7961_s13 }
 0xd05   : > { %3155 = vrot.lane.b32.xlu1 %v8837_v14, %s7963_s18 }
 0xd6d   : > { %v2844_v61 = vpop.xlane.xlu1 %2843 }
 0xd6e   : > { %v2849_v54 = vrot.slane %v2844_v61, %v8325_v22 }
 0xd70   : > { %7451 = vmatmul.mubr.msk.f32.vlgmr.msra.gmra.mxu1 %vm972_vm4, %v2849_v54 }
 0xd71   : > { %2990 = vmatpush1.bf16.msra.mxu1 %v8641_v0  ;;  %3007 = vmatprep.mubr.bf16.mxu1 %v7951_v3  ;;  %v8868_v0 = vadd.f32 %v8664_v24, %v3132_v36  ;;  %v3140_v36 = vpop.permute.xlu1 %3139 }
 0xd72   : > { %3071 = vmatprep.subr.bf16.mxu1 %v8645_v28 }
 0xd74   : > { %7314 = vmatmul.mubr.msk.bf16.vlgmr.msra.gmra.mxu1 %vm399_vm1, %v8807_v19 }
 0xd75   : > { %3072 = vmatpush1.bf16.msra.mxu1 %v8650_v50  ;;  %3089 = vmatprep.mubr.bf16.mxu1 %v7951_v3  ;;  %v3143_v38 = vpop.permute.xlu1 %3142 }
 0xd76   : > { %7459 = vmatprep.subr.mxu1 %v7952_v9 }
 0xd79   : > { %v3146_v31 = vpop.permute.xlu1 %3145 }
 0xd7c   : > { %7316 = vmatmul.mubr.msk.bf16.vlgmr.msra.gmra.mxu1 %vm399_vm1, %v8807_v19 }
 0xd7d   : > { %7460 = vmatpush3.msra.mxu1 %v8733_v1  ;;  %7461 = vmatprep.mubr.msk.f32.mxu1 %vm7953_vm2, %v7952_v9  ;;  %v3150_v27 = vpop.permute.xlu1 %3149 }
 0xd7e   : > { %7464 = vmatprep.subr.mxu1 %v7952_v9 }
 0xe30   : > { %v2918_v28 = vpop.f32.mrf.mxu1 }
 0xe31   : > { %v2919_v50 = vadd.f32 %v8744_v18, %v2918_v28 }
 0xe32   : > { %v7452_v39 = vpop.f32.mrf.mxu1 }
 0xe33   : > { %v3419_v6 = vadd.f32 %v8868_v0, %v2919_v50 }
 0xe34   : > { %v8872_v40 = vpop.f32.mrf.mxu1 }
 0xe35   : > { %v3420_v41 = vmax.f32 %v3419_v6, 0.0  ;;  %3159 = vrot.lane.b32.xlu1 %v8872_v40, %s7961_s13 }
 0xe36   : > { %v8876_v11 = vpop.f32.mrf.mxu1 }
 0xe37   : > { %3422 = vrot.lane.b32.xlu0 %v3420_v41, %s7955_s12 }
 0xe38   : > { %v3013_v45 = vpop.f32.mrf.mxu1 }
 0xe39   : > { %3162 = vrot.lane.b32.xlu1 %v8872_v40, %s7962_s16 }
 0xe3a   : > { %v3014_v24 = vpop.f32.mrf.mxu1 }
 0xe3b   : > { %3425 = vrot.lane.b32.xlu0 %v3420_v41, %s7957_s20 }
 0xe3c   : > { %v8914_v21 = vpop.f32.mrf.mxu1 }
 0xe3d   : > { %3165 = vrot.lane.b32.xlu1 %v8872_v40, %s7963_s18 }
 0xe3e   : > { %v8918_v10 = vpop.f32.mrf.mxu1 }
 0xe3f   : > { %3428 = vrot.lane.b32.xlu0 %v3420_v41, %s7954_s11 }
 0xe40   : > { %v3095_v26 = vpop.f32.mrf.mxu1 }
 0xe41   : > { %3169 = vrot.lane.b32.xlu1 %v8876_v11, %s7961_s13 }
 0xe42   : > { %v3096_v63 = vpop.f32.mrf.mxu1 }
 0xe43   : > { %3431 = vrot.lane.b32.xlu0 %v3420_v41, %s7956_s17 }
 0xe45   : > { %3175 = vrot.lane.b32.xlu1 %v8876_v11, %s7963_s18 }
 0xe47   : > { %3434 = vrot.lane.b32.xlu0 %v3420_v41, %s7959_s29 }
 0xe49   : > { %3182 = vrot.lane.b32.xlu1 %v8841_v25, %s7962_s16 }
 0xe4b   : > { %3437 = vrot.lane.b32.xlu0 %v3420_v41, %s7958_s8 }
 0xe4d   : > { %3189 = vrot.lane.b32.xlu1 %v8845_v30, %s7961_s13 }
 0xe4f   : > { %3440 = vrot.lane.b32.xlu0 %v3420_v41, %s7960_s30 }
 0xe51   : > { %3195 = vrot.lane.b32.xlu1 %v8845_v30, %s7963_s18 }
 0xe55   : > { %3202 = vrot.lane.b32.xlu1 %v8914_v21, %s7962_s16 }
 0xe59   : > { %3209 = vrot.lane.b32.xlu1 %v8918_v10, %s7961_s13 }
 0xe5d   : > { %3215 = vrot.lane.b32.xlu1 %v8918_v10, %s7963_s18 }
 0xea9   : > { %v3423_v44 = vpop.permute.xlu0 %3422 }
 0xead   : > { %v3426_v59 = vpop.permute.xlu0 %3425 }
 0xeae   : > { %v3443_v13 = vcombine.low %v3420_v41, %v3426_v59 }
 0xeb0   : > { %v3450_v37 = vrot.slane %v3443_v13, %v8292_v49 }
 0xeb1   : > { %v3429_v7 = vpop.permute.xlu0 %3428 }
 0xeb2   : > { %v3451_v19 = vcombine.low %v3423_v44, %v3429_v7 }
 0xeb4   : > { %v3458_v16 = vrot.slane %v3451_v19, %v8292_v49 }
 0xeb5   : > { %v3432_v32 = vpop.permute.xlu0 %3431 }
 0xeb6   : > { %v3475_v53 = vcombine.low %v3450_v37, %v3458_v16 }
 0xeb8   : > { %v3482_v17 = vrot.slane %v3475_v53, %v8298_v60  ;;  %v3226_v53 = vcombine.low %v3140_v36, %v3146_v31 }
 0xeb9   : > { %v3435_v33 = vpop.permute.xlu0 %3434 }
 0xebd   : > { %v3438_v42 = vpop.permute.xlu0 %3437 }
 0xebe   : > { %v3459_v46 = vcombine.low %v3432_v32, %v3438_v42 }
 0xec0   : > { %v3466_v47 = vrot.slane %v3459_v46, %v8292_v49 }
 0xec1   : > { %v3441_v51 = vpop.permute.xlu0 %3440 }
 0xec2   : > { %v3467_v23 = vcombine.low %v3435_v33, %v3441_v51 }
 0xec4   : > { %v3474_v5 = vrot.slane %v3467_v23, %v8292_v49  ;;  %v3218_v23 = vcombine.low %v8833_v15, %v3143_v38 }
 0xec6   : > { %v3483_v52 = vcombine.low %v3466_v47, %v3474_v5 }
 0xec8   : > { %v3490_v8 = vrot.slane %v3483_v52, %v8298_v60 }
 0xeca   : > { %v3491_v43 = vcombine.low %v3482_v17, %v3490_v8 }
 0xecc   : > { %v3492_v56 = vsel %vm961_vm3, %v3491_v43, -inf }
 0xecd   : > { %3493 = vmax.xlane.f32.xlu0 %v3492_v56 }
 0xee3   : > { %3152 = vrot.lane.b32.xlu0 %v8837_v14, %s7962_s16 }
 0xee7   : > { %3172 = vrot.lane.b32.xlu0 %v8876_v11, %s7962_s16 }
 0xeeb   : > { %3179 = vrot.lane.b32.xlu0 %v8841_v25, %s7961_s13 }
 0xeef   : > { %3185 = vrot.lane.b32.xlu0 %v8841_v25, %s7963_s18 }
 0xef3   : > { %3192 = vrot.lane.b32.xlu0 %v8845_v30, %s7962_s16 }
 0xef7   : > { %3199 = vrot.lane.b32.xlu0 %v8914_v21, %s7961_s13 }
 0xefb   : > { %3205 = vrot.lane.b32.xlu0 %v8914_v21, %s7963_s18 }
 0xeff   : > { %3212 = vrot.lane.b32.xlu0 %v8918_v10, %s7962_s16 }
 0xf56   : > { %v3494_v34 = vpop.xlane.xlu0 %3493 }
 0xf57   : > { %v3499_v2 = vrot.slane %v3494_v34, %v8325_v22  ;;  %v3225_v34 = vrot.slane %v3218_v23, %v8292_v49 }
 0xf59   : > { %7462 = vmatmul.mubr.msk.f32.vlgmr.msra.gmra.mxu1 %vm972_vm4, %v3499_v2  ;;  %v3233_v2 = vrot.slane %v3226_v53, %v8292_v49 }
 0xf5a   : > { %7465 = vmatpush3.msra.mxu1 %v8733_v1  ;;  %7466 = vmatprep.mubr.msk.f32.mxu1 %vm7953_vm2, %v7952_v9  ;;  %v3153_v39 = vpop.permute.xlu0 %3152 }
 0xf5b   : > { %3829 = vmatprep.subr.bf16.mxu1 %v8738_v62  ;;  %v3156_v62 = vpop.permute.xlu1 %3155  ;;  %v3234_v51 = vcombine.low %v8837_v14, %v3153_v39 }
 0xf5c   : > { %v3242_v47 = vcombine.low %v3150_v27, %v3156_v62 }
 0xf5e   : > { %v3173_v41 = vpop.permute.xlu0 %3172 }
 0xf5f   : > { %v3160_v61 = vpop.permute.xlu1 %3159  ;;  %v3283_v37 = vcombine.low %v8876_v11, %v3173_v41 }
 0xf61   : > { %v3290_v56 = vrot.slane %v3283_v37, %v8292_v49 }
 0xf62   : > { %v3180_v24 = vpop.permute.xlu0 %3179 }
 0xf63   : > { %v3163_v54 = vpop.permute.xlu1 %3162 }
 0xf64   : > { %v3267_v13 = vcombine.low %v8872_v40, %v3163_v54  ;;  %v3241_v40 = vrot.slane %v3234_v51, %v8292_v49 }
 0xf66   : > { %v3186_v59 = vpop.permute.xlu0 %3185  ;;  %v3274_v17 = vrot.slane %v3267_v13, %v8292_v49 }
 0xf67   : > { %v3166_v28 = vpop.permute.xlu1 %3165 }
 0xf68   : > { %v3275_v16 = vcombine.low %v3160_v61, %v3166_v28  ;;  %v3250_v61 = vcombine.low %v3225_v34, %v3233_v2 }
 0xf6a   : > { %v3193_v32 = vpop.permute.xlu0 %3192  ;;  %v3282_v8 = vrot.slane %v3275_v16, %v8292_v49 }
 0xf6b   : > { %v3170_v50 = vpop.permute.xlu1 %3169  ;;  %v3332_v14 = vcombine.low %v8845_v30, %v3193_v32 }
 0xf6d   : > { %v3339_v30 = vrot.slane %v3332_v14, %v8292_v49 }
 0xf6f   : > { %v3176_v6 = vpop.permute.xlu1 %3175 }
 0xf70   : > { %v3291_v46 = vcombine.low %v3170_v50, %v3176_v6 }
 0xf72   : > { %v3298_v43 = vrot.slane %v3291_v46, %v8292_v49 }
 0xf73   : > { %v3183_v45 = vpop.permute.xlu1 %3182 }
 0xf74   : > { %v3316_v36 = vcombine.low %v8841_v25, %v3183_v45  ;;  %v3307_v31 = vcombine.low %v3290_v56, %v3298_v43 }
 0xf76   : > { %v3323_v50 = vrot.slane %v3316_v36, %v8292_v49  ;;  %v7678_v36 = vld [vmem:[%s8158_s15] ss:$0 sps:$4 sm:$0x44]  }
 0xf77   : > { %v3190_v44 = vpop.permute.xlu1 %3189 }
 0xf7b   : > { %v3196_v7 = vpop.permute.xlu1 %3195 }
 0xf7f   : > { %v3203_v33 = vpop.permute.xlu1 %3202 }
 0xf80   : > { %v3365_v11 = vcombine.low %v8914_v21, %v3203_v33 }
 0xf82   : > { %v3372_v21 = vrot.slane %v3365_v11, %v8292_v49 }
 0xf83   : > { %v3210_v19 = vpop.permute.xlu1 %3209 }
 0xf87   : > { %v3216_v5 = vpop.permute.xlu1 %3215 }
 0xf88   : > { %v3389_v15 = vcombine.low %v3210_v19, %v3216_v5 }
0x1019   : > { %v3568_v57 = vpop.f32.mrf.mxu1 }
0x101a   : > { %v3569_v58 = vadd.f32 %v8744_v18, %v3568_v57  ;;  %v3249_v57 = vrot.slane %v3242_v47, %v8292_v49 }
0x101b   : > { %v7463_v12 = vpop.f32.mrf.mxu1 }
0x101c   : > { %v3575_v35 = vrot.slane %v3569_v58, %v8338_v29  ;;  %3765 = vst.msk [vmem:[%s8173_s6 + $0x3] sm:$0x1] %vm1239_vm5, %v3569_v58  ;;  %v3340_v58 = vcombine.low %v3190_v44, %v3196_v7  ;;  %v3299_v12 = vcombine.low %v3274_v17, %v3282_v8  ;;  %v3258_v38 = vcombine.low %v3241_v40, %v3249_v57 }
0x101d   : > { %v3257_v44 = vrot.slane %v3250_v61, %v8298_v60 }
0x101e   : > { %3581 = vbcast.lane.b32.xlu1 %v3575_v35, 264  ;;  %3577 = vbcast.lane.b32.xlu0 %v3575_v35, 256  ;;  %v3347_v54 = vrot.slane %v3340_v58, %v8292_v49  ;;  %v3265_v39 = vrot.slane %v3258_v38, %v8298_v60  ;;  %v3306_v45 = vrot.slane %v3299_v12, %v8298_v60  ;;  %v8987_v38 = vrot.slane %v7678_v36, 2 }
0x1020   : > { %v3356_v25 = vcombine.low %v3339_v30, %v3347_v54  ;;  %v3266_v7 = vcombine.low %v3257_v44, %v3265_v39  ;;  %7321 = vmatmul.mubr.msk.bf16.vlgmr.msra.gmra.mxu0 %vm399_vm1, %v8987_v38  ;;  %v9003_v30 = vld [vmem:[#allocation6 + $0x20] ss:$36 sps:$4 sm:$0xff]  }
0x1021   : > { %3888 = vmatprep.mubr.bf16.mxu0 %v7951_v3 }
0x1022   : > { %3589 = vbcast.lane.b32.xlu1 %v3575_v35, 280  ;;  %3585 = vbcast.lane.b32.xlu0 %v3575_v35, 272  ;;  %v3324_v35 = vcombine.low %v3180_v24, %v3186_v59  ;;  %v3314_v24 = vrot.slane %v3307_v31, %v8298_v60  ;;  %v3363_v19 = vrot.slane %v3356_v25, %v8298_v60  ;;  %v8993_v31 = vld [vmem:[#allocation6 + $0x10] ss:$36 sps:$4 sm:$0xff]  }
0x1023   : > { %v3414_v16 = vadd.f32 %v8787_v55, %v3266_v7  ;;  %3871 = vmatpush1.bf16.msra.mxu0 %v8993_v31 }
0x1024   : > { %v3331_v28 = vrot.slane %v3324_v35, %v8292_v49  ;;  %v3315_v32 = vcombine.low %v3306_v45, %v3314_v24  ;;  %7469 = vmatprep.subr.bf16.mxu0 %v7952_v9 }
0x1026   : > { %3609 = vrot.lane.b32.xlu0 %v8868_v0, %s7961_s13  ;;  %v3200_v0 = vpop.permute.xlu0 %3199  ;;  %v3348_v59 = vcombine.low %v3323_v50, %v3331_v28  ;;  %v3415_v13 = vadd.f32 %v8784_v48, %v3315_v32 }
0x1028   : > { %7323 = vmatmul.mubr.msk.bf16.vlgmr.msra.gmra.mxu0 %vm399_vm1, %v8987_v38 }
0x1029   : > { %7470 = vmatpush3.bf16.msra.mxu0 %v9003_v30  ;;  %7471 = vmatprep.mubr.msk.bf16.mxu0 %vm7953_vm2, %v7952_v9 }
0x102a   : > { %v3206_v42 = vpop.permute.xlu0 %3205 }
0x102b   : > { %v3373_v26 = vcombine.low %v3200_v0, %v3206_v42  ;;  %v3355_v42 = vrot.slane %v3348_v59, %v8298_v60 }
0x102d   : > { %v3380_v27 = vrot.slane %v3373_v26, %v8292_v49  ;;  %v3364_v51 = vcombine.low %v3355_v42, %v3363_v19 }
0x102e   : > { %v3213_v52 = vpop.permute.xlu0 %3212 }
0x102f   : > { %v3381_v63 = vcombine.low %v8918_v10, %v3213_v52  ;;  %v3396_v10 = vrot.slane %v3389_v15, %v8292_v49  ;;  %v3397_v6 = vcombine.low %v3372_v21, %v3380_v27  ;;  %v3416_v8 = vadd.f32 %v8795_v4, %v3364_v51  ;;  %v9008_v21 = vld [vmem:[#allocation6 + $0x4] ss:$36 sps:$4 sm:$0xff]  }
0x1030   : > { %4631 = vmatprep.subr.bf16.mxu0 %v9008_v21  ;;  %7472 = vmatmul.mubr.msk.bf16.vlgmr.msra.gmra.mxu0 %vm399_vm1, %v8987_v38  ;;  %v9013_v27 = vld [vmem:[#allocation6] ss:$36 sps:$4 sm:$0xff]  }
0x1031   : > { %v3388_v62 = vrot.slane %v3381_v63, %v8292_v49  ;;  %v3404_v33 = vrot.slane %v3397_v6, %v8298_v60  ;;  %4632 = vmatpush1.bf16.msra.mxu0 %v9013_v27  ;;  %4649 = vmatprep.mubr.bf16.mxu0 %v7951_v3 }
0x1033   : > { %v3405_v41 = vcombine.low %v3388_v62, %v3396_v10  ;;  %v9017_v10 = vld [vmem:[#allocation6 + $0x14] ss:$36 sps:$4 sm:$0xff]  }
0x1034   : > { %4713 = vmatprep.subr.bf16.mxu0 %v9017_v10 }
0x1035   : > { %v3412_v0 = vrot.slane %v3405_v41, %v8298_v60 }
0x1037   : > { %v3413_v46 = vcombine.low %v3404_v33, %v3412_v0 }
0x1039   : > { %v3417_v17 = vadd.f32 %v8792_v20, %v3413_v46 }
0x1090   : > { %v3582_v37 = vpop.permute.xlu1 %3581  ;;  %v3578_v23 = vpop.permute.xlu0 %3577 }
0x1091   : > { %v3592_v53 = vmul.f32 %v3582_v37, %v3415_v13  ;;  %v3591_v47 = vmul.f32 %v3578_v23, %v3414_v16 }
0x1093   : > { %v3596_v5 = vsel %vm1068_vm6, %v3592_v53, 0.0  ;;  %v3595_v52 = vsel %vm1068_vm6, %v3591_v47, 0.0 }
0x1094   : > { %v3590_v43 = vpop.permute.xlu1 %3589  ;;  %v3586_v40 = vpop.permute.xlu0 %3585  ;;  %v3597_v55 = vadd.f32 %v3596_v5, %v3595_v52 }
0x1095   : > { %v3594_v56 = vmul.f32 %v3590_v43, %v3417_v17  ;;  %v3593_v48 = vmul.f32 %v3586_v40, %v3416_v8 }
0x1097   : > { %v3598_v14 = vsel %vm1068_vm6, %v3593_v48, 0.0  ;;  %v3600_v26 = vsel %vm1068_vm6, %v3594_v56, 0.0 }
0x1098   : > { %v3599_v11 = vadd.f32 %v3598_v14, %v3597_v55  ;;  %v3610_v12 = vpop.permute.xlu0 %3609  ;;  %v9047_v55 = vld [vmem:[#allocation6 + $0x8] ss:$36 sps:$4 sm:$0xff]   ;;  %v9051_v14 = vld [vmem:[#allocation6 + $0x1c] ss:$36 sps:$4 sm:$0xff]  }
0x109a   : > { %v3601_v15 = vadd.f32 %v3600_v26, %v3599_v11  ;;  %v9056_v11 = vld [vmem:[#allocation6 + $0x18] ss:$36 sps:$4 sm:$0xff]   ;;  %v9070_v26 = vld [vmem:[%s9839_s2] sm:$0x1] }
0x109c   : > { %v3602_v63 = vrot.slane %v3601_v15, 4 }
0x109e   : > { %v3603_v34 = vadd.f32 %v3602_v63, %v3601_v15 }
0x10a0   : > { %v3604_v2 = vrot.slane %v3603_v34, 2 }
0x10a2   : > { %v3605_v57 = vadd.f32 %v3604_v2, %v3603_v34 }
0x10a4   : > { %v3606_v58 = vrot.slane %v3605_v57, 1 }
0x10a6   : > { %v3607_v20 = vadd.f32 %v3606_v58, %v3605_v57 }
0x10a8   : > { %v3612_v4 = vadd.f32 %v3610_v12, %v3607_v20 }
0x10aa   : > { %v3613_v35 = vmax.f32 %v3612_v4, 0.0 }
0x10ac   : > { %3618 = vrot.lane.b32.xlu0 %v3613_v35, %s7957_s20  ;;  %3615 = vrot.lane.b32.xlu1 %v3613_v35, %s7955_s12 }
0x10b0   : > { %3624 = vrot.lane.b32.xlu0 %v3613_v35, %s7956_s17  ;;  %3621 = vrot.lane.b32.xlu1 %v3613_v35, %s7954_s11 }
0x10b4   : > { %3630 = vrot.lane.b32.xlu0 %v3613_v35, %s7958_s8  ;;  %3627 = vrot.lane.b32.xlu1 %v3613_v35, %s7959_s29 }
0x10b8   : > { %3633 = vrot.lane.b32.xlu1 %v3613_v35, %s7960_s30 }
0x10e0   : > { %v9027_v46 = vpop.f32.mrf.mxu0 }
0x10e2   : > { %v9031_v51 = vpop.f32.mrf.mxu0 }
0x10e4   : > { %v3812_v37 = vpop.f32.mrf.mxu0 }
0x10e6   : > { %v3813_v23 = vpop.f32.mrf.mxu0 }
0x10e8   : > { %v9035_v53 = vpop.f32.mrf.mxu0 }
0x10ea   : > { %v9039_v47 = vpop.f32.mrf.mxu0 }
0x10ec   : > { %v3894_v5 = vpop.f32.mrf.mxu0 }
0x10ed   : > { %v9139_v5 = vld [vmem:[#allocation9] sm:$0xff] }
0x10ee   : > { %v3895_v52 = vpop.f32.mrf.mxu0 }
0x10ef   : > { %v9144_v52 = vld [vmem:[#allocation6 + $0xc] ss:$36 sps:$4 sm:$0xff]  }
0x10f0   : > { %v3972_v17 = vpop.f32.mrf.mxu0 }
0x10f1   : > { %v9073_v15 = vadd.f32 %v9070_v26, %v3972_v17 }
0x10f2   : > { %v7473_v8 = vpop.f32.mrf.mxu0 }
0x10f3   : > { %v9150_v8 = vld [vmem:[%s9842_s5] sm:$0x1] }
0x10f4   : > { %v3975_v43 = vpop.f32.mrf.mxu0 }
0x10f6   : > { %v7474_v40 = vpop.f32.mrf.mxu0 }
0x111e   : > { %v3619_v62 = vpop.permute.xlu0 %3618  ;;  %v3616_v61 = vpop.permute.xlu1 %3615 }
0x111f   : > { %v3636_v6 = vcombine.low %v3613_v35, %v3619_v62 }
0x1121   : > { %v3643_v44 = vrot.slane %v3636_v6, %v8292_v49 }
0x1122   : > { %v3625_v54 = vpop.permute.xlu0 %3624  ;;  %v3622_v28 = vpop.permute.xlu1 %3621 }
0x1123   : > { %v3644_v50 = vcombine.low %v3616_v61, %v3622_v28 }
0x1125   : > { %v3651_v41 = vrot.slane %v3644_v50, %v8292_v49 }
0x1126   : > { %v3631_v25 = vpop.permute.xlu0 %3630  ;;  %v3628_v39 = vpop.permute.xlu1 %3627 }
0x1127   : > { %v3652_v45 = vcombine.low %v3625_v54, %v3631_v25  ;;  %v3668_v7 = vcombine.low %v3643_v44, %v3651_v41 }
0x1129   : > { %v3659_v32 = vrot.slane %v3652_v45, %v8292_v49  ;;  %v3675_v19 = vrot.slane %v3668_v7, %v8298_v60 }
0x112a   : > { %v3634_v24 = vpop.permute.xlu1 %3633 }
0x112b   : > { %v3660_v59 = vcombine.low %v3628_v39, %v3634_v24 }
0x112d   : > { %v3667_v33 = vrot.slane %v3660_v59, %v8292_v49 }
0x112f   : > { %v3676_v0 = vcombine.low %v3659_v32, %v3667_v33 }
0x1131   : > { %v3683_v42 = vrot.slane %v3676_v0, %v8298_v60 }
0x1133   : > { %v3684_v13 = vcombine.low %v3675_v19, %v3683_v42 }
0x1135   : > { %v3685_v16 = vsel %vm961_vm3, %v3684_v13, -inf }
0x1136   : > { %3686 = vmax.xlane.f32.xlu0 %v3685_v16 }
0x114c   : > { %3979 = vrot.lane.b32.xlu0 %v9027_v46, %s7961_s13 }
0x1150   : > { %3982 = vrot.lane.b32.xlu0 %v9027_v46, %s7962_s16 }
0x1154   : > { %3985 = vrot.lane.b32.xlu0 %v9027_v46, %s7963_s18 }
0x1158   : > { %3989 = vrot.lane.b32.xlu0 %v9031_v51, %s7961_s13 }
0x115c   : > { %3992 = vrot.lane.b32.xlu0 %v9031_v51, %s7962_s16 }
0x11bf   : > { %v3687_v56 = vpop.xlane.xlu0 %3686 }
0x11c0   : > { %v3692_v48 = vrot.slane %v3687_v56, %v8325_v22 }
0x11c2   : > { %7467 = vmatmul.mubr.msk.f32.vlgmr.msra.gmra.mxu1 %vm972_vm4, %v3692_v48 }
0x11c3   : > { %3830 = vmatpush1.bf16.msra.mxu1 %v9047_v55  ;;  %3847 = vmatprep.mubr.bf16.mxu1 %v7951_v3  ;;  %v3980_v48 = vpop.permute.xlu0 %3979 }
0x11c4   : > { %3911 = vmatprep.subr.bf16.mxu1 %v9051_v14 }
0x11c6   : > { %7322 = vmatmul.mubr.msk.bf16.vlgmr.msra.gmra.mxu1 %vm399_vm1, %v8987_v38 }
0x11c7   : > { %3912 = vmatpush1.bf16.msra.mxu1 %v9056_v11  ;;  %3929 = vmatprep.mubr.bf16.mxu1 %v7951_v3 }
0x11c8   : > { %7475 = vmatprep.subr.mxu1 %v7952_v9 }
0x11ce   : > { %7324 = vmatmul.mubr.msk.bf16.vlgmr.msra.gmra.mxu1 %vm399_vm1, %v8987_v38 }
0x11cf   : > { %7476 = vmatpush3.msra.mxu1 %v8733_v1  ;;  %7477 = vmatprep.mubr.msk.f32.mxu1 %vm7953_vm2, %v7952_v9 }
0x11d0   : > { %7480 = vmatprep.subr.mxu1 %v7952_v9 }
0x1282   : > { %v3761_v63 = vpop.f32.mrf.mxu1 }
0x1283   : > { %v3762_v34 = vadd.f32 %v8744_v18, %v3761_v63  ;;  %v3983_v63 = vpop.permute.xlu0 %3982 }
0x1284   : > { %v7468_v2 = vpop.f32.mrf.mxu1 }
0x1285   : > { %v4259_v57 = vadd.f32 %v9073_v15, %v3762_v34 }
0x1286   : > { %v9077_v1 = vpop.f32.mrf.mxu1 }
0x1287   : > { %v4260_v58 = vmax.f32 %v4259_v57, 0.0  ;;  %3999 = vrot.lane.b32.xlu0 %v9077_v1, %s7961_s13  ;;  %v3986_v34 = vpop.permute.xlu0 %3985 }
0x1288   : > { %v9081_v20 = vpop.f32.mrf.mxu1 }
0x1289   : > { %4262 = vrot.lane.b32.xlu1 %v4260_v58, %s7955_s12 }
0x128a   : > { %v3853_v12 = vpop.f32.mrf.mxu1 }
0x128b   : > { %4002 = vrot.lane.b32.xlu0 %v9077_v1, %s7962_s16  ;;  %v3990_v2 = vpop.permute.xlu0 %3989 }
0x128c   : > { %v3854_v4 = vpop.f32.mrf.mxu1 }
0x128d   : > { %4265 = vrot.lane.b32.xlu1 %v4260_v58, %s7957_s20 }
0x128e   : > { %v9121_v19 = vpop.f32.mrf.mxu1 }
0x128f   : > { %4005 = vrot.lane.b32.xlu0 %v9077_v1, %s7963_s18  ;;  %v3993_v57 = vpop.permute.xlu0 %3992 }
0x1290   : > { %v9125_v42 = vpop.f32.mrf.mxu1 }
0x1291   : > { %4268 = vrot.lane.b32.xlu1 %v4260_v58, %s7954_s11 }
0x1292   : > { %v3935_v13 = vpop.f32.mrf.mxu1 }
0x1293   : > { %4009 = vrot.lane.b32.xlu0 %v9081_v20, %s7961_s13 }
0x1294   : > { %v3936_v16 = vpop.f32.mrf.mxu1 }
0x1295   : > { %4271 = vrot.lane.b32.xlu1 %v4260_v58, %s7956_s17 }
0x1297   : > { %4015 = vrot.lane.b32.xlu0 %v9081_v20, %s7963_s18 }
0x1299   : > { %4274 = vrot.lane.b32.xlu1 %v4260_v58, %s7959_s29 }
0x129b   : > { %4022 = vrot.lane.b32.xlu0 %v9035_v53, %s7962_s16 }
0x129d   : > { %4277 = vrot.lane.b32.xlu1 %v4260_v58, %s7958_s8 }
0x129f   : > { %4029 = vrot.lane.b32.xlu0 %v9039_v47, %s7961_s13 }
0x12a1   : > { %4280 = vrot.lane.b32.xlu1 %v4260_v58, %s7960_s30 }
0x12a3   : > { %4035 = vrot.lane.b32.xlu0 %v9039_v47, %s7963_s18 }
0x12a7   : > { %4042 = vrot.lane.b32.xlu0 %v9121_v19, %s7962_s16 }
0x12ab   : > { %4049 = vrot.lane.b32.xlu0 %v9125_v42, %s7961_s13 }
0x12af   : > { %4055 = vrot.lane.b32.xlu0 %v9125_v42, %s7963_s18 }
0x12fb   : > { %v4263_v18 = vpop.permute.xlu1 %4262 }
0x12ff   : > { %v4266_v35 = vpop.permute.xlu1 %4265 }
0x1300   : > { %v4283_v28 = vcombine.low %v4260_v58, %v4266_v35  ;;  %v4000_v58 = vpop.permute.xlu0 %3999 }
0x1302   : > { %v4290_v6 = vrot.slane %v4283_v28, %v8292_v49 }
0x1303   : > { %v4269_v36 = vpop.permute.xlu1 %4268 }
0x1304   : > { %v4291_v61 = vcombine.low %v4263_v18, %v4269_v36  ;;  %v4003_v12 = vpop.permute.xlu0 %4002 }
0x1306   : > { %v4298_v50 = vrot.slane %v4291_v61, %v8292_v49 }
0x1307   : > { %v4272_v38 = vpop.permute.xlu1 %4271 }
0x1308   : > { %v4315_v45 = vcombine.low %v4290_v6, %v4298_v50  ;;  %v4006_v4 = vpop.permute.xlu0 %4005 }
0x130a   : > { %v4322_v7 = vrot.slane %v4315_v45, %v8298_v60  ;;  %v4107_v45 = vcombine.low %v9077_v1, %v4003_v12 }
0x130b   : > { %v4275_v62 = vpop.permute.xlu1 %4274 }
0x130c   : > { %v4010_v18 = vpop.permute.xlu0 %4009 }
0x130f   : > { %v4278_v54 = vpop.permute.xlu1 %4277 }
0x1310   : > { %v4299_v25 = vcombine.low %v4272_v38, %v4278_v54  ;;  %v4016_v36 = vpop.permute.xlu0 %4015 }
0x1312   : > { %v4306_v24 = vrot.slane %v4299_v25, %v8292_v49 }
0x1313   : > { %v4281_v39 = vpop.permute.xlu1 %4280 }
0x1314   : > { %v4307_v41 = vcombine.low %v4275_v62, %v4281_v39  ;;  %v4023_v62 = vpop.permute.xlu0 %4022 }
0x1315   : > { %v4156_v12 = vcombine.low %v9035_v53, %v4023_v62 }
0x1316   : > { %v4314_v44 = vrot.slane %v4307_v41, %v8292_v49 }
0x1318   : > { %v4323_v59 = vcombine.low %v4306_v24, %v4314_v44  ;;  %v4030_v54 = vpop.permute.xlu0 %4029  ;;  %v4115_v24 = vcombine.low %v4000_v58, %v4006_v4  ;;  %v4131_v44 = vcombine.low %v4010_v18, %v4016_v36 }
0x131a   : > { %v4330_v32 = vrot.slane %v4323_v59, %v8298_v60 }
0x131c   : > { %v4331_v33 = vcombine.low %v4322_v7, %v4330_v32  ;;  %v4036_v50 = vpop.permute.xlu0 %4035  ;;  %v4058_v32 = vcombine.low %v9027_v46, %v3983_v63 }
0x131e   : > { %v4332_v0 = vsel %vm961_vm3, %v4331_v33, -inf  ;;  %v4066_v33 = vcombine.low %v3980_v48, %v3986_v34  ;;  %v4065_v48 = vrot.slane %v4058_v32, %v8292_v49 }
0x131f   : > { %4333 = vmax.xlane.f32.xlu1 %v4332_v0  ;;  %v4074_v0 = vcombine.low %v9031_v51, %v3993_v57 }
0x1320   : > { %v4043_v39 = vpop.permute.xlu0 %4042  ;;  %v4073_v63 = vrot.slane %v4066_v33, %v8292_v49  ;;  %v9190_v33 = vld [vmem:[#allocation8 + $0x8] sm:$0xff] }
0x1321   : > { %v4081_v34 = vrot.slane %v4074_v0, %v8292_v49 }
0x1330   : > { %3995 = vrot.lane.b32.xlu1 %v9031_v51, %s7963_s18 }
0x1334   : > { %4012 = vrot.lane.b32.xlu1 %v9081_v20, %s7962_s16 }
0x1338   : > { %4019 = vrot.lane.b32.xlu1 %v9035_v53, %s7961_s13 }
0x133c   : > { %4025 = vrot.lane.b32.xlu1 %v9035_v53, %s7963_s18 }
0x1340   : > { %4032 = vrot.lane.b32.xlu1 %v9039_v47, %s7962_s16 }
0x1344   : > { %4039 = vrot.lane.b32.xlu1 %v9121_v19, %s7961_s13 }
0x1348   : > { %4045 = vrot.lane.b32.xlu1 %v9121_v19, %s7963_s18 }
0x134c   : > { %4052 = vrot.lane.b32.xlu1 %v9125_v42, %s7962_s16 }
0x13a8   : > { %v4334_v37 = vpop.xlane.xlu1 %4333 }
0x13a9   : > { %v4339_v23 = vrot.slane %v4334_v37, %v8325_v22  ;;  %v4114_v37 = vrot.slane %v4107_v45, %v8292_v49 }
0x13ab   : > { %7478 = vmatmul.mubr.msk.f32.vlgmr.msra.gmra.mxu1 %vm972_vm4, %v4339_v23  ;;  %v4122_v23 = vrot.slane %v4115_v24, %v8292_v49 }
0x13ac   : > { %7481 = vmatpush3.msra.mxu1 %v9139_v5  ;;  %7482 = vmatprep.mubr.msk.f32.mxu1 %vm7953_vm2, %v7952_v9  ;;  %v3996_v35 = vpop.permute.xlu1 %3995 }
0x13ad   : > { %4672 = vmatprep.subr.bf16.mxu1 %v9144_v52  ;;  %v4082_v59 = vcombine.low %v3990_v2, %v3996_v35  ;;  %v4180_v2 = vcombine.low %v4030_v54, %v4036_v50  ;;  %v4139_v57 = vcombine.low %v4114_v37, %v4122_v23 }
0x13af   : > { %v4089_v1 = vrot.slane %v4082_v59, %v8292_v49 }
0x13b0   : > { %v4013_v38 = vpop.permute.xlu1 %4012 }
0x13b1   : > { %v4123_v7 = vcombine.low %v9081_v20, %v4013_v38  ;;  %v4205_v20 = vcombine.low %v9121_v19, %v4043_v39  ;;  %v4098_v4 = vcombine.low %v4081_v34, %v4089_v1  ;;  %v4090_v38 = vcombine.low %v4065_v48, %v4073_v63  ;;  %v9201_v48 = vld [vmem:[#allocation8 + $0x10] sm:$0xff] }
0x13b2   : > { %v4146_v39 = vrot.slane %v4139_v57, %v8298_v60 }
0x13b3   : > { %v4212_v19 = vrot.slane %v4205_v20, %v8292_v49  ;;  %v4105_v62 = vrot.slane %v4098_v4, %v8298_v60 }
0x13b4   : > { %v4020_v61 = vpop.permute.xlu1 %4019 }
0x13b8   : > { %v4026_v28 = vpop.permute.xlu1 %4025 }
0x13b9   : > { %v4164_v58 = vcombine.low %v4020_v61, %v4026_v28  ;;  %v4163_v61 = vrot.slane %v4156_v12, %v8292_v49 }
0x13bb   : > { %v4171_v54 = vrot.slane %v4164_v58, %v8292_v49 }
0x13bc   : > { %v4033_v25 = vpop.permute.xlu1 %4032 }
0x13c0   : > { %v4040_v6 = vpop.permute.xlu1 %4039 }
0x13c4   : > { %v4046_v41 = vpop.permute.xlu1 %4045 }
0x13c5   : > { %v4213_v46 = vcombine.low %v4040_v6, %v4046_v41  ;;  %v4188_v41 = vcombine.low %v4163_v61, %v4171_v54 }
0x13c7   : > { %v4220_v35 = vrot.slane %v4213_v46, %v8292_v49  ;;  %v4195_v32 = vrot.slane %v4188_v41, %v8298_v60 }
0x13c8   : > { %v4053_v16 = vpop.permute.xlu1 %4052 }
0x13c9   : > { %v4221_v51 = vcombine.low %v9125_v42, %v4053_v16  ;;  %v4237_v28 = vcombine.low %v4212_v19, %v4220_v35 }
0x13cb   : > { %v4228_v36 = vrot.slane %v4221_v51, %v8292_v49 }
0x146b   : > { %v4408_v17 = vpop.f32.mrf.mxu1 }
0x146c   : > { %v4409_v43 = vadd.f32 %v9150_v8, %v4408_v17  ;;  %v4138_v17 = vrot.slane %v4131_v44, %v8292_v49  ;;  %v4244_v44 = vrot.slane %v4237_v28, %v8298_v60  ;;  %v7679_v28 = vld [vmem:[%s8158_s15] ss:$0 sps:$4 sm:$0x44]  }
0x146d   : > { %v7479_v40 = vpop.f32.mrf.mxu1 }
0x146e   : > { %v4415_v56 = vrot.slane %v4409_v43, %v8338_v29  ;;  %4605 = vst.msk [vmem:[%s8173_s6 + $0x4] sm:$0x1] %vm1239_vm5, %v4409_v43  ;;  %v4130_v43 = vrot.slane %v4123_v7, %v8292_v49  ;;  %v4172_v40 = vcombine.low %v9039_v47, %v4033_v25  ;;  %v4187_v25 = vrot.slane %v4180_v2, %v8292_v49 }
0x1470   : > { %4421 = vbcast.lane.b32.xlu0 %v4415_v56, 264  ;;  %4417 = vbcast.lane.b32.xlu1 %v4415_v56, 256  ;;  %v4147_v18 = vcombine.low %v4130_v43, %v4138_v17  ;;  %v4179_v47 = vrot.slane %v4172_v40, %v8292_v49 }
0x1472   : > { %v4196_v53 = vcombine.low %v4179_v47, %v4187_v25  ;;  %v4154_v6 = vrot.slane %v4147_v18, %v8298_v60 }
0x1474   : > { %4429 = vbcast.lane.b32.xlu0 %v4415_v56, 280  ;;  %4425 = vbcast.lane.b32.xlu1 %v4415_v56, 272  ;;  %v4155_v24 = vcombine.low %v4146_v39, %v4154_v6  ;;  %v4203_v7 = vrot.slane %v4196_v53, %v8298_v60 }
0x1476   : > { %v4255_v0 = vadd.f32 %v9190_v33, %v4155_v24  ;;  %v4204_v23 = vcombine.low %v4195_v32, %v4203_v7 }
0x1478   : > { %4449 = vrot.lane.b32.xlu1 %v9073_v15, %s7961_s13  ;;  %v4050_v15 = vpop.permute.xlu0 %4049  ;;  %v4256_v63 = vadd.f32 %v9201_v48, %v4204_v23 }
0x147c   : > { %v4056_v13 = vpop.permute.xlu0 %4055 }
0x147d   : > { %v4229_v56 = vcombine.low %v4050_v15, %v4056_v13  ;;  %v4097_v15 = vrot.slane %v4090_v38, %v8298_v60  ;;  %v9193_v13 = vld [vmem:[#allocation8] sm:$0xff] }
0x147f   : > { %v4236_v42 = vrot.slane %v4229_v56, %v8292_v49  ;;  %v4106_v45 = vcombine.low %v4097_v15, %v4105_v62  ;;  %v9198_v56 = vld [vmem:[#allocation8 + $0x18] sm:$0xff] }
0x1481   : > { %v4245_v50 = vcombine.low %v4228_v36, %v4236_v42  ;;  %v4254_v16 = vadd.f32 %v9193_v13, %v4106_v45 }
0x1483   : > { %v4252_v59 = vrot.slane %v4245_v50, %v8298_v60  ;;  %v4611_v50 = vshrl.u32 %v7679_v28, 16 }
0x1485   : > { %v4253_v37 = vcombine.low %v4244_v44, %v4252_v59  ;;  %v9213_v39 = vrot.slane %v4611_v50, 2 }
0x1487   : > { %v4257_v51 = vadd.f32 %v9198_v56, %v4253_v37  ;;  %7329 = vmatmul.mubr.msk.bf16.vlgmr.msra.gmra.mxu0 %vm399_vm1, %v9213_v39 }
0x1488   : > { %4714 = vmatpush1.bf16.msra.mxu0 %v8993_v31  ;;  %4731 = vmatprep.mubr.bf16.mxu0 %v7951_v3 }
0x1489   : > { %7485 = vmatprep.subr.bf16.mxu0 %v7952_v9 }
0x148f   : > { %7331 = vmatmul.mubr.msk.bf16.vlgmr.msra.gmra.mxu0 %vm399_vm1, %v9213_v39 }
0x1490   : > { %7486 = vmatpush3.bf16.msra.mxu0 %v9003_v30  ;;  %7487 = vmatprep.mubr.msk.bf16.mxu0 %vm7953_vm2, %v7952_v9 }
0x1491   : > { %5471 = vmatprep.subr.bf16.mxu0 %v9008_v21 }
0x1497   : > { %7488 = vmatmul.mubr.msk.bf16.vlgmr.msra.gmra.mxu0 %vm399_vm1, %v9213_v39 }
0x1498   : > { %5472 = vmatpush1.bf16.msra.mxu0 %v9013_v27  ;;  %5489 = vmatprep.mubr.bf16.mxu0 %v7951_v3 }
0x1499   : > { %5553 = vmatprep.subr.bf16.mxu0 %v9017_v10 }
0x14e2   : > { %v4422_v17 = vpop.permute.xlu0 %4421  ;;  %v4418_v1 = vpop.permute.xlu1 %4417 }
0x14e3   : > { %v4432_v43 = vmul.f32 %v4422_v17, %v4255_v0  ;;  %v4431_v40 = vmul.f32 %v4418_v1, %v4254_v16 }
0x14e5   : > { %v4436_v20 = vsel %vm1068_vm6, %v4432_v43, 0.0  ;;  %v4435_v46 = vsel %vm1068_vm6, %v4431_v40, 0.0 }
0x14e6   : > { %v4430_v34 = vpop.permute.xlu0 %4429  ;;  %v4426_v2 = vpop.permute.xlu1 %4425  ;;  %v4437_v12 = vadd.f32 %v4436_v20, %v4435_v46 }
0x14e7   : > { %v4434_v57 = vmul.f32 %v4430_v34, %v4257_v51  ;;  %v4433_v58 = vmul.f32 %v4426_v2, %v4256_v63 }
0x14e9   : > { %v4438_v4 = vsel %vm1068_vm6, %v4433_v58, 0.0  ;;  %v4440_v47 = vsel %vm1068_vm6, %v4434_v57, 0.0 }
0x14ea   : > { %v4439_v18 = vadd.f32 %v4438_v4, %v4437_v12  ;;  %v4450_v61 = vpop.permute.xlu1 %4449 }
0x14ec   : > { %v4441_v19 = vadd.f32 %v4440_v47, %v4439_v18 }
0x14ee   : > { %v4442_v35 = vrot.slane %v4441_v19, 4 }
0x14f0   : > { %v4443_v42 = vadd.f32 %v4442_v35, %v4441_v19 }
0x14f2   : > { %v4444_v36 = vrot.slane %v4443_v42, 2 }
0x14f4   : > { %v4445_v38 = vadd.f32 %v4444_v36, %v4443_v42 }
0x14f6   : > { %v4446_v25 = vrot.slane %v4445_v38, 1 }
0x14f8   : > { %v4447_v54 = vadd.f32 %v4446_v25, %v4445_v38 }
0x14fa   : > { %v4452_v53 = vadd.f32 %v4450_v61, %v4447_v54 }
0x14fc   : > { %v4453_v62 = vmax.f32 %v4452_v53, 0.0 }
0x14fe   : > { %4458 = vrot.lane.b32.xlu1 %v4453_v62, %s7957_s20  ;;  %4455 = vrot.lane.b32.xlu0 %v4453_v62, %s7955_s12 }
0x1502   : > { %4464 = vrot.lane.b32.xlu1 %v4453_v62, %s7956_s17  ;;  %4461 = vrot.lane.b32.xlu0 %v4453_v62, %s7954_s11 }
0x1506   : > { %4470 = vrot.lane.b32.xlu1 %v4453_v62, %s7958_s8  ;;  %4467 = vrot.lane.b32.xlu0 %v4453_v62, %s7959_s29 }
0x150a   : > { %4473 = vrot.lane.b32.xlu0 %v4453_v62, %s7960_s30 }
0x1547   : > { %v9239_v40 = vpop.f32.mrf.mxu0 }
0x1549   : > { %v9243_v20 = vpop.f32.mrf.mxu0 }
0x154b   : > { %v4655_v46 = vpop.f32.mrf.mxu0 }
0x154d   : > { %v4656_v51 = vpop.f32.mrf.mxu0 }
0x154f   : > { %v9247_v63 = vpop.f32.mrf.mxu0 }
0x1551   : > { %v9251_v34 = vpop.f32.mrf.mxu0 }
0x1553   : > { %v4737_v2 = vpop.f32.mrf.mxu0 }
0x1555   : > { %v4738_v57 = vpop.f32.mrf.mxu0 }
0x1557   : > { %v4815_v58 = vpop.f32.mrf.mxu0 }
0x1559   : > { %v7489_v12 = vpop.f32.mrf.mxu0 }
0x155b   : > { %v4818_v4 = vpop.f32.mrf.mxu0 }
0x155d   : > { %v7490_v18 = vpop.f32.mrf.mxu0 }
0x1570   : > { %v4459_v31 = vpop.permute.xlu1 %4458  ;;  %v4456_v6 = vpop.permute.xlu0 %4455 }
0x1571   : > { %v4476_v44 = vcombine.low %v4453_v62, %v4459_v31 }
0x1573   : > { %v4483_v32 = vrot.slane %v4476_v44, %v8292_v49 }
0x1574   : > { %v4465_v15 = vpop.permute.xlu1 %4464  ;;  %v4462_v41 = vpop.permute.xlu0 %4461 }
0x1575   : > { %v4484_v45 = vcombine.low %v4456_v6, %v4462_v41 }
0x1577   : > { %v4491_v59 = vrot.slane %v4484_v45, %v8292_v49 }
0x1578   : > { %v4471_v30 = vpop.permute.xlu1 %4470  ;;  %v4468_v24 = vpop.permute.xlu0 %4467 }
0x1579   : > { %v4492_v21 = vcombine.low %v4465_v15, %v4471_v30  ;;  %v4508_v27 = vcombine.low %v4483_v32, %v4491_v59 }
0x157b   : > { %v4499_v16 = vrot.slane %v4492_v21, %v8292_v49  ;;  %v4515_v23 = vrot.slane %v4508_v27, %v8298_v60 }
0x157c   : > { %v4474_v7 = vpop.permute.xlu0 %4473 }
0x157d   : > { %v4500_v0 = vcombine.low %v4468_v24, %v4474_v7 }
0x157f   : > { %v4507_v10 = vrot.slane %v4500_v0, %v8292_v49 }
0x1581   : > { %v4516_v37 = vcombine.low %v4499_v16, %v4507_v10 }
0x1583   : > { %v4523_v17 = vrot.slane %v4516_v37, %v8298_v60 }
0x1585   : > { %v4524_v1 = vcombine.low %v4515_v23, %v4523_v17 }
0x1587   : > { %v4525_v43 = vsel %vm961_vm3, %v4524_v1, -inf }
0x1588   : > { %4526 = vmax.xlane.f32.xlu1 %v4525_v43 }
0x1599   : > { %4822 = vrot.lane.b32.xlu1 %v9239_v40, %s7961_s13 }
0x159d   : > { %4825 = vrot.lane.b32.xlu1 %v9239_v40, %s7962_s16 }
0x15a1   : > { %4828 = vrot.lane.b32.xlu1 %v9239_v40, %s7963_s18 }
0x15a5   : > { %4832 = vrot.lane.b32.xlu1 %v9243_v20, %s7961_s13 }
0x15a9   : > { %4838 = vrot.lane.b32.xlu1 %v9243_v20, %s7963_s18 }
0x1611   : > { %v4527_v47 = vpop.xlane.xlu1 %4526 }
0x1612   : > { %v4532_v19 = vrot.slane %v4527_v47, %v8325_v22 }
0x1614   : > { %7483 = vmatmul.mubr.msk.f32.vlgmr.msra.gmra.mxu1 %vm972_vm4, %v4532_v19 }
0x1615   : > { %4673 = vmatpush1.bf16.msra.mxu1 %v9047_v55  ;;  %4690 = vmatprep.mubr.bf16.mxu1 %v7951_v3  ;;  %v9274_v55 = vadd.f32 %v9070_v26, %v4815_v58  ;;  %v4823_v58 = vpop.permute.xlu1 %4822 }
0x1616   : > { %4754 = vmatprep.subr.bf16.mxu1 %v9051_v14 }
0x1618   : > { %7330 = vmatmul.mubr.msk.bf16.vlgmr.msra.gmra.mxu1 %vm399_vm1, %v9213_v39 }
0x1619   : > { %4755 = vmatpush1.bf16.msra.mxu1 %v9056_v11  ;;  %4772 = vmatprep.mubr.bf16.mxu1 %v7951_v3  ;;  %v4826_v12 = vpop.permute.xlu1 %4825 }
0x161a   : > { %7491 = vmatprep.subr.mxu1 %v7952_v9 }
0x161d   : > { %v4829_v4 = vpop.permute.xlu1 %4828 }
0x1620   : > { %7332 = vmatmul.mubr.msk.bf16.vlgmr.msra.gmra.mxu1 %vm399_vm1, %v9213_v39 }
0x1621   : > { %7492 = vmatpush3.msra.mxu1 %v9139_v5  ;;  %7493 = vmatprep.mubr.msk.f32.mxu1 %vm7953_vm2, %v7952_v9  ;;  %v4833_v18 = vpop.permute.xlu1 %4832 }
0x1622   : > { %7496 = vmatprep.subr.mxu1 %v7952_v9 }
0x16d4   : > { %v4601_v14 = vpop.f32.mrf.mxu1 }
0x16d5   : > { %v4602_v11 = vadd.f32 %v9150_v8, %v4601_v14 }
0x16d6   : > { %v7484_v35 = vpop.f32.mrf.mxu1 }
0x16d7   : > { %v5102_v42 = vadd.f32 %v9274_v55, %v4602_v11 }
0x16d8   : > { %v9278_v36 = vpop.f32.mrf.mxu1 }
0x16d9   : > { %v5103_v38 = vmax.f32 %v5102_v42, 0.0  ;;  %4842 = vrot.lane.b32.xlu1 %v9278_v36, %s7961_s13 }
0x16da   : > { %v9282_v25 = vpop.f32.mrf.mxu1 }
0x16db   : > { %5105 = vrot.lane.b32.xlu0 %v5103_v38, %s7955_s12 }
0x16dc   : > { %v4696_v54 = vpop.f32.mrf.mxu1 }
0x16dd   : > { %4845 = vrot.lane.b32.xlu1 %v9278_v36, %s7962_s16 }
0x16de   : > { %v4697_v26 = vpop.f32.mrf.mxu1 }
0x16df   : > { %5108 = vrot.lane.b32.xlu0 %v5103_v38, %s7957_s20 }
0x16e0   : > { %v9320_v10 = vpop.f32.mrf.mxu1 }
0x16e1   : > { %4848 = vrot.lane.b32.xlu1 %v9278_v36, %s7963_s18 }
0x16e2   : > { %v9324_v37 = vpop.f32.mrf.mxu1 }
0x16e3   : > { %5111 = vrot.lane.b32.xlu0 %v5103_v38, %s7954_s11 }
0x16e4   : > { %v4778_v23 = vpop.f32.mrf.mxu1 }
0x16e5   : > { %4852 = vrot.lane.b32.xlu1 %v9282_v25, %s7961_s13 }
0x16e6   : > { %v4779_v17 = vpop.f32.mrf.mxu1 }
0x16e7   : > { %5114 = vrot.lane.b32.xlu0 %v5103_v38, %s7956_s17 }
0x16e9   : > { %4858 = vrot.lane.b32.xlu1 %v9282_v25, %s7963_s18 }
0x16eb   : > { %5117 = vrot.lane.b32.xlu0 %v5103_v38, %s7959_s29 }
0x16ed   : > { %4865 = vrot.lane.b32.xlu1 %v9247_v63, %s7962_s16 }
0x16ef   : > { %5120 = vrot.lane.b32.xlu0 %v5103_v38, %s7958_s8 }
0x16f1   : > { %4872 = vrot.lane.b32.xlu1 %v9251_v34, %s7961_s13 }
0x16f3   : > { %5123 = vrot.lane.b32.xlu0 %v5103_v38, %s7960_s30 }
0x16f5   : > { %4878 = vrot.lane.b32.xlu1 %v9251_v34, %s7963_s18 }
0x16f9   : > { %4885 = vrot.lane.b32.xlu1 %v9320_v10, %s7962_s16 }
0x16fd   : > { %4892 = vrot.lane.b32.xlu1 %v9324_v37, %s7961_s13 }
0x1701   : > { %4898 = vrot.lane.b32.xlu1 %v9324_v37, %s7963_s18 }
0x174d   : > { %v5106_v61 = vpop.permute.xlu0 %5105 }
0x1751   : > { %v5109_v53 = vpop.permute.xlu0 %5108 }
0x1752   : > { %v5126_v6 = vcombine.low %v5103_v38, %v5109_v53 }
0x1754   : > { %v5133_v30 = vrot.slane %v5126_v6, %v8292_v49 }
0x1755   : > { %v5112_v62 = vpop.permute.xlu0 %5111 }
0x1756   : > { %v5134_v39 = vcombine.low %v5106_v61, %v5112_v62 }
0x1758   : > { %v5141_v15 = vrot.slane %v5134_v39, %v8292_v49 }
0x1759   : > { %v5115_v28 = vpop.permute.xlu0 %5114 }
0x175a   : > { %v5158_v44 = vcombine.low %v5133_v30, %v5141_v15 }
0x175c   : > { %v5165_v32 = vrot.slane %v5158_v44, %v8298_v60  ;;  %v4909_v44 = vcombine.low %v4823_v58, %v4829_v4 }
0x175d   : > { %v5118_v50 = vpop.permute.xlu0 %5117 }
0x1761   : > { %v5121_v31 = vpop.permute.xlu0 %5120 }
0x1762   : > { %v5142_v41 = vcombine.low %v5115_v28, %v5121_v31 }
0x1764   : > { %v5149_v59 = vrot.slane %v5142_v41, %v8292_v49 }
0x1765   : > { %v5124_v45 = vpop.permute.xlu0 %5123 }
0x1766   : > { %v5150_v24 = vcombine.low %v5118_v50, %v5124_v45 }
0x1768   : > { %v5157_v21 = vrot.slane %v5150_v24, %v8292_v49  ;;  %v4901_v24 = vcombine.low %v9239_v40, %v4826_v12 }
0x176a   : > { %v5166_v7 = vcombine.low %v5149_v59, %v5157_v21 }
0x176c   : > { %v5173_v0 = vrot.slane %v5166_v7, %v8298_v60 }
0x176e   : > { %v5174_v27 = vcombine.low %v5165_v32, %v5173_v0 }
0x1770   : > { %v5175_v16 = vsel %vm961_vm3, %v5174_v27, -inf }
0x1771   : > { %5176 = vmax.xlane.f32.xlu0 %v5175_v16 }
0x1787   : > { %4835 = vrot.lane.b32.xlu0 %v9243_v20, %s7962_s16 }
0x178b   : > { %4855 = vrot.lane.b32.xlu0 %v9282_v25, %s7962_s16 }
0x178f   : > { %4862 = vrot.lane.b32.xlu0 %v9247_v63, %s7961_s13 }
0x1793   : > { %4868 = vrot.lane.b32.xlu0 %v9247_v63, %s7963_s18 }
0x1797   : > { %4875 = vrot.lane.b32.xlu0 %v9251_v34, %s7962_s16 }
0x179b   : > { %4882 = vrot.lane.b32.xlu0 %v9320_v10, %s7961_s13 }
0x179f   : > { %4888 = vrot.lane.b32.xlu0 %v9320_v10, %s7963_s18 }
0x17a3   : > { %4895 = vrot.lane.b32.xlu0 %v9324_v37, %s7962_s16 }
0x17fa   : > { %v5177_v1 = vpop.xlane.xlu0 %5176 }
0x17fb   : > { %v5182_v43 = vrot.slane %v5177_v1, %v8325_v22  ;;  %v4908_v1 = vrot.slane %v4901_v24, %v8292_v49 }
0x17fd   : > { %7494 = vmatmul.mubr.msk.f32.vlgmr.msra.gmra.mxu1 %vm972_vm4, %v5182_v43  ;;  %v4916_v43 = vrot.slane %v4909_v44, %v8292_v49 }
0x17fe   : > { %7497 = vmatpush3.msra.mxu1 %v9139_v5  ;;  %7498 = vmatprep.mubr.msk.f32.mxu1 %vm7953_vm2, %v7952_v9  ;;  %v4836_v35 = vpop.permute.xlu0 %4835 }
0x17ff   : > { %5512 = vmatprep.subr.bf16.mxu1 %v9144_v52  ;;  %v4839_v52 = vpop.permute.xlu1 %4838  ;;  %v4917_v45 = vcombine.low %v9243_v20, %v4836_v35 }
0x1800   : > { %v4925_v59 = vcombine.low %v4833_v18, %v4839_v52 }
0x1802   : > { %v4856_v38 = vpop.permute.xlu0 %4855 }
0x1803   : > { %v4843_v47 = vpop.permute.xlu1 %4842  ;;  %v4966_v30 = vcombine.low %v9282_v25, %v4856_v38 }
0x1805   : > { %v4973_v16 = vrot.slane %v4966_v30, %v8292_v49 }
0x1806   : > { %v4863_v26 = vpop.permute.xlu0 %4862 }
0x1807   : > { %v4846_v19 = vpop.permute.xlu1 %4845 }
0x1808   : > { %v4950_v6 = vcombine.low %v9278_v36, %v4846_v19  ;;  %v4924_v36 = vrot.slane %v4917_v45, %v8292_v49 }
0x180a   : > { %v4869_v53 = vpop.permute.xlu0 %4868  ;;  %v4957_v32 = vrot.slane %v4950_v6, %v8292_v49 }
0x180b   : > { %v4849_v14 = vpop.permute.xlu1 %4848 }
0x180c   : > { %v4958_v15 = vcombine.low %v4843_v47, %v4849_v14  ;;  %v4933_v47 = vcombine.low %v4908_v1, %v4916_v43 }
0x180e   : > { %v4876_v28 = vpop.permute.xlu0 %4875  ;;  %v4965_v0 = vrot.slane %v4958_v15, %v8292_v49 }
0x180f   : > { %v4853_v11 = vpop.permute.xlu1 %4852  ;;  %v5015_v20 = vcombine.low %v9251_v34, %v4876_v28 }
0x1811   : > { %v5022_v34 = vrot.slane %v5015_v20, %v8292_v49 }
0x1813   : > { %v4859_v42 = vpop.permute.xlu1 %4858 }
0x1814   : > { %v4974_v41 = vcombine.low %v4853_v11, %v4859_v42 }
0x1816   : > { %v4981_v27 = vrot.slane %v4974_v41, %v8292_v49 }
0x1817   : > { %v4866_v54 = vpop.permute.xlu1 %4865 }
0x1818   : > { %v4999_v58 = vcombine.low %v9247_v63, %v4866_v54  ;;  %v4990_v4 = vcombine.low %v4973_v16, %v4981_v27 }
0x181a   : > { %v5006_v11 = vrot.slane %v4999_v58, %v8292_v49  ;;  %v7680_v58 = vld [vmem:[%s8158_s15] ss:$0 sps:$4 sm:$0x88]  }
0x181b   : > { %v4873_v61 = vpop.permute.xlu1 %4872 }
0x181f   : > { %v4879_v62 = vpop.permute.xlu1 %4878 }
0x1823   : > { %v4886_v50 = vpop.permute.xlu1 %4885 }
0x1824   : > { %v5048_v25 = vcombine.low %v9320_v10, %v4886_v50 }
0x1826   : > { %v5055_v10 = vrot.slane %v5048_v25, %v8292_v49 }
0x1827   : > { %v4893_v39 = vpop.permute.xlu1 %4892 }
0x182b   : > { %v4899_v21 = vpop.permute.xlu1 %4898 }
0x182c   : > { %v5072_v40 = vcombine.low %v4893_v39, %v4899_v21 }
0x18bd   : > { %v5251_v46 = vpop.f32.mrf.mxu1 }
0x18be   : > { %v5252_v51 = vadd.f32 %v9150_v8, %v5251_v46  ;;  %v4932_v46 = vrot.slane %v4925_v59, %v8292_v49 }
0x18bf   : > { %v7495_v2 = vpop.f32.mrf.mxu1 }
0x18c0   : > { %v5258_v57 = vrot.slane %v5252_v51, %v8338_v29  ;;  %5448 = vst.msk [vmem:[%s8173_s6 + $0x5] sm:$0x1] %vm1239_vm5, %v5252_v51  ;;  %v5023_v51 = vcombine.low %v4873_v61, %v4879_v62  ;;  %v4982_v2 = vcombine.low %v4957_v32, %v4965_v0  ;;  %v4941_v12 = vcombine.low %v4924_v36, %v4932_v46 }
0x18c1   : > { %v4940_v61 = vrot.slane %v4933_v47, %v8298_v60 }
0x18c2   : > { %5264 = vbcast.lane.b32.xlu1 %v5258_v57, 264  ;;  %5260 = vbcast.lane.b32.xlu0 %v5258_v57, 256  ;;  %v5030_v19 = vrot.slane %v5023_v51, %v8292_v49  ;;  %v4948_v35 = vrot.slane %v4941_v12, %v8298_v60  ;;  %v4989_v54 = vrot.slane %v4982_v2, %v8298_v60  ;;  %v9393_v12 = vrot.slane %v7680_v58, 3 }
0x18c4   : > { %v5039_v63 = vcombine.low %v5022_v34, %v5030_v19  ;;  %v4949_v62 = vcombine.low %v4940_v61, %v4948_v35  ;;  %7337 = vmatmul.mubr.msk.bf16.vlgmr.msra.gmra.mxu0 %vm399_vm1, %v9393_v12  ;;  %v9409_v34 = vld [vmem:[#allocation6 + $0x20] ss:$36 sps:$4 sm:$0xff]  }
0x18c5   : > { %5571 = vmatprep.mubr.bf16.mxu0 %v7951_v3 }
0x18c6   : > { %5272 = vbcast.lane.b32.xlu1 %v5258_v57, 280  ;;  %5268 = vbcast.lane.b32.xlu0 %v5258_v57, 272  ;;  %v5007_v57 = vcombine.low %v4863_v26, %v4869_v53  ;;  %v4997_v26 = vrot.slane %v4990_v4, %v8298_v60  ;;  %v5046_v39 = vrot.slane %v5039_v63, %v8298_v60  ;;  %v9399_v4 = vld [vmem:[#allocation6 + $0x10] ss:$36 sps:$4 sm:$0xff]  }
0x18c7   : > { %v5097_v15 = vadd.f32 %v9193_v13, %v4949_v62  ;;  %5554 = vmatpush1.bf16.msra.mxu0 %v9399_v4 }
0x18c8   : > { %v5014_v14 = vrot.slane %v5007_v57, %v8292_v49  ;;  %v4998_v28 = vcombine.low %v4989_v54, %v4997_v26  ;;  %7501 = vmatprep.subr.bf16.mxu0 %v7952_v9 }
0x18ca   : > { %5292 = vrot.lane.b32.xlu0 %v9274_v55, %s7961_s13  ;;  %v4883_v55 = vpop.permute.xlu0 %4882  ;;  %v5031_v53 = vcombine.low %v5006_v11, %v5014_v14  ;;  %v5098_v6 = vadd.f32 %v9190_v33, %v4998_v28 }
0x18cc   : > { %7339 = vmatmul.mubr.msk.bf16.vlgmr.msra.gmra.mxu0 %vm399_vm1, %v9393_v12 }
0x18cd   : > { %7502 = vmatpush3.bf16.msra.mxu0 %v9409_v34  ;;  %7503 = vmatprep.mubr.msk.bf16.mxu0 %vm7953_vm2, %v7952_v9 }
0x18ce   : > { %v4889_v31 = vpop.permute.xlu0 %4888 }
0x18cf   : > { %v5056_v23 = vcombine.low %v4883_v55, %v4889_v31  ;;  %v5038_v31 = vrot.slane %v5031_v53, %v8298_v60 }
0x18d1   : > { %v5063_v18 = vrot.slane %v5056_v23, %v8292_v49  ;;  %v5047_v45 = vcombine.low %v5038_v31, %v5046_v39 }
0x18d2   : > { %v4896_v7 = vpop.permute.xlu0 %4895 }
0x18d3   : > { %v5064_v17 = vcombine.low %v9324_v37, %v4896_v7  ;;  %v5079_v37 = vrot.slane %v5072_v40, %v8292_v49  ;;  %v5080_v42 = vcombine.low %v5055_v10, %v5063_v18  ;;  %v5099_v0 = vadd.f32 %v9201_v48, %v5047_v45  ;;  %v7716_v10 = vld [vmem:[#allocation6 + $0x4] ss:$36 sps:$4 sm:$0xff]  }
0x18d4   : > { %6314 = vmatprep.subr.bf16.mxu0 %v7716_v10  ;;  %7504 = vmatmul.mubr.msk.bf16.vlgmr.msra.gmra.mxu0 %vm399_vm1, %v9393_v12  ;;  %v7717_v18 = vld [vmem:[#allocation6] ss:$36 sps:$4 sm:$0xff]  }
0x18d5   : > { %v5071_v52 = vrot.slane %v5064_v17, %v8292_v49  ;;  %v5087_v50 = vrot.slane %v5080_v42, %v8298_v60  ;;  %6315 = vmatpush1.bf16.msra.mxu0 %v7717_v18  ;;  %6332 = vmatprep.mubr.bf16.mxu0 %v7951_v3 }
0x18d7   : > { %v5088_v38 = vcombine.low %v5071_v52, %v5079_v37  ;;  %v7718_v37 = vld [vmem:[#allocation6 + $0x14] ss:$36 sps:$4 sm:$0xff]  }
0x18d8   : > { %6396 = vmatprep.subr.bf16.mxu0 %v7718_v37 }
0x18d9   : > { %v5095_v55 = vrot.slane %v5088_v38, %v8298_v60 }
0x18db   : > { %v5096_v41 = vcombine.low %v5087_v50, %v5095_v55 }
0x18dd   : > { %v5100_v32 = vadd.f32 %v9198_v56, %v5096_v41 }
0x1934   : > { %v5265_v30 = vpop.permute.xlu1 %5264  ;;  %v5261_v24 = vpop.permute.xlu0 %5260 }
0x1935   : > { %v5275_v44 = vmul.f32 %v5265_v30, %v5098_v6  ;;  %v5274_v59 = vmul.f32 %v5261_v24, %v5097_v15 }
0x1937   : > { %v5279_v21 = vsel %vm1068_vm6, %v5275_v44, 0.0  ;;  %v5278_v7 = vsel %vm1068_vm6, %v5274_v59, 0.0 }
0x1938   : > { %v5273_v27 = vpop.permute.xlu1 %5272  ;;  %v5269_v36 = vpop.permute.xlu0 %5268  ;;  %v5280_v13 = vadd.f32 %v5279_v21, %v5278_v7 }
0x1939   : > { %v5277_v16 = vmul.f32 %v5273_v27, %v5100_v32  ;;  %v5276_v33 = vmul.f32 %v5269_v36, %v5099_v0 }
0x193b   : > { %v5281_v20 = vsel %vm1068_vm6, %v5276_v33, 0.0  ;;  %v5283_v23 = vsel %vm1068_vm6, %v5277_v16, 0.0 }
0x193c   : > { %v5282_v25 = vadd.f32 %v5281_v20, %v5280_v13  ;;  %v5293_v2 = vpop.permute.xlu0 %5292  ;;  %v9444_v13 = vld [vmem:[#allocation6 + $0x8] ss:$36 sps:$4 sm:$0xff]   ;;  %v9448_v20 = vld [vmem:[#allocation6 + $0x1c] ss:$36 sps:$4 sm:$0xff]  }
0x193e   : > { %v5284_v40 = vadd.f32 %v5283_v23, %v5282_v25  ;;  %v9453_v25 = vld [vmem:[#allocation6 + $0x18] ss:$36 sps:$4 sm:$0xff]   ;;  %v9467_v23 = vld [vmem:[%s9839_s2] sm:$0x1] }
0x1940   : > { %v5285_v17 = vrot.slane %v5284_v40, 4 }
0x1942   : > { %v5286_v1 = vadd.f32 %v5285_v17, %v5284_v40 }
0x1944   : > { %v5287_v43 = vrot.slane %v5286_v1, 2 }
0x1946   : > { %v5288_v46 = vadd.f32 %v5287_v43, %v5286_v1 }
0x1948   : > { %v5289_v51 = vrot.slane %v5288_v46, 1 }
0x194a   : > { %v5290_v56 = vadd.f32 %v5289_v51, %v5288_v46 }
0x194c   : > { %v5295_v48 = vadd.f32 %v5293_v2, %v5290_v56 }
0x194e   : > { %v5296_v57 = vmax.f32 %v5295_v48, 0.0 }
0x1950   : > { %5301 = vrot.lane.b32.xlu0 %v5296_v57, %s7957_s20  ;;  %5298 = vrot.lane.b32.xlu1 %v5296_v57, %s7955_s12 }
0x1954   : > { %5307 = vrot.lane.b32.xlu0 %v5296_v57, %s7956_s17  ;;  %5304 = vrot.lane.b32.xlu1 %v5296_v57, %s7954_s11 }
0x1958   : > { %5313 = vrot.lane.b32.xlu0 %v5296_v57, %s7958_s8  ;;  %5310 = vrot.lane.b32.xlu1 %v5296_v57, %s7959_s29 }
0x195c   : > { %5316 = vrot.lane.b32.xlu1 %v5296_v57, %s7960_s30 }
0x1984   : > { %v9424_v41 = vpop.f32.mrf.mxu0 }
0x1986   : > { %v9428_v45 = vpop.f32.mrf.mxu0 }
0x1988   : > { %v5495_v30 = vpop.f32.mrf.mxu0 }
0x1989   : > { %v7724_v30 = vld [vmem:[#allocation6 + $0xc] ss:$36 sps:$4 sm:$0xff]  }
0x198a   : > { %v5496_v24 = vpop.f32.mrf.mxu0 }
0x198c   : > { %v9432_v44 = vpop.f32.mrf.mxu0 }
0x198e   : > { %v9436_v59 = vpop.f32.mrf.mxu0 }
0x1990   : > { %v5577_v21 = vpop.f32.mrf.mxu0 }
0x1991   : > { %v9544_v21 = vld [vmem:[%s9842_s5] sm:$0x1] }
0x1992   : > { %v5578_v7 = vpop.f32.mrf.mxu0 }
0x1994   : > { %v5655_v32 = vpop.f32.mrf.mxu0 }
0x1995   : > { %v9470_v40 = vadd.f32 %v9467_v23, %v5655_v32 }
0x1996   : > { %v7505_v0 = vpop.f32.mrf.mxu0 }
0x1998   : > { %v5658_v27 = vpop.f32.mrf.mxu0 }
0x199a   : > { %v7506_v36 = vpop.f32.mrf.mxu0 }
0x19c2   : > { %v5302_v52 = vpop.permute.xlu0 %5301  ;;  %v5299_v47 = vpop.permute.xlu1 %5298 }
0x19c3   : > { %v5319_v42 = vcombine.low %v5296_v57, %v5302_v52 }
0x19c5   : > { %v5326_v61 = vrot.slane %v5319_v42, %v8292_v49 }
0x19c6   : > { %v5308_v19 = vpop.permute.xlu0 %5307  ;;  %v5305_v14 = vpop.permute.xlu1 %5304 }
0x19c7   : > { %v5327_v11 = vcombine.low %v5299_v47, %v5305_v14 }
0x19c9   : > { %v5334_v38 = vrot.slane %v5327_v11, %v8292_v49 }
0x19ca   : > { %v5314_v63 = vpop.permute.xlu0 %5313  ;;  %v5311_v35 = vpop.permute.xlu1 %5310 }
0x19cb   : > { %v5335_v54 = vcombine.low %v5308_v19, %v5314_v63  ;;  %v5351_v62 = vcombine.low %v5326_v61, %v5334_v38 }
0x19cd   : > { %v5342_v28 = vrot.slane %v5335_v54, %v8292_v49  ;;  %v5358_v39 = vrot.slane %v5351_v62, %v8298_v60 }
0x19ce   : > { %v5317_v26 = vpop.permute.xlu1 %5316 }
0x19cf   : > { %v5343_v53 = vcombine.low %v5311_v35, %v5317_v26 }
0x19d1   : > { %v5350_v50 = vrot.slane %v5343_v53, %v8292_v49 }
0x19d3   : > { %v5359_v55 = vcombine.low %v5342_v28, %v5350_v50 }
0x19d5   : > { %v5366_v31 = vrot.slane %v5359_v55, %v8298_v60 }
0x19d7   : > { %v5367_v6 = vcombine.low %v5358_v39, %v5366_v31 }
0x19d9   : > { %v5368_v15 = vsel %vm961_vm3, %v5367_v6, -inf }
0x19da   : > { %5369 = vmax.xlane.f32.xlu0 %v5368_v15  ;;  %v9536_v15 = vld [vmem:[#allocation9] sm:$0xff] }
0x19f0   : > { %5662 = vrot.lane.b32.xlu0 %v9424_v41, %s7961_s13 }
0x19f4   : > { %5665 = vrot.lane.b32.xlu0 %v9424_v41, %s7962_s16 }
0x19f8   : > { %5668 = vrot.lane.b32.xlu0 %v9424_v41, %s7963_s18 }
0x19fc   : > { %5672 = vrot.lane.b32.xlu0 %v9428_v45, %s7961_s13 }
0x1a00   : > { %5675 = vrot.lane.b32.xlu0 %v9428_v45, %s7962_s16 }
0x1a63   : > { %v5370_v16 = vpop.xlane.xlu0 %5369 }
0x1a64   : > { %v5375_v33 = vrot.slane %v5370_v16, %v8325_v22 }
0x1a66   : > { %7499 = vmatmul.mubr.msk.f32.vlgmr.msra.gmra.mxu1 %vm972_vm4, %v5375_v33 }
0x1a67   : > { %5513 = vmatpush1.bf16.msra.mxu1 %v9444_v13  ;;  %5530 = vmatprep.mubr.bf16.mxu1 %v7951_v3  ;;  %v5663_v27 = vpop.permute.xlu0 %5662 }
0x1a68   : > { %5594 = vmatprep.subr.bf16.mxu1 %v9448_v20 }
0x1a6a   : > { %7338 = vmatmul.mubr.msk.bf16.vlgmr.msra.gmra.mxu1 %vm399_vm1, %v9393_v12 }
0x1a6b   : > { %5595 = vmatpush1.bf16.msra.mxu1 %v9453_v25  ;;  %5612 = vmatprep.mubr.bf16.mxu1 %v7951_v3  ;;  %v5666_v36 = vpop.permute.xlu0 %5665 }
0x1a6c   : > { %7507 = vmatprep.subr.mxu1 %v7952_v9 }
0x1a6f   : > { %v5669_v16 = vpop.permute.xlu0 %5668 }
0x1a72   : > { %7340 = vmatmul.mubr.msk.bf16.vlgmr.msra.gmra.mxu1 %vm399_vm1, %v9393_v12 }
0x1a73   : > { %7508 = vmatpush3.msra.mxu1 %v9139_v5  ;;  %7509 = vmatprep.mubr.msk.f32.mxu1 %vm7953_vm2, %v7952_v9  ;;  %v5673_v33 = vpop.permute.xlu0 %5672 }
0x1a74   : > { %7512 = vmatprep.subr.mxu1 %v7952_v9 }
0x1b26   : > { %v5444_v17 = vpop.f32.mrf.mxu1 }
0x1b27   : > { %v5445_v1 = vadd.f32 %v9150_v8, %v5444_v17  ;;  %v5676_v17 = vpop.permute.xlu0 %5675 }
0x1b28   : > { %v7500_v43 = vpop.f32.mrf.mxu1 }
0x1b29   : > { %v5942_v46 = vadd.f32 %v9470_v40, %v5445_v1 }
0x1b2a   : > { %v9474_v5 = vpop.f32.mrf.mxu1 }
0x1b2b   : > { %v5943_v51 = vmax.f32 %v5942_v46, 0.0  ;;  %5682 = vrot.lane.b32.xlu0 %v9474_v5, %s7961_s13 }
0x1b2c   : > { %v9478_v56 = vpop.f32.mrf.mxu1 }
0x1b2d   : > { %5945 = vrot.lane.b32.xlu1 %v5943_v51, %s7955_s12 }
0x1b2e   : > { %v5536_v2 = vpop.f32.mrf.mxu1 }
0x1b2f   : > { %5685 = vrot.lane.b32.xlu0 %v9474_v5, %s7962_s16 }
0x1b30   : > { %v5537_v48 = vpop.f32.mrf.mxu1 }
0x1b31   : > { %5948 = vrot.lane.b32.xlu1 %v5943_v51, %s7957_s20 }
0x1b32   : > { %v9518_v28 = vpop.f32.mrf.mxu1 }
0x1b33   : > { %5688 = vrot.lane.b32.xlu0 %v9474_v5, %s7963_s18 }
0x1b34   : > { %v9522_v50 = vpop.f32.mrf.mxu1 }
0x1b35   : > { %5951 = vrot.lane.b32.xlu1 %v5943_v51, %s7954_s11 }
0x1b36   : > { %v5618_v55 = vpop.f32.mrf.mxu1 }
0x1b37   : > { %5692 = vrot.lane.b32.xlu0 %v9478_v56, %s7961_s13 }
0x1b38   : > { %v5619_v39 = vpop.f32.mrf.mxu1 }
0x1b39   : > { %5954 = vrot.lane.b32.xlu1 %v5943_v51, %s7956_s17 }
0x1b3b   : > { %5698 = vrot.lane.b32.xlu0 %v9478_v56, %s7963_s18 }
0x1b3d   : > { %5957 = vrot.lane.b32.xlu1 %v5943_v51, %s7959_s29 }
0x1b3f   : > { %5705 = vrot.lane.b32.xlu0 %v9432_v44, %s7962_s16 }
0x1b41   : > { %5960 = vrot.lane.b32.xlu1 %v5943_v51, %s7958_s8 }
0x1b43   : > { %5712 = vrot.lane.b32.xlu0 %v9436_v59, %s7961_s13 }
0x1b45   : > { %5963 = vrot.lane.b32.xlu1 %v5943_v51, %s7960_s30 }
0x1b47   : > { %5718 = vrot.lane.b32.xlu0 %v9436_v59, %s7963_s18 }
0x1b4b   : > { %5725 = vrot.lane.b32.xlu0 %v9518_v28, %s7962_s16 }
0x1b4f   : > { %5732 = vrot.lane.b32.xlu0 %v9522_v50, %s7961_s13 }
0x1b53   : > { %5738 = vrot.lane.b32.xlu0 %v9522_v50, %s7963_s18 }
0x1b9d   : > { %v5683_v1 = vpop.permute.xlu0 %5682 }
0x1b9f   : > { %v5946_v8 = vpop.permute.xlu1 %5945 }
0x1ba1   : > { %v5686_v43 = vpop.permute.xlu0 %5685 }
0x1ba3   : > { %v5949_v57 = vpop.permute.xlu1 %5948 }
0x1ba4   : > { %v5966_v52 = vcombine.low %v5943_v51, %v5949_v57 }
0x1ba5   : > { %v5689_v46 = vpop.permute.xlu0 %5688 }
0x1ba6   : > { %v5973_v11 = vrot.slane %v5966_v52, %v8292_v49 }
0x1ba7   : > { %v5952_v58 = vpop.permute.xlu1 %5951 }
0x1ba8   : > { %v5974_v18 = vcombine.low %v5946_v8, %v5952_v58 }
0x1ba9   : > { %v5693_v51 = vpop.permute.xlu0 %5692 }
0x1baa   : > { %v5981_v47 = vrot.slane %v5974_v18, %v8292_v49 }
0x1bab   : > { %v5955_v12 = vpop.permute.xlu1 %5954 }
0x1bac   : > { %v5998_v35 = vcombine.low %v5973_v11, %v5981_v47  ;;  %v5798_v11 = vcombine.low %v5683_v1, %v5689_v46 }
0x1bad   : > { %v5699_v48 = vpop.permute.xlu0 %5698 }
0x1bae   : > { %v6005_v26 = vrot.slane %v5998_v35, %v8298_v60  ;;  %v5805_v55 = vrot.slane %v5798_v11, %v8292_v49 }
0x1baf   : > { %v5958_v10 = vpop.permute.xlu1 %5957 }
0x1bb1   : > { %v5706_v57 = vpop.permute.xlu0 %5705 }
0x1bb3   : > { %v5961_v37 = vpop.permute.xlu1 %5960 }
0x1bb4   : > { %v5982_v19 = vcombine.low %v5955_v12, %v5961_v37 }
0x1bb5   : > { %v5713_v12 = vpop.permute.xlu0 %5712 }
0x1bb6   : > { %v5989_v42 = vrot.slane %v5982_v19, %v8292_v49 }
0x1bb7   : > { %v5964_v14 = vpop.permute.xlu1 %5963 }
0x1bb8   : > { %v5990_v63 = vcombine.low %v5958_v10, %v5964_v14  ;;  %v5790_v14 = vcombine.low %v9474_v5, %v5686_v43 }
0x1bb9   : > { %v5719_v18 = vpop.permute.xlu0 %5718 }
0x1bba   : > { %v5997_v38 = vrot.slane %v5990_v63, %v8292_v49  ;;  %v5814_v63 = vcombine.low %v5693_v51, %v5699_v48 }
0x1bbc   : > { %v6006_v54 = vcombine.low %v5989_v42, %v5997_v38  ;;  %v5741_v38 = vcombine.low %v9424_v41, %v5666_v36  ;;  %v5821_v39 = vrot.slane %v5814_v63, %v8292_v49  ;;  %v9584_v63 = vld [vmem:[#allocation8 + $0x8] sm:$0xff] }
0x1bbd   : > { %v5726_v52 = vpop.permute.xlu0 %5725 }
0x1bbe   : > { %v6013_v61 = vrot.slane %v6006_v54, %v8298_v60  ;;  %v5749_v54 = vcombine.low %v5663_v27, %v5669_v16  ;;  %v5839_v16 = vcombine.low %v9432_v44, %v5706_v57 }
0x1bc0   : > { %v6014_v53 = vcombine.low %v6005_v26, %v6013_v61  ;;  %v5757_v26 = vcombine.low %v9428_v45, %v5676_v17  ;;  %v5846_v48 = vrot.slane %v5839_v16, %v8292_v49 }
0x1bc2   : > { %v6015_v62 = vsel %vm961_vm3, %v6014_v53, -inf }
0x1bc3   : > { %6016 = vmax.xlane.f32.xlu1 %v6015_v62  ;;  %v5797_v62 = vrot.slane %v5790_v14, %v8292_v49 }
0x1bc5   : > { %v5822_v27 = vcombine.low %v5797_v62, %v5805_v55 }
0x1bd4   : > { %5678 = vrot.lane.b32.xlu1 %v9428_v45, %s7963_s18 }
0x1bd8   : > { %5695 = vrot.lane.b32.xlu1 %v9478_v56, %s7962_s16 }
0x1bdc   : > { %5702 = vrot.lane.b32.xlu1 %v9432_v44, %s7961_s13 }
0x1be0   : > { %5708 = vrot.lane.b32.xlu1 %v9432_v44, %s7963_s18 }
0x1be4   : > { %5715 = vrot.lane.b32.xlu1 %v9436_v59, %s7962_s16 }
0x1be8   : > { %5722 = vrot.lane.b32.xlu1 %v9518_v28, %s7961_s13 }
0x1bec   : > { %5728 = vrot.lane.b32.xlu1 %v9518_v28, %s7963_s18 }
0x1bf0   : > { %5735 = vrot.lane.b32.xlu1 %v9522_v50, %s7962_s16 }
0x1c4c   : > { %v6017_v31 = vpop.xlane.xlu1 %6016 }
0x1c4d   : > { %v6022_v6 = vrot.slane %v6017_v31, %v8325_v22 }
0x1c4f   : > { %7510 = vmatmul.mubr.msk.f32.vlgmr.msra.gmra.mxu1 %vm972_vm4, %v6022_v6 }
0x1c50   : > { %7513 = vmatpush3.msra.mxu1 %v9536_v15  ;;  %7514 = vmatprep.mubr.msk.f32.mxu1 %vm7953_vm2, %v7952_v9  ;;  %v5679_v2 = vpop.permute.xlu1 %5678 }
0x1c51   : > { %6355 = vmatprep.subr.bf16.mxu1 %v7724_v30  ;;  %v5765_v35 = vcombine.low %v5673_v33, %v5679_v2 }
0x1c53   : > { %v5772_v5 = vrot.slane %v5765_v35, %v8292_v49 }
0x1c54   : > { %v5696_v8 = vpop.permute.xlu1 %5695 }
0x1c55   : > { %v5806_v42 = vcombine.low %v9478_v56, %v5696_v8  ;;  %v5888_v56 = vcombine.low %v9518_v28, %v5726_v52 }
0x1c57   : > { %v5813_v31 = vrot.slane %v5806_v42, %v8292_v49  ;;  %v5895_v28 = vrot.slane %v5888_v56, %v8292_v49  ;;  %v9587_v42 = vld [vmem:[#allocation8] sm:$0xff]  ;;  %v9595_v56 = vld [vmem:[#allocation8 + $0x10] sm:$0xff] }
0x1c58   : > { %v5703_v58 = vpop.permute.xlu1 %5702 }
0x1c59   : > { %v5830_v17 = vcombine.low %v5813_v31, %v5821_v39  ;;  %v9592_v31 = vld [vmem:[#allocation8 + $0x18] sm:$0xff] }
0x1c5c   : > { %v5709_v10 = vpop.permute.xlu1 %5708 }
0x1c5d   : > { %v5847_v36 = vcombine.low %v5703_v58, %v5709_v10  ;;  %v5837_v10 = vrot.slane %v5830_v17, %v8298_v60 }
0x1c5f   : > { %v5854_v2 = vrot.slane %v5847_v36, %v8292_v49 }
0x1c60   : > { %v5716_v37 = vpop.permute.xlu1 %5715 }
0x1c61   : > { %v5855_v6 = vcombine.low %v9436_v59, %v5716_v37  ;;  %v5871_v37 = vcombine.low %v5846_v48, %v5854_v2  ;;  %v7681_v2 = vld [vmem:[%s8158_s15] ss:$0 sps:$4 sm:$0x88]  }
0x1c62   : > { %v6294_v48 = vshrl.u32 %v7681_v2, 16 }
0x1c63   : > { %v5862_v59 = vrot.slane %v5855_v6, %v8292_v49  ;;  %v5878_v11 = vrot.slane %v5871_v37, %v8298_v60 }
0x1c64   : > { %v5723_v47 = vpop.permute.xlu1 %5722 }
0x1c68   : > { %v5729_v19 = vpop.permute.xlu1 %5728 }
0x1c69   : > { %v5896_v41 = vcombine.low %v5723_v47, %v5729_v19 }
0x1c6b   : > { %v5903_v1 = vrot.slane %v5896_v41, %v8292_v49 }
0x1c6c   : > { %v5736_v53 = vpop.permute.xlu1 %5735 }
0x1c6d   : > { %v5904_v45 = vcombine.low %v9522_v50, %v5736_v53  ;;  %v5920_v57 = vcombine.low %v5895_v28, %v5903_v1 }
0x1c6f   : > { %v5911_v43 = vrot.slane %v5904_v45, %v8292_v49 }
0x1d0f   : > { %v6091_v24 = vpop.f32.mrf.mxu1 }
0x1d10   : > { %v6092_v7 = vadd.f32 %v9544_v21, %v6091_v24  ;;  %v5748_v24 = vrot.slane %v5741_v38, %v8292_v49 }
0x1d11   : > { %v7511_v32 = vpop.f32.mrf.mxu1 }
0x1d12   : > { %v6098_v0 = vrot.slane %v6092_v7, %v8338_v29  ;;  %6288 = vst.msk [vmem:[%s8173_s6 + $0x6] sm:$0x1] %vm1239_vm5, %v6092_v7  ;;  %v5756_v7 = vrot.slane %v5749_v54, %v8292_v49  ;;  %v5764_v32 = vrot.slane %v5757_v26, %v8292_v49 }
0x1d14   : > { %6104 = vbcast.lane.b32.xlu0 %v6098_v0, 264  ;;  %6100 = vbcast.lane.b32.xlu1 %v6098_v0, 256  ;;  %v5781_v33 = vcombine.low %v5764_v32, %v5772_v5  ;;  %v5773_v46 = vcombine.low %v5748_v24, %v5756_v7 }
0x1d16   : > { %v5788_v8 = vrot.slane %v5781_v33, %v8298_v60 }
0x1d18   : > { %6112 = vbcast.lane.b32.xlu0 %v6098_v0, 280  ;;  %6108 = vbcast.lane.b32.xlu1 %v6098_v0, 272  ;;  %v5863_v0 = vcombine.low %v5713_v12, %v5719_v18  ;;  %v5829_v12 = vrot.slane %v5822_v27, %v8298_v60  ;;  %v5780_v18 = vrot.slane %v5773_v46, %v8298_v60 }
0x1d1a   : > { %v5870_v51 = vrot.slane %v5863_v0, %v8292_v49  ;;  %v5789_v52 = vcombine.low %v5780_v18, %v5788_v8  ;;  %v5838_v47 = vcombine.low %v5829_v12, %v5837_v10 }
0x1d1c   : > { %6132 = vrot.lane.b32.xlu1 %v9470_v40, %s7961_s13  ;;  %v5733_v40 = vpop.permute.xlu0 %5732  ;;  %v5879_v44 = vcombine.low %v5862_v59, %v5870_v51  ;;  %v5938_v35 = vadd.f32 %v9584_v63, %v5838_v47  ;;  %v5937_v38 = vadd.f32 %v9587_v42, %v5789_v52 }
0x1d1e   : > { %v5886_v14 = vrot.slane %v5879_v44, %v8298_v60  ;;  %v6296_v44 = vrot.slane %v6294_v48, 3 }
0x1d20   : > { %v5739_v61 = vpop.permute.xlu0 %5738  ;;  %v5887_v26 = vcombine.low %v5878_v11, %v5886_v14  ;;  %7345 = vmatmul.mubr.msk.bf16.vlgmr.msra.gmra.mxu0 %vm399_vm1, %v6296_v44 }
0x1d21   : > { %v5912_v30 = vcombine.low %v5733_v40, %v5739_v61  ;;  %v5927_v40 = vrot.slane %v5920_v57, %v8298_v60  ;;  %6397 = vmatpush1.bf16.msra.mxu0 %v9399_v4  ;;  %6414 = vmatprep.mubr.bf16.mxu0 %v7951_v3 }
0x1d22   : > { %v5939_v41 = vadd.f32 %v9595_v56, %v5887_v26  ;;  %7517 = vmatprep.subr.bf16.mxu0 %v7952_v9 }
0x1d23   : > { %v5919_v50 = vrot.slane %v5912_v30, %v8292_v49 }
0x1d25   : > { %v5928_v58 = vcombine.low %v5911_v43, %v5919_v50 }
0x1d27   : > { %v5935_v19 = vrot.slane %v5928_v58, %v8298_v60 }
0x1d28   : > { %7347 = vmatmul.mubr.msk.bf16.vlgmr.msra.gmra.mxu0 %vm399_vm1, %v6296_v44 }
0x1d29   : > { %v5936_v54 = vcombine.low %v5927_v40, %v5935_v19  ;;  %7518 = vmatpush3.bf16.msra.mxu0 %v9409_v34  ;;  %7519 = vmatprep.mubr.msk.bf16.mxu0 %vm7953_vm2, %v7952_v9 }
0x1d2b   : > { %v5940_v6 = vadd.f32 %v9592_v31, %v5936_v54 }
0x1d30   : > { %7520 = vmatmul.mubr.msk.bf16.vlgmr.msra.gmra.mxu0 %vm399_vm1, %v6296_v44 }
0x1d86   : > { %v6105_v61 = vpop.permute.xlu0 %6104  ;;  %v6101_v53 = vpop.permute.xlu1 %6100 }
0x1d87   : > { %v6115_v62 = vmul.f32 %v6105_v61, %v5938_v35  ;;  %v6114_v55 = vmul.f32 %v6101_v53, %v5937_v38 }
0x1d89   : > { %v6119_v39 = vsel %vm1068_vm6, %v6115_v62, 0.0  ;;  %v6118_v5 = vsel %vm1068_vm6, %v6114_v55, 0.0 }
0x1d8a   : > { %v6113_v30 = vpop.permute.xlu0 %6112  ;;  %v6109_v45 = vpop.permute.xlu1 %6108  ;;  %v6120_v32 = vadd.f32 %v6119_v39, %v6118_v5 }
0x1d8b   : > { %v6117_v24 = vmul.f32 %v6113_v30, %v5940_v6  ;;  %v6116_v7 = vmul.f32 %v6109_v45, %v5939_v41 }
0x1d8d   : > { %v6121_v0 = vsel %vm1068_vm6, %v6116_v7, 0.0  ;;  %v6123_v36 = vsel %vm1068_vm6, %v6117_v24, 0.0 }
0x1d8e   : > { %v6122_v27 = vadd.f32 %v6121_v0, %v6120_v32  ;;  %v6133_v43 = vpop.permute.xlu1 %6132 }
0x1d90   : > { %v6124_v16 = vadd.f32 %v6123_v36, %v6122_v27 }
0x1d92   : > { %v6125_v33 = vrot.slane %v6124_v16, 4 }
0x1d94   : > { %v6126_v17 = vadd.f32 %v6125_v33, %v6124_v16 }
0x1d96   : > { %v6127_v59 = vrot.slane %v6126_v17, 2 }
0x1d98   : > { %v6128_v28 = vadd.f32 %v6127_v59, %v6126_v17 }
0x1d9a   : > { %v6129_v1 = vrot.slane %v6128_v28, 1 }
0x1d9c   : > { %v6130_v50 = vadd.f32 %v6129_v1, %v6128_v28 }
0x1d9e   : > { %v6135_v46 = vadd.f32 %v6133_v43, %v6130_v50 }
0x1da0   : > { %v6136_v51 = vmax.f32 %v6135_v46, 0.0 }
0x1da2   : > { %6141 = vrot.lane.b32.xlu1 %v6136_v51, %s7957_s20  ;;  %6138 = vrot.lane.b32.xlu0 %v6136_v51, %s7955_s12 }
0x1da6   : > { %6147 = vrot.lane.b32.xlu1 %v6136_v51, %s7956_s17  ;;  %6144 = vrot.lane.b32.xlu0 %v6136_v51, %s7954_s11 }
0x1daa   : > { %6153 = vrot.lane.b32.xlu1 %v6136_v51, %s7958_s8  ;;  %6150 = vrot.lane.b32.xlu0 %v6136_v51, %s7959_s29 }
0x1dae   : > { %6156 = vrot.lane.b32.xlu0 %v6136_v51, %s7960_s30 }
0x1de0   : > { %v9624_v62 = vpop.f32.mrf.mxu0 }
0x1de2   : > { %v9628_v55 = vpop.f32.mrf.mxu0 }
0x1de4   : > { %v6338_v39 = vpop.f32.mrf.mxu0 }
0x1de6   : > { %v6339_v5 = vpop.f32.mrf.mxu0 }
0x1de8   : > { %v9632_v6 = vpop.f32.mrf.mxu0 }
0x1dea   : > { %v9636_v41 = vpop.f32.mrf.mxu0 }
0x1dec   : > { %v6420_v30 = vpop.f32.mrf.mxu0 }
0x1dee   : > { %v6421_v45 = vpop.f32.mrf.mxu0 }
0x1df0   : > { %v6498_v24 = vpop.f32.mrf.mxu0 }
0x1df2   : > { %v7521_v7 = vpop.f32.mrf.mxu0 }
0x1df4   : > { %v6501_v32 = vpop.f32.mrf.mxu0 }
0x1df6   : > { %v7522_v0 = vpop.f32.mrf.mxu0 }
0x1e14   : > { %v6142_v8 = vpop.permute.xlu1 %6141  ;;  %v6139_v57 = vpop.permute.xlu0 %6138 }
0x1e15   : > { %v6159_v37 = vcombine.low %v6136_v51, %v6142_v8 }
0x1e17   : > { %v6166_v19 = vrot.slane %v6159_v37, %v8292_v49 }
0x1e18   : > { %v6148_v58 = vpop.permute.xlu1 %6147  ;;  %v6145_v12 = vpop.permute.xlu0 %6144 }
0x1e19   : > { %v6167_v10 = vcombine.low %v6139_v57, %v6145_v12 }
0x1e1b   : > { %v6174_v52 = vrot.slane %v6167_v10, %v8292_v49 }
0x1e1c   : > { %v6154_v18 = vpop.permute.xlu1 %6153  ;;  %v6151_v4 = vpop.permute.xlu0 %6150 }
0x1e1d   : > { %v6175_v47 = vcombine.low %v6148_v58, %v6154_v18  ;;  %v6191_v14 = vcombine.low %v6166_v19, %v6174_v52 }
0x1e1f   : > { %v6182_v11 = vrot.slane %v6175_v47, %v8292_v49  ;;  %v6198_v54 = vrot.slane %v6191_v14, %v8298_v60 }
0x1e20   : > { %v6157_v40 = vpop.permute.xlu0 %6156 }
0x1e21   : > { %v6183_v34 = vcombine.low %v6151_v4, %v6157_v40 }
0x1e23   : > { %v6190_v35 = vrot.slane %v6183_v34, %v8292_v49 }
0x1e25   : > { %v6199_v38 = vcombine.low %v6182_v11, %v6190_v35 }
0x1e27   : > { %v6206_v26 = vrot.slane %v6199_v38, %v8298_v60 }
0x1e29   : > { %v6207_v61 = vcombine.low %v6198_v54, %v6206_v26 }
0x1e2b   : > { %v6208_v53 = vsel %vm961_vm3, %v6207_v61, -inf }
0x1e2c   : > { %6209 = vmax.xlane.f32.xlu1 %v6208_v53 }
0x1e3d   : > { %6505 = vrot.lane.b32.xlu1 %v9624_v62, %s7961_s13 }
0x1e41   : > { %6508 = vrot.lane.b32.xlu1 %v9624_v62, %s7962_s16 }
0x1e45   : > { %6511 = vrot.lane.b32.xlu1 %v9624_v62, %s7963_s18 }
0x1e49   : > { %6515 = vrot.lane.b32.xlu1 %v9628_v55, %s7961_s13 }
0x1e4d   : > { %6521 = vrot.lane.b32.xlu1 %v9628_v55, %s7963_s18 }
0x1eb5   : > { %v6210_v27 = vpop.xlane.xlu1 %6209 }
0x1eb6   : > { %v6215_v36 = vrot.slane %v6210_v27, %v8325_v22 }
0x1eb8   : > { %7515 = vmatmul.mubr.msk.f32.vlgmr.msra.gmra.mxu1 %vm972_vm4, %v6215_v36 }
0x1eb9   : > { %6356 = vmatpush1.bf16.msra.mxu1 %v9444_v13  ;;  %6373 = vmatprep.mubr.bf16.mxu1 %v7951_v3  ;;  %v9657_v13 = vadd.f32 %v9467_v23, %v6498_v24  ;;  %v6506_v30 = vpop.permute.xlu1 %6505 }
0x1eba   : > { %6437 = vmatprep.subr.bf16.mxu1 %v9448_v20 }
0x1ebc   : > { %7346 = vmatmul.mubr.msk.bf16.vlgmr.msra.gmra.mxu1 %vm399_vm1, %v6296_v44 }
0x1ebd   : > { %6438 = vmatpush1.bf16.msra.mxu1 %v9453_v25  ;;  %6455 = vmatprep.mubr.bf16.mxu1 %v7951_v3 }
0x1ebe   : > { %7523 = vmatprep.subr.mxu1 %v7952_v9 }
0x1ec4   : > { %7348 = vmatmul.mubr.msk.bf16.vlgmr.msra.gmra.mxu1 %vm399_vm1, %v6296_v44 }
0x1ec5   : > { %7524 = vmatpush3.msra.mxu1 %v9536_v15  ;;  %7525 = vmatprep.mubr.msk.f32.mxu1 %vm7953_vm2, %v7952_v9 }
0x1ec6   : > { %7528 = vmatprep.subr.mxu1 %v7952_v9 }
0x1f78   : > { %v6284_v20 = vpop.f32.mrf.mxu1 }
0x1f79   : > { %v6285_v16 = vadd.f32 %v9544_v21, %v6284_v20 }
0x1f7a   : > { %v7516_v25 = vpop.f32.mrf.mxu1 }
0x1f7b   : > { %v6785_v3 = vadd.f32 %v9657_v13, %v6285_v16 }
0x1f7c   : > { %v9661_v33 = vpop.f32.mrf.mxu1 }
0x1f7d   : > { %v6786_v17 = vmax.f32 %v6785_v3, 0.0  ;;  %6525 = vrot.lane.b32.xlu1 %v9661_v33, %s7961_s13 }
0x1f7e   : > { %v9665_v59 = vpop.f32.mrf.mxu1 }
0x1f7f   : > { %6788 = vrot.lane.b32.xlu0 %v6786_v17, %s7955_s12 }
0x1f80   : > { %v6379_v28 = vpop.f32.mrf.mxu1 }
0x1f81   : > { %6528 = vrot.lane.b32.xlu1 %v9661_v33, %s7962_s16 }
0x1f82   : > { %v6380_v23 = vpop.f32.mrf.mxu1 }
0x1f83   : > { %6791 = vrot.lane.b32.xlu0 %v6786_v17, %s7957_s20 }
0x1f84   : > { %v9703_v14 = vpop.f32.mrf.mxu1 }
0x1f85   : > { %6531 = vrot.lane.b32.xlu1 %v9661_v33, %s7963_s18 }
0x1f86   : > { %v9707_v11 = vpop.f32.mrf.mxu1 }
0x1f87   : > { %6794 = vrot.lane.b32.xlu0 %v6786_v17, %s7954_s11 }
0x1f88   : > { %v6461_v35 = vpop.f32.mrf.mxu1 }
0x1f89   : > { %6535 = vrot.lane.b32.xlu1 %v9665_v59, %s7961_s13 }
0x1f8a   : > { %v6462_v38 = vpop.f32.mrf.mxu1 }
0x1f8b   : > { %6797 = vrot.lane.b32.xlu0 %v6786_v17, %s7956_s17 }
0x1f8d   : > { %6541 = vrot.lane.b32.xlu1 %v9665_v59, %s7963_s18 }
0x1f8f   : > { %6800 = vrot.lane.b32.xlu0 %v6786_v17, %s7959_s29 }
0x1f91   : > { %6548 = vrot.lane.b32.xlu1 %v9632_v6, %s7962_s16 }
0x1f93   : > { %6803 = vrot.lane.b32.xlu0 %v6786_v17, %s7958_s8 }
0x1f95   : > { %6555 = vrot.lane.b32.xlu1 %v9636_v41, %s7961_s13 }
0x1f97   : > { %6806 = vrot.lane.b32.xlu0 %v6786_v17, %s7960_s30 }
0x1f99   : > { %6561 = vrot.lane.b32.xlu1 %v9636_v41, %s7963_s18 }
0x1f9d   : > { %6568 = vrot.lane.b32.xlu1 %v9703_v14, %s7962_s16 }
0x1fa1   : > { %6575 = vrot.lane.b32.xlu1 %v9707_v11, %s7961_s13 }
0x1fa5   : > { %6581 = vrot.lane.b32.xlu1 %v9707_v11, %s7963_s18 }
0x1ff1   : > { %v6789_v1 = vpop.permute.xlu0 %6788 }
0x1ff5   : > { %v6792_v50 = vpop.permute.xlu0 %6791 }
0x1ff6   : > { %v6809_v44 = vcombine.low %v6786_v17, %v6792_v50 }
0x1ff8   : > { %v6816_v12 = vrot.slane %v6809_v44, %v8292_v49 }
0x1ff9   : > { %v6795_v43 = vpop.permute.xlu0 %6794 }
0x1ffa   : > { %v6817_v2 = vcombine.low %v6789_v1, %v6795_v43 }
0x1ffc   : > { %v6824_v8 = vrot.slane %v6817_v2, %v8292_v49 }
0x1ffd   : > { %v6798_v46 = vpop.permute.xlu0 %6797 }
0x1ffe   : > { %v6841_v18 = vcombine.low %v6816_v12, %v6824_v8 }
0x2000   : > { %v6848_v47 = vrot.slane %v6841_v18, %v8298_v60 }
0x2001   : > { %v6801_v51 = vpop.permute.xlu0 %6800 }
0x2005   : > { %v6804_v48 = vpop.permute.xlu0 %6803 }
0x2006   : > { %v6825_v57 = vcombine.low %v6798_v46, %v6804_v48 }
0x2008   : > { %v6832_v4 = vrot.slane %v6825_v57, %v8292_v49 }
0x2009   : > { %v6807_v58 = vpop.permute.xlu0 %6806 }
0x200a   : > { %v6833_v10 = vcombine.low %v6801_v51, %v6807_v58 }
0x200c   : > { %v6840_v37 = vrot.slane %v6833_v10, %v8292_v49 }
0x200e   : > { %v6849_v52 = vcombine.low %v6832_v4, %v6840_v37 }
0x2010   : > { %v6856_v40 = vrot.slane %v6849_v52, %v8298_v60 }
0x2012   : > { %v6857_v19 = vcombine.low %v6848_v47, %v6856_v40 }
0x2014   : > { %v6858_v34 = vsel %vm961_vm3, %v6857_v19, -inf }
0x2015   : > { %6859 = vmax.xlane.f32.xlu0 %v6858_v34 }
0x202b   : > { %6518 = vrot.lane.b32.xlu0 %v9628_v55, %s7962_s16 }
0x202f   : > { %6538 = vrot.lane.b32.xlu0 %v9665_v59, %s7962_s16 }
0x2033   : > { %6545 = vrot.lane.b32.xlu0 %v9632_v6, %s7961_s13 }
0x2037   : > { %6551 = vrot.lane.b32.xlu0 %v9632_v6, %s7963_s18 }
0x203b   : > { %6558 = vrot.lane.b32.xlu0 %v9636_v41, %s7962_s16 }
0x203f   : > { %6565 = vrot.lane.b32.xlu0 %v9703_v14, %s7961_s13 }
0x2043   : > { %6571 = vrot.lane.b32.xlu0 %v9703_v14, %s7963_s18 }
0x2047   : > { %6578 = vrot.lane.b32.xlu0 %v9707_v11, %s7962_s16  ;;  %s7134_s16 = scalar_lea.sflag [#allocation5], %s8154_s4 }
0x209e   : > { %v6860_v54 = vpop.xlane.xlu0 %6859 }
0x209f   : > { %v6865_v26 = vrot.slane %v6860_v54, %v8325_v22 }
0x20a1   : > { %7526 = vmatmul.mubr.msk.f32.vlgmr.msra.gmra.mxu1 %vm972_vm4, %v6865_v26 }
0x20a2   : > { %7529 = vmatpush3.msra.mxu1 %v9536_v15  ;;  %7530 = vmatprep.mubr.msk.f32.mxu1 %vm7953_vm2, %v7952_v9  ;;  %v6509_v15 = vpop.permute.xlu1 %6508  ;;  %v6519_v36 = vpop.permute.xlu0 %6518 }
0x20a3   : > { %v6600_v48 = vcombine.low %v9628_v55, %v6519_v36  ;;  %v6584_v8 = vcombine.low %v9624_v62, %v6509_v15 }
0x20a5   : > { %v6591_v19 = vrot.slane %v6584_v8, %v8292_v49 }
0x20a6   : > { %v6512_v45 = vpop.permute.xlu1 %6511  ;;  %v6539_v20 = vpop.permute.xlu0 %6538 }
0x20a7   : > { %v6649_v44 = vcombine.low %v9665_v59, %v6539_v20  ;;  %v6592_v57 = vcombine.low %v6506_v30, %v6512_v45 }
0x20a9   : > { %v6656_v52 = vrot.slane %v6649_v44, %v8292_v49  ;;  %v6599_v34 = vrot.slane %v6592_v57, %v8292_v49 }
0x20aa   : > { %v6516_v24 = vpop.permute.xlu1 %6515  ;;  %v6546_v25 = vpop.permute.xlu0 %6545 }
0x20ab   : > { %v6616_v15 = vcombine.low %v6591_v19, %v6599_v34 }
0x20ae   : > { %v6522_v9 = vpop.permute.xlu1 %6521  ;;  %v6552_v17 = vpop.permute.xlu0 %6551 }
0x20af   : > { %v6608_v58 = vcombine.low %v6516_v24, %v6522_v9  ;;  %v6690_v26 = vcombine.low %v6546_v25, %v6552_v17 }
0x20b1   : > { %v6615_v35 = vrot.slane %v6608_v58, %v8292_v49  ;;  %v6697_v24 = vrot.slane %v6690_v26, %v8292_v49 }
0x20b2   : > { %v6526_v7 = vpop.permute.xlu1 %6525  ;;  %v6559_v23 = vpop.permute.xlu0 %6558 }
0x20b3   : > { %v6698_v55 = vcombine.low %v9636_v41, %v6559_v23 }
0x20b5   : > { %v6705_v41 = vrot.slane %v6698_v55, %v8292_v49 }
0x20b6   : > { %v6529_v32 = vpop.permute.xlu1 %6528 }
0x20b7   : > { %v6633_v46 = vcombine.low %v9661_v33, %v6529_v32  ;;  %v6607_v33 = vrot.slane %v6600_v48, %v8292_v49 }
0x20b9   : > { %v6640_v18 = vrot.slane %v6633_v46, %v8292_v49 }
0x20ba   : > { %v6532_v0 = vpop.permute.xlu1 %6531 }
0x20bb   : > { %v6641_v51 = vcombine.low %v6526_v7, %v6532_v0 }
0x20bd   : > { %v6648_v4 = vrot.slane %v6641_v51, %v8292_v49 }
0x20be   : > { %v6536_v27 = vpop.permute.xlu1 %6535 }
0x20bf   : > { %v6665_v54 = vcombine.low %v6640_v18, %v6648_v4 }
0x2161   : > { %v6934_v61 = vpop.f32.mrf.mxu1 }
0x2162   : > { %v6935_v53 = vadd.f32 %v9544_v21, %v6934_v61 }
0x2163   : > { %v7527_v39 = vpop.f32.mrf.mxu1 }
0x2164   : > { %v6941_v5 = vrot.slane %v6935_v53, %v8338_v29  ;;  %7131 = vst.msk [vmem:[%s8173_s6 + $0x7] sm:$0x1] %vm1239_vm5, %v6935_v53  ;;  %v6542_v29 = vpop.permute.xlu1 %6541  ;;  %v6624_v53 = vcombine.low %v6607_v33, %v6615_v35 }
0x2165   : > { %v6657_v2 = vcombine.low %v6536_v27, %v6542_v29  ;;  %v6672_v27 = vrot.slane %v6665_v54, %v8298_v60  ;;  %v6623_v29 = vrot.slane %v6616_v15, %v8298_v60 }
0x2166   : > { %6947 = vbcast.lane.b32.xlu1 %v6941_v5, 264  ;;  %6943 = vbcast.lane.b32.xlu0 %v6941_v5, 256  ;;  %v6631_v7 = vrot.slane %v6624_v53, %v8298_v60 }
0x2167   : > { %v6664_v37 = vrot.slane %v6657_v2, %v8292_v49 }
0x2168   : > { %v6549_v16 = vpop.permute.xlu1 %6548 }
0x2169   : > { %v6682_v61 = vcombine.low %v9632_v6, %v6549_v16  ;;  %v6673_v39 = vcombine.low %v6656_v52, %v6664_v37  ;;  %v6632_v16 = vcombine.low %v6623_v29, %v6631_v7 }
0x216a   : > { %6955 = vbcast.lane.b32.xlu1 %v6941_v5, 280  ;;  %6951 = vbcast.lane.b32.xlu0 %v6941_v5, 272 }
0x216b   : > { %v6689_v9 = vrot.slane %v6682_v61, %v8292_v49  ;;  %v6680_v36 = vrot.slane %v6673_v39, %v8298_v60 }
0x216c   : > { %v6556_v3 = vpop.permute.xlu1 %6555 }
0x216d   : > { %v6714_v20 = vcombine.low %v6689_v9, %v6697_v24  ;;  %v6681_v25 = vcombine.low %v6672_v27, %v6680_v36 }
0x216e   : > { %6975 = vrot.lane.b32.xlu0 %v9657_v13, %s7961_s13  ;;  %v6566_v13 = vpop.permute.xlu0 %6565 }
0x216f   : > { %v6721_v23 = vrot.slane %v6714_v20, %v8298_v60 }
0x2170   : > { %v6562_v28 = vpop.permute.xlu1 %6561 }
0x2171   : > { %v6706_v38 = vcombine.low %v6556_v3, %v6562_v28 }
0x2172   : > { %v6572_v43 = vpop.permute.xlu0 %6571 }
0x2173   : > { %v6739_v47 = vcombine.low %v6566_v13, %v6572_v43  ;;  %v6713_v45 = vrot.slane %v6706_v38, %v8292_v49  ;;  %v6780_v13 = vadd.f32 %v9587_v42, %v6632_v16 }
0x2174   : > { %v6569_v1 = vpop.permute.xlu1 %6568 }
0x2175   : > { %v6731_v59 = vcombine.low %v9703_v14, %v6569_v1  ;;  %v6746_v5 = vrot.slane %v6739_v47, %v8292_v49  ;;  %v6722_v6 = vcombine.low %v6705_v41, %v6713_v45  ;;  %v6781_v1 = vadd.f32 %v9584_v63, %v6681_v25 }
0x2176   : > { %v6579_v10 = vpop.permute.xlu0 %6578 }
0x2177   : > { %v6747_v40 = vcombine.low %v9707_v11, %v6579_v10  ;;  %v6738_v14 = vrot.slane %v6731_v59, %v8292_v49  ;;  %v6729_v28 = vrot.slane %v6722_v6, %v8298_v60 }
0x2178   : > { %v6576_v50 = vpop.permute.xlu1 %6575 }
0x2179   : > { %v6754_v30 = vrot.slane %v6747_v40, %v8292_v49  ;;  %v6763_v32 = vcombine.low %v6738_v14, %v6746_v5  ;;  %v6730_v43 = vcombine.low %v6721_v23, %v6729_v28 }
0x217b   : > { %v6770_v3 = vrot.slane %v6763_v32, %v8298_v60  ;;  %v6782_v58 = vadd.f32 %v9595_v56, %v6730_v43 }
0x217c   : > { %v6582_v12 = vpop.permute.xlu1 %6581 }
0x217d   : > { %v6755_v62 = vcombine.low %v6576_v50, %v6582_v12 }
0x217f   : > { %v6762_v11 = vrot.slane %v6755_v62, %v8292_v49 }
0x2181   : > { %v6771_v0 = vcombine.low %v6754_v30, %v6762_v11 }
0x2183   : > { %v6778_v17 = vrot.slane %v6771_v0, %v8298_v60 }
0x2185   : > { %v6779_v50 = vcombine.low %v6770_v3, %v6778_v17 }
0x2187   : > { %v6783_v57 = vadd.f32 %v9592_v31, %v6779_v50 }
0x21d8   : > { %v6948_v46 = vpop.permute.xlu1 %6947  ;;  %v6944_v51 = vpop.permute.xlu0 %6943 }
0x21d9   : > { %v6958_v2 = vmul.f32 %v6948_v46, %v6781_v1  ;;  %v6957_v48 = vmul.f32 %v6944_v51, %v6780_v13 }
0x21db   : > { %v6962_v44 = vsel %vm1068_vm6, %v6958_v2, 0.0  ;;  %v6961_v8 = vsel %vm1068_vm6, %v6957_v48, 0.0 }
0x21dc   : > { %v6956_v12 = vpop.permute.xlu1 %6955  ;;  %v6952_v10 = vpop.permute.xlu0 %6951  ;;  %v6963_v4 = vadd.f32 %v6962_v44, %v6961_v8 }
0x21dd   : > { %v6960_v18 = vmul.f32 %v6956_v12, %v6783_v57  ;;  %v6959_v63 = vmul.f32 %v6952_v10, %v6782_v58 }
0x21df   : > { %v6964_v42 = vsel %vm1068_vm6, %v6959_v63, 0.0  ;;  %v6966_v33 = vsel %vm1068_vm6, %v6960_v18, 0.0 }
0x21e0   : > { %v6965_v37 = vadd.f32 %v6964_v42, %v6963_v4  ;;  %v6976_v31 = vpop.permute.xlu0 %6975 }
0x21e2   : > { %v6967_v52 = vadd.f32 %v6966_v33, %v6965_v37 }
0x21e4   : > { %v6968_v55 = vrot.slane %v6967_v52, 4 }
0x21e6   : > { %v6969_v59 = vadd.f32 %v6968_v55, %v6967_v52 }
0x21e8   : > { %v6970_v47 = vrot.slane %v6969_v59, 2 }
0x21ea   : > { %v6971_v62 = vadd.f32 %v6970_v47, %v6969_v59 }
0x21ec   : > { %v6972_v40 = vrot.slane %v6971_v62, 1 }
0x21ee   : > { %v6973_v19 = vadd.f32 %v6972_v40, %v6971_v62 }
0x21f0   : > { %v6978_v34 = vadd.f32 %v6976_v31, %v6973_v19 }
0x21f2   : > { %v6979_v56 = vmax.f32 %v6978_v34, 0.0 }
0x21f4   : > { %6984 = vrot.lane.b32.xlu0 %v6979_v56, %s7957_s20  ;;  %6981 = vrot.lane.b32.xlu1 %v6979_v56, %s7955_s12  ;;  %s7149_s20 = sshll.u32 %s8173_s6, 4  ;;  %s7150_s20 = int_to_ptr.vmem [resolvable:$true] %s7149_s20 }
0x21f5   : > { %s7836_s18 = scalar_lea.vmem %s7150_s20, 128  ;;  %p7843_p7 = scmp.lt.s32.totalorder %s7150_s20, %s7841_s1 }
0x21f6   : > { %p7837_p1 = scmp.ne.s32.totalorder %s7150_s20, %s7836_s18  ;;  %p7844_p9 = scmp.lt.s32.totalorder %s7842_s7, %s7836_s18 }
0x21f8   : > { %6990 = vrot.lane.b32.xlu0 %v6979_v56, %s7956_s17  ;;  %6987 = vrot.lane.b32.xlu1 %v6979_v56, %s7954_s11  ;;  %s7353_s11 = sshll.u32 %s7928_s25, 1  ;;  %p7838_p2 = pnand %p7837_p1, %p8117_p6 }
0x21f9   : > { %s7145_s12 = sadd.s32 %s7924_s24, %s7353_s11  ;;  %p7845_p12 = por %p7844_p9, %p7843_p7 }
0x21fa   : > { %s7354_s17 = sshll.u32 %s7145_s12, 7  ;;  %p7839_p4 = pneg %p7838_p2 }
0x21fc   : > { %6996 = vrot.lane.b32.xlu0 %v6979_v56, %s7958_s8  ;;  %6993 = vrot.lane.b32.xlu1 %v6979_v56, %s7959_s29  ;;  %p7846_p11 = pnand %p7845_p12, %p7839_p4 }
0x2200   : > { %6999 = vrot.lane.b32.xlu1 %v6979_v56, %s7960_s30  ;;  %s9876_s30 = sld [smem:[#allocation23_spill]] }
0x2206   : > { %s7147_s13 = scalar_lea.hbm %s9876_s30, %s7354_s17 }
0x2266   : > { %v6985_v35 = vpop.permute.xlu0 %6984  ;;  %v6982_v38 = vpop.permute.xlu1 %6981 }
0x2267   : > { %v7002_v41 = vcombine.low %v6979_v56, %v6985_v35 }
0x2269   : > { %v7009_v30 = vrot.slane %v7002_v41, %v8292_v49 }
0x226a   : > { %v6991_v54 = vpop.permute.xlu0 %6990  ;;  %v6988_v26 = vpop.permute.xlu1 %6987 }
0x226b   : > { %v7010_v61 = vcombine.low %v6982_v38, %v6988_v26 }
0x226d   : > { %v7017_v14 = vrot.slane %v7010_v61, %v8292_v49 }
0x226e   : > { %v6997_v53 = vpop.permute.xlu0 %6996  ;;  %v6994_v39 = vpop.permute.xlu1 %6993 }
0x226f   : > { %v7018_v5 = vcombine.low %v6991_v54, %v6997_v53  ;;  %v7034_v45 = vcombine.low %v7009_v30, %v7017_v14 }
0x2271   : > { %v7025_v24 = vrot.slane %v7018_v5, %v8292_v49  ;;  %v7041_v7 = vrot.slane %v7034_v45, %v8298_v60 }
0x2272   : > { %v7000_v11 = vpop.permute.xlu1 %6999 }
0x2273   : > { %v7026_v15 = vcombine.low %v6994_v39, %v7000_v11 }
0x2275   : > { %v7033_v9 = vrot.slane %v7026_v15, %v8292_v49 }
0x2277   : > { %v7042_v6 = vcombine.low %v7025_v24, %v7033_v9 }
0x2279   : > { %v7049_v32 = vrot.slane %v7042_v6, %v8298_v60 }
0x227b   : > { %v7050_v0 = vcombine.low %v7041_v7, %v7049_v32 }
0x227d   : > { %v7051_v27 = vsel %vm961_vm3, %v7050_v0, -inf }
0x227e   : > { %7052 = vmax.xlane.f32.xlu0 %v7051_v27 }
0x2307   : > { %v7053_v36 = vpop.xlane.xlu0 %7052 }
0x2308   : > { %v7058_v29 = vrot.slane %v7053_v36, %v8325_v22 }
0x230a   : > { %7531 = vmatmul.mubr.msk.f32.vlgmr.msra.gmra.mxu1 %vm972_vm4, %v7058_v29 }
0x230b   : > { %7849 = shalt.err (!%p7846_p11)
}
0x230c   : > { %s7850_s24 = scalar_lea.hbm %s7147_s13, 128  ;;  %s7854_s6 = scalar_lea.hbm %s9876_s30, 512 }
0x230d   : > { %p7851_p13 = scmp.ne.s32.totalorder %s7147_s13, %s7850_s24  ;;  %p7855_p10 = scmp.lt.s32.totalorder %s7147_s13, %s9876_s30 }
0x230e   : > { %p7856_p5 = scmp.lt.s32.totalorder %s7854_s6, %s7850_s24 }
0x230f   : > { %p7852_p3 = pnand %p7851_p13, %p8117_p6 }
0x2310   : > { %p7857_p8 = por %p7856_p5, %p7855_p10 }
0x2311   : > { %p7853_p0 = pneg %p7852_p3 }
0x2313   : > { %p7858_p1 = pnand %p7857_p8, %p7853_p0 }
0x2315   : > { %7861 = shalt.err (!%p7858_p1)
}
0x2316   : > { %7547 = dma.vmem_to_hbm [thread:$0]  (%p8117_p6), %s7150_s20, 128, %s7147_s13, %s7134_s16  }
0x23ca   : > { %v7127_v49 = vpop.f32.mrf.mxu1 }
0x23cb   : > { %v7128_v60 = vadd.f32 %v9544_v21, %v7127_v49 }
0x23cc   : > { %v7532_v22 = vpop.f32.mrf.mxu1 }
0x23cd   : > { %7132 = vst.msk [vmem:[#allocation2] sm:$0x1] %vm1239_vm5, %v7128_v60 }
0x23ce PF: > { %s9877_s21 = sld [smem:[#allocation16_spill]]  ;;  %p7574_p2 = scmp.ge.s32.totalorder %s7940_s28, 2 }
0x23cf   : > { %s9878_s11 = sld [smem:[#allocation17_spill]] }
0x23d4   : > { %s7161_s12 = sand.u32 1, %s9877_s21  }
0x23d5   : > { %p9879_p4 = scmp.ne.s32.totalorder %s9878_s11, 0  ;;  %s7162_s17 = scalar_lea.sflag [#allocation5], %s7161_s12 }
0x23d7   : > { %p7564_p7 = pnand %p7574_p2, %p9879_p4 }
0x23d9   : > { %p7565_p9 = pneg %p7564_p7 }
0x23db   : > { %7907 = dma.done.wait (%p7565_p9), %s7162_s17, 128  }
0x23dc   : > { %7909 = vsyncadd (%p7565_p9), %s7162_s17, 4294967168  ;;  %s24_s28 = sadd.s32 1, %s7940_s28   ;;  %s9880_s15 = sld [smem:[#allocation18_spill]] }
0x23dd   : > { %p21_p6 = scmp.ge.s32.totalorder %s24_s28, 6   ;;  %s9881_s21 = smov %s7916_s22 }
0x23de   : > { %s9882_s22 = smov %s7920_s23  ;;  %s9883_s23 = smov %s8134_s3 }
0x23df   : > { %s9884_s24 = smov %s7932_s26  ;;  %s9885_s25 = smov %s7936_s27 }
0x23e0   : > { %s9887_s27 = smov %s9893_s14  ;;  %23 = sbr.rel (!%p21_p6) target bundleno = 14 (0xe), region = 105 }
0x23e2   : > { %s9886_s26 = smov %s9880_s15 }
0x23e5   :  { %7167 = vsyncpa [#allocation4], 1 }
0x23e6   :  { %7169 = vsyncpa [#allocation4 + $0x1], 1 }
0x23e7   :  { %7170 = vsyncpa [#allocation7], 1 }
0x23e8   :  { %7171 = vsyncpa [#allocation10], 1 }
0x23e9   :  { %7172 = vsyncpa [#allocation5], 1 }
0x23ea   :  { %7174 = vsyncpa [#allocation5 + $0x1], 1 }

// kernel: tpu_custom_call.1
= control target key start
LH: loop header
LB: loop body
LE: loop exit
PB: predicated region body
PF: predicated region fallthrough
CT: control target
= control target key end

     0   :  { %s9837_s0 = inlined_call_operand.hbm [shape: bf16[2,16,16], index: 0, kind: input, shape index: {}]   ;;  %s9838_s1 = inlined_call_operand.hbm [shape: bf16[16,1088], index: 1, kind: input, shape index: {}]   ;;  %s9839_s2 = inlined_call_operand.vmem [shape: f32[1,64], index: 2, kind: input, shape index: {}]   ;;  %s9840_s3 = inlined_call_operand.hbm [shape: f32[32,32], index: 3, kind: input, shape index: {}]   ;;  %s9841_s4 = inlined_call_operand.hbm [shape: f32[8,32], index: 4, kind: input, shape index: {}]   ;;  %s9842_s5 = inlined_call_operand.vmem [shape: f32[1,32], index: 5, kind: input, shape index: {}]   ;;  %s9843_s6 = inlined_call_operand.hbm [shape: f32[2,16,32], index: 6, kind: output, shape index: {}]  }
   0x1   :  { %9853 = sst [smem:[#allocation20_spill]] %s9838_s1 }
   0x2   :  { %9854 = sst [smem:[#allocation21_spill]] %s9840_s3 }
   0x3   :  { %9855 = sst [smem:[#allocation22_spill]] %s9841_s4 }
   0x4   :  { %9856 = sst [smem:[#allocation23_spill]] %s9843_s6 }
   0x5   :  { %11 = vsyncpa [#allocation4], 0 }
   0x6   :  { %13 = vsyncpa [#allocation4 + $0x1], 0 }
   0x7   :  { %14 = vsyncpa [#allocation7], 0 }
   0x8   :  { %15 = vsyncpa [#allocation10], 0 }
   0x9   :  { %16 = vsyncpa [#allocation5], 0 }
   0xa   :  { %18 = vsyncpa [#allocation5 + $0x1], 0  ;;  %s8002_s21 = smov 0   ;;  %s8004_s22 = smov 0  }
   0xb   :  { %s8006_s23 = smov 0   ;;  %s8008_s24 = smov 0  }
   0xc   :  { %s8010_s25 = smov 0   ;;  %s8012_s26 = smov 0  }
   0xd   :  { %s8014_s27 = smov 0   ;;  %s8016_s28 = smov 0  }
   0xe LB: > { %9857 = sst [smem:[#allocation16_spill]] %s7912_s21  ;;  %s7263_s29 = sadd.s32 4294967295, %s7940_s28   ;;  %s7940_s28 = sphi %s8016_s28, %s24_s28   ;;  %s7936_s27 = sphi %s8014_s27, %s9887_s27   ;;  %s7932_s26 = sphi %s8012_s26, %s9886_s26   ;;  %s7928_s25 = sphi %s8010_s25, %s9885_s25   ;;  %s7924_s24 = sphi %s8008_s24, %s9884_s24   ;;  %s7920_s23 = sphi %s8006_s23, %s9883_s23   ;;  %s7916_s22 = sphi %s8004_s22, %s9882_s22   ;;  %s7912_s21 = sphi %s8002_s21, %s9881_s21  }
   0xf   : > { %s7264_s30 = sadd.s32 4294967294, %s7940_s28   ;;  %p58_p0 = scmp.ne.s32.totalorder %s7916_s22, %s7912_s21 }
  0x10   : > { %p8046_p1 = scmp.eq.s32.totalorder %s7263_s29, 0  ;;  %p8050_p2 = scmp.eq.s32.totalorder %s7263_s29, 3 }
  0x11   : > { %p195_p3 = scmp.eq.s32.totalorder %s7264_s30, 3  ;;  %p7265_p5 = scmp.ge.s32.totalorder %s7940_s28, 1 }
  0x12   : > { %s9858_s7 = scalar_select %p8046_p1, 1, 0 }
  0x13   : > { %p8056_p4 = por %p8046_p1, %p58_p0  ;;  %p8061_p6 = por %p195_p3, %p58_p0 }
  0x14   : > { %p202_p7 = scmp.lt.s32.totalorder %s7940_s28, 5  ;;  %s7942_s12 = smov [#allocation6]  }
  0x15   : > { %s9860_s9 = scalar_select %p8056_p4, 1, 0 }
  0x16   : > { %s9861_s10 = scalar_select %p8061_p6, 1, 0 }
  0x17   : > { %p8066_p8 = pnand %p7265_p5, %p202_p7  ;;  %s214_s13 = sshll.u32 %s7942_s12, 4  ;;  %s215_s13 = int_to_ptr.vmem [resolvable:$true] %s214_s13 }
  0x18   : > { %9862 = sst [smem:[#allocation17_spill]] %s9861_s10  ;;  %s7943_s15 = smov [#allocation8]  }
  0x19   : > { %p7549_p9 = pneg %p8066_p8  ;;  %s230_s16 = sshll.u32 %s7943_s15, 4  ;;  %s231_s16 = int_to_ptr.vmem [resolvable:$true] %s230_s16 }
  0x1a   : > { %s7741_s17 = scalar_lea.vmem %s215_s13, 1152  ;;  %p7749_p3 = scmp.lt.s32.totalorder %s215_s13, %s215_s13 }
  0x1b   : > { %p8074_p10 = pnand %p7549_p9, %p8046_p1  ;;  %p7742_p12 = scmp.ne.s32.totalorder %s215_s13, %s7741_s17 }
  0x1c   : > { %p7750_p5 = scmp.lt.s32.totalorder %s7741_s17, %s7741_s17 }
  0x1d   : > { %p7732_p11 = pneg %p8074_p10 }
  0x1e   : > { %p7751_p7 = por %p7750_p5, %p7749_p3 }
  0x1f   : > { %p7744_p13 = pnand %p7742_p12, %p7732_p11 }
  0x21   : > { %p7745_p0 = pneg %p7744_p13 }
  0x23   : > { %p7752_p9 = pnand %p7751_p7, %p7745_p0 }
  0x25   : > { %7755 = shalt.err (!%p7752_p9)
}
  0x26   : > { %s7944_s18 = smov 576   ;;  %s7945_s19 = smov 36  }
  0x27   : > { %s9865_s1 = sld [smem:[#allocation20_spill]]  ;;  %s7767_s30 = scalar_lea.vmem %s231_s16, 512 }
  0x28   : > { %p7768_p6 = scmp.ne.s32.totalorder %s231_s16, %s7767_s30  ;;  %p7775_p1 = scmp.lt.s32.totalorder %s231_s16, %s231_s16 }
  0x29   : > { %p7776_p4 = scmp.lt.s32.totalorder %s7767_s30, %s7767_s30 }
  0x2a   : > { %p7770_p12 = pnand %p7768_p6, %p7732_p11 }
  0x2b   : > { %p7777_p3 = por %p7776_p4, %p7775_p1 }
  0x2c   : > { %p7771_p13 = pneg %p7770_p12 }
  0x2d   : > { %7552 = dma.hbm_to_vmem [thread:$0]  (!%p8074_p10), %s9865_s1, 1152, %s215_s13, [#allocation7], %s7944_s18, %s7944_s18, %s7945_s19  }
  0x2e   : > { %p7778_p0 = pnand %p7777_p3, %p7771_p13 }
  0x30   : > { %7781 = shalt.err (!%p7778_p0)
}
  0x31   : > { %s7946_s12 = smov 128   ;;  %s7947_s15 = smov 8  }
  0x32   : > { %s9866_s3 = sld [smem:[#allocation21_spill]]  ;;  %s7948_s13 = smov [#allocation9]  }
  0x33   : > { %s244_s18 = sshll.u32 %s7948_s13, 4  ;;  %s245_s18 = int_to_ptr.vmem [resolvable:$true] %s244_s18 }
  0x34   : > { %s7793_s19 = scalar_lea.vmem %s245_s18, 128  ;;  %p7801_p4 = scmp.lt.s32.totalorder %s245_s18, %s245_s18 }
  0x35   : > { %p7794_p6 = scmp.ne.s32.totalorder %s245_s18, %s7793_s19  ;;  %p7802_p7 = scmp.lt.s32.totalorder %s7793_s19, %s7793_s19 }
  0x37   : > { %p7796_p5 = pnand %p7794_p6, %p7732_p11  ;;  %p7803_p9 = por %p7802_p7, %p7801_p4 }
  0x38   : > { %7555 = dma.hbm_to_vmem [thread:$0]  (!%p8074_p10), %s9866_s3, 512, %s231_s16, [#allocation7], %s7946_s12, %s7946_s12, %s7947_s15  }
  0x39   : > { %p7797_p1 = pneg %p7796_p5 }
  0x3b   : > { %p7804_p12 = pnand %p7803_p9, %p7797_p1 }
  0x3d   : > { %7807 = shalt.err (!%p7804_p12)
}
  0x3e   : > { %s9867_s4 = sld [smem:[#allocation22_spill]]  ;;  %s33_s10 = sadd.s32 1, %s7932_s26 }
  0x3f   : > { %p34_p11 = scmp.ge.s32.totalorder %s33_s10, 2  ;;  %s36_s14 = sadd.s32 1, %s7936_s27 }
  0x40   : > { %s45_s16 = sadd.s32 1, %s7920_s23  ;;  %p52_p13 = scmp.ne.s32.totalorder %s7920_s23, %s7916_s22 }
  0x41   : > { %s9889_s10 = smov (%p34_p11, %s33_s10), 0  ;;  %s9891_s14 = smov (!%p34_p11, %s36_s14), %s7936_s27 }
  0x42   : > { %9868 = sst [smem:[#allocation18_spill]] %s9889_s10  ;;  %s41_s30 = ssub.s32 %s7932_s26, %s9889_s10 }
  0x43   : > { %p53_p3 = scmp.eq.s32.totalorder %s7940_s28, 0  ;;  %p38_p0 = scmp.ge.s32.totalorder %s9891_s14, 2 }
  0x44   : > { %7558 = dma.hbm_to_vmem [thread:$0]  (!%p8074_p10), %s9867_s4, 128, %s245_s18, [#allocation10]  }
  0x45   : > { %p8117_p6 = por %p8050_p2, %p52_p13  ;;  %p8121_p10 = por %p53_p3, %p52_p13 }
  0x46   : > { %p7570_p5 = scmp.lt.s32.totalorder %s7940_s28, 4  ;;  %s9893_s14 = smov (%p38_p0, %s9891_s14), 0 }
  0x47   : > { %s9869_s12 = scalar_select %p8117_p6, 1, 0 }
  0x48   : > { %s258_s17 = sand.u32 1, %s7920_s23   ;;  %s7271_s13 = sshll.u32 %s7936_s27, 1 }
  0x49   : > { %9870 = sst [smem:[#allocation19_spill]] %s9869_s12  ;;  %s40_s18 = ssub.s32 %s7936_s27, %s9893_s14 }
  0x4a   : > { %s42_s19 = sor.u32 %s41_s30, %s40_s18  ;;  %s7270_s20 = sshll.u32 %s258_s17, 2 }
  0x4b   : > { %p43_p1 = scmp.eq.s32.totalorder %s42_s19, 0  ;;  %s267_s8 = sadd.s32 %s7932_s26, %s7271_s13 }
  0x4c   : > { %s262_s29 = scalar_lea.vmem [#allocation3], %s7270_s20  ;;  %s7272_s4 = sshll.u32 %s267_s8, 6 }
  0x4d   : > { %s271_s1 = sshll.u32 %s262_s29, 4  ;;  %s269_s6 = scalar_lea.hbm %s9837_s0, %s7272_s4  ;;  %s272_s1 = int_to_ptr.vmem [resolvable:$true] %s271_s1 }
  0x4e   : > { %s8134_s3 = scalar_select %p43_p1, %s7920_s23, %s45_s16  }
  0x4f   : > { %p8143_p2 = pnand %p7570_p5, %p8121_p10  ;;  %s259_s30 = scalar_lea.sflag [#allocation4], %s258_s17 }
  0x50   : > { %s7821_s13 = scalar_lea.vmem %s272_s1, 64  ;;  %s7949_s16 = smov [#allocation3]  }
  0x51   : > { %p7810_p4 = pneg %p8143_p2  ;;  %p7822_p7 = scmp.ne.s32.totalorder %s272_s1, %s7821_s13 }
  0x52   : > { %s7826_s18 = sshll.u32 %s7949_s16, 4  ;;  %s7827_s18 = int_to_ptr.vmem [resolvable:$false] %s7826_s18 }
  0x53   : > { %p7824_p9 = pnand %p7822_p7, %p7810_p4  ;;  %s7828_s19 = scalar_lea.vmem %s7827_s18, 128 }
  0x54   : > { %p7829_p11 = scmp.lt.s32.totalorder %s272_s1, %s7827_s18  ;;  %p7830_p13 = scmp.lt.s32.totalorder %s7828_s19, %s7821_s13 }
  0x55   : > { %p7825_p12 = pneg %p7824_p9 }
  0x56   : > { %p7831_p3 = por %p7830_p13, %p7829_p11 }
  0x58   : > { %p7832_p0 = pnand %p7831_p3, %p7825_p12 }
  0x5a   : > { %7835 = shalt.err (!%p7832_p0)
}
  0x5b   : > { %7562 = dma.hbm_to_vmem [thread:$0]  (!%p8143_p2), %s269_s6, 64, %s272_s1, %s259_s30  }
  0x5c   : > { %280 = sbr.rel (%p8066_p8) target bundleno = 9166 (0x23ce), region = 44  ;;  %s8154_s4 = sand.u32 (!%p8066_p8), 1, %s7916_s22  }
  0x5d   : > { %s7274_s21 = sshll.u32 (!%p8066_p8), %s8154_s4, 2  ;;  %s283_s10 = scalar_lea.sflag (!%p8066_p8), [#allocation4], %s8154_s4 }
  0x5e   : > { %s8158_s15 = scalar_lea.vmem (!%p8066_p8), [#allocation3], %s7274_s21  ;;  %p9873_p10 = scmp.ne.s32.totalorder (!%p8066_p8), %s9860_s9, 0 }
  0x61   : > { %7895 = dma.done.wait (%p9873_p10), %s283_s10, 64  }
  0x62   : > { %7897 = vsyncadd (%p9873_p10), %s283_s10, 4294967232  ;;  %p9874_p5 = scmp.ne.s32.totalorder %s9858_s7, 0 }
  0x64   : > { %7899 = dma.done.wait (%p9874_p5), [#allocation7], 1664  }
  0x65   : > { %7901 = vsyncadd (%p9874_p5), [#allocation7], 4294965632 }
  0x66   : > { %7903 = dma.done.wait (%p9874_p5), [#allocation10], 128  }
  0x67   : > { %7905 = vsyncadd (%p9874_p5), [#allocation10], 4294967168  ;;  %s7278_s1 = sshll.u32 %s8154_s4, 3  ;;  %p7279_p8 = scmp.ne.s32.totalorder %s7924_s24, 0 }
  0x68   : > { %s8173_s6 = scalar_lea.vmem [#allocation11], %s7278_s1 }
  0x69   : > { %331 = sbr.rel (%p7279_p8) target bundleno = 112 (0x70), region = 64 }
  0x6e   : > { %vm332_vm0 = vcmask 253952   ;;  %v7950_v0 = vmov 0.0  }
  0x6f   : > { %333 = vst.msk [vmem:[#allocation2] sm:$0x1] %vm332_vm0, %v7950_v0 }
  0x70 PF: > { %v8176_v1 = vld [vmem:[#allocation6 + $0x4] ss:$36 sps:$4 sm:$0xff]   ;;  %v7951_v3 = vmov 0   ;;  %v8184_v4 = vld [vmem:[%s8158_s15] sm:$0x1]  ;;  %vm399_vm1 = vcmask 130048   ;;  %v691_v39 = vlaneseq }
  0x71   : > { %v8178_v2 = vld [vmem:[#allocation6] ss:$36 sps:$4 sm:$0xff]   ;;  %435 = vmatprep.mubr.bf16.mxu0 %v7951_v3  ;;  %476 = vmatprep.mubr.bf16.mxu1 %v7951_v3  ;;  %v8186_v5 = vld [vmem:[#allocation6 + $0x14] ss:$36 sps:$4 sm:$0xff]   ;;  %v8192_v7 = vld [vmem:[#allocation6 + $0xc] ss:$36 sps:$4 sm:$0xff]  }
  0x72   : > { %417 = vmatprep.subr.bf16.mxu0 %v8176_v1  ;;  %v8189_v6 = vld [vmem:[#allocation6 + $0x10] ss:$36 sps:$4 sm:$0xff]   ;;  %v8194_v8 = vld [vmem:[#allocation6 + $0x8] ss:$36 sps:$4 sm:$0xff]   ;;  %458 = vmatprep.subr.bf16.mxu1 %v8192_v7  ;;  %v7952_v9 = vmov 0.0   ;;  %vm7953_vm2 = vmmov 0  }
  0x73   : > { %418 = vmatpush1.bf16.msra.mxu0 %v8178_v2  ;;  %459 = vmatpush1.bf16.msra.mxu1 %v8194_v8  ;;  %v8203_v10 = vld [vmem:[#allocation6 + $0x20] ss:$36 sps:$4 sm:$0xff]   ;;  %v8234_v23 = vld [vmem:[%s9839_s2] sm:$0x1]  ;;  %s7954_s11 = smov 116   ;;  %s7955_s12 = smov 124  }
  0x74   : > { %499 = vmatprep.subr.bf16.mxu0 %v8186_v5  ;;  %s7956_s17 = smov 112   ;;  %s7957_s20 = smov 120   ;;  %v8246_v32 = vld [vmem:[#allocation6 + $0x1c] ss:$36 sps:$4 sm:$0xff]   ;;  %v8282_v34 = vld [vmem:[#allocation9] sm:$0xff]  ;;  %v692_v43 = vshrl.u32 %v691_v39, 7 }
  0x75   : > { %s7958_s8 = smov 104   ;;  %s7959_s29 = smov 108   ;;  %v8249_v33 = vld [vmem:[#allocation6 + $0x18] ss:$36 sps:$4 sm:$0xff]   ;;  %540 = vmatprep.subr.bf16.mxu1 %v8246_v32  ;;  %v7964_v37 = vmov 1983009808  }
  0x76   : > { %7289 = vmatmul.mubr.msk.bf16.vlgmr.msra.gmra.mxu0 %vm399_vm1, %v8184_v4  ;;  %7290 = vmatmul.mubr.msk.bf16.vlgmr.msra.gmra.mxu1 %vm399_vm1, %v8184_v4  ;;  %v351_v24 = vld [vmem:[#allocation2] sm:$0x1]  ;;  %s7960_s30 = smov 100   ;;  %s7961_s13 = smov 96   ;;  %v689_v38 = vunpack.c.l.s4 %v7964_v37  ;;  %v7965_v45 = vmov 1934713408  }
  0x77   : > { %500 = vmatpush1.bf16.msra.mxu0 %v8189_v6  ;;  %517 = vmatprep.mubr.bf16.mxu0 %v7951_v3  ;;  %s7962_s16 = smov 64   ;;  %s7963_s18 = smov 32   ;;  %v721_v46 = vunpack.c.l.s4 %v7965_v45  ;;  %vm961_vm3 = vcmask 31744   ;;  %vm972_vm4 = vcmask 64512   ;;  %vm1239_vm5 = vcmask 253952  }
  0x78   : > { %7405 = vmatprep.subr.bf16.mxu0 %v7952_v9  ;;  %558 = vmatprep.mubr.bf16.mxu1 %v7951_v3  ;;  %v690_v42 = vunpack.c.0.s8 %v689_v38  ;;  %vm1068_vm6 = vcmask 261120   ;;  %s7966_s10 = smov [#allocation11]  }
  0x79   : > { %541 = vmatpush1.bf16.msra.mxu1 %v8249_v33  ;;  %v722_v53 = vunpack.c.0.s8 %v721_v46  ;;  %s7840_s1 = sshll.u32 %s7966_s10, 4  ;;  %s7841_s1 = int_to_ptr.vmem [resolvable:$false] %s7840_s1 }
  0x7a   : > { %7411 = vmatprep.subr.mxu1 %v7952_v9  ;;  %v8292_v49 = vsub.s32 %v690_v42, %v692_v43  ;;  %s7842_s7 = scalar_lea.vmem %s7841_s1, 256 }
  0x7b   : > { %v8298_v60 = vsub.s32 %v722_v53, %v692_v43 }
  0x7e   : > { %7291 = vmatmul.mubr.msk.bf16.vlgmr.msra.gmra.mxu0 %vm399_vm1, %v8184_v4  ;;  %7292 = vmatmul.mubr.msk.bf16.vlgmr.msra.gmra.mxu1 %vm399_vm1, %v8184_v4 }
  0x7f   : > { %7406 = vmatpush3.bf16.msra.mxu0 %v8203_v10  ;;  %7407 = vmatprep.mubr.msk.bf16.mxu0 %vm7953_vm2, %v7952_v9 }
  0x80   : > { %1265 = vmatprep.subr.bf16.mxu0 %v8176_v1  ;;  %7413 = vmatprep.mubr.msk.f32.mxu1 %vm7953_vm2, %v7952_v9 }
  0x81   : > { %7412 = vmatpush3.msra.mxu1 %v8282_v34 }
  0x82   : > { %7416 = vmatprep.subr.mxu1 %v7952_v9 }
  0x86   : > { %7408 = vmatmul.mubr.msk.bf16.vlgmr.msra.gmra.mxu0 %vm399_vm1, %v8184_v4 }
  0x87   : > { %1266 = vmatpush1.bf16.msra.mxu0 %v8178_v2  ;;  %1283 = vmatprep.mubr.bf16.mxu0 %v7951_v3 }
  0x88   : > { %1347 = vmatprep.subr.bf16.mxu0 %v8186_v5 }
 0x136   : > { %v8219_v11 = vpop.f32.mrf.mxu0  ;;  %v8223_v14 = vpop.f32.mrf.mxu1 }
 0x138   : > { %v8221_v12 = vpop.f32.mrf.mxu0  ;;  %v8225_v16 = vpop.f32.mrf.mxu1 }
 0x13a   : > { %v441_v13 = vpop.f32.mrf.mxu0  ;;  %v482_v18 = vpop.f32.mrf.mxu1 }
 0x13c   : > { %v442_v15 = vpop.f32.mrf.mxu0  ;;  %v483_v20 = vpop.f32.mrf.mxu1 }
 0x13e   : > { %v8227_v17 = vpop.f32.mrf.mxu0  ;;  %v8309_v13 = vpop.f32.mrf.mxu1 }
 0x140   : > { %v8229_v19 = vpop.f32.mrf.mxu0  ;;  %v8315_v15 = vpop.f32.mrf.mxu1 }
 0x142   : > { %v523_v21 = vpop.f32.mrf.mxu0  ;;  %v564_v18 = vpop.f32.mrf.mxu1 }
 0x143   : > { %v967_v21 = vand.u32 127, %v691_v39 }
 0x144   : > { %v524_v22 = vpop.f32.mrf.mxu0  ;;  %v565_v20 = vpop.f32.mrf.mxu1 }
 0x145   : > { %v8325_v22 = vsub.s32 %v967_v21, %v692_v43 }
 0x146   : > { %v601_v25 = vpop.f32.mrf.mxu0 }
 0x147   : > { %v8237_v26 = vadd.f32 %v601_v25, %v8234_v23 }
 0x148   : > { %v7409_v27 = vpop.f32.mrf.mxu0 }
 0x149   : > { %v888_v28 = vadd.f32 %v8237_v26, %v351_v24  ;;  %v8336_v27 = vld [vmem:[%s9842_s5] sm:$0x1] }
 0x14a   : > { %v604_v29 = vpop.f32.mrf.mxu0 }
 0x14b   : > { %v889_v30 = vmax.f32 %v888_v28, 0.0  ;;  %v8338_v29 = vsub.s32 0, %v692_v43 }
 0x14c   : > { %v7410_v31 = vpop.f32.mrf.mxu0 }
 0x14d   : > { %897 = vrot.lane.b32.xlu1 %v889_v30, %s7954_s11  ;;  %891 = vrot.lane.b32.xlu0 %v889_v30, %s7955_s12 }
 0x151   : > { %900 = vrot.lane.b32.xlu1 %v889_v30, %s7956_s17  ;;  %894 = vrot.lane.b32.xlu0 %v889_v30, %s7957_s20 }
 0x155   : > { %906 = vrot.lane.b32.xlu1 %v889_v30, %s7958_s8  ;;  %903 = vrot.lane.b32.xlu0 %v889_v30, %s7959_s29 }
 0x159   : > { %909 = vrot.lane.b32.xlu0 %v889_v30, %s7960_s30 }
 0x15d   : > { %608 = vrot.lane.b32.xlu0 %v8219_v11, %s7961_s13 }
 0x161   : > { %611 = vrot.lane.b32.xlu0 %v8219_v11, %s7962_s16 }
 0x165   : > { %614 = vrot.lane.b32.xlu0 %v8219_v11, %s7963_s18 }
 0x169   : > { %618 = vrot.lane.b32.xlu0 %v8221_v12, %s7961_s13 }
 0x16d   : > { %621 = vrot.lane.b32.xlu0 %v8221_v12, %s7962_s16 }
 0x171   : > { %624 = vrot.lane.b32.xlu0 %v8221_v12, %s7963_s18 }
 0x175   : > { %628 = vrot.lane.b32.xlu0 %v8223_v14, %s7961_s13 }
 0x179   : > { %631 = vrot.lane.b32.xlu0 %v8223_v14, %s7962_s16 }
 0x17d   : > { %634 = vrot.lane.b32.xlu0 %v8223_v14, %s7963_s18 }
 0x181   : > { %641 = vrot.lane.b32.xlu0 %v8225_v16, %s7962_s16 }
 0x185   : > { %644 = vrot.lane.b32.xlu0 %v8225_v16, %s7963_s18 }
 0x189   : > { %648 = vrot.lane.b32.xlu0 %v8227_v17, %s7961_s13 }
 0x18d   : > { %651 = vrot.lane.b32.xlu0 %v8227_v17, %s7962_s16 }
 0x191   : > { %658 = vrot.lane.b32.xlu0 %v8229_v19, %s7961_s13 }
 0x195   : > { %664 = vrot.lane.b32.xlu0 %v8229_v19, %s7963_s18 }
 0x199   : > { %671 = vrot.lane.b32.xlu0 %v8309_v13, %s7962_s16 }
 0x19d   : > { %678 = vrot.lane.b32.xlu0 %v8315_v15, %s7961_s13 }
 0x1a1   : > { %684 = vrot.lane.b32.xlu0 %v8315_v15, %s7963_s18 }
 0x1bf   : > { %v898_v35 = vpop.permute.xlu1 %897  ;;  %v892_v36 = vpop.permute.xlu0 %891 }
 0x1c0   : > { %v920_v50 = vcombine.low %v892_v36, %v898_v35 }
 0x1c2   : > { %v927_v55 = vrot.slane %v920_v50, %v8292_v49 }
 0x1c3   : > { %v901_v40 = vpop.permute.xlu1 %900  ;;  %v895_v41 = vpop.permute.xlu0 %894 }
 0x1c4   : > { %v912_v44 = vcombine.low %v889_v30, %v895_v41 }
 0x1c6   : > { %v919_v51 = vrot.slane %v912_v44, %v8292_v49 }
 0x1c7   : > { %v907_v47 = vpop.permute.xlu1 %906  ;;  %v904_v48 = vpop.permute.xlu0 %903 }
 0x1c8   : > { %v928_v52 = vcombine.low %v901_v40, %v907_v47  ;;  %v944_v57 = vcombine.low %v919_v51, %v927_v55 }
 0x1ca   : > { %v935_v58 = vrot.slane %v928_v52, %v8292_v49  ;;  %v951_v62 = vrot.slane %v944_v57, %v8298_v60 }
 0x1cb   : > { %v910_v54 = vpop.permute.xlu0 %909 }
 0x1cc   : > { %v936_v56 = vcombine.low %v904_v48, %v910_v54 }
 0x1ce   : > { %v943_v59 = vrot.slane %v936_v56, %v8292_v49 }
 0x1cf   : > { %v609_v28 = vpop.permute.xlu0 %608 }
 0x1d0   : > { %v952_v61 = vcombine.low %v935_v58, %v943_v59 }
 0x1d2   : > { %v959_v63 = vrot.slane %v952_v61, %v8298_v60 }
 0x1d3   : > { %v612_v37 = vpop.permute.xlu0 %611 }
 0x1d4   : > { %v960_v0 = vcombine.low %v951_v62, %v959_v63  ;;  %v687_v21 = vcombine.low %v8219_v11, %v612_v37 }
 0x1d6   : > { %v962_v4 = vsel %vm961_vm3, %v960_v0, -inf }
 0x1d7   : > { %963 = vmax.xlane.f32.xlu1 %v962_v4  ;;  %v615_v38 = vpop.permute.xlu0 %614 }
 0x1d8   : > { %v695_v4 = vcombine.low %v609_v28, %v615_v38 }
 0x1da   : > { %v702_v37 = vrot.slane %v695_v4, %v8292_v49  ;;  %v8379_v4 = vld [vmem:[#allocation8 + $0x8] sm:$0xff] }
 0x1db   : > { %v619_v39 = vpop.permute.xlu0 %618 }
 0x1df   : > { %v622_v40 = vpop.permute.xlu0 %621 }
 0x1e3   : > { %v625_v41 = vpop.permute.xlu0 %624 }
 0x1e4   : > { %v711_v59 = vcombine.low %v619_v39, %v625_v41  ;;  %v694_v39 = vrot.slane %v687_v21, %v8292_v49 }
 0x1e7   : > { %v629_v42 = vpop.permute.xlu0 %628 }
 0x1e8   : > { %638 = vrot.lane.b32.xlu1 %v8225_v16, %s7961_s13 }
 0x1eb   : > { %v632_v43 = vpop.permute.xlu0 %631 }
 0x1ec   : > { %654 = vrot.lane.b32.xlu1 %v8227_v17, %s7963_s18  ;;  %v736_v61 = vcombine.low %v8223_v14, %v632_v43 }
 0x1ef   : > { %v635_v44 = vpop.permute.xlu0 %634 }
 0x1f0   : > { %661 = vrot.lane.b32.xlu1 %v8229_v19, %s7962_s16  ;;  %v744_v62 = vcombine.low %v629_v42, %v635_v44 }
 0x1f3   : > { %v642_v45 = vpop.permute.xlu0 %641 }
 0x1f4   : > { %668 = vrot.lane.b32.xlu1 %v8309_v13, %s7961_s13  ;;  %v752_v63 = vcombine.low %v8225_v16, %v642_v45 }
 0x1f7   : > { %v645_v46 = vpop.permute.xlu0 %644 }
 0x1f8   : > { %674 = vrot.lane.b32.xlu1 %v8309_v13, %s7963_s18 }
 0x1fb   : > { %v649_v47 = vpop.permute.xlu0 %648 }
 0x1fc   : > { %681 = vrot.lane.b32.xlu1 %v8315_v15, %s7962_s16 }
 0x1ff   : > { %v652_v48 = vpop.permute.xlu0 %651 }
 0x200   : > { %v785_v43 = vcombine.low %v8227_v17, %v652_v48 }
 0x203   : > { %v659_v51 = vpop.permute.xlu0 %658 }
 0x207   : > { %v665_v53 = vpop.permute.xlu0 %664 }
 0x208   : > { %v809_v38 = vcombine.low %v659_v51, %v665_v53 }
 0x20a   : > { %v816_v51 = vrot.slane %v809_v38, %v8292_v49 }
 0x20b   : > { %v672_v56 = vpop.permute.xlu0 %671 }
 0x20c   : > { %v834_v28 = vcombine.low %v8309_v13, %v672_v56 }
 0x20f   : > { %v679_v58 = vpop.permute.xlu0 %678 }
 0x213   : > { %v685_v20 = vpop.permute.xlu0 %684 }
 0x214   : > { %v858_v11 = vcombine.low %v679_v58, %v685_v20 }
 0x260   : > { %v964_v24 = vpop.xlane.xlu1 %963 }
 0x261   : > { %v971_v25 = vrot.slane %v964_v24, %v8325_v22 }
 0x263   : > { %7414 = vmatmul.mubr.msk.f32.vlgmr.msra.gmra.mxu1 %vm972_vm4, %v971_v25  ;;  %v718_v25 = vrot.slane %v711_v59, %v8292_v49 }
 0x264   : > { %7417 = vmatpush3.msra.mxu1 %v8282_v34  ;;  %7418 = vmatprep.mubr.msk.f32.mxu1 %vm7953_vm2, %v7952_v9  ;;  %v639_v50 = vpop.permute.xlu1 %638 }
 0x265   : > { %1306 = vmatprep.subr.bf16.mxu1 %v8192_v7  ;;  %v760_v0 = vcombine.low %v639_v50, %v645_v46  ;;  %v865_v46 = vrot.slane %v858_v11, %v8292_v49  ;;  %v719_v50 = vcombine.low %v694_v39, %v702_v37 }
 0x267   : > { %v767_v14 = vrot.slane %v760_v0, %v8292_v49  ;;  %v8377_v0 = vld [vmem:[#allocation8] sm:$0xff] }
 0x268   : > { %v655_v52 = vpop.permute.xlu1 %654 }
 0x269   : > { %v793_v41 = vcombine.low %v649_v47, %v655_v52  ;;  %v792_v47 = vrot.slane %v785_v43, %v8292_v49 }
 0x26b   : > { %v800_v53 = vrot.slane %v793_v41, %v8292_v49 }
 0x26c   : > { %v662_v54 = vpop.permute.xlu1 %661 }
 0x26d   : > { %v801_v16 = vcombine.low %v8229_v19, %v662_v54  ;;  %v841_v19 = vrot.slane %v834_v28, %v8292_v49  ;;  %v817_v58 = vcombine.low %v792_v47, %v800_v53 }
 0x26f   : > { %v808_v45 = vrot.slane %v801_v16, %v8292_v49 }
 0x270   : > { %v669_v55 = vpop.permute.xlu1 %668 }
 0x271   : > { %v825_v52 = vcombine.low %v808_v45, %v816_v51 }
 0x274   : > { %v675_v57 = vpop.permute.xlu1 %674 }
 0x278   : > { %v682_v18 = vpop.permute.xlu1 %681 }
 0x323   : > { %v1041_v30 = vpop.f32.mrf.mxu1 }
 0x324   : > { %v1042_v31 = vadd.f32 %v1041_v30, %v8336_v27  ;;  %v743_v30 = vrot.slane %v736_v61, %v8292_v49  ;;  %v832_v61 = vrot.slane %v825_v52, %v8298_v60 }
 0x325   : > { %v7415_v35 = vpop.f32.mrf.mxu1 }
 0x326   : > { %v1048_v36 = vrot.slane %v1042_v31, %v8338_v29  ;;  %1240 = vst.msk [vmem:[%s8173_s6] sm:$0x1] %vm1239_vm5, %v1042_v31  ;;  %v759_v31 = vrot.slane %v752_v63, %v8292_v49  ;;  %v842_v35 = vcombine.low %v669_v55, %v675_v57  ;;  %v726_v57 = vrot.slane %v719_v50, %v8298_v60 }
 0x328   : > { %1054 = vbcast.lane.b32.xlu0 %v1048_v36, 264  ;;  %1050 = vbcast.lane.b32.xlu1 %v1048_v36, 256  ;;  %v776_v44 = vcombine.low %v759_v31, %v767_v14  ;;  %v849_v13 = vrot.slane %v842_v35, %v8292_v49  ;;  %v8384_v31 = vld [vmem:[#allocation8 + $0x10] sm:$0xff]  ;;  %v8386_v14 = vld [vmem:[#allocation8 + $0x18] sm:$0xff] }
 0x32a   : > { %v866_v48 = vcombine.low %v841_v19, %v849_v13  ;;  %v783_v56 = vrot.slane %v776_v44, %v8298_v60 }
 0x32c   : > { %1062 = vbcast.lane.b32.xlu0 %v1048_v36, 280  ;;  %1058 = vbcast.lane.b32.xlu1 %v1048_v36, 272  ;;  %v850_v36 = vcombine.low %v8315_v15, %v682_v18  ;;  %v824_v18 = vrot.slane %v817_v58, %v8298_v60 }
 0x32e   : > { %v857_v15 = vrot.slane %v850_v36, %v8292_v49 }
 0x330   : > { %1083 = vrot.lane.b32.xlu1 %v8237_v26, %s7961_s13  ;;  %v703_v26 = vcombine.low %v8221_v12, %v622_v40  ;;  %v751_v12 = vrot.slane %v744_v62, %v8292_v49  ;;  %v874_v54 = vcombine.low %v857_v15, %v865_v46  ;;  %v873_v62 = vrot.slane %v866_v48, %v8298_v60  ;;  %v7675_v48 = vld [vmem:[%s8158_s15] ss:$0 sps:$4 sm:$0x11]  }
 0x332   : > { %v710_v24 = vrot.slane %v703_v26, %v8292_v49  ;;  %v768_v42 = vcombine.low %v743_v30, %v751_v12  ;;  %v881_v63 = vrot.slane %v874_v54, %v8298_v60  ;;  %v8401_v54 = vshrl.u32 %v7675_v48, 16 }
 0x334   : > { %v727_v40 = vcombine.low %v710_v24, %v718_v25  ;;  %v775_v55 = vrot.slane %v768_v42, %v8298_v60  ;;  %v833_v24 = vcombine.low %v824_v18, %v832_v61  ;;  %v882_v25 = vcombine.low %v873_v62, %v881_v63  ;;  %7297 = vmatmul.mubr.msk.bf16.vlgmr.msra.gmra.mxu0 %vm399_vm1, %v8401_v54 }
 0x335   : > { %1348 = vmatpush1.bf16.msra.mxu0 %v8189_v6  ;;  %1365 = vmatprep.mubr.bf16.mxu0 %v7951_v3 }
 0x336   : > { %v734_v17 = vrot.slane %v727_v40, %v8298_v60  ;;  %v784_v59 = vcombine.low %v775_v55, %v783_v56  ;;  %v885_v11 = vadd.f32 %v833_v24, %v8384_v31  ;;  %v886_v37 = vadd.f32 %v882_v25, %v8386_v14  ;;  %7421 = vmatprep.subr.bf16.mxu0 %v7952_v9 }
 0x338   : > { %v735_v26 = vcombine.low %v726_v57, %v734_v17  ;;  %v884_v21 = vadd.f32 %v784_v59, %v8379_v4 }
 0x33a   : > { %v883_v20 = vadd.f32 %v735_v26, %v8377_v0 }
 0x33c   : > { %7299 = vmatmul.mubr.msk.bf16.vlgmr.msra.gmra.mxu0 %vm399_vm1, %v8401_v54 }
 0x33d   : > { %7422 = vmatpush3.bf16.msra.mxu0 %v8203_v10  ;;  %7423 = vmatprep.mubr.msk.bf16.mxu0 %vm7953_vm2, %v7952_v9 }
 0x33e   : > { %2105 = vmatprep.subr.bf16.mxu0 %v8176_v1 }
 0x344   : > { %7424 = vmatmul.mubr.msk.bf16.vlgmr.msra.gmra.mxu0 %vm399_vm1, %v8401_v54 }
 0x345   : > { %2106 = vmatpush1.bf16.msra.mxu0 %v8178_v2  ;;  %2123 = vmatprep.mubr.bf16.mxu0 %v7951_v3 }
 0x346   : > { %2187 = vmatprep.subr.bf16.mxu0 %v8186_v5 }
 0x39a   : > { %v1051_v30 = vpop.permute.xlu1 %1050  ;;  %v1055_v12 = vpop.permute.xlu0 %1054 }
 0x39b   : > { %v1064_v16 = vmul.f32 %v1051_v30, %v883_v20  ;;  %v1065_v28 = vmul.f32 %v1055_v12, %v884_v21 }
 0x39d   : > { %v1069_v35 = vsel %vm1068_vm6, %v1064_v16, 0.0  ;;  %v1070_v36 = vsel %vm1068_vm6, %v1065_v28, 0.0 }
 0x39e   : > { %v1059_v38 = vpop.permute.xlu1 %1058  ;;  %v1063_v39 = vpop.permute.xlu0 %1062  ;;  %v1071_v42 = vadd.f32 %v1070_v36, %v1069_v35 }
 0x39f   : > { %v1066_v40 = vmul.f32 %v1059_v38, %v885_v11  ;;  %v1067_v41 = vmul.f32 %v1063_v39, %v886_v37 }
 0x3a1   : > { %v1072_v43 = vsel %vm1068_vm6, %v1066_v40, 0.0  ;;  %v1074_v45 = vsel %vm1068_vm6, %v1067_v41, 0.0 }
 0x3a2   : > { %v1073_v44 = vadd.f32 %v1072_v43, %v1071_v42  ;;  %v1084_v47 = vpop.permute.xlu1 %1083 }
 0x3a4   : > { %v1075_v19 = vadd.f32 %v1074_v45, %v1073_v44 }
 0x3a6   : > { %v1076_v13 = vrot.slane %v1075_v19, 4 }
 0x3a8   : > { %v1077_v15 = vadd.f32 %v1076_v13, %v1075_v19 }
 0x3aa   : > { %v1078_v46 = vrot.slane %v1077_v15, 2 }
 0x3ac   : > { %v1079_v50 = vadd.f32 %v1078_v46, %v1077_v15 }
 0x3ae   : > { %v1080_v51 = vrot.slane %v1079_v50, 1 }
 0x3b0   : > { %v1081_v53 = vadd.f32 %v1080_v51, %v1079_v50 }
 0x3b2   : > { %v1086_v52 = vadd.f32 %v1084_v47, %v1081_v53 }
 0x3b4   : > { %v1087_v17 = vmax.f32 %v1086_v52, 0.0 }
 0x3b6   : > { %1092 = vrot.lane.b32.xlu1 %v1087_v17, %s7957_s20  ;;  %1089 = vrot.lane.b32.xlu0 %v1087_v17, %s7955_s12 }
 0x3ba   : > { %1098 = vrot.lane.b32.xlu1 %v1087_v17, %s7956_s17  ;;  %1095 = vrot.lane.b32.xlu0 %v1087_v17, %s7954_s11 }
 0x3be   : > { %1104 = vrot.lane.b32.xlu1 %v1087_v17, %s7958_s8  ;;  %1101 = vrot.lane.b32.xlu0 %v1087_v17, %s7959_s29 }
 0x3c2   : > { %1107 = vrot.lane.b32.xlu0 %v1087_v17, %s7960_s30 }
 0x3f4   : > { %v8427_v16 = vpop.f32.mrf.mxu0 }
 0x3f6   : > { %v8431_v28 = vpop.f32.mrf.mxu0 }
 0x3f8   : > { %v1289_v35 = vpop.f32.mrf.mxu0 }
 0x3fa   : > { %v1290_v36 = vpop.f32.mrf.mxu0 }
 0x3fc   : > { %v8435_v11 = vpop.f32.mrf.mxu0 }
 0x3fe   : > { %v8439_v37 = vpop.f32.mrf.mxu0 }
 0x400   : > { %v1371_v38 = vpop.f32.mrf.mxu0 }
 0x402   : > { %v1372_v39 = vpop.f32.mrf.mxu0 }
 0x404   : > { %v1449_v40 = vpop.f32.mrf.mxu0 }
 0x406   : > { %v7425_v41 = vpop.f32.mrf.mxu0 }
 0x408   : > { %v1452_v42 = vpop.f32.mrf.mxu0 }
 0x40a   : > { %v7426_v43 = vpop.f32.mrf.mxu0 }
 0x428   : > { %v1093_v6 = vpop.permute.xlu1 %1092  ;;  %v1090_v55 = vpop.permute.xlu0 %1089 }
 0x429   : > { %v1110_v59 = vcombine.low %v1087_v17, %v1093_v6 }
 0x42b   : > { %v1117_v63 = vrot.slane %v1110_v59, %v8292_v49 }
 0x42c   : > { %v1099_v56 = vpop.permute.xlu1 %1098  ;;  %v1096_v57 = vpop.permute.xlu0 %1095 }
 0x42d   : > { %v1118_v58 = vcombine.low %v1090_v55, %v1096_v57 }
 0x42f   : > { %v1125_v61 = vrot.slane %v1118_v58, %v8292_v49 }
 0x430   : > { %v1105_v10 = vpop.permute.xlu1 %1104  ;;  %v1102_v26 = vpop.permute.xlu0 %1101 }
 0x431   : > { %v1126_v1 = vcombine.low %v1099_v56, %v1105_v10  ;;  %v1142_v2 = vcombine.low %v1117_v63, %v1125_v61 }
 0x433   : > { %v1133_v20 = vrot.slane %v1126_v1, %v8292_v49  ;;  %v1149_v24 = vrot.slane %v1142_v2, %v8298_v60 }
 0x434   : > { %v1108_v62 = vpop.permute.xlu0 %1107 }
 0x435   : > { %v1134_v18 = vcombine.low %v1102_v26, %v1108_v62 }
 0x437   : > { %v1141_v5 = vrot.slane %v1134_v18, %v8292_v49 }
 0x439   : > { %v1150_v21 = vcombine.low %v1133_v20, %v1141_v5 }
 0x43b   : > { %v1157_v25 = vrot.slane %v1150_v21, %v8298_v60 }
 0x43d   : > { %v1158_v30 = vcombine.low %v1149_v24, %v1157_v25 }
 0x43f   : > { %v1159_v12 = vsel %vm961_vm3, %v1158_v30, -inf }
 0x440   : > { %1160 = vmax.xlane.f32.xlu1 %v1159_v12 }
 0x451   : > { %1456 = vrot.lane.b32.xlu1 %v8427_v16, %s7961_s13 }
 0x455   : > { %1459 = vrot.lane.b32.xlu1 %v8427_v16, %s7962_s16 }
 0x459   : > { %1462 = vrot.lane.b32.xlu1 %v8427_v16, %s7963_s18 }
 0x45d   : > { %1466 = vrot.lane.b32.xlu1 %v8431_v28, %s7961_s13 }
 0x461   : > { %1472 = vrot.lane.b32.xlu1 %v8431_v28, %s7963_s18 }
 0x4c9   : > { %v1161_v44 = vpop.xlane.xlu1 %1160 }
 0x4ca   : > { %v1166_v45 = vrot.slane %v1161_v44, %v8325_v22 }
 0x4cc   : > { %7419 = vmatmul.mubr.msk.f32.vlgmr.msra.gmra.mxu1 %vm972_vm4, %v1166_v45 }
 0x4cd   : > { %1307 = vmatpush1.bf16.msra.mxu1 %v8194_v8  ;;  %1324 = vmatprep.mubr.bf16.mxu1 %v7951_v3  ;;  %v8462_v8 = vadd.f32 %v1449_v40, %v8234_v23  ;;  %v1457_v40 = vpop.permute.xlu1 %1456 }
 0x4ce   : > { %1388 = vmatprep.subr.bf16.mxu1 %v8246_v32 }
 0x4d0   : > { %7298 = vmatmul.mubr.msk.bf16.vlgmr.msra.gmra.mxu1 %vm399_vm1, %v8401_v54 }
 0x4d1   : > { %1389 = vmatpush1.bf16.msra.mxu1 %v8249_v33  ;;  %1406 = vmatprep.mubr.bf16.mxu1 %v7951_v3  ;;  %v1460_v41 = vpop.permute.xlu1 %1459 }
 0x4d2   : > { %7427 = vmatprep.subr.mxu1 %v7952_v9 }
 0x4d5   : > { %v1463_v42 = vpop.permute.xlu1 %1462 }
 0x4d8   : > { %7300 = vmatmul.mubr.msk.bf16.vlgmr.msra.gmra.mxu1 %vm399_vm1, %v8401_v54 }
 0x4d9   : > { %7428 = vmatpush3.msra.mxu1 %v8282_v34  ;;  %7429 = vmatprep.mubr.msk.f32.mxu1 %vm7953_vm2, %v7952_v9  ;;  %v1467_v43 = vpop.permute.xlu1 %1466 }
 0x4da   : > { %7432 = vmatprep.subr.mxu1 %v7952_v9 }
 0x58c   : > { %v1235_v32 = vpop.f32.mrf.mxu1 }
 0x58d   : > { %v1236_v33 = vadd.f32 %v1235_v32, %v8336_v27 }
 0x58e   : > { %v7420_v19 = vpop.f32.mrf.mxu1 }
 0x58f   : > { %v1736_v13 = vadd.f32 %v8462_v8, %v1236_v33 }
 0x590   : > { %v8466_v15 = vpop.f32.mrf.mxu1 }
 0x591   : > { %v1737_v46 = vmax.f32 %v1736_v13, 0.0  ;;  %1476 = vrot.lane.b32.xlu1 %v8466_v15, %s7961_s13 }
 0x592   : > { %v8470_v50 = vpop.f32.mrf.mxu1 }
 0x593   : > { %1739 = vrot.lane.b32.xlu0 %v1737_v46, %s7955_s12 }
 0x594   : > { %v1330_v51 = vpop.f32.mrf.mxu1 }
 0x595   : > { %1479 = vrot.lane.b32.xlu1 %v8466_v15, %s7962_s16 }
 0x596   : > { %v1331_v23 = vpop.f32.mrf.mxu1 }
 0x597   : > { %1742 = vrot.lane.b32.xlu0 %v1737_v46, %s7957_s20 }
 0x598   : > { %v8508_v5 = vpop.f32.mrf.mxu1 }
 0x599   : > { %1482 = vrot.lane.b32.xlu1 %v8466_v15, %s7963_s18 }
 0x59a   : > { %v8512_v21 = vpop.f32.mrf.mxu1 }
 0x59b   : > { %1745 = vrot.lane.b32.xlu0 %v1737_v46, %s7954_s11 }
 0x59c   : > { %v1412_v24 = vpop.f32.mrf.mxu1 }
 0x59d   : > { %1486 = vrot.lane.b32.xlu1 %v8470_v50, %s7961_s13 }
 0x59e   : > { %v1413_v25 = vpop.f32.mrf.mxu1 }
 0x59f   : > { %1748 = vrot.lane.b32.xlu0 %v1737_v46, %s7956_s17 }
 0x5a1   : > { %1492 = vrot.lane.b32.xlu1 %v8470_v50, %s7963_s18 }
 0x5a3   : > { %1751 = vrot.lane.b32.xlu0 %v1737_v46, %s7959_s29 }
 0x5a5   : > { %1499 = vrot.lane.b32.xlu1 %v8435_v11, %s7962_s16 }
 0x5a7   : > { %1754 = vrot.lane.b32.xlu0 %v1737_v46, %s7958_s8 }
 0x5a9   : > { %1506 = vrot.lane.b32.xlu1 %v8439_v37, %s7961_s13 }
 0x5ab   : > { %1757 = vrot.lane.b32.xlu0 %v1737_v46, %s7960_s30 }
 0x5ad   : > { %1512 = vrot.lane.b32.xlu1 %v8439_v37, %s7963_s18 }
 0x5b1   : > { %1519 = vrot.lane.b32.xlu1 %v8508_v5, %s7962_s16 }
 0x5b5   : > { %1526 = vrot.lane.b32.xlu1 %v8512_v21, %s7961_s13 }
 0x5b9   : > { %1532 = vrot.lane.b32.xlu1 %v8512_v21, %s7963_s18 }
 0x605   : > { %v1740_v53 = vpop.permute.xlu0 %1739 }
 0x609   : > { %v1743_v47 = vpop.permute.xlu0 %1742 }
 0x60a   : > { %v1760_v55 = vcombine.low %v1737_v46, %v1743_v47 }
 0x60c   : > { %v1767_v10 = vrot.slane %v1760_v55, %v8292_v49 }
 0x60d   : > { %v1746_v52 = vpop.permute.xlu0 %1745 }
 0x60e   : > { %v1768_v54 = vcombine.low %v1740_v53, %v1746_v52 }
 0x610   : > { %v1775_v56 = vrot.slane %v1768_v54, %v8292_v49 }
 0x611   : > { %v1749_v17 = vpop.permute.xlu0 %1748 }
 0x612   : > { %v1792_v59 = vcombine.low %v1767_v10, %v1775_v56 }
 0x614   : > { %v1799_v63 = vrot.slane %v1792_v59, %v8298_v60  ;;  %v1543_v59 = vcombine.low %v1457_v40, %v1463_v42 }
 0x615   : > { %v1752_v48 = vpop.permute.xlu0 %1751 }
 0x619   : > { %v1755_v6 = vpop.permute.xlu0 %1754 }
 0x61a   : > { %v1776_v57 = vcombine.low %v1749_v17, %v1755_v6 }
 0x61c   : > { %v1783_v61 = vrot.slane %v1776_v57, %v8292_v49 }
 0x61d   : > { %v1758_v58 = vpop.permute.xlu0 %1757 }
 0x61e   : > { %v1784_v26 = vcombine.low %v1752_v48, %v1758_v58 }
 0x620   : > { %v1791_v1 = vrot.slane %v1784_v26, %v8292_v49  ;;  %v1535_v26 = vcombine.low %v8427_v16, %v1460_v41 }
 0x622   : > { %v1800_v62 = vcombine.low %v1783_v61, %v1791_v1 }
 0x624   : > { %v1807_v18 = vrot.slane %v1800_v62, %v8298_v60 }
 0x626   : > { %v1808_v2 = vcombine.low %v1799_v63, %v1807_v18 }
 0x628   : > { %v1809_v20 = vsel %vm961_vm3, %v1808_v2, -inf }
 0x629   : > { %1810 = vmax.xlane.f32.xlu0 %v1809_v20 }
 0x63f   : > { %1469 = vrot.lane.b32.xlu0 %v8431_v28, %s7962_s16 }
 0x643   : > { %1489 = vrot.lane.b32.xlu0 %v8470_v50, %s7962_s16 }
 0x647   : > { %1496 = vrot.lane.b32.xlu0 %v8435_v11, %s7961_s13 }
 0x64b   : > { %1502 = vrot.lane.b32.xlu0 %v8435_v11, %s7963_s18 }
 0x64f   : > { %1509 = vrot.lane.b32.xlu0 %v8439_v37, %s7962_s16 }
 0x653   : > { %1516 = vrot.lane.b32.xlu0 %v8508_v5, %s7961_s13 }
 0x657   : > { %1522 = vrot.lane.b32.xlu0 %v8508_v5, %s7963_s18 }
 0x65b   : > { %1529 = vrot.lane.b32.xlu0 %v8512_v21, %s7962_s16 }
 0x6b2   : > { %v1811_v30 = vpop.xlane.xlu0 %1810 }
 0x6b3   : > { %v1816_v12 = vrot.slane %v1811_v30, %v8325_v22  ;;  %v1542_v30 = vrot.slane %v1535_v26, %v8292_v49 }
 0x6b5   : > { %7430 = vmatmul.mubr.msk.f32.vlgmr.msra.gmra.mxu1 %vm972_vm4, %v1816_v12  ;;  %v1550_v12 = vrot.slane %v1543_v59, %v8292_v49 }
 0x6b6   : > { %7433 = vmatpush3.msra.mxu1 %v8282_v34  ;;  %7434 = vmatprep.mubr.msk.f32.mxu1 %vm7953_vm2, %v7952_v9  ;;  %v1470_v19 = vpop.permute.xlu0 %1469 }
 0x6b7   : > { %2146 = vmatprep.subr.bf16.mxu1 %v8192_v7  ;;  %v1473_v7 = vpop.permute.xlu1 %1472  ;;  %v1551_v58 = vcombine.low %v8431_v28, %v1470_v19 }
 0x6b8   : > { %v1559_v61 = vcombine.low %v1467_v43, %v1473_v7 }
 0x6ba   : > { %v1490_v46 = vpop.permute.xlu0 %1489 }
 0x6bb   : > { %v1477_v44 = vpop.permute.xlu1 %1476  ;;  %v1600_v10 = vcombine.low %v8470_v50, %v1490_v46 }
 0x6bd   : > { %v1607_v20 = vrot.slane %v1600_v10, %v8292_v49 }
 0x6be   : > { %v1497_v23 = vpop.permute.xlu0 %1496 }
 0x6bf   : > { %v1480_v45 = vpop.permute.xlu1 %1479 }
 0x6c0   : > { %v1584_v55 = vcombine.low %v8466_v15, %v1480_v45  ;;  %v1558_v15 = vrot.slane %v1551_v58, %v8292_v49 }
 0x6c2   : > { %v1503_v47 = vpop.permute.xlu0 %1502  ;;  %v1591_v63 = vrot.slane %v1584_v55, %v8292_v49 }
 0x6c3   : > { %v1483_v32 = vpop.permute.xlu1 %1482 }
 0x6c4   : > { %v1592_v56 = vcombine.low %v1477_v44, %v1483_v32  ;;  %v1567_v44 = vcombine.low %v1542_v30, %v1550_v12 }
 0x6c6   : > { %v1510_v17 = vpop.permute.xlu0 %1509  ;;  %v1599_v18 = vrot.slane %v1592_v56, %v8292_v49 }
 0x6c7   : > { %v1487_v33 = vpop.permute.xlu1 %1486  ;;  %v1649_v28 = vcombine.low %v8439_v37, %v1510_v17 }
 0x6c9   : > { %v1656_v37 = vrot.slane %v1649_v28, %v8292_v49 }
 0x6cb   : > { %v1493_v13 = vpop.permute.xlu1 %1492 }
 0x6cc   : > { %v1608_v57 = vcombine.low %v1487_v33, %v1493_v13 }
 0x6ce   : > { %v1615_v2 = vrot.slane %v1608_v57, %v8292_v49 }
 0x6cf   : > { %v1500_v51 = vpop.permute.xlu1 %1499 }
 0x6d0   : > { %v1633_v40 = vcombine.low %v8435_v11, %v1500_v51  ;;  %v1624_v42 = vcombine.low %v1607_v20, %v1615_v2 }
 0x6d2   : > { %v1640_v33 = vrot.slane %v1633_v40, %v8292_v49  ;;  %v7676_v40 = vld [vmem:[%s8158_s15] ss:$0 sps:$4 sm:$0x22]  }
 0x6d3   : > { %v1507_v53 = vpop.permute.xlu1 %1506 }
 0x6d7   : > { %v1513_v52 = vpop.permute.xlu1 %1512 }
 0x6db   : > { %v1520_v48 = vpop.permute.xlu1 %1519 }
 0x6dc   : > { %v1682_v50 = vcombine.low %v8508_v5, %v1520_v48 }
 0x6de   : > { %v1689_v5 = vrot.slane %v1682_v50, %v8292_v49 }
 0x6df   : > { %v1527_v54 = vpop.permute.xlu1 %1526 }
 0x6e3   : > { %v1533_v1 = vpop.permute.xlu1 %1532 }
 0x6e4   : > { %v1706_v16 = vcombine.low %v1527_v54, %v1533_v1 }
 0x775   : > { %v1885_v35 = vpop.f32.mrf.mxu1 }
 0x776   : > { %v1886_v36 = vadd.f32 %v1885_v35, %v8336_v27  ;;  %v1566_v35 = vrot.slane %v1559_v61, %v8292_v49 }
 0x777   : > { %v7431_v38 = vpop.f32.mrf.mxu1 }
 0x778   : > { %v1892_v39 = vrot.slane %v1886_v36, %v8338_v29  ;;  %2082 = vst.msk [vmem:[%s8173_s6 + $0x1] sm:$0x1] %vm1239_vm5, %v1886_v36  ;;  %v1657_v36 = vcombine.low %v1507_v53, %v1513_v52  ;;  %v1616_v38 = vcombine.low %v1591_v63, %v1599_v18  ;;  %v1575_v41 = vcombine.low %v1558_v15, %v1566_v35 }
 0x779   : > { %v1574_v53 = vrot.slane %v1567_v44, %v8298_v60 }
 0x77a   : > { %1898 = vbcast.lane.b32.xlu1 %v1892_v39, 264  ;;  %1894 = vbcast.lane.b32.xlu0 %v1892_v39, 256  ;;  %v1664_v45 = vrot.slane %v1657_v36, %v8292_v49  ;;  %v1582_v19 = vrot.slane %v1575_v41, %v8298_v60  ;;  %v1623_v51 = vrot.slane %v1616_v38, %v8298_v60  ;;  %v8581_v41 = vrot.slane %v7676_v40, 1 }
 0x77c   : > { %v1673_v11 = vcombine.low %v1656_v37, %v1664_v45  ;;  %v1583_v52 = vcombine.low %v1574_v53, %v1582_v19  ;;  %7305 = vmatmul.mubr.msk.bf16.vlgmr.msra.gmra.mxu0 %vm399_vm1, %v8581_v41  ;;  %v8597_v37 = vld [vmem:[#allocation6 + $0x20] ss:$36 sps:$4 sm:$0xff]  }
 0x77d   : > { %2205 = vmatprep.mubr.bf16.mxu0 %v7951_v3 }
 0x77e   : > { %1906 = vbcast.lane.b32.xlu1 %v1892_v39, 280  ;;  %1902 = vbcast.lane.b32.xlu0 %v1892_v39, 272  ;;  %v1641_v39 = vcombine.low %v1497_v23, %v1503_v47  ;;  %v1631_v23 = vrot.slane %v1624_v42, %v8298_v60  ;;  %v1680_v54 = vrot.slane %v1673_v11, %v8298_v60  ;;  %v8587_v42 = vld [vmem:[#allocation6 + $0x10] ss:$36 sps:$4 sm:$0xff]  }
 0x77f   : > { %v1731_v56 = vadd.f32 %v1583_v52, %v8377_v0  ;;  %2188 = vmatpush1.bf16.msra.mxu0 %v8587_v42 }
 0x780   : > { %v1648_v32 = vrot.slane %v1641_v39, %v8292_v49  ;;  %v1632_v17 = vcombine.low %v1623_v51, %v1631_v23  ;;  %7437 = vmatprep.subr.bf16.mxu0 %v7952_v9 }
 0x782   : > { %1926 = vrot.lane.b32.xlu0 %v8462_v8, %s7961_s13  ;;  %v1517_v8 = vpop.permute.xlu0 %1516  ;;  %v1665_v47 = vcombine.low %v1640_v33, %v1648_v32  ;;  %v1732_v55 = vadd.f32 %v1632_v17, %v8379_v4 }
 0x784   : > { %7307 = vmatmul.mubr.msk.bf16.vlgmr.msra.gmra.mxu0 %vm399_vm1, %v8581_v41 }
 0x785   : > { %7438 = vmatpush3.bf16.msra.mxu0 %v8597_v37  ;;  %7439 = vmatprep.mubr.msk.bf16.mxu0 %vm7953_vm2, %v7952_v9 }
 0x786   : > { %v1523_v6 = vpop.permute.xlu0 %1522 }
 0x787   : > { %v1690_v24 = vcombine.low %v1517_v8, %v1523_v6  ;;  %v1672_v6 = vrot.slane %v1665_v47, %v8298_v60 }
 0x789   : > { %v1697_v43 = vrot.slane %v1690_v24, %v8292_v49  ;;  %v1681_v58 = vcombine.low %v1672_v6, %v1680_v54 }
 0x78a   : > { %v1530_v62 = vpop.permute.xlu0 %1529 }
 0x78b   : > { %v1698_v25 = vcombine.low %v8512_v21, %v1530_v62  ;;  %v1713_v21 = vrot.slane %v1706_v16, %v8292_v49  ;;  %v1714_v13 = vcombine.low %v1689_v5, %v1697_v43  ;;  %v1733_v18 = vadd.f32 %v1681_v58, %v8384_v31  ;;  %v8602_v5 = vld [vmem:[#allocation6 + $0x4] ss:$36 sps:$4 sm:$0xff]  }
 0x78c   : > { %2948 = vmatprep.subr.bf16.mxu0 %v8602_v5  ;;  %7440 = vmatmul.mubr.msk.bf16.vlgmr.msra.gmra.mxu0 %vm399_vm1, %v8581_v41  ;;  %v8607_v43 = vld [vmem:[#allocation6] ss:$36 sps:$4 sm:$0xff]  }
 0x78d   : > { %v1705_v7 = vrot.slane %v1698_v25, %v8292_v49  ;;  %v1721_v48 = vrot.slane %v1714_v13, %v8298_v60  ;;  %2949 = vmatpush1.bf16.msra.mxu0 %v8607_v43  ;;  %2966 = vmatprep.mubr.bf16.mxu0 %v7951_v3 }
 0x78f   : > { %v1722_v46 = vcombine.low %v1705_v7, %v1713_v21  ;;  %v8611_v21 = vld [vmem:[#allocation6 + $0x14] ss:$36 sps:$4 sm:$0xff]  }
 0x790   : > { %3030 = vmatprep.subr.bf16.mxu0 %v8611_v21 }
 0x791   : > { %v1729_v8 = vrot.slane %v1722_v46, %v8298_v60 }
 0x793   : > { %v1730_v57 = vcombine.low %v1721_v48, %v1729_v8 }
 0x795   : > { %v1734_v63 = vadd.f32 %v1730_v57, %v8386_v14 }
 0x7ec   : > { %v1899_v10 = vpop.permute.xlu1 %1898  ;;  %v1895_v26 = vpop.permute.xlu0 %1894 }
 0x7ed   : > { %v1909_v59 = vmul.f32 %v1899_v10, %v1732_v55  ;;  %v1908_v61 = vmul.f32 %v1895_v26, %v1731_v56 }
 0x7ef   : > { %v1913_v1 = vsel %vm1068_vm6, %v1909_v59, 0.0  ;;  %v1912_v62 = vsel %vm1068_vm6, %v1908_v61, 0.0 }
 0x7f0   : > { %v1907_v2 = vpop.permute.xlu1 %1906  ;;  %v1903_v15 = vpop.permute.xlu0 %1902  ;;  %v1914_v0 = vadd.f32 %v1913_v1, %v1912_v62 }
 0x7f1   : > { %v1911_v20 = vmul.f32 %v1907_v2, %v1734_v63  ;;  %v1910_v4 = vmul.f32 %v1903_v15, %v1733_v18 }
 0x7f3   : > { %v1915_v28 = vsel %vm1068_vm6, %v1910_v4, 0.0  ;;  %v1917_v24 = vsel %vm1068_vm6, %v1911_v20, 0.0 }
 0x7f4   : > { %v1916_v50 = vadd.f32 %v1915_v28, %v1914_v0  ;;  %v1927_v38 = vpop.permute.xlu0 %1926  ;;  %v8641_v0 = vld [vmem:[#allocation6 + $0x8] ss:$36 sps:$4 sm:$0xff]   ;;  %v8645_v28 = vld [vmem:[#allocation6 + $0x1c] ss:$36 sps:$4 sm:$0xff]  }
 0x7f6   : > { %v1918_v16 = vadd.f32 %v1917_v24, %v1916_v50  ;;  %v8650_v50 = vld [vmem:[#allocation6 + $0x18] ss:$36 sps:$4 sm:$0xff]   ;;  %v8664_v24 = vld [vmem:[%s9839_s2] sm:$0x1] }
 0x7f8   : > { %v1919_v25 = vrot.slane %v1918_v16, 4 }
 0x7fa   : > { %v1920_v30 = vadd.f32 %v1919_v25, %v1918_v16 }
 0x7fc   : > { %v1921_v12 = vrot.slane %v1920_v30, 2 }
 0x7fe   : > { %v1922_v35 = vadd.f32 %v1921_v12, %v1920_v30 }
 0x800   : > { %v1923_v36 = vrot.slane %v1922_v35, 1 }
 0x802   : > { %v1924_v14 = vadd.f32 %v1923_v36, %v1922_v35 }
 0x804   : > { %v1929_v31 = vadd.f32 %v1927_v38, %v1924_v14 }
 0x806   : > { %v1930_v39 = vmax.f32 %v1929_v31, 0.0 }
 0x808   : > { %1935 = vrot.lane.b32.xlu0 %v1930_v39, %s7957_s20  ;;  %1932 = vrot.lane.b32.xlu1 %v1930_v39, %s7955_s12 }
 0x80c   : > { %1941 = vrot.lane.b32.xlu0 %v1930_v39, %s7956_s17  ;;  %1938 = vrot.lane.b32.xlu1 %v1930_v39, %s7954_s11 }
 0x810   : > { %1947 = vrot.lane.b32.xlu0 %v1930_v39, %s7958_s8  ;;  %1944 = vrot.lane.b32.xlu1 %v1930_v39, %s7959_s29 }
 0x814   : > { %1950 = vrot.lane.b32.xlu1 %v1930_v39, %s7960_s30 }
 0x83c   : > { %v8621_v57 = vpop.f32.mrf.mxu0 }
 0x83e   : > { %v8625_v58 = vpop.f32.mrf.mxu0 }
 0x840   : > { %v2129_v10 = vpop.f32.mrf.mxu0 }
 0x842   : > { %v2130_v26 = vpop.f32.mrf.mxu0 }
 0x844   : > { %v8629_v59 = vpop.f32.mrf.mxu0 }
 0x846   : > { %v8633_v61 = vpop.f32.mrf.mxu0 }
 0x848   : > { %v2211_v1 = vpop.f32.mrf.mxu0 }
 0x849   : > { %v8733_v1 = vld [vmem:[#allocation9] sm:$0xff] }
 0x84a   : > { %v2212_v62 = vpop.f32.mrf.mxu0 }
 0x84b   : > { %v8738_v62 = vld [vmem:[#allocation6 + $0xc] ss:$36 sps:$4 sm:$0xff]  }
 0x84c   : > { %v2289_v63 = vpop.f32.mrf.mxu0 }
 0x84d   : > { %v8667_v16 = vadd.f32 %v8664_v24, %v2289_v63 }
 0x84e   : > { %v7441_v18 = vpop.f32.mrf.mxu0 }
 0x84f   : > { %v8744_v18 = vld [vmem:[%s9842_s5] sm:$0x1] }
 0x850   : > { %v2292_v2 = vpop.f32.mrf.mxu0 }
 0x852   : > { %v7442_v15 = vpop.f32.mrf.mxu0 }
 0x87a   : > { %v1936_v7 = vpop.permute.xlu0 %1935  ;;  %v1933_v44 = vpop.permute.xlu1 %1932 }
 0x87b   : > { %v1953_v13 = vcombine.low %v1930_v39, %v1936_v7 }
 0x87d   : > { %v1960_v53 = vrot.slane %v1953_v13, %v8292_v49 }
 0x87e   : > { %v1942_v45 = vpop.permute.xlu0 %1941  ;;  %v1939_v32 = vpop.permute.xlu1 %1938 }
 0x87f   : > { %v1961_v33 = vcombine.low %v1933_v44, %v1939_v32 }
 0x881   : > { %v1968_v46 = vrot.slane %v1961_v33, %v8292_v49 }
 0x882   : > { %v1948_v11 = vpop.permute.xlu0 %1947  ;;  %v1945_v19 = vpop.permute.xlu1 %1944 }
 0x883   : > { %v1969_v51 = vcombine.low %v1942_v45, %v1948_v11  ;;  %v1985_v52 = vcombine.low %v1960_v53, %v1968_v46 }
 0x885   : > { %v1976_v17 = vrot.slane %v1969_v51, %v8292_v49  ;;  %v1992_v54 = vrot.slane %v1985_v52, %v8298_v60 }
 0x886   : > { %v1951_v23 = vpop.permute.xlu1 %1950 }
 0x887   : > { %v1977_v47 = vcombine.low %v1945_v19, %v1951_v23 }
 0x889   : > { %v1984_v48 = vrot.slane %v1977_v47, %v8292_v49 }
 0x88b   : > { %v1993_v8 = vcombine.low %v1976_v17, %v1984_v48 }
 0x88d   : > { %v2000_v6 = vrot.slane %v1993_v8, %v8298_v60 }
 0x88f   : > { %v2001_v55 = vcombine.low %v1992_v54, %v2000_v6 }
 0x891   : > { %v2002_v56 = vsel %vm961_vm3, %v2001_v55, -inf }
 0x892   : > { %2003 = vmax.xlane.f32.xlu0 %v2002_v56 }
 0x8a8   : > { %2296 = vrot.lane.b32.xlu0 %v8621_v57, %s7961_s13 }
 0x8ac   : > { %2299 = vrot.lane.b32.xlu0 %v8621_v57, %s7962_s16 }
 0x8b0   : > { %2302 = vrot.lane.b32.xlu0 %v8621_v57, %s7963_s18 }
 0x8b4   : > { %2306 = vrot.lane.b32.xlu0 %v8625_v58, %s7961_s13 }
 0x8b8   : > { %2309 = vrot.lane.b32.xlu0 %v8625_v58, %s7962_s16 }
 0x91b   : > { %v2004_v20 = vpop.xlane.xlu0 %2003 }
 0x91c   : > { %v2009_v4 = vrot.slane %v2004_v20, %v8325_v22 }
 0x91e   : > { %7435 = vmatmul.mubr.msk.f32.vlgmr.msra.gmra.mxu1 %vm972_vm4, %v2009_v4 }
 0x91f   : > { %2147 = vmatpush1.bf16.msra.mxu1 %v8641_v0  ;;  %2164 = vmatprep.mubr.bf16.mxu1 %v7951_v3  ;;  %v2297_v4 = vpop.permute.xlu0 %2296 }
 0x920   : > { %2228 = vmatprep.subr.bf16.mxu1 %v8645_v28 }
 0x922   : > { %7306 = vmatmul.mubr.msk.bf16.vlgmr.msra.gmra.mxu1 %vm399_vm1, %v8581_v41 }
 0x923   : > { %2229 = vmatpush1.bf16.msra.mxu1 %v8650_v50  ;;  %2246 = vmatprep.mubr.bf16.mxu1 %v7951_v3 }
 0x924   : > { %7443 = vmatprep.subr.mxu1 %v7952_v9 }
 0x92a   : > { %7308 = vmatmul.mubr.msk.bf16.vlgmr.msra.gmra.mxu1 %vm399_vm1, %v8581_v41 }
 0x92b   : > { %7444 = vmatpush3.msra.mxu1 %v8282_v34  ;;  %7445 = vmatprep.mubr.msk.f32.mxu1 %vm7953_vm2, %v7952_v9 }
 0x92c   : > { %7448 = vmatprep.subr.mxu1 %v7952_v9 }
 0x9de   : > { %v2078_v25 = vpop.f32.mrf.mxu1 }
 0x9df   : > { %v2079_v30 = vadd.f32 %v2078_v25, %v8336_v27  ;;  %v2300_v25 = vpop.permute.xlu0 %2299 }
 0x9e0   : > { %v7436_v12 = vpop.f32.mrf.mxu1 }
 0x9e1   : > { %v2576_v35 = vadd.f32 %v8667_v16, %v2079_v30 }
 0x9e2   : > { %v8671_v34 = vpop.f32.mrf.mxu1 }
 0x9e3   : > { %v2577_v36 = vmax.f32 %v2576_v35, 0.0  ;;  %2316 = vrot.lane.b32.xlu0 %v8671_v34, %s7961_s13  ;;  %v2303_v30 = vpop.permute.xlu0 %2302 }
 0x9e4   : > { %v8675_v14 = vpop.f32.mrf.mxu1 }
 0x9e5   : > { %2579 = vrot.lane.b32.xlu1 %v2577_v36, %s7955_s12 }
 0x9e6   : > { %v2170_v38 = vpop.f32.mrf.mxu1 }
 0x9e7   : > { %2319 = vrot.lane.b32.xlu0 %v8671_v34, %s7962_s16  ;;  %v2307_v12 = vpop.permute.xlu0 %2306 }
 0x9e8   : > { %v2171_v31 = vpop.f32.mrf.mxu1 }
 0x9e9   : > { %2582 = vrot.lane.b32.xlu1 %v2577_v36, %s7957_s20 }
 0x9ea   : > { %v8715_v54 = vpop.f32.mrf.mxu1 }
 0x9eb   : > { %2322 = vrot.lane.b32.xlu0 %v8671_v34, %s7963_s18  ;;  %v2310_v35 = vpop.permute.xlu0 %2309 }
 0x9ec   : > { %v8719_v6 = vpop.f32.mrf.mxu1 }
 0x9ed   : > { %2585 = vrot.lane.b32.xlu1 %v2577_v36, %s7954_s11 }
 0x9ee   : > { %v2252_v55 = vpop.f32.mrf.mxu1 }
 0x9ef   : > { %2326 = vrot.lane.b32.xlu0 %v8675_v14, %s7961_s13 }
 0x9f0   : > { %v2253_v56 = vpop.f32.mrf.mxu1 }
 0x9f1   : > { %2588 = vrot.lane.b32.xlu1 %v2577_v36, %s7956_s17 }
 0x9f3   : > { %2332 = vrot.lane.b32.xlu0 %v8675_v14, %s7963_s18 }
 0x9f5   : > { %2591 = vrot.lane.b32.xlu1 %v2577_v36, %s7959_s29 }
 0x9f7   : > { %2339 = vrot.lane.b32.xlu0 %v8629_v59, %s7962_s16 }
 0x9f9   : > { %2594 = vrot.lane.b32.xlu1 %v2577_v36, %s7958_s8 }
 0x9fb   : > { %2346 = vrot.lane.b32.xlu0 %v8633_v61, %s7961_s13 }
 0x9fd   : > { %2597 = vrot.lane.b32.xlu1 %v2577_v36, %s7960_s30 }
 0x9ff   : > { %2352 = vrot.lane.b32.xlu0 %v8633_v61, %s7963_s18 }
 0xa03   : > { %2359 = vrot.lane.b32.xlu0 %v8715_v54, %s7962_s16 }
 0xa07   : > { %2366 = vrot.lane.b32.xlu0 %v8719_v6, %s7961_s13 }
 0xa0b   : > { %2372 = vrot.lane.b32.xlu0 %v8719_v6, %s7963_s18 }
 0xa57   : > { %v2580_v27 = vpop.permute.xlu1 %2579 }
 0xa5b   : > { %v2583_v39 = vpop.permute.xlu1 %2582 }
 0xa5c   : > { %v2600_v32 = vcombine.low %v2577_v36, %v2583_v39  ;;  %v2317_v36 = vpop.permute.xlu0 %2316 }
 0xa5e   : > { %v2607_v13 = vrot.slane %v2600_v32, %v8292_v49 }
 0xa5f   : > { %v2586_v40 = vpop.permute.xlu1 %2585 }
 0xa60   : > { %v2608_v44 = vcombine.low %v2580_v27, %v2586_v40  ;;  %v2320_v38 = vpop.permute.xlu0 %2319 }
 0xa62   : > { %v2615_v33 = vrot.slane %v2608_v44, %v8292_v49 }
 0xa63   : > { %v2589_v41 = vpop.permute.xlu1 %2588 }
 0xa64   : > { %v2632_v51 = vcombine.low %v2607_v13, %v2615_v33  ;;  %v2323_v31 = vpop.permute.xlu0 %2322 }
 0xa66   : > { %v2639_v52 = vrot.slane %v2632_v51, %v8298_v60  ;;  %v2424_v51 = vcombine.low %v8671_v34, %v2320_v38 }
 0xa67   : > { %v2592_v7 = vpop.permute.xlu1 %2591 }
 0xa68   : > { %v2327_v27 = vpop.permute.xlu0 %2326 }
 0xa6b   : > { %v2595_v45 = vpop.permute.xlu1 %2594 }
 0xa6c   : > { %v2616_v11 = vcombine.low %v2589_v41, %v2595_v45  ;;  %v2333_v40 = vpop.permute.xlu0 %2332 }
 0xa6e   : > { %v2623_v23 = vrot.slane %v2616_v11, %v8292_v49 }
 0xa6f   : > { %v2598_v19 = vpop.permute.xlu1 %2597 }
 0xa70   : > { %v2624_v46 = vcombine.low %v2592_v7, %v2598_v19  ;;  %v2340_v7 = vpop.permute.xlu0 %2339 }
 0xa71   : > { %v2473_v38 = vcombine.low %v8629_v59, %v2340_v7 }
 0xa72   : > { %v2631_v53 = vrot.slane %v2624_v46, %v8292_v49 }
 0xa74   : > { %v2640_v47 = vcombine.low %v2623_v23, %v2631_v53  ;;  %v2347_v45 = vpop.permute.xlu0 %2346  ;;  %v2432_v23 = vcombine.low %v2317_v36, %v2323_v31  ;;  %v2448_v53 = vcombine.low %v2327_v27, %v2333_v40 }
 0xa76   : > { %v2647_v17 = vrot.slane %v2640_v47, %v8298_v60 }
 0xa78   : > { %v2648_v48 = vcombine.low %v2639_v52, %v2647_v17  ;;  %v2353_v33 = vpop.permute.xlu0 %2352  ;;  %v2375_v17 = vcombine.low %v8621_v57, %v2300_v25 }
 0xa7a   : > { %v2649_v8 = vsel %vm961_vm3, %v2648_v48, -inf  ;;  %v2383_v48 = vcombine.low %v2297_v4, %v2303_v30  ;;  %v2382_v4 = vrot.slane %v2375_v17, %v8292_v49 }
 0xa7b   : > { %2650 = vmax.xlane.f32.xlu1 %v2649_v8  ;;  %v2391_v8 = vcombine.low %v8625_v58, %v2310_v35 }
 0xa7c   : > { %v2360_v19 = vpop.permute.xlu0 %2359  ;;  %v2390_v25 = vrot.slane %v2383_v48, %v8292_v49  ;;  %v8784_v48 = vld [vmem:[#allocation8 + $0x8] sm:$0xff] }
 0xa7d   : > { %v2398_v30 = vrot.slane %v2391_v8, %v8292_v49 }
 0xa8c   : > { %2312 = vrot.lane.b32.xlu1 %v8625_v58, %s7963_s18 }
 0xa90   : > { %2329 = vrot.lane.b32.xlu1 %v8675_v14, %s7962_s16 }
 0xa94   : > { %2336 = vrot.lane.b32.xlu1 %v8629_v59, %s7961_s13 }
 0xa98   : > { %2342 = vrot.lane.b32.xlu1 %v8629_v59, %s7963_s18 }
 0xa9c   : > { %2349 = vrot.lane.b32.xlu1 %v8633_v61, %s7962_s16 }
 0xaa0   : > { %2356 = vrot.lane.b32.xlu1 %v8715_v54, %s7961_s13 }
 0xaa4   : > { %2362 = vrot.lane.b32.xlu1 %v8715_v54, %s7963_s18 }
 0xaa8   : > { %2369 = vrot.lane.b32.xlu1 %v8719_v6, %s7962_s16 }
 0xb04   : > { %v2651_v10 = vpop.xlane.xlu1 %2650 }
 0xb05   : > { %v2656_v26 = vrot.slane %v2651_v10, %v8325_v22  ;;  %v2431_v10 = vrot.slane %v2424_v51, %v8292_v49 }
 0xb07   : > { %7446 = vmatmul.mubr.msk.f32.vlgmr.msra.gmra.mxu1 %vm972_vm4, %v2656_v26  ;;  %v2439_v26 = vrot.slane %v2432_v23, %v8292_v49 }
 0xb08   : > { %7449 = vmatpush3.msra.mxu1 %v8733_v1  ;;  %7450 = vmatprep.mubr.msk.f32.mxu1 %vm7953_vm2, %v7952_v9  ;;  %v2313_v39 = vpop.permute.xlu1 %2312 }
 0xb09   : > { %2989 = vmatprep.subr.bf16.mxu1 %v8738_v62  ;;  %v2399_v47 = vcombine.low %v2307_v12, %v2313_v39  ;;  %v2497_v12 = vcombine.low %v2347_v45, %v2353_v33  ;;  %v2456_v35 = vcombine.low %v2431_v10, %v2439_v26 }
 0xb0b   : > { %v2406_v34 = vrot.slane %v2399_v47, %v8292_v49 }
 0xb0c   : > { %v2330_v41 = vpop.permute.xlu1 %2329 }
 0xb0d   : > { %v2440_v52 = vcombine.low %v8675_v14, %v2330_v41  ;;  %v2522_v14 = vcombine.low %v8715_v54, %v2360_v19  ;;  %v2415_v31 = vcombine.low %v2398_v30, %v2406_v34  ;;  %v2407_v41 = vcombine.low %v2382_v4, %v2390_v25  ;;  %v8795_v4 = vld [vmem:[#allocation8 + $0x10] sm:$0xff] }
 0xb0e   : > { %v2463_v19 = vrot.slane %v2456_v35, %v8298_v60 }
 0xb0f   : > { %v2529_v54 = vrot.slane %v2522_v14, %v8292_v49  ;;  %v2422_v7 = vrot.slane %v2415_v31, %v8298_v60 }
 0xb10   : > { %v2337_v44 = vpop.permute.xlu1 %2336 }
 0xb14   : > { %v2343_v32 = vpop.permute.xlu1 %2342 }
 0xb15   : > { %v2481_v36 = vcombine.low %v2337_v44, %v2343_v32  ;;  %v2480_v44 = vrot.slane %v2473_v38, %v8292_v49 }
 0xb17   : > { %v2488_v45 = vrot.slane %v2481_v36, %v8292_v49 }
 0xb18   : > { %v2350_v11 = vpop.permute.xlu1 %2349 }
 0xb1c   : > { %v2357_v13 = vpop.permute.xlu1 %2356 }
 0xb20   : > { %v2363_v46 = vpop.permute.xlu1 %2362 }
 0xb21   : > { %v2530_v57 = vcombine.low %v2357_v13, %v2363_v46  ;;  %v2505_v46 = vcombine.low %v2480_v44, %v2488_v45 }
 0xb23   : > { %v2537_v39 = vrot.slane %v2530_v57, %v8292_v49  ;;  %v2512_v17 = vrot.slane %v2505_v46, %v8298_v60 }
 0xb24   : > { %v2370_v56 = vpop.permute.xlu1 %2369 }
 0xb25   : > { %v2538_v58 = vcombine.low %v8719_v6, %v2370_v56  ;;  %v2554_v32 = vcombine.low %v2529_v54, %v2537_v39 }
 0xb27   : > { %v2545_v40 = vrot.slane %v2538_v58, %v8292_v49 }
 0xbc7   : > { %v2725_v63 = vpop.f32.mrf.mxu1 }
 0xbc8   : > { %v2726_v2 = vadd.f32 %v8744_v18, %v2725_v63  ;;  %v2455_v63 = vrot.slane %v2448_v53, %v8292_v49  ;;  %v2561_v53 = vrot.slane %v2554_v32, %v8298_v60  ;;  %v7677_v32 = vld [vmem:[%s8158_s15] ss:$0 sps:$4 sm:$0x22]  }
 0xbc9   : > { %v7447_v15 = vpop.f32.mrf.mxu1 }
 0xbca   : > { %v2732_v20 = vrot.slane %v2726_v2, %v8338_v29  ;;  %2922 = vst.msk [vmem:[%s8173_s6 + $0x2] sm:$0x1] %vm1239_vm5, %v2726_v2  ;;  %v2447_v2 = vrot.slane %v2440_v52, %v8292_v49  ;;  %v2489_v15 = vcombine.low %v8633_v61, %v2350_v11  ;;  %v2504_v11 = vrot.slane %v2497_v12, %v8292_v49 }
 0xbcc   : > { %2738 = vbcast.lane.b32.xlu0 %v2732_v20, 264  ;;  %2734 = vbcast.lane.b32.xlu1 %v2732_v20, 256  ;;  %v2464_v27 = vcombine.low %v2447_v2, %v2455_v63  ;;  %v2496_v61 = vrot.slane %v2489_v15, %v8292_v49 }
 0xbce   : > { %v2513_v59 = vcombine.low %v2496_v61, %v2504_v11  ;;  %v2471_v13 = vrot.slane %v2464_v27, %v8298_v60 }
 0xbd0   : > { %2746 = vbcast.lane.b32.xlu0 %v2732_v20, 280  ;;  %2742 = vbcast.lane.b32.xlu1 %v2732_v20, 272  ;;  %v2472_v23 = vcombine.low %v2463_v19, %v2471_v13  ;;  %v2520_v52 = vrot.slane %v2513_v59, %v8298_v60 }
 0xbd2   : > { %v2572_v8 = vadd.f32 %v8784_v48, %v2472_v23  ;;  %v2521_v26 = vcombine.low %v2512_v17, %v2520_v52 }
 0xbd4   : > { %2766 = vrot.lane.b32.xlu1 %v8667_v16, %s7961_s13  ;;  %v2367_v16 = vpop.permute.xlu0 %2366  ;;  %v2573_v25 = vadd.f32 %v8795_v4, %v2521_v26 }
 0xbd8   : > { %v2373_v55 = vpop.permute.xlu0 %2372 }
 0xbd9   : > { %v2546_v20 = vcombine.low %v2367_v16, %v2373_v55  ;;  %v2414_v16 = vrot.slane %v2407_v41, %v8298_v60  ;;  %v8787_v55 = vld [vmem:[#allocation8] sm:$0xff] }
 0xbdb   : > { %v2553_v6 = vrot.slane %v2546_v20, %v8292_v49  ;;  %v2423_v51 = vcombine.low %v2414_v16, %v2422_v7  ;;  %v8792_v20 = vld [vmem:[#allocation8 + $0x18] sm:$0xff] }
 0xbdd   : > { %v2562_v33 = vcombine.low %v2545_v40, %v2553_v6  ;;  %v2571_v56 = vadd.f32 %v8787_v55, %v2423_v51 }
 0xbdf   : > { %v2569_v47 = vrot.slane %v2562_v33, %v8298_v60  ;;  %v2928_v33 = vshrl.u32 %v7677_v32, 16 }
 0xbe1   : > { %v2570_v10 = vcombine.low %v2561_v53, %v2569_v47  ;;  %v8807_v19 = vrot.slane %v2928_v33, 1 }
 0xbe3   : > { %v2574_v58 = vadd.f32 %v8792_v20, %v2570_v10  ;;  %7313 = vmatmul.mubr.msk.bf16.vlgmr.msra.gmra.mxu0 %vm399_vm1, %v8807_v19 }
 0xbe4   : > { %3031 = vmatpush1.bf16.msra.mxu0 %v8587_v42  ;;  %3048 = vmatprep.mubr.bf16.mxu0 %v7951_v3 }
 0xbe5   : > { %7453 = vmatprep.subr.bf16.mxu0 %v7952_v9 }
 0xbeb   : > { %7315 = vmatmul.mubr.msk.bf16.vlgmr.msra.gmra.mxu0 %vm399_vm1, %v8807_v19 }
 0xbec   : > { %7454 = vmatpush3.bf16.msra.mxu0 %v8597_v37  ;;  %7455 = vmatprep.mubr.msk.bf16.mxu0 %vm7953_vm2, %v7952_v9 }
 0xbed   : > { %3788 = vmatprep.subr.bf16.mxu0 %v8602_v5 }
 0xbf3   : > { %7456 = vmatmul.mubr.msk.bf16.vlgmr.msra.gmra.mxu0 %vm399_vm1, %v8807_v19 }
 0xbf4   : > { %3789 = vmatpush1.bf16.msra.mxu0 %v8607_v43  ;;  %3806 = vmatprep.mubr.bf16.mxu0 %v7951_v3 }
 0xbf5   : > { %3870 = vmatprep.subr.bf16.mxu0 %v8611_v21 }
 0xc3e   : > { %v2739_v63 = vpop.permute.xlu0 %2738  ;;  %v2735_v34 = vpop.permute.xlu1 %2734 }
 0xc3f   : > { %v2749_v2 = vmul.f32 %v2739_v63, %v2572_v8  ;;  %v2748_v15 = vmul.f32 %v2735_v34, %v2571_v56 }
 0xc41   : > { %v2753_v14 = vsel %vm1068_vm6, %v2749_v2, 0.0  ;;  %v2752_v57 = vsel %vm1068_vm6, %v2748_v15, 0.0 }
 0xc42   : > { %v2747_v30 = vpop.permute.xlu0 %2746  ;;  %v2743_v12 = vpop.permute.xlu1 %2742  ;;  %v2754_v38 = vadd.f32 %v2753_v14, %v2752_v57 }
 0xc43   : > { %v2751_v35 = vmul.f32 %v2747_v30, %v2574_v58  ;;  %v2750_v36 = vmul.f32 %v2743_v12, %v2573_v25 }
 0xc45   : > { %v2755_v31 = vsel %vm1068_vm6, %v2750_v36, 0.0  ;;  %v2757_v61 = vsel %vm1068_vm6, %v2751_v35, 0.0 }
 0xc46   : > { %v2756_v27 = vadd.f32 %v2755_v31, %v2754_v38  ;;  %v2767_v44 = vpop.permute.xlu1 %2766 }
 0xc48   : > { %v2758_v54 = vadd.f32 %v2757_v61, %v2756_v27 }
 0xc4a   : > { %v2759_v39 = vrot.slane %v2758_v54, 4 }
 0xc4c   : > { %v2760_v6 = vadd.f32 %v2759_v39, %v2758_v54 }
 0xc4e   : > { %v2761_v40 = vrot.slane %v2760_v6, 2 }
 0xc50   : > { %v2762_v41 = vadd.f32 %v2761_v40, %v2760_v6 }
 0xc52   : > { %v2763_v11 = vrot.slane %v2762_v41, 1 }
 0xc54   : > { %v2764_v45 = vadd.f32 %v2763_v11, %v2762_v41 }
 0xc56   : > { %v2769_v59 = vadd.f32 %v2767_v44, %v2764_v45 }
 0xc58   : > { %v2770_v7 = vmax.f32 %v2769_v59, 0.0 }
 0xc5a   : > { %2775 = vrot.lane.b32.xlu1 %v2770_v7, %s7957_s20  ;;  %2772 = vrot.lane.b32.xlu0 %v2770_v7, %s7955_s12 }
 0xc5e   : > { %2781 = vrot.lane.b32.xlu1 %v2770_v7, %s7956_s17  ;;  %2778 = vrot.lane.b32.xlu0 %v2770_v7, %s7954_s11 }
 0xc62   : > { %2787 = vrot.lane.b32.xlu1 %v2770_v7, %s7958_s8  ;;  %2784 = vrot.lane.b32.xlu0 %v2770_v7, %s7959_s29 }
 0xc66   : > { %2790 = vrot.lane.b32.xlu0 %v2770_v7, %s7960_s30 }
 0xca3   : > { %v8833_v15 = vpop.f32.mrf.mxu0 }
 0xca5   : > { %v8837_v14 = vpop.f32.mrf.mxu0 }
 0xca7   : > { %v2972_v57 = vpop.f32.mrf.mxu0 }
 0xca9   : > { %v2973_v58 = vpop.f32.mrf.mxu0 }
 0xcab   : > { %v8841_v25 = vpop.f32.mrf.mxu0 }
 0xcad   : > { %v8845_v30 = vpop.f32.mrf.mxu0 }
 0xcaf   : > { %v3054_v12 = vpop.f32.mrf.mxu0 }
 0xcb1   : > { %v3055_v35 = vpop.f32.mrf.mxu0 }
 0xcb3   : > { %v3132_v36 = vpop.f32.mrf.mxu0 }
 0xcb5   : > { %v7457_v38 = vpop.f32.mrf.mxu0 }
 0xcb7   : > { %v3135_v31 = vpop.f32.mrf.mxu0 }
 0xcb9   : > { %v7458_v27 = vpop.f32.mrf.mxu0 }
 0xccc   : > { %v2776_v42 = vpop.permute.xlu1 %2775  ;;  %v2773_v13 = vpop.permute.xlu0 %2772 }
 0xccd   : > { %v2793_v53 = vcombine.low %v2770_v7, %v2776_v42 }
 0xccf   : > { %v2800_v17 = vrot.slane %v2793_v53, %v8292_v49 }
 0xcd0   : > { %v2782_v16 = vpop.permute.xlu1 %2781  ;;  %v2779_v46 = vpop.permute.xlu0 %2778 }
 0xcd1   : > { %v2801_v51 = vcombine.low %v2773_v13, %v2779_v46 }
 0xcd3   : > { %v2808_v47 = vrot.slane %v2801_v51, %v8292_v49 }
 0xcd4   : > { %v2788_v37 = vpop.permute.xlu1 %2787  ;;  %v2785_v23 = vpop.permute.xlu0 %2784 }
 0xcd5   : > { %v2809_v5 = vcombine.low %v2782_v16, %v2788_v37  ;;  %v2825_v43 = vcombine.low %v2800_v17, %v2808_v47 }
 0xcd7   : > { %v2816_v56 = vrot.slane %v2809_v5, %v8292_v49  ;;  %v2832_v26 = vrot.slane %v2825_v43, %v8298_v60 }
 0xcd8   : > { %v2791_v52 = vpop.permute.xlu0 %2790 }
 0xcd9   : > { %v2817_v8 = vcombine.low %v2785_v23, %v2791_v52 }
 0xcdb   : > { %v2824_v21 = vrot.slane %v2817_v8, %v8292_v49 }
 0xcdd   : > { %v2833_v10 = vcombine.low %v2816_v56, %v2824_v21 }
 0xcdf   : > { %v2840_v63 = vrot.slane %v2833_v10, %v8298_v60 }
 0xce1   : > { %v2841_v34 = vcombine.low %v2832_v26, %v2840_v63 }
 0xce3   : > { %v2842_v2 = vsel %vm961_vm3, %v2841_v34, -inf }
 0xce4   : > { %2843 = vmax.xlane.f32.xlu1 %v2842_v2 }
 0xcf5   : > { %3139 = vrot.lane.b32.xlu1 %v8833_v15, %s7961_s13 }
 0xcf9   : > { %3142 = vrot.lane.b32.xlu1 %v8833_v15, %s7962_s16 }
 0xcfd   : > { %3145 = vrot.lane.b32.xlu1 %v8833_v15, %s7963_s18 }
 0xd01   : > { %3149 = vrot.lane.b32.xlu1 %v8837_v14, %s7961_s13 }
 0xd05   : > { %3155 = vrot.lane.b32.xlu1 %v8837_v14, %s7963_s18 }
 0xd6d   : > { %v2844_v61 = vpop.xlane.xlu1 %2843 }
 0xd6e   : > { %v2849_v54 = vrot.slane %v2844_v61, %v8325_v22 }
 0xd70   : > { %7451 = vmatmul.mubr.msk.f32.vlgmr.msra.gmra.mxu1 %vm972_vm4, %v2849_v54 }
 0xd71   : > { %2990 = vmatpush1.bf16.msra.mxu1 %v8641_v0  ;;  %3007 = vmatprep.mubr.bf16.mxu1 %v7951_v3  ;;  %v8868_v0 = vadd.f32 %v8664_v24, %v3132_v36  ;;  %v3140_v36 = vpop.permute.xlu1 %3139 }
 0xd72   : > { %3071 = vmatprep.subr.bf16.mxu1 %v8645_v28 }
 0xd74   : > { %7314 = vmatmul.mubr.msk.bf16.vlgmr.msra.gmra.mxu1 %vm399_vm1, %v8807_v19 }
 0xd75   : > { %3072 = vmatpush1.bf16.msra.mxu1 %v8650_v50  ;;  %3089 = vmatprep.mubr.bf16.mxu1 %v7951_v3  ;;  %v3143_v38 = vpop.permute.xlu1 %3142 }
 0xd76   : > { %7459 = vmatprep.subr.mxu1 %v7952_v9 }
 0xd79   : > { %v3146_v31 = vpop.permute.xlu1 %3145 }
 0xd7c   : > { %7316 = vmatmul.mubr.msk.bf16.vlgmr.msra.gmra.mxu1 %vm399_vm1, %v8807_v19 }
 0xd7d   : > { %7460 = vmatpush3.msra.mxu1 %v8733_v1  ;;  %7461 = vmatprep.mubr.msk.f32.mxu1 %vm7953_vm2, %v7952_v9  ;;  %v3150_v27 = vpop.permute.xlu1 %3149 }
 0xd7e   : > { %7464 = vmatprep.subr.mxu1 %v7952_v9 }
 0xe30   : > { %v2918_v28 = vpop.f32.mrf.mxu1 }
 0xe31   : > { %v2919_v50 = vadd.f32 %v8744_v18, %v2918_v28 }
 0xe32   : > { %v7452_v39 = vpop.f32.mrf.mxu1 }
 0xe33   : > { %v3419_v6 = vadd.f32 %v8868_v0, %v2919_v50 }
 0xe34   : > { %v8872_v40 = vpop.f32.mrf.mxu1 }
 0xe35   : > { %v3420_v41 = vmax.f32 %v3419_v6, 0.0  ;;  %3159 = vrot.lane.b32.xlu1 %v8872_v40, %s7961_s13 }
 0xe36   : > { %v8876_v11 = vpop.f32.mrf.mxu1 }
 0xe37   : > { %3422 = vrot.lane.b32.xlu0 %v3420_v41, %s7955_s12 }
 0xe38   : > { %v3013_v45 = vpop.f32.mrf.mxu1 }
 0xe39   : > { %3162 = vrot.lane.b32.xlu1 %v8872_v40, %s7962_s16 }
 0xe3a   : > { %v3014_v24 = vpop.f32.mrf.mxu1 }
 0xe3b   : > { %3425 = vrot.lane.b32.xlu0 %v3420_v41, %s7957_s20 }
 0xe3c   : > { %v8914_v21 = vpop.f32.mrf.mxu1 }
 0xe3d   : > { %3165 = vrot.lane.b32.xlu1 %v8872_v40, %s7963_s18 }
 0xe3e   : > { %v8918_v10 = vpop.f32.mrf.mxu1 }
 0xe3f   : > { %3428 = vrot.lane.b32.xlu0 %v3420_v41, %s7954_s11 }
 0xe40   : > { %v3095_v26 = vpop.f32.mrf.mxu1 }
 0xe41   : > { %3169 = vrot.lane.b32.xlu1 %v8876_v11, %s7961_s13 }
 0xe42   : > { %v3096_v63 = vpop.f32.mrf.mxu1 }
 0xe43   : > { %3431 = vrot.lane.b32.xlu0 %v3420_v41, %s7956_s17 }
 0xe45   : > { %3175 = vrot.lane.b32.xlu1 %v8876_v11, %s7963_s18 }
 0xe47   : > { %3434 = vrot.lane.b32.xlu0 %v3420_v41, %s7959_s29 }
 0xe49   : > { %3182 = vrot.lane.b32.xlu1 %v8841_v25, %s7962_s16 }
 0xe4b   : > { %3437 = vrot.lane.b32.xlu0 %v3420_v41, %s7958_s8 }
 0xe4d   : > { %3189 = vrot.lane.b32.xlu1 %v8845_v30, %s7961_s13 }
 0xe4f   : > { %3440 = vrot.lane.b32.xlu0 %v3420_v41, %s7960_s30 }
 0xe51   : > { %3195 = vrot.lane.b32.xlu1 %v8845_v30, %s7963_s18 }
 0xe55   : > { %3202 = vrot.lane.b32.xlu1 %v8914_v21, %s7962_s16 }
 0xe59   : > { %3209 = vrot.lane.b32.xlu1 %v8918_v10, %s7961_s13 }
 0xe5d   : > { %3215 = vrot.lane.b32.xlu1 %v8918_v10, %s7963_s18 }
 0xea9   : > { %v3423_v44 = vpop.permute.xlu0 %3422 }
 0xead   : > { %v3426_v59 = vpop.permute.xlu0 %3425 }
 0xeae   : > { %v3443_v13 = vcombine.low %v3420_v41, %v3426_v59 }
 0xeb0   : > { %v3450_v37 = vrot.slane %v3443_v13, %v8292_v49 }
 0xeb1   : > { %v3429_v7 = vpop.permute.xlu0 %3428 }
 0xeb2   : > { %v3451_v19 = vcombine.low %v3423_v44, %v3429_v7 }
 0xeb4   : > { %v3458_v16 = vrot.slane %v3451_v19, %v8292_v49 }
 0xeb5   : > { %v3432_v32 = vpop.permute.xlu0 %3431 }
 0xeb6   : > { %v3475_v53 = vcombine.low %v3450_v37, %v3458_v16 }
 0xeb8   : > { %v3482_v17 = vrot.slane %v3475_v53, %v8298_v60  ;;  %v3226_v53 = vcombine.low %v3140_v36, %v3146_v31 }
 0xeb9   : > { %v3435_v33 = vpop.permute.xlu0 %3434 }
 0xebd   : > { %v3438_v42 = vpop.permute.xlu0 %3437 }
 0xebe   : > { %v3459_v46 = vcombine.low %v3432_v32, %v3438_v42 }
 0xec0   : > { %v3466_v47 = vrot.slane %v3459_v46, %v8292_v49 }
 0xec1   : > { %v3441_v51 = vpop.permute.xlu0 %3440 }
 0xec2   : > { %v3467_v23 = vcombine.low %v3435_v33, %v3441_v51 }
 0xec4   : > { %v3474_v5 = vrot.slane %v3467_v23, %v8292_v49  ;;  %v3218_v23 = vcombine.low %v8833_v15, %v3143_v38 }
 0xec6   : > { %v3483_v52 = vcombine.low %v3466_v47, %v3474_v5 }
 0xec8   : > { %v3490_v8 = vrot.slane %v3483_v52, %v8298_v60 }
 0xeca   : > { %v3491_v43 = vcombine.low %v3482_v17, %v3490_v8 }
 0xecc   : > { %v3492_v56 = vsel %vm961_vm3, %v3491_v43, -inf }
 0xecd   : > { %3493 = vmax.xlane.f32.xlu0 %v3492_v56 }
 0xee3   : > { %3152 = vrot.lane.b32.xlu0 %v8837_v14, %s7962_s16 }
 0xee7   : > { %3172 = vrot.lane.b32.xlu0 %v8876_v11, %s7962_s16 }
 0xeeb   : > { %3179 = vrot.lane.b32.xlu0 %v8841_v25, %s7961_s13 }
 0xeef   : > { %3185 = vrot.lane.b32.xlu0 %v8841_v25, %s7963_s18 }
 0xef3   : > { %3192 = vrot.lane.b32.xlu0 %v8845_v30, %s7962_s16 }
 0xef7   : > { %3199 = vrot.lane.b32.xlu0 %v8914_v21, %s7961_s13 }
 0xefb   : > { %3205 = vrot.lane.b32.xlu0 %v8914_v21, %s7963_s18 }
 0xeff   : > { %3212 = vrot.lane.b32.xlu0 %v8918_v10, %s7962_s16 }
 0xf56   : > { %v3494_v34 = vpop.xlane.xlu0 %3493 }
 0xf57   : > { %v3499_v2 = vrot.slane %v3494_v34, %v8325_v22  ;;  %v3225_v34 = vrot.slane %v3218_v23, %v8292_v49 }
 0xf59   : > { %7462 = vmatmul.mubr.msk.f32.vlgmr.msra.gmra.mxu1 %vm972_vm4, %v3499_v2  ;;  %v3233_v2 = vrot.slane %v3226_v53, %v8292_v49 }
 0xf5a   : > { %7465 = vmatpush3.msra.mxu1 %v8733_v1  ;;  %7466 = vmatprep.mubr.msk.f32.mxu1 %vm7953_vm2, %v7952_v9  ;;  %v3153_v39 = vpop.permute.xlu0 %3152 }
 0xf5b   : > { %3829 = vmatprep.subr.bf16.mxu1 %v8738_v62  ;;  %v3156_v62 = vpop.permute.xlu1 %3155  ;;  %v3234_v51 = vcombine.low %v8837_v14, %v3153_v39 }
 0xf5c   : > { %v3242_v47 = vcombine.low %v3150_v27, %v3156_v62 }
 0xf5e   : > { %v3173_v41 = vpop.permute.xlu0 %3172 }
 0xf5f   : > { %v3160_v61 = vpop.permute.xlu1 %3159  ;;  %v3283_v37 = vcombine.low %v8876_v11, %v3173_v41 }
 0xf61   : > { %v3290_v56 = vrot.slane %v3283_v37, %v8292_v49 }
 0xf62   : > { %v3180_v24 = vpop.permute.xlu0 %3179 }
 0xf63   : > { %v3163_v54 = vpop.permute.xlu1 %3162 }
 0xf64   : > { %v3267_v13 = vcombine.low %v8872_v40, %v3163_v54  ;;  %v3241_v40 = vrot.slane %v3234_v51, %v8292_v49 }
 0xf66   : > { %v3186_v59 = vpop.permute.xlu0 %3185  ;;  %v3274_v17 = vrot.slane %v3267_v13, %v8292_v49 }
 0xf67   : > { %v3166_v28 = vpop.permute.xlu1 %3165 }
 0xf68   : > { %v3275_v16 = vcombine.low %v3160_v61, %v3166_v28  ;;  %v3250_v61 = vcombine.low %v3225_v34, %v3233_v2 }
 0xf6a   : > { %v3193_v32 = vpop.permute.xlu0 %3192  ;;  %v3282_v8 = vrot.slane %v3275_v16, %v8292_v49 }
 0xf6b   : > { %v3170_v50 = vpop.permute.xlu1 %3169  ;;  %v3332_v14 = vcombine.low %v8845_v30, %v3193_v32 }
 0xf6d   : > { %v3339_v30 = vrot.slane %v3332_v14, %v8292_v49 }
 0xf6f   : > { %v3176_v6 = vpop.permute.xlu1 %3175 }
 0xf70   : > { %v3291_v46 = vcombine.low %v3170_v50, %v3176_v6 }
 0xf72   : > { %v3298_v43 = vrot.slane %v3291_v46, %v8292_v49 }
 0xf73   : > { %v3183_v45 = vpop.permute.xlu1 %3182 }
 0xf74   : > { %v3316_v36 = vcombine.low %v8841_v25, %v3183_v45  ;;  %v3307_v31 = vcombine.low %v3290_v56, %v3298_v43 }
 0xf76   : > { %v3323_v50 = vrot.slane %v3316_v36, %v8292_v49  ;;  %v7678_v36 = vld [vmem:[%s8158_s15] ss:$0 sps:$4 sm:$0x44]  }
 0xf77   : > { %v3190_v44 = vpop.permute.xlu1 %3189 }
 0xf7b   : > { %v3196_v7 = vpop.permute.xlu1 %3195 }
 0xf7f   : > { %v3203_v33 = vpop.permute.xlu1 %3202 }
 0xf80   : > { %v3365_v11 = vcombine.low %v8914_v21, %v3203_v33 }
 0xf82   : > { %v3372_v21 = vrot.slane %v3365_v11, %v8292_v49 }
 0xf83   : > { %v3210_v19 = vpop.permute.xlu1 %3209 }
 0xf87   : > { %v3216_v5 = vpop.permute.xlu1 %3215 }
 0xf88   : > { %v3389_v15 = vcombine.low %v3210_v19, %v3216_v5 }
0x1019   : > { %v3568_v57 = vpop.f32.mrf.mxu1 }
0x101a   : > { %v3569_v58 = vadd.f32 %v8744_v18, %v3568_v57  ;;  %v3249_v57 = vrot.slane %v3242_v47, %v8292_v49 }
0x101b   : > { %v7463_v12 = vpop.f32.mrf.mxu1 }
0x101c   : > { %v3575_v35 = vrot.slane %v3569_v58, %v8338_v29  ;;  %3765 = vst.msk [vmem:[%s8173_s6 + $0x3] sm:$0x1] %vm1239_vm5, %v3569_v58  ;;  %v3340_v58 = vcombine.low %v3190_v44, %v3196_v7  ;;  %v3299_v12 = vcombine.low %v3274_v17, %v3282_v8  ;;  %v3258_v38 = vcombine.low %v3241_v40, %v3249_v57 }
0x101d   : > { %v3257_v44 = vrot.slane %v3250_v61, %v8298_v60 }
0x101e   : > { %3581 = vbcast.lane.b32.xlu1 %v3575_v35, 264  ;;  %3577 = vbcast.lane.b32.xlu0 %v3575_v35, 256  ;;  %v3347_v54 = vrot.slane %v3340_v58, %v8292_v49  ;;  %v3265_v39 = vrot.slane %v3258_v38, %v8298_v60  ;;  %v3306_v45 = vrot.slane %v3299_v12, %v8298_v60  ;;  %v8987_v38 = vrot.slane %v7678_v36, 2 }
0x1020   : > { %v3356_v25 = vcombine.low %v3339_v30, %v3347_v54  ;;  %v3266_v7 = vcombine.low %v3257_v44, %v3265_v39  ;;  %7321 = vmatmul.mubr.msk.bf16.vlgmr.msra.gmra.mxu0 %vm399_vm1, %v8987_v38  ;;  %v9003_v30 = vld [vmem:[#allocation6 + $0x20] ss:$36 sps:$4 sm:$0xff]  }
0x1021   : > { %3888 = vmatprep.mubr.bf16.mxu0 %v7951_v3 }
0x1022   : > { %3589 = vbcast.lane.b32.xlu1 %v3575_v35, 280  ;;  %3585 = vbcast.lane.b32.xlu0 %v3575_v35, 272  ;;  %v3324_v35 = vcombine.low %v3180_v24, %v3186_v59  ;;  %v3314_v24 = vrot.slane %v3307_v31, %v8298_v60  ;;  %v3363_v19 = vrot.slane %v3356_v25, %v8298_v60  ;;  %v8993_v31 = vld [vmem:[#allocation6 + $0x10] ss:$36 sps:$4 sm:$0xff]  }
0x1023   : > { %v3414_v16 = vadd.f32 %v8787_v55, %v3266_v7  ;;  %3871 = vmatpush1.bf16.msra.mxu0 %v8993_v31 }
0x1024   : > { %v3331_v28 = vrot.slane %v3324_v35, %v8292_v49  ;;  %v3315_v32 = vcombine.low %v3306_v45, %v3314_v24  ;;  %7469 = vmatprep.subr.bf16.mxu0 %v7952_v9 }
0x1026   : > { %3609 = vrot.lane.b32.xlu0 %v8868_v0, %s7961_s13  ;;  %v3200_v0 = vpop.permute.xlu0 %3199  ;;  %v3348_v59 = vcombine.low %v3323_v50, %v3331_v28  ;;  %v3415_v13 = vadd.f32 %v8784_v48, %v3315_v32 }
0x1028   : > { %7323 = vmatmul.mubr.msk.bf16.vlgmr.msra.gmra.mxu0 %vm399_vm1, %v8987_v38 }
0x1029   : > { %7470 = vmatpush3.bf16.msra.mxu0 %v9003_v30  ;;  %7471 = vmatprep.mubr.msk.bf16.mxu0 %vm7953_vm2, %v7952_v9 }
0x102a   : > { %v3206_v42 = vpop.permute.xlu0 %3205 }
0x102b   : > { %v3373_v26 = vcombine.low %v3200_v0, %v3206_v42  ;;  %v3355_v42 = vrot.slane %v3348_v59, %v8298_v60 }
0x102d   : > { %v3380_v27 = vrot.slane %v3373_v26, %v8292_v49  ;;  %v3364_v51 = vcombine.low %v3355_v42, %v3363_v19 }
0x102e   : > { %v3213_v52 = vpop.permute.xlu0 %3212 }
0x102f   : > { %v3381_v63 = vcombine.low %v8918_v10, %v3213_v52  ;;  %v3396_v10 = vrot.slane %v3389_v15, %v8292_v49  ;;  %v3397_v6 = vcombine.low %v3372_v21, %v3380_v27  ;;  %v3416_v8 = vadd.f32 %v8795_v4, %v3364_v51  ;;  %v9008_v21 = vld [vmem:[#allocation6 + $0x4] ss:$36 sps:$4 sm:$0xff]  }
0x1030   : > { %4631 = vmatprep.subr.bf16.mxu0 %v9008_v21  ;;  %7472 = vmatmul.mubr.msk.bf16.vlgmr.msra.gmra.mxu0 %vm399_vm1, %v8987_v38  ;;  %v9013_v27 = vld [vmem:[#allocation6] ss:$36 sps:$4 sm:$0xff]  }
0x1031   : > { %v3388_v62 = vrot.slane %v3381_v63, %v8292_v49  ;;  %v3404_v33 = vrot.slane %v3397_v6, %v8298_v60  ;;  %4632 = vmatpush1.bf16.msra.mxu0 %v9013_v27  ;;  %4649 = vmatprep.mubr.bf16.mxu0 %v7951_v3 }
0x1033   : > { %v3405_v41 = vcombine.low %v3388_v62, %v3396_v10  ;;  %v9017_v10 = vld [vmem:[#allocation6 + $0x14] ss:$36 sps:$4 sm:$0xff]  }
0x1034   : > { %4713 = vmatprep.subr.bf16.mxu0 %v9017_v10 }
0x1035   : > { %v3412_v0 = vrot.slane %v3405_v41, %v8298_v60 }
0x1037   : > { %v3413_v46 = vcombine.low %v3404_v33, %v3412_v0 }
0x1039   : > { %v3417_v17 = vadd.f32 %v8792_v20, %v3413_v46 }
0x1090   : > { %v3582_v37 = vpop.permute.xlu1 %3581  ;;  %v3578_v23 = vpop.permute.xlu0 %3577 }
0x1091   : > { %v3592_v53 = vmul.f32 %v3582_v37, %v3415_v13  ;;  %v3591_v47 = vmul.f32 %v3578_v23, %v3414_v16 }
0x1093   : > { %v3596_v5 = vsel %vm1068_vm6, %v3592_v53, 0.0  ;;  %v3595_v52 = vsel %vm1068_vm6, %v3591_v47, 0.0 }
0x1094   : > { %v3590_v43 = vpop.permute.xlu1 %3589  ;;  %v3586_v40 = vpop.permute.xlu0 %3585  ;;  %v3597_v55 = vadd.f32 %v3596_v5, %v3595_v52 }
0x1095   : > { %v3594_v56 = vmul.f32 %v3590_v43, %v3417_v17  ;;  %v3593_v48 = vmul.f32 %v3586_v40, %v3416_v8 }
0x1097   : > { %v3598_v14 = vsel %vm1068_vm6, %v3593_v48, 0.0  ;;  %v3600_v26 = vsel %vm1068_vm6, %v3594_v56, 0.0 }
0x1098   : > { %v3599_v11 = vadd.f32 %v3598_v14, %v3597_v55  ;;  %v3610_v12 = vpop.permute.xlu0 %3609  ;;  %v9047_v55 = vld [vmem:[#allocation6 + $0x8] ss:$36 sps:$4 sm:$0xff]   ;;  %v9051_v14 = vld [vmem:[#allocation6 + $0x1c] ss:$36 sps:$4 sm:$0xff]  }
0x109a   : > { %v3601_v15 = vadd.f32 %v3600_v26, %v3599_v11  ;;  %v9056_v11 = vld [vmem:[#allocation6 + $0x18] ss:$36 sps:$4 sm:$0xff]   ;;  %v9070_v26 = vld [vmem:[%s9839_s2] sm:$0x1] }
0x109c   : > { %v3602_v63 = vrot.slane %v3601_v15, 4 }
0x109e   : > { %v3603_v34 = vadd.f32 %v3602_v63, %v3601_v15 }
0x10a0   : > { %v3604_v2 = vrot.slane %v3603_v34, 2 }
0x10a2   : > { %v3605_v57 = vadd.f32 %v3604_v2, %v3603_v34 }
0x10a4   : > { %v3606_v58 = vrot.slane %v3605_v57, 1 }
0x10a6   : > { %v3607_v20 = vadd.f32 %v3606_v58, %v3605_v57 }
0x10a8   : > { %v3612_v4 = vadd.f32 %v3610_v12, %v3607_v20 }
0x10aa   : > { %v3613_v35 = vmax.f32 %v3612_v4, 0.0 }
0x10ac   : > { %3618 = vrot.lane.b32.xlu0 %v3613_v35, %s7957_s20  ;;  %3615 = vrot.lane.b32.xlu1 %v3613_v35, %s7955_s12 }
0x10b0   : > { %3624 = vrot.lane.b32.xlu0 %v3613_v35, %s7956_s17  ;;  %3621 = vrot.lane.b32.xlu1 %v3613_v35, %s7954_s11 }
0x10b4   : > { %3630 = vrot.lane.b32.xlu0 %v3613_v35, %s7958_s8  ;;  %3627 = vrot.lane.b32.xlu1 %v3613_v35, %s7959_s29 }
0x10b8   : > { %3633 = vrot.lane.b32.xlu1 %v3613_v35, %s7960_s30 }
0x10e0   : > { %v9027_v46 = vpop.f32.mrf.mxu0 }
0x10e2   : > { %v9031_v51 = vpop.f32.mrf.mxu0 }
0x10e4   : > { %v3812_v37 = vpop.f32.mrf.mxu0 }
0x10e6   : > { %v3813_v23 = vpop.f32.mrf.mxu0 }
0x10e8   : > { %v9035_v53 = vpop.f32.mrf.mxu0 }
0x10ea   : > { %v9039_v47 = vpop.f32.mrf.mxu0 }
0x10ec   : > { %v3894_v5 = vpop.f32.mrf.mxu0 }
0x10ed   : > { %v9139_v5 = vld [vmem:[#allocation9] sm:$0xff] }
0x10ee   : > { %v3895_v52 = vpop.f32.mrf.mxu0 }
0x10ef   : > { %v9144_v52 = vld [vmem:[#allocation6 + $0xc] ss:$36 sps:$4 sm:$0xff]  }
0x10f0   : > { %v3972_v17 = vpop.f32.mrf.mxu0 }
0x10f1   : > { %v9073_v15 = vadd.f32 %v9070_v26, %v3972_v17 }
0x10f2   : > { %v7473_v8 = vpop.f32.mrf.mxu0 }
0x10f3   : > { %v9150_v8 = vld [vmem:[%s9842_s5] sm:$0x1] }
0x10f4   : > { %v3975_v43 = vpop.f32.mrf.mxu0 }
0x10f6   : > { %v7474_v40 = vpop.f32.mrf.mxu0 }
0x111e   : > { %v3619_v62 = vpop.permute.xlu0 %3618  ;;  %v3616_v61 = vpop.permute.xlu1 %3615 }
0x111f   : > { %v3636_v6 = vcombine.low %v3613_v35, %v3619_v62 }
0x1121   : > { %v3643_v44 = vrot.slane %v3636_v6, %v8292_v49 }
0x1122   : > { %v3625_v54 = vpop.permute.xlu0 %3624  ;;  %v3622_v28 = vpop.permute.xlu1 %3621 }
0x1123   : > { %v3644_v50 = vcombine.low %v3616_v61, %v3622_v28 }
0x1125   : > { %v3651_v41 = vrot.slane %v3644_v50, %v8292_v49 }
0x1126   : > { %v3631_v25 = vpop.permute.xlu0 %3630  ;;  %v3628_v39 = vpop.permute.xlu1 %3627 }
0x1127   : > { %v3652_v45 = vcombine.low %v3625_v54, %v3631_v25  ;;  %v3668_v7 = vcombine.low %v3643_v44, %v3651_v41 }
0x1129   : > { %v3659_v32 = vrot.slane %v3652_v45, %v8292_v49  ;;  %v3675_v19 = vrot.slane %v3668_v7, %v8298_v60 }
0x112a   : > { %v3634_v24 = vpop.permute.xlu1 %3633 }
0x112b   : > { %v3660_v59 = vcombine.low %v3628_v39, %v3634_v24 }
0x112d   : > { %v3667_v33 = vrot.slane %v3660_v59, %v8292_v49 }
0x112f   : > { %v3676_v0 = vcombine.low %v3659_v32, %v3667_v33 }
0x1131   : > { %v3683_v42 = vrot.slane %v3676_v0, %v8298_v60 }
0x1133   : > { %v3684_v13 = vcombine.low %v3675_v19, %v3683_v42 }
0x1135   : > { %v3685_v16 = vsel %vm961_vm3, %v3684_v13, -inf }
0x1136   : > { %3686 = vmax.xlane.f32.xlu0 %v3685_v16 }
0x114c   : > { %3979 = vrot.lane.b32.xlu0 %v9027_v46, %s7961_s13 }
0x1150   : > { %3982 = vrot.lane.b32.xlu0 %v9027_v46, %s7962_s16 }
0x1154   : > { %3985 = vrot.lane.b32.xlu0 %v9027_v46, %s7963_s18 }
0x1158   : > { %3989 = vrot.lane.b32.xlu0 %v9031_v51, %s7961_s13 }
0x115c   : > { %3992 = vrot.lane.b32.xlu0 %v9031_v51, %s7962_s16 }
0x11bf   : > { %v3687_v56 = vpop.xlane.xlu0 %3686 }
0x11c0   : > { %v3692_v48 = vrot.slane %v3687_v56, %v8325_v22 }
0x11c2   : > { %7467 = vmatmul.mubr.msk.f32.vlgmr.msra.gmra.mxu1 %vm972_vm4, %v3692_v48 }
0x11c3   : > { %3830 = vmatpush1.bf16.msra.mxu1 %v9047_v55  ;;  %3847 = vmatprep.mubr.bf16.mxu1 %v7951_v3  ;;  %v3980_v48 = vpop.permute.xlu0 %3979 }
0x11c4   : > { %3911 = vmatprep.subr.bf16.mxu1 %v9051_v14 }
0x11c6   : > { %7322 = vmatmul.mubr.msk.bf16.vlgmr.msra.gmra.mxu1 %vm399_vm1, %v8987_v38 }
0x11c7   : > { %3912 = vmatpush1.bf16.msra.mxu1 %v9056_v11  ;;  %3929 = vmatprep.mubr.bf16.mxu1 %v7951_v3 }
0x11c8   : > { %7475 = vmatprep.subr.mxu1 %v7952_v9 }
0x11ce   : > { %7324 = vmatmul.mubr.msk.bf16.vlgmr.msra.gmra.mxu1 %vm399_vm1, %v8987_v38 }
0x11cf   : > { %7476 = vmatpush3.msra.mxu1 %v8733_v1  ;;  %7477 = vmatprep.mubr.msk.f32.mxu1 %vm7953_vm2, %v7952_v9 }
0x11d0   : > { %7480 = vmatprep.subr.mxu1 %v7952_v9 }
0x1282   : > { %v3761_v63 = vpop.f32.mrf.mxu1 }
0x1283   : > { %v3762_v34 = vadd.f32 %v8744_v18, %v3761_v63  ;;  %v3983_v63 = vpop.permute.xlu0 %3982 }
0x1284   : > { %v7468_v2 = vpop.f32.mrf.mxu1 }
0x1285   : > { %v4259_v57 = vadd.f32 %v9073_v15, %v3762_v34 }
0x1286   : > { %v9077_v1 = vpop.f32.mrf.mxu1 }
0x1287   : > { %v4260_v58 = vmax.f32 %v4259_v57, 0.0  ;;  %3999 = vrot.lane.b32.xlu0 %v9077_v1, %s7961_s13  ;;  %v3986_v34 = vpop.permute.xlu0 %3985 }
0x1288   : > { %v9081_v20 = vpop.f32.mrf.mxu1 }
0x1289   : > { %4262 = vrot.lane.b32.xlu1 %v4260_v58, %s7955_s12 }
0x128a   : > { %v3853_v12 = vpop.f32.mrf.mxu1 }
0x128b   : > { %4002 = vrot.lane.b32.xlu0 %v9077_v1, %s7962_s16  ;;  %v3990_v2 = vpop.permute.xlu0 %3989 }
0x128c   : > { %v3854_v4 = vpop.f32.mrf.mxu1 }
0x128d   : > { %4265 = vrot.lane.b32.xlu1 %v4260_v58, %s7957_s20 }
0x128e   : > { %v9121_v19 = vpop.f32.mrf.mxu1 }
0x128f   : > { %4005 = vrot.lane.b32.xlu0 %v9077_v1, %s7963_s18  ;;  %v3993_v57 = vpop.permute.xlu0 %3992 }
0x1290   : > { %v9125_v42 = vpop.f32.mrf.mxu1 }
0x1291   : > { %4268 = vrot.lane.b32.xlu1 %v4260_v58, %s7954_s11 }
0x1292   : > { %v3935_v13 = vpop.f32.mrf.mxu1 }
0x1293   : > { %4009 = vrot.lane.b32.xlu0 %v9081_v20, %s7961_s13 }
0x1294   : > { %v3936_v16 = vpop.f32.mrf.mxu1 }
0x1295   : > { %4271 = vrot.lane.b32.xlu1 %v4260_v58, %s7956_s17 }
0x1297   : > { %4015 = vrot.lane.b32.xlu0 %v9081_v20, %s7963_s18 }
0x1299   : > { %4274 = vrot.lane.b32.xlu1 %v4260_v58, %s7959_s29 }
0x129b   : > { %4022 = vrot.lane.b32.xlu0 %v9035_v53, %s7962_s16 }
0x129d   : > { %4277 = vrot.lane.b32.xlu1 %v4260_v58, %s7958_s8 }
0x129f   : > { %4029 = vrot.lane.b32.xlu0 %v9039_v47, %s7961_s13 }
0x12a1   : > { %4280 = vrot.lane.b32.xlu1 %v4260_v58, %s7960_s30 }
0x12a3   : > { %4035 = vrot.lane.b32.xlu0 %v9039_v47, %s7963_s18 }
0x12a7   : > { %4042 = vrot.lane.b32.xlu0 %v9121_v19, %s7962_s16 }
0x12ab   : > { %4049 = vrot.lane.b32.xlu0 %v9125_v42, %s7961_s13 }
0x12af   : > { %4055 = vrot.lane.b32.xlu0 %v9125_v42, %s7963_s18 }
0x12fb   : > { %v4263_v18 = vpop.permute.xlu1 %4262 }
0x12ff   : > { %v4266_v35 = vpop.permute.xlu1 %4265 }
0x1300   : > { %v4283_v28 = vcombine.low %v4260_v58, %v4266_v35  ;;  %v4000_v58 = vpop.permute.xlu0 %3999 }
0x1302   : > { %v4290_v6 = vrot.slane %v4283_v28, %v8292_v49 }
0x1303   : > { %v4269_v36 = vpop.permute.xlu1 %4268 }
0x1304   : > { %v4291_v61 = vcombine.low %v4263_v18, %v4269_v36  ;;  %v4003_v12 = vpop.permute.xlu0 %4002 }
0x1306   : > { %v4298_v50 = vrot.slane %v4291_v61, %v8292_v49 }
0x1307   : > { %v4272_v38 = vpop.permute.xlu1 %4271 }
0x1308   : > { %v4315_v45 = vcombine.low %v4290_v6, %v4298_v50  ;;  %v4006_v4 = vpop.permute.xlu0 %4005 }
0x130a   : > { %v4322_v7 = vrot.slane %v4315_v45, %v8298_v60  ;;  %v4107_v45 = vcombine.low %v9077_v1, %v4003_v12 }
0x130b   : > { %v4275_v62 = vpop.permute.xlu1 %4274 }
0x130c   : > { %v4010_v18 = vpop.permute.xlu0 %4009 }
0x130f   : > { %v4278_v54 = vpop.permute.xlu1 %4277 }
0x1310   : > { %v4299_v25 = vcombine.low %v4272_v38, %v4278_v54  ;;  %v4016_v36 = vpop.permute.xlu0 %4015 }
0x1312   : > { %v4306_v24 = vrot.slane %v4299_v25, %v8292_v49 }
0x1313   : > { %v4281_v39 = vpop.permute.xlu1 %4280 }
0x1314   : > { %v4307_v41 = vcombine.low %v4275_v62, %v4281_v39  ;;  %v4023_v62 = vpop.permute.xlu0 %4022 }
0x1315   : > { %v4156_v12 = vcombine.low %v9035_v53, %v4023_v62 }
0x1316   : > { %v4314_v44 = vrot.slane %v4307_v41, %v8292_v49 }
0x1318   : > { %v4323_v59 = vcombine.low %v4306_v24, %v4314_v44  ;;  %v4030_v54 = vpop.permute.xlu0 %4029  ;;  %v4115_v24 = vcombine.low %v4000_v58, %v4006_v4  ;;  %v4131_v44 = vcombine.low %v4010_v18, %v4016_v36 }
0x131a   : > { %v4330_v32 = vrot.slane %v4323_v59, %v8298_v60 }
0x131c   : > { %v4331_v33 = vcombine.low %v4322_v7, %v4330_v32  ;;  %v4036_v50 = vpop.permute.xlu0 %4035  ;;  %v4058_v32 = vcombine.low %v9027_v46, %v3983_v63 }
0x131e   : > { %v4332_v0 = vsel %vm961_vm3, %v4331_v33, -inf  ;;  %v4066_v33 = vcombine.low %v3980_v48, %v3986_v34  ;;  %v4065_v48 = vrot.slane %v4058_v32, %v8292_v49 }
0x131f   : > { %4333 = vmax.xlane.f32.xlu1 %v4332_v0  ;;  %v4074_v0 = vcombine.low %v9031_v51, %v3993_v57 }
0x1320   : > { %v4043_v39 = vpop.permute.xlu0 %4042  ;;  %v4073_v63 = vrot.slane %v4066_v33, %v8292_v49  ;;  %v9190_v33 = vld [vmem:[#allocation8 + $0x8] sm:$0xff] }
0x1321   : > { %v4081_v34 = vrot.slane %v4074_v0, %v8292_v49 }
0x1330   : > { %3995 = vrot.lane.b32.xlu1 %v9031_v51, %s7963_s18 }
0x1334   : > { %4012 = vrot.lane.b32.xlu1 %v9081_v20, %s7962_s16 }
0x1338   : > { %4019 = vrot.lane.b32.xlu1 %v9035_v53, %s7961_s13 }
0x133c   : > { %4025 = vrot.lane.b32.xlu1 %v9035_v53, %s7963_s18 }
0x1340   : > { %4032 = vrot.lane.b32.xlu1 %v9039_v47, %s7962_s16 }
0x1344   : > { %4039 = vrot.lane.b32.xlu1 %v9121_v19, %s7961_s13 }
0x1348   : > { %4045 = vrot.lane.b32.xlu1 %v9121_v19, %s7963_s18 }
0x134c   : > { %4052 = vrot.lane.b32.xlu1 %v9125_v42, %s7962_s16 }
0x13a8   : > { %v4334_v37 = vpop.xlane.xlu1 %4333 }
0x13a9   : > { %v4339_v23 = vrot.slane %v4334_v37, %v8325_v22  ;;  %v4114_v37 = vrot.slane %v4107_v45, %v8292_v49 }
0x13ab   : > { %7478 = vmatmul.mubr.msk.f32.vlgmr.msra.gmra.mxu1 %vm972_vm4, %v4339_v23  ;;  %v4122_v23 = vrot.slane %v4115_v24, %v8292_v49 }
0x13ac   : > { %7481 = vmatpush3.msra.mxu1 %v9139_v5  ;;  %7482 = vmatprep.mubr.msk.f32.mxu1 %vm7953_vm2, %v7952_v9  ;;  %v3996_v35 = vpop.permute.xlu1 %3995 }
0x13ad   : > { %4672 = vmatprep.subr.bf16.mxu1 %v9144_v52  ;;  %v4082_v59 = vcombine.low %v3990_v2, %v3996_v35  ;;  %v4180_v2 = vcombine.low %v4030_v54, %v4036_v50  ;;  %v4139_v57 = vcombine.low %v4114_v37, %v4122_v23 }
0x13af   : > { %v4089_v1 = vrot.slane %v4082_v59, %v8292_v49 }
0x13b0   : > { %v4013_v38 = vpop.permute.xlu1 %4012 }
0x13b1   : > { %v4123_v7 = vcombine.low %v9081_v20, %v4013_v38  ;;  %v4205_v20 = vcombine.low %v9121_v19, %v4043_v39  ;;  %v4098_v4 = vcombine.low %v4081_v34, %v4089_v1  ;;  %v4090_v38 = vcombine.low %v4065_v48, %v4073_v63  ;;  %v9201_v48 = vld [vmem:[#allocation8 + $0x10] sm:$0xff] }
0x13b2   : > { %v4146_v39 = vrot.slane %v4139_v57, %v8298_v60 }
0x13b3   : > { %v4212_v19 = vrot.slane %v4205_v20, %v8292_v49  ;;  %v4105_v62 = vrot.slane %v4098_v4, %v8298_v60 }
0x13b4   : > { %v4020_v61 = vpop.permute.xlu1 %4019 }
0x13b8   : > { %v4026_v28 = vpop.permute.xlu1 %4025 }
0x13b9   : > { %v4164_v58 = vcombine.low %v4020_v61, %v4026_v28  ;;  %v4163_v61 = vrot.slane %v4156_v12, %v8292_v49 }
0x13bb   : > { %v4171_v54 = vrot.slane %v4164_v58, %v8292_v49 }
0x13bc   : > { %v4033_v25 = vpop.permute.xlu1 %4032 }
0x13c0   : > { %v4040_v6 = vpop.permute.xlu1 %4039 }
0x13c4   : > { %v4046_v41 = vpop.permute.xlu1 %4045 }
0x13c5   : > { %v4213_v46 = vcombine.low %v4040_v6, %v4046_v41  ;;  %v4188_v41 = vcombine.low %v4163_v61, %v4171_v54 }
0x13c7   : > { %v4220_v35 = vrot.slane %v4213_v46, %v8292_v49  ;;  %v4195_v32 = vrot.slane %v4188_v41, %v8298_v60 }
0x13c8   : > { %v4053_v16 = vpop.permute.xlu1 %4052 }
0x13c9   : > { %v4221_v51 = vcombine.low %v9125_v42, %v4053_v16  ;;  %v4237_v28 = vcombine.low %v4212_v19, %v4220_v35 }
0x13cb   : > { %v4228_v36 = vrot.slane %v4221_v51, %v8292_v49 }
0x146b   : > { %v4408_v17 = vpop.f32.mrf.mxu1 }
0x146c   : > { %v4409_v43 = vadd.f32 %v9150_v8, %v4408_v17  ;;  %v4138_v17 = vrot.slane %v4131_v44, %v8292_v49  ;;  %v4244_v44 = vrot.slane %v4237_v28, %v8298_v60  ;;  %v7679_v28 = vld [vmem:[%s8158_s15] ss:$0 sps:$4 sm:$0x44]  }
0x146d   : > { %v7479_v40 = vpop.f32.mrf.mxu1 }
0x146e   : > { %v4415_v56 = vrot.slane %v4409_v43, %v8338_v29  ;;  %4605 = vst.msk [vmem:[%s8173_s6 + $0x4] sm:$0x1] %vm1239_vm5, %v4409_v43  ;;  %v4130_v43 = vrot.slane %v4123_v7, %v8292_v49  ;;  %v4172_v40 = vcombine.low %v9039_v47, %v4033_v25  ;;  %v4187_v25 = vrot.slane %v4180_v2, %v8292_v49 }
0x1470   : > { %4421 = vbcast.lane.b32.xlu0 %v4415_v56, 264  ;;  %4417 = vbcast.lane.b32.xlu1 %v4415_v56, 256  ;;  %v4147_v18 = vcombine.low %v4130_v43, %v4138_v17  ;;  %v4179_v47 = vrot.slane %v4172_v40, %v8292_v49 }
0x1472   : > { %v4196_v53 = vcombine.low %v4179_v47, %v4187_v25  ;;  %v4154_v6 = vrot.slane %v4147_v18, %v8298_v60 }
0x1474   : > { %4429 = vbcast.lane.b32.xlu0 %v4415_v56, 280  ;;  %4425 = vbcast.lane.b32.xlu1 %v4415_v56, 272  ;;  %v4155_v24 = vcombine.low %v4146_v39, %v4154_v6  ;;  %v4203_v7 = vrot.slane %v4196_v53, %v8298_v60 }
0x1476   : > { %v4255_v0 = vadd.f32 %v9190_v33, %v4155_v24  ;;  %v4204_v23 = vcombine.low %v4195_v32, %v4203_v7 }
0x1478   : > { %4449 = vrot.lane.b32.xlu1 %v9073_v15, %s7961_s13  ;;  %v4050_v15 = vpop.permute.xlu0 %4049  ;;  %v4256_v63 = vadd.f32 %v9201_v48, %v4204_v23 }
0x147c   : > { %v4056_v13 = vpop.permute.xlu0 %4055 }
0x147d   : > { %v4229_v56 = vcombine.low %v4050_v15, %v4056_v13  ;;  %v4097_v15 = vrot.slane %v4090_v38, %v8298_v60  ;;  %v9193_v13 = vld [vmem:[#allocation8] sm:$0xff] }
0x147f   : > { %v4236_v42 = vrot.slane %v4229_v56, %v8292_v49  ;;  %v4106_v45 = vcombine.low %v4097_v15, %v4105_v62  ;;  %v9198_v56 = vld [vmem:[#allocation8 + $0x18] sm:$0xff] }
0x1481   : > { %v4245_v50 = vcombine.low %v4228_v36, %v4236_v42  ;;  %v4254_v16 = vadd.f32 %v9193_v13, %v4106_v45 }
0x1483   : > { %v4252_v59 = vrot.slane %v4245_v50, %v8298_v60  ;;  %v4611_v50 = vshrl.u32 %v7679_v28, 16 }
0x1485   : > { %v4253_v37 = vcombine.low %v4244_v44, %v4252_v59  ;;  %v9213_v39 = vrot.slane %v4611_v50, 2 }
0x1487   : > { %v4257_v51 = vadd.f32 %v9198_v56, %v4253_v37  ;;  %7329 = vmatmul.mubr.msk.bf16.vlgmr.msra.gmra.mxu0 %vm399_vm1, %v9213_v39 }
0x1488   : > { %4714 = vmatpush1.bf16.msra.mxu0 %v8993_v31  ;;  %4731 = vmatprep.mubr.bf16.mxu0 %v7951_v3 }
0x1489   : > { %7485 = vmatprep.subr.bf16.mxu0 %v7952_v9 }
0x148f   : > { %7331 = vmatmul.mubr.msk.bf16.vlgmr.msra.gmra.mxu0 %vm399_vm1, %v9213_v39 }
0x1490   : > { %7486 = vmatpush3.bf16.msra.mxu0 %v9003_v30  ;;  %7487 = vmatprep.mubr.msk.bf16.mxu0 %vm7953_vm2, %v7952_v9 }
0x1491   : > { %5471 = vmatprep.subr.bf16.mxu0 %v9008_v21 }
0x1497   : > { %7488 = vmatmul.mubr.msk.bf16.vlgmr.msra.gmra.mxu0 %vm399_vm1, %v9213_v39 }
0x1498   : > { %5472 = vmatpush1.bf16.msra.mxu0 %v9013_v27  ;;  %5489 = vmatprep.mubr.bf16.mxu0 %v7951_v3 }
0x1499   : > { %5553 = vmatprep.subr.bf16.mxu0 %v9017_v10 }
0x14e2   : > { %v4422_v17 = vpop.permute.xlu0 %4421  ;;  %v4418_v1 = vpop.permute.xlu1 %4417 }
0x14e3   : > { %v4432_v43 = vmul.f32 %v4422_v17, %v4255_v0  ;;  %v4431_v40 = vmul.f32 %v4418_v1, %v4254_v16 }
0x14e5   : > { %v4436_v20 = vsel %vm1068_vm6, %v4432_v43, 0.0  ;;  %v4435_v46 = vsel %vm1068_vm6, %v4431_v40, 0.0 }
0x14e6   : > { %v4430_v34 = vpop.permute.xlu0 %4429  ;;  %v4426_v2 = vpop.permute.xlu1 %4425  ;;  %v4437_v12 = vadd.f32 %v4436_v20, %v4435_v46 }
0x14e7   : > { %v4434_v57 = vmul.f32 %v4430_v34, %v4257_v51  ;;  %v4433_v58 = vmul.f32 %v4426_v2, %v4256_v63 }
0x14e9   : > { %v4438_v4 = vsel %vm1068_vm6, %v4433_v58, 0.0  ;;  %v4440_v47 = vsel %vm1068_vm6, %v4434_v57, 0.0 }
0x14ea   : > { %v4439_v18 = vadd.f32 %v4438_v4, %v4437_v12  ;;  %v4450_v61 = vpop.permute.xlu1 %4449 }
0x14ec   : > { %v4441_v19 = vadd.f32 %v4440_v47, %v4439_v18 }
0x14ee   : > { %v4442_v35 = vrot.slane %v4441_v19, 4 }
0x14f0   : > { %v4443_v42 = vadd.f32 %v4442_v35, %v4441_v19 }
0x14f2   : > { %v4444_v36 = vrot.slane %v4443_v42, 2 }
0x14f4   : > { %v4445_v38 = vadd.f32 %v4444_v36, %v4443_v42 }
0x14f6   : > { %v4446_v25 = vrot.slane %v4445_v38, 1 }
0x14f8   : > { %v4447_v54 = vadd.f32 %v4446_v25, %v4445_v38 }
0x14fa   : > { %v4452_v53 = vadd.f32 %v4450_v61, %v4447_v54 }
0x14fc   : > { %v4453_v62 = vmax.f32 %v4452_v53, 0.0 }
0x14fe   : > { %4458 = vrot.lane.b32.xlu1 %v4453_v62, %s7957_s20  ;;  %4455 = vrot.lane.b32.xlu0 %v4453_v62, %s7955_s12 }
0x1502   : > { %4464 = vrot.lane.b32.xlu1 %v4453_v62, %s7956_s17  ;;  %4461 = vrot.lane.b32.xlu0 %v4453_v62, %s7954_s11 }
0x1506   : > { %4470 = vrot.lane.b32.xlu1 %v4453_v62, %s7958_s8  ;;  %4467 = vrot.lane.b32.xlu0 %v4453_v62, %s7959_s29 }
0x150a   : > { %4473 = vrot.lane.b32.xlu0 %v4453_v62, %s7960_s30 }
0x1547   : > { %v9239_v40 = vpop.f32.mrf.mxu0 }
0x1549   : > { %v9243_v20 = vpop.f32.mrf.mxu0 }
0x154b   : > { %v4655_v46 = vpop.f32.mrf.mxu0 }
0x154d   : > { %v4656_v51 = vpop.f32.mrf.mxu0 }
0x154f   : > { %v9247_v63 = vpop.f32.mrf.mxu0 }
0x1551   : > { %v9251_v34 = vpop.f32.mrf.mxu0 }
0x1553   : > { %v4737_v2 = vpop.f32.mrf.mxu0 }
0x1555   : > { %v4738_v57 = vpop.f32.mrf.mxu0 }
0x1557   : > { %v4815_v58 = vpop.f32.mrf.mxu0 }
0x1559   : > { %v7489_v12 = vpop.f32.mrf.mxu0 }
0x155b   : > { %v4818_v4 = vpop.f32.mrf.mxu0 }
0x155d   : > { %v7490_v18 = vpop.f32.mrf.mxu0 }
0x1570   : > { %v4459_v31 = vpop.permute.xlu1 %4458  ;;  %v4456_v6 = vpop.permute.xlu0 %4455 }
0x1571   : > { %v4476_v44 = vcombine.low %v4453_v62, %v4459_v31 }
0x1573   : > { %v4483_v32 = vrot.slane %v4476_v44, %v8292_v49 }
0x1574   : > { %v4465_v15 = vpop.permute.xlu1 %4464  ;;  %v4462_v41 = vpop.permute.xlu0 %4461 }
0x1575   : > { %v4484_v45 = vcombine.low %v4456_v6, %v4462_v41 }
0x1577   : > { %v4491_v59 = vrot.slane %v4484_v45, %v8292_v49 }
0x1578   : > { %v4471_v30 = vpop.permute.xlu1 %4470  ;;  %v4468_v24 = vpop.permute.xlu0 %4467 }
0x1579   : > { %v4492_v21 = vcombine.low %v4465_v15, %v4471_v30  ;;  %v4508_v27 = vcombine.low %v4483_v32, %v4491_v59 }
0x157b   : > { %v4499_v16 = vrot.slane %v4492_v21, %v8292_v49  ;;  %v4515_v23 = vrot.slane %v4508_v27, %v8298_v60 }
0x157c   : > { %v4474_v7 = vpop.permute.xlu0 %4473 }
0x157d   : > { %v4500_v0 = vcombine.low %v4468_v24, %v4474_v7 }
0x157f   : > { %v4507_v10 = vrot.slane %v4500_v0, %v8292_v49 }
0x1581   : > { %v4516_v37 = vcombine.low %v4499_v16, %v4507_v10 }
0x1583   : > { %v4523_v17 = vrot.slane %v4516_v37, %v8298_v60 }
0x1585   : > { %v4524_v1 = vcombine.low %v4515_v23, %v4523_v17 }
0x1587   : > { %v4525_v43 = vsel %vm961_vm3, %v4524_v1, -inf }
0x1588   : > { %4526 = vmax.xlane.f32.xlu1 %v4525_v43 }
0x1599   : > { %4822 = vrot.lane.b32.xlu1 %v9239_v40, %s7961_s13 }
0x159d   : > { %4825 = vrot.lane.b32.xlu1 %v9239_v40, %s7962_s16 }
0x15a1   : > { %4828 = vrot.lane.b32.xlu1 %v9239_v40, %s7963_s18 }
0x15a5   : > { %4832 = vrot.lane.b32.xlu1 %v9243_v20, %s7961_s13 }
0x15a9   : > { %4838 = vrot.lane.b32.xlu1 %v9243_v20, %s7963_s18 }
0x1611   : > { %v4527_v47 = vpop.xlane.xlu1 %4526 }
0x1612   : > { %v4532_v19 = vrot.slane %v4527_v47, %v8325_v22 }
0x1614   : > { %7483 = vmatmul.mubr.msk.f32.vlgmr.msra.gmra.mxu1 %vm972_vm4, %v4532_v19 }
0x1615   : > { %4673 = vmatpush1.bf16.msra.mxu1 %v9047_v55  ;;  %4690 = vmatprep.mubr.bf16.mxu1 %v7951_v3  ;;  %v9274_v55 = vadd.f32 %v9070_v26, %v4815_v58  ;;  %v4823_v58 = vpop.permute.xlu1 %4822 }
0x1616   : > { %4754 = vmatprep.subr.bf16.mxu1 %v9051_v14 }
0x1618   : > { %7330 = vmatmul.mubr.msk.bf16.vlgmr.msra.gmra.mxu1 %vm399_vm1, %v9213_v39 }
0x1619   : > { %4755 = vmatpush1.bf16.msra.mxu1 %v9056_v11  ;;  %4772 = vmatprep.mubr.bf16.mxu1 %v7951_v3  ;;  %v4826_v12 = vpop.permute.xlu1 %4825 }
0x161a   : > { %7491 = vmatprep.subr.mxu1 %v7952_v9 }
0x161d   : > { %v4829_v4 = vpop.permute.xlu1 %4828 }
0x1620   : > { %7332 = vmatmul.mubr.msk.bf16.vlgmr.msra.gmra.mxu1 %vm399_vm1, %v9213_v39 }
0x1621   : > { %7492 = vmatpush3.msra.mxu1 %v9139_v5  ;;  %7493 = vmatprep.mubr.msk.f32.mxu1 %vm7953_vm2, %v7952_v9  ;;  %v4833_v18 = vpop.permute.xlu1 %4832 }
0x1622   : > { %7496 = vmatprep.subr.mxu1 %v7952_v9 }
0x16d4   : > { %v4601_v14 = vpop.f32.mrf.mxu1 }
0x16d5   : > { %v4602_v11 = vadd.f32 %v9150_v8, %v4601_v14 }
0x16d6   : > { %v7484_v35 = vpop.f32.mrf.mxu1 }
0x16d7   : > { %v5102_v42 = vadd.f32 %v9274_v55, %v4602_v11 }
0x16d8   : > { %v9278_v36 = vpop.f32.mrf.mxu1 }
0x16d9   : > { %v5103_v38 = vmax.f32 %v5102_v42, 0.0  ;;  %4842 = vrot.lane.b32.xlu1 %v9278_v36, %s7961_s13 }
0x16da   : > { %v9282_v25 = vpop.f32.mrf.mxu1 }
0x16db   : > { %5105 = vrot.lane.b32.xlu0 %v5103_v38, %s7955_s12 }
0x16dc   : > { %v4696_v54 = vpop.f32.mrf.mxu1 }
0x16dd   : > { %4845 = vrot.lane.b32.xlu1 %v9278_v36, %s7962_s16 }
0x16de   : > { %v4697_v26 = vpop.f32.mrf.mxu1 }
0x16df   : > { %5108 = vrot.lane.b32.xlu0 %v5103_v38, %s7957_s20 }
0x16e0   : > { %v9320_v10 = vpop.f32.mrf.mxu1 }
0x16e1   : > { %4848 = vrot.lane.b32.xlu1 %v9278_v36, %s7963_s18 }
0x16e2   : > { %v9324_v37 = vpop.f32.mrf.mxu1 }
0x16e3   : > { %5111 = vrot.lane.b32.xlu0 %v5103_v38, %s7954_s11 }
0x16e4   : > { %v4778_v23 = vpop.f32.mrf.mxu1 }
0x16e5   : > { %4852 = vrot.lane.b32.xlu1 %v9282_v25, %s7961_s13 }
0x16e6   : > { %v4779_v17 = vpop.f32.mrf.mxu1 }
0x16e7   : > { %5114 = vrot.lane.b32.xlu0 %v5103_v38, %s7956_s17 }
0x16e9   : > { %4858 = vrot.lane.b32.xlu1 %v9282_v25, %s7963_s18 }
0x16eb   : > { %5117 = vrot.lane.b32.xlu0 %v5103_v38, %s7959_s29 }
0x16ed   : > { %4865 = vrot.lane.b32.xlu1 %v9247_v63, %s7962_s16 }
0x16ef   : > { %5120 = vrot.lane.b32.xlu0 %v5103_v38, %s7958_s8 }
0x16f1   : > { %4872 = vrot.lane.b32.xlu1 %v9251_v34, %s7961_s13 }
0x16f3   : > { %5123 = vrot.lane.b32.xlu0 %v5103_v38, %s7960_s30 }
0x16f5   : > { %4878 = vrot.lane.b32.xlu1 %v9251_v34, %s7963_s18 }
0x16f9   : > { %4885 = vrot.lane.b32.xlu1 %v9320_v10, %s7962_s16 }
0x16fd   : > { %4892 = vrot.lane.b32.xlu1 %v9324_v37, %s7961_s13 }
0x1701   : > { %4898 = vrot.lane.b32.xlu1 %v9324_v37, %s7963_s18 }
0x174d   : > { %v5106_v61 = vpop.permute.xlu0 %5105 }
0x1751   : > { %v5109_v53 = vpop.permute.xlu0 %5108 }
0x1752   : > { %v5126_v6 = vcombine.low %v5103_v38, %v5109_v53 }
0x1754   : > { %v5133_v30 = vrot.slane %v5126_v6, %v8292_v49 }
0x1755   : > { %v5112_v62 = vpop.permute.xlu0 %5111 }
0x1756   : > { %v5134_v39 = vcombine.low %v5106_v61, %v5112_v62 }
0x1758   : > { %v5141_v15 = vrot.slane %v5134_v39, %v8292_v49 }
0x1759   : > { %v5115_v28 = vpop.permute.xlu0 %5114 }
0x175a   : > { %v5158_v44 = vcombine.low %v5133_v30, %v5141_v15 }
0x175c   : > { %v5165_v32 = vrot.slane %v5158_v44, %v8298_v60  ;;  %v4909_v44 = vcombine.low %v4823_v58, %v4829_v4 }
0x175d   : > { %v5118_v50 = vpop.permute.xlu0 %5117 }
0x1761   : > { %v5121_v31 = vpop.permute.xlu0 %5120 }
0x1762   : > { %v5142_v41 = vcombine.low %v5115_v28, %v5121_v31 }
0x1764   : > { %v5149_v59 = vrot.slane %v5142_v41, %v8292_v49 }
0x1765   : > { %v5124_v45 = vpop.permute.xlu0 %5123 }
0x1766   : > { %v5150_v24 = vcombine.low %v5118_v50, %v5124_v45 }
0x1768   : > { %v5157_v21 = vrot.slane %v5150_v24, %v8292_v49  ;;  %v4901_v24 = vcombine.low %v9239_v40, %v4826_v12 }
0x176a   : > { %v5166_v7 = vcombine.low %v5149_v59, %v5157_v21 }
0x176c   : > { %v5173_v0 = vrot.slane %v5166_v7, %v8298_v60 }
0x176e   : > { %v5174_v27 = vcombine.low %v5165_v32, %v5173_v0 }
0x1770   : > { %v5175_v16 = vsel %vm961_vm3, %v5174_v27, -inf }
0x1771   : > { %5176 = vmax.xlane.f32.xlu0 %v5175_v16 }
0x1787   : > { %4835 = vrot.lane.b32.xlu0 %v9243_v20, %s7962_s16 }
0x178b   : > { %4855 = vrot.lane.b32.xlu0 %v9282_v25, %s7962_s16 }
0x178f   : > { %4862 = vrot.lane.b32.xlu0 %v9247_v63, %s7961_s13 }
0x1793   : > { %4868 = vrot.lane.b32.xlu0 %v9247_v63, %s7963_s18 }
0x1797   : > { %4875 = vrot.lane.b32.xlu0 %v9251_v34, %s7962_s16 }
0x179b   : > { %4882 = vrot.lane.b32.xlu0 %v9320_v10, %s7961_s13 }
0x179f   : > { %4888 = vrot.lane.b32.xlu0 %v9320_v10, %s7963_s18 }
0x17a3   : > { %4895 = vrot.lane.b32.xlu0 %v9324_v37, %s7962_s16 }
0x17fa   : > { %v5177_v1 = vpop.xlane.xlu0 %5176 }
0x17fb   : > { %v5182_v43 = vrot.slane %v5177_v1, %v8325_v22  ;;  %v4908_v1 = vrot.slane %v4901_v24, %v8292_v49 }
0x17fd   : > { %7494 = vmatmul.mubr.msk.f32.vlgmr.msra.gmra.mxu1 %vm972_vm4, %v5182_v43  ;;  %v4916_v43 = vrot.slane %v4909_v44, %v8292_v49 }
0x17fe   : > { %7497 = vmatpush3.msra.mxu1 %v9139_v5  ;;  %7498 = vmatprep.mubr.msk.f32.mxu1 %vm7953_vm2, %v7952_v9  ;;  %v4836_v35 = vpop.permute.xlu0 %4835 }
0x17ff   : > { %5512 = vmatprep.subr.bf16.mxu1 %v9144_v52  ;;  %v4839_v52 = vpop.permute.xlu1 %4838  ;;  %v4917_v45 = vcombine.low %v9243_v20, %v4836_v35 }
0x1800   : > { %v4925_v59 = vcombine.low %v4833_v18, %v4839_v52 }
0x1802   : > { %v4856_v38 = vpop.permute.xlu0 %4855 }
0x1803   : > { %v4843_v47 = vpop.permute.xlu1 %4842  ;;  %v4966_v30 = vcombine.low %v9282_v25, %v4856_v38 }
0x1805   : > { %v4973_v16 = vrot.slane %v4966_v30, %v8292_v49 }
0x1806   : > { %v4863_v26 = vpop.permute.xlu0 %4862 }
0x1807   : > { %v4846_v19 = vpop.permute.xlu1 %4845 }
0x1808   : > { %v4950_v6 = vcombine.low %v9278_v36, %v4846_v19  ;;  %v4924_v36 = vrot.slane %v4917_v45, %v8292_v49 }
0x180a   : > { %v4869_v53 = vpop.permute.xlu0 %4868  ;;  %v4957_v32 = vrot.slane %v4950_v6, %v8292_v49 }
0x180b   : > { %v4849_v14 = vpop.permute.xlu1 %4848 }
0x180c   : > { %v4958_v15 = vcombine.low %v4843_v47, %v4849_v14  ;;  %v4933_v47 = vcombine.low %v4908_v1, %v4916_v43 }
0x180e   : > { %v4876_v28 = vpop.permute.xlu0 %4875  ;;  %v4965_v0 = vrot.slane %v4958_v15, %v8292_v49 }
0x180f   : > { %v4853_v11 = vpop.permute.xlu1 %4852  ;;  %v5015_v20 = vcombine.low %v9251_v34, %v4876_v28 }
0x1811   : > { %v5022_v34 = vrot.slane %v5015_v20, %v8292_v49 }
0x1813   : > { %v4859_v42 = vpop.permute.xlu1 %4858 }
0x1814   : > { %v4974_v41 = vcombine.low %v4853_v11, %v4859_v42 }
0x1816   : > { %v4981_v27 = vrot.slane %v4974_v41, %v8292_v49 }
0x1817   : > { %v4866_v54 = vpop.permute.xlu1 %4865 }
0x1818   : > { %v4999_v58 = vcombine.low %v9247_v63, %v4866_v54  ;;  %v4990_v4 = vcombine.low %v4973_v16, %v4981_v27 }
0x181a   : > { %v5006_v11 = vrot.slane %v4999_v58, %v8292_v49  ;;  %v7680_v58 = vld [vmem:[%s8158_s15] ss:$0 sps:$4 sm:$0x88]  }
0x181b   : > { %v4873_v61 = vpop.permute.xlu1 %4872 }
0x181f   : > { %v4879_v62 = vpop.permute.xlu1 %4878 }
0x1823   : > { %v4886_v50 = vpop.permute.xlu1 %4885 }
0x1824   : > { %v5048_v25 = vcombine.low %v9320_v10, %v4886_v50 }
0x1826   : > { %v5055_v10 = vrot.slane %v5048_v25, %v8292_v49 }
0x1827   : > { %v4893_v39 = vpop.permute.xlu1 %4892 }
0x182b   : > { %v4899_v21 = vpop.permute.xlu1 %4898 }
0x182c   : > { %v5072_v40 = vcombine.low %v4893_v39, %v4899_v21 }
0x18bd   : > { %v5251_v46 = vpop.f32.mrf.mxu1 }
0x18be   : > { %v5252_v51 = vadd.f32 %v9150_v8, %v5251_v46  ;;  %v4932_v46 = vrot.slane %v4925_v59, %v8292_v49 }
0x18bf   : > { %v7495_v2 = vpop.f32.mrf.mxu1 }
0x18c0   : > { %v5258_v57 = vrot.slane %v5252_v51, %v8338_v29  ;;  %5448 = vst.msk [vmem:[%s8173_s6 + $0x5] sm:$0x1] %vm1239_vm5, %v5252_v51  ;;  %v5023_v51 = vcombine.low %v4873_v61, %v4879_v62  ;;  %v4982_v2 = vcombine.low %v4957_v32, %v4965_v0  ;;  %v4941_v12 = vcombine.low %v4924_v36, %v4932_v46 }
0x18c1   : > { %v4940_v61 = vrot.slane %v4933_v47, %v8298_v60 }
0x18c2   : > { %5264 = vbcast.lane.b32.xlu1 %v5258_v57, 264  ;;  %5260 = vbcast.lane.b32.xlu0 %v5258_v57, 256  ;;  %v5030_v19 = vrot.slane %v5023_v51, %v8292_v49  ;;  %v4948_v35 = vrot.slane %v4941_v12, %v8298_v60  ;;  %v4989_v54 = vrot.slane %v4982_v2, %v8298_v60  ;;  %v9393_v12 = vrot.slane %v7680_v58, 3 }
0x18c4   : > { %v5039_v63 = vcombine.low %v5022_v34, %v5030_v19  ;;  %v4949_v62 = vcombine.low %v4940_v61, %v4948_v35  ;;  %7337 = vmatmul.mubr.msk.bf16.vlgmr.msra.gmra.mxu0 %vm399_vm1, %v9393_v12  ;;  %v9409_v34 = vld [vmem:[#allocation6 + $0x20] ss:$36 sps:$4 sm:$0xff]  }
0x18c5   : > { %5571 = vmatprep.mubr.bf16.mxu0 %v7951_v3 }
0x18c6   : > { %5272 = vbcast.lane.b32.xlu1 %v5258_v57, 280  ;;  %5268 = vbcast.lane.b32.xlu0 %v5258_v57, 272  ;;  %v5007_v57 = vcombine.low %v4863_v26, %v4869_v53  ;;  %v4997_v26 = vrot.slane %v4990_v4, %v8298_v60  ;;  %v5046_v39 = vrot.slane %v5039_v63, %v8298_v60  ;;  %v9399_v4 = vld [vmem:[#allocation6 + $0x10] ss:$36 sps:$4 sm:$0xff]  }
0x18c7   : > { %v5097_v15 = vadd.f32 %v9193_v13, %v4949_v62  ;;  %5554 = vmatpush1.bf16.msra.mxu0 %v9399_v4 }
0x18c8   : > { %v5014_v14 = vrot.slane %v5007_v57, %v8292_v49  ;;  %v4998_v28 = vcombine.low %v4989_v54, %v4997_v26  ;;  %7501 = vmatprep.subr.bf16.mxu0 %v7952_v9 }
0x18ca   : > { %5292 = vrot.lane.b32.xlu0 %v9274_v55, %s7961_s13  ;;  %v4883_v55 = vpop.permute.xlu0 %4882  ;;  %v5031_v53 = vcombine.low %v5006_v11, %v5014_v14  ;;  %v5098_v6 = vadd.f32 %v9190_v33, %v4998_v28 }
0x18cc   : > { %7339 = vmatmul.mubr.msk.bf16.vlgmr.msra.gmra.mxu0 %vm399_vm1, %v9393_v12 }
0x18cd   : > { %7502 = vmatpush3.bf16.msra.mxu0 %v9409_v34  ;;  %7503 = vmatprep.mubr.msk.bf16.mxu0 %vm7953_vm2, %v7952_v9 }
0x18ce   : > { %v4889_v31 = vpop.permute.xlu0 %4888 }
0x18cf   : > { %v5056_v23 = vcombine.low %v4883_v55, %v4889_v31  ;;  %v5038_v31 = vrot.slane %v5031_v53, %v8298_v60 }
0x18d1   : > { %v5063_v18 = vrot.slane %v5056_v23, %v8292_v49  ;;  %v5047_v45 = vcombine.low %v5038_v31, %v5046_v39 }
0x18d2   : > { %v4896_v7 = vpop.permute.xlu0 %4895 }
0x18d3   : > { %v5064_v17 = vcombine.low %v9324_v37, %v4896_v7  ;;  %v5079_v37 = vrot.slane %v5072_v40, %v8292_v49  ;;  %v5080_v42 = vcombine.low %v5055_v10, %v5063_v18  ;;  %v5099_v0 = vadd.f32 %v9201_v48, %v5047_v45  ;;  %v7716_v10 = vld [vmem:[#allocation6 + $0x4] ss:$36 sps:$4 sm:$0xff]  }
0x18d4   : > { %6314 = vmatprep.subr.bf16.mxu0 %v7716_v10  ;;  %7504 = vmatmul.mubr.msk.bf16.vlgmr.msra.gmra.mxu0 %vm399_vm1, %v9393_v12  ;;  %v7717_v18 = vld [vmem:[#allocation6] ss:$36 sps:$4 sm:$0xff]  }
0x18d5   : > { %v5071_v52 = vrot.slane %v5064_v17, %v8292_v49  ;;  %v5087_v50 = vrot.slane %v5080_v42, %v8298_v60  ;;  %6315 = vmatpush1.bf16.msra.mxu0 %v7717_v18  ;;  %6332 = vmatprep.mubr.bf16.mxu0 %v7951_v3 }
0x18d7   : > { %v5088_v38 = vcombine.low %v5071_v52, %v5079_v37  ;;  %v7718_v37 = vld [vmem:[#allocation6 + $0x14] ss:$36 sps:$4 sm:$0xff]  }
0x18d8   : > { %6396 = vmatprep.subr.bf16.mxu0 %v7718_v37 }
0x18d9   : > { %v5095_v55 = vrot.slane %v5088_v38, %v8298_v60 }
0x18db   : > { %v5096_v41 = vcombine.low %v5087_v50, %v5095_v55 }
0x18dd   : > { %v5100_v32 = vadd.f32 %v9198_v56, %v5096_v41 }
0x1934   : > { %v5265_v30 = vpop.permute.xlu1 %5264  ;;  %v5261_v24 = vpop.permute.xlu0 %5260 }
0x1935   : > { %v5275_v44 = vmul.f32 %v5265_v30, %v5098_v6  ;;  %v5274_v59 = vmul.f32 %v5261_v24, %v5097_v15 }
0x1937   : > { %v5279_v21 = vsel %vm1068_vm6, %v5275_v44, 0.0  ;;  %v5278_v7 = vsel %vm1068_vm6, %v5274_v59, 0.0 }
0x1938   : > { %v5273_v27 = vpop.permute.xlu1 %5272  ;;  %v5269_v36 = vpop.permute.xlu0 %5268  ;;  %v5280_v13 = vadd.f32 %v5279_v21, %v5278_v7 }
0x1939   : > { %v5277_v16 = vmul.f32 %v5273_v27, %v5100_v32  ;;  %v5276_v33 = vmul.f32 %v5269_v36, %v5099_v0 }
0x193b   : > { %v5281_v20 = vsel %vm1068_vm6, %v5276_v33, 0.0  ;;  %v5283_v23 = vsel %vm1068_vm6, %v5277_v16, 0.0 }
0x193c   : > { %v5282_v25 = vadd.f32 %v5281_v20, %v5280_v13  ;;  %v5293_v2 = vpop.permute.xlu0 %5292  ;;  %v9444_v13 = vld [vmem:[#allocation6 + $0x8] ss:$36 sps:$4 sm:$0xff]   ;;  %v9448_v20 = vld [vmem:[#allocation6 + $0x1c] ss:$36 sps:$4 sm:$0xff]  }
0x193e   : > { %v5284_v40 = vadd.f32 %v5283_v23, %v5282_v25  ;;  %v9453_v25 = vld [vmem:[#allocation6 + $0x18] ss:$36 sps:$4 sm:$0xff]   ;;  %v9467_v23 = vld [vmem:[%s9839_s2] sm:$0x1] }
0x1940   : > { %v5285_v17 = vrot.slane %v5284_v40, 4 }
0x1942   : > { %v5286_v1 = vadd.f32 %v5285_v17, %v5284_v40 }
0x1944   : > { %v5287_v43 = vrot.slane %v5286_v1, 2 }
0x1946   : > { %v5288_v46 = vadd.f32 %v5287_v43, %v5286_v1 }
0x1948   : > { %v5289_v51 = vrot.slane %v5288_v46, 1 }
0x194a   : > { %v5290_v56 = vadd.f32 %v5289_v51, %v5288_v46 }
0x194c   : > { %v5295_v48 = vadd.f32 %v5293_v2, %v5290_v56 }
0x194e   : > { %v5296_v57 = vmax.f32 %v5295_v48, 0.0 }
0x1950   : > { %5301 = vrot.lane.b32.xlu0 %v5296_v57, %s7957_s20  ;;  %5298 = vrot.lane.b32.xlu1 %v5296_v57, %s7955_s12 }
0x1954   : > { %5307 = vrot.lane.b32.xlu0 %v5296_v57, %s7956_s17  ;;  %5304 = vrot.lane.b32.xlu1 %v5296_v57, %s7954_s11 }
0x1958   : > { %5313 = vrot.lane.b32.xlu0 %v5296_v57, %s7958_s8  ;;  %5310 = vrot.lane.b32.xlu1 %v5296_v57, %s7959_s29 }
0x195c   : > { %5316 = vrot.lane.b32.xlu1 %v5296_v57, %s7960_s30 }
0x1984   : > { %v9424_v41 = vpop.f32.mrf.mxu0 }
0x1986   : > { %v9428_v45 = vpop.f32.mrf.mxu0 }
0x1988   : > { %v5495_v30 = vpop.f32.mrf.mxu0 }
0x1989   : > { %v7724_v30 = vld [vmem:[#allocation6 + $0xc] ss:$36 sps:$4 sm:$0xff]  }
0x198a   : > { %v5496_v24 = vpop.f32.mrf.mxu0 }
0x198c   : > { %v9432_v44 = vpop.f32.mrf.mxu0 }
0x198e   : > { %v9436_v59 = vpop.f32.mrf.mxu0 }
0x1990   : > { %v5577_v21 = vpop.f32.mrf.mxu0 }
0x1991   : > { %v9544_v21 = vld [vmem:[%s9842_s5] sm:$0x1] }
0x1992   : > { %v5578_v7 = vpop.f32.mrf.mxu0 }
0x1994   : > { %v5655_v32 = vpop.f32.mrf.mxu0 }
0x1995   : > { %v9470_v40 = vadd.f32 %v9467_v23, %v5655_v32 }
0x1996   : > { %v7505_v0 = vpop.f32.mrf.mxu0 }
0x1998   : > { %v5658_v27 = vpop.f32.mrf.mxu0 }
0x199a   : > { %v7506_v36 = vpop.f32.mrf.mxu0 }
0x19c2   : > { %v5302_v52 = vpop.permute.xlu0 %5301  ;;  %v5299_v47 = vpop.permute.xlu1 %5298 }
0x19c3   : > { %v5319_v42 = vcombine.low %v5296_v57, %v5302_v52 }
0x19c5   : > { %v5326_v61 = vrot.slane %v5319_v42, %v8292_v49 }
0x19c6   : > { %v5308_v19 = vpop.permute.xlu0 %5307  ;;  %v5305_v14 = vpop.permute.xlu1 %5304 }
0x19c7   : > { %v5327_v11 = vcombine.low %v5299_v47, %v5305_v14 }
0x19c9   : > { %v5334_v38 = vrot.slane %v5327_v11, %v8292_v49 }
0x19ca   : > { %v5314_v63 = vpop.permute.xlu0 %5313  ;;  %v5311_v35 = vpop.permute.xlu1 %5310 }
0x19cb   : > { %v5335_v54 = vcombine.low %v5308_v19, %v5314_v63  ;;  %v5351_v62 = vcombine.low %v5326_v61, %v5334_v38 }
0x19cd   : > { %v5342_v28 = vrot.slane %v5335_v54, %v8292_v49  ;;  %v5358_v39 = vrot.slane %v5351_v62, %v8298_v60 }
0x19ce   : > { %v5317_v26 = vpop.permute.xlu1 %5316 }
0x19cf   : > { %v5343_v53 = vcombine.low %v5311_v35, %v5317_v26 }
0x19d1   : > { %v5350_v50 = vrot.slane %v5343_v53, %v8292_v49 }
0x19d3   : > { %v5359_v55 = vcombine.low %v5342_v28, %v5350_v50 }
0x19d5   : > { %v5366_v31 = vrot.slane %v5359_v55, %v8298_v60 }
0x19d7   : > { %v5367_v6 = vcombine.low %v5358_v39, %v5366_v31 }
0x19d9   : > { %v5368_v15 = vsel %vm961_vm3, %v5367_v6, -inf }
0x19da   : > { %5369 = vmax.xlane.f32.xlu0 %v5368_v15  ;;  %v9536_v15 = vld [vmem:[#allocation9] sm:$0xff] }
0x19f0   : > { %5662 = vrot.lane.b32.xlu0 %v9424_v41, %s7961_s13 }
0x19f4   : > { %5665 = vrot.lane.b32.xlu0 %v9424_v41, %s7962_s16 }
0x19f8   : > { %5668 = vrot.lane.b32.xlu0 %v9424_v41, %s7963_s18 }
0x19fc   : > { %5672 = vrot.lane.b32.xlu0 %v9428_v45, %s7961_s13 }
0x1a00   : > { %5675 = vrot.lane.b32.xlu0 %v9428_v45, %s7962_s16 }
0x1a63   : > { %v5370_v16 = vpop.xlane.xlu0 %5369 }
0x1a64   : > { %v5375_v33 = vrot.slane %v5370_v16, %v8325_v22 }
0x1a66   : > { %7499 = vmatmul.mubr.msk.f32.vlgmr.msra.gmra.mxu1 %vm972_vm4, %v5375_v33 }
0x1a67   : > { %5513 = vmatpush1.bf16.msra.mxu1 %v9444_v13  ;;  %5530 = vmatprep.mubr.bf16.mxu1 %v7951_v3  ;;  %v5663_v27 = vpop.permute.xlu0 %5662 }
0x1a68   : > { %5594 = vmatprep.subr.bf16.mxu1 %v9448_v20 }
0x1a6a   : > { %7338 = vmatmul.mubr.msk.bf16.vlgmr.msra.gmra.mxu1 %vm399_vm1, %v9393_v12 }
0x1a6b   : > { %5595 = vmatpush1.bf16.msra.mxu1 %v9453_v25  ;;  %5612 = vmatprep.mubr.bf16.mxu1 %v7951_v3  ;;  %v5666_v36 = vpop.permute.xlu0 %5665 }
0x1a6c   : > { %7507 = vmatprep.subr.mxu1 %v7952_v9 }
0x1a6f   : > { %v5669_v16 = vpop.permute.xlu0 %5668 }
0x1a72   : > { %7340 = vmatmul.mubr.msk.bf16.vlgmr.msra.gmra.mxu1 %vm399_vm1, %v9393_v12 }
0x1a73   : > { %7508 = vmatpush3.msra.mxu1 %v9139_v5  ;;  %7509 = vmatprep.mubr.msk.f32.mxu1 %vm7953_vm2, %v7952_v9  ;;  %v5673_v33 = vpop.permute.xlu0 %5672 }
0x1a74   : > { %7512 = vmatprep.subr.mxu1 %v7952_v9 }
0x1b26   : > { %v5444_v17 = vpop.f32.mrf.mxu1 }
0x1b27   : > { %v5445_v1 = vadd.f32 %v9150_v8, %v5444_v17  ;;  %v5676_v17 = vpop.permute.xlu0 %5675 }
0x1b28   : > { %v7500_v43 = vpop.f32.mrf.mxu1 }
0x1b29   : > { %v5942_v46 = vadd.f32 %v9470_v40, %v5445_v1 }
0x1b2a   : > { %v9474_v5 = vpop.f32.mrf.mxu1 }
0x1b2b   : > { %v5943_v51 = vmax.f32 %v5942_v46, 0.0  ;;  %5682 = vrot.lane.b32.xlu0 %v9474_v5, %s7961_s13 }
0x1b2c   : > { %v9478_v56 = vpop.f32.mrf.mxu1 }
0x1b2d   : > { %5945 = vrot.lane.b32.xlu1 %v5943_v51, %s7955_s12 }
0x1b2e   : > { %v5536_v2 = vpop.f32.mrf.mxu1 }
0x1b2f   : > { %5685 = vrot.lane.b32.xlu0 %v9474_v5, %s7962_s16 }
0x1b30   : > { %v5537_v48 = vpop.f32.mrf.mxu1 }
0x1b31   : > { %5948 = vrot.lane.b32.xlu1 %v5943_v51, %s7957_s20 }
0x1b32   : > { %v9518_v28 = vpop.f32.mrf.mxu1 }
0x1b33   : > { %5688 = vrot.lane.b32.xlu0 %v9474_v5, %s7963_s18 }
0x1b34   : > { %v9522_v50 = vpop.f32.mrf.mxu1 }
0x1b35   : > { %5951 = vrot.lane.b32.xlu1 %v5943_v51, %s7954_s11 }
0x1b36   : > { %v5618_v55 = vpop.f32.mrf.mxu1 }
0x1b37   : > { %5692 = vrot.lane.b32.xlu0 %v9478_v56, %s7961_s13 }
0x1b38   : > { %v5619_v39 = vpop.f32.mrf.mxu1 }
0x1b39   : > { %5954 = vrot.lane.b32.xlu1 %v5943_v51, %s7956_s17 }
0x1b3b   : > { %5698 = vrot.lane.b32.xlu0 %v9478_v56, %s7963_s18 }
0x1b3d   : > { %5957 = vrot.lane.b32.xlu1 %v5943_v51, %s7959_s29 }
0x1b3f   : > { %5705 = vrot.lane.b32.xlu0 %v9432_v44, %s7962_s16 }
0x1b41   : > { %5960 = vrot.lane.b32.xlu1 %v5943_v51, %s7958_s8 }
0x1b43   : > { %5712 = vrot.lane.b32.xlu0 %v9436_v59, %s7961_s13 }
0x1b45   : > { %5963 = vrot.lane.b32.xlu1 %v5943_v51, %s7960_s30 }
0x1b47   : > { %5718 = vrot.lane.b32.xlu0 %v9436_v59, %s7963_s18 }
0x1b4b   : > { %5725 = vrot.lane.b32.xlu0 %v9518_v28, %s7962_s16 }
0x1b4f   : > { %5732 = vrot.lane.b32.xlu0 %v9522_v50, %s7961_s13 }
0x1b53   : > { %5738 = vrot.lane.b32.xlu0 %v9522_v50, %s7963_s18 }
0x1b9d   : > { %v5683_v1 = vpop.permute.xlu0 %5682 }
0x1b9f   : > { %v5946_v8 = vpop.permute.xlu1 %5945 }
0x1ba1   : > { %v5686_v43 = vpop.permute.xlu0 %5685 }
0x1ba3   : > { %v5949_v57 = vpop.permute.xlu1 %5948 }
0x1ba4   : > { %v5966_v52 = vcombine.low %v5943_v51, %v5949_v57 }
0x1ba5   : > { %v5689_v46 = vpop.permute.xlu0 %5688 }
0x1ba6   : > { %v5973_v11 = vrot.slane %v5966_v52, %v8292_v49 }
0x1ba7   : > { %v5952_v58 = vpop.permute.xlu1 %5951 }
0x1ba8   : > { %v5974_v18 = vcombine.low %v5946_v8, %v5952_v58 }
0x1ba9   : > { %v5693_v51 = vpop.permute.xlu0 %5692 }
0x1baa   : > { %v5981_v47 = vrot.slane %v5974_v18, %v8292_v49 }
0x1bab   : > { %v5955_v12 = vpop.permute.xlu1 %5954 }
0x1bac   : > { %v5998_v35 = vcombine.low %v5973_v11, %v5981_v47  ;;  %v5798_v11 = vcombine.low %v5683_v1, %v5689_v46 }
0x1bad   : > { %v5699_v48 = vpop.permute.xlu0 %5698 }
0x1bae   : > { %v6005_v26 = vrot.slane %v5998_v35, %v8298_v60  ;;  %v5805_v55 = vrot.slane %v5798_v11, %v8292_v49 }
0x1baf   : > { %v5958_v10 = vpop.permute.xlu1 %5957 }
0x1bb1   : > { %v5706_v57 = vpop.permute.xlu0 %5705 }
0x1bb3   : > { %v5961_v37 = vpop.permute.xlu1 %5960 }
0x1bb4   : > { %v5982_v19 = vcombine.low %v5955_v12, %v5961_v37 }
0x1bb5   : > { %v5713_v12 = vpop.permute.xlu0 %5712 }
0x1bb6   : > { %v5989_v42 = vrot.slane %v5982_v19, %v8292_v49 }
0x1bb7   : > { %v5964_v14 = vpop.permute.xlu1 %5963 }
0x1bb8   : > { %v5990_v63 = vcombine.low %v5958_v10, %v5964_v14  ;;  %v5790_v14 = vcombine.low %v9474_v5, %v5686_v43 }
0x1bb9   : > { %v5719_v18 = vpop.permute.xlu0 %5718 }
0x1bba   : > { %v5997_v38 = vrot.slane %v5990_v63, %v8292_v49  ;;  %v5814_v63 = vcombine.low %v5693_v51, %v5699_v48 }
0x1bbc   : > { %v6006_v54 = vcombine.low %v5989_v42, %v5997_v38  ;;  %v5741_v38 = vcombine.low %v9424_v41, %v5666_v36  ;;  %v5821_v39 = vrot.slane %v5814_v63, %v8292_v49  ;;  %v9584_v63 = vld [vmem:[#allocation8 + $0x8] sm:$0xff] }
0x1bbd   : > { %v5726_v52 = vpop.permute.xlu0 %5725 }
0x1bbe   : > { %v6013_v61 = vrot.slane %v6006_v54, %v8298_v60  ;;  %v5749_v54 = vcombine.low %v5663_v27, %v5669_v16  ;;  %v5839_v16 = vcombine.low %v9432_v44, %v5706_v57 }
0x1bc0   : > { %v6014_v53 = vcombine.low %v6005_v26, %v6013_v61  ;;  %v5757_v26 = vcombine.low %v9428_v45, %v5676_v17  ;;  %v5846_v48 = vrot.slane %v5839_v16, %v8292_v49 }
0x1bc2   : > { %v6015_v62 = vsel %vm961_vm3, %v6014_v53, -inf }
0x1bc3   : > { %6016 = vmax.xlane.f32.xlu1 %v6015_v62  ;;  %v5797_v62 = vrot.slane %v5790_v14, %v8292_v49 }
0x1bc5   : > { %v5822_v27 = vcombine.low %v5797_v62, %v5805_v55 }
0x1bd4   : > { %5678 = vrot.lane.b32.xlu1 %v9428_v45, %s7963_s18 }
0x1bd8   : > { %5695 = vrot.lane.b32.xlu1 %v9478_v56, %s7962_s16 }
0x1bdc   : > { %5702 = vrot.lane.b32.xlu1 %v9432_v44, %s7961_s13 }
0x1be0   : > { %5708 = vrot.lane.b32.xlu1 %v9432_v44, %s7963_s18 }
0x1be4   : > { %5715 = vrot.lane.b32.xlu1 %v9436_v59, %s7962_s16 }
0x1be8   : > { %5722 = vrot.lane.b32.xlu1 %v9518_v28, %s7961_s13 }
0x1bec   : > { %5728 = vrot.lane.b32.xlu1 %v9518_v28, %s7963_s18 }
0x1bf0   : > { %5735 = vrot.lane.b32.xlu1 %v9522_v50, %s7962_s16 }
0x1c4c   : > { %v6017_v31 = vpop.xlane.xlu1 %6016 }
0x1c4d   : > { %v6022_v6 = vrot.slane %v6017_v31, %v8325_v22 }
0x1c4f   : > { %7510 = vmatmul.mubr.msk.f32.vlgmr.msra.gmra.mxu1 %vm972_vm4, %v6022_v6 }
0x1c50   : > { %7513 = vmatpush3.msra.mxu1 %v9536_v15  ;;  %7514 = vmatprep.mubr.msk.f32.mxu1 %vm7953_vm2, %v7952_v9  ;;  %v5679_v2 = vpop.permute.xlu1 %5678 }
0x1c51   : > { %6355 = vmatprep.subr.bf16.mxu1 %v7724_v30  ;;  %v5765_v35 = vcombine.low %v5673_v33, %v5679_v2 }
0x1c53   : > { %v5772_v5 = vrot.slane %v5765_v35, %v8292_v49 }
0x1c54   : > { %v5696_v8 = vpop.permute.xlu1 %5695 }
0x1c55   : > { %v5806_v42 = vcombine.low %v9478_v56, %v5696_v8  ;;  %v5888_v56 = vcombine.low %v9518_v28, %v5726_v52 }
0x1c57   : > { %v5813_v31 = vrot.slane %v5806_v42, %v8292_v49  ;;  %v5895_v28 = vrot.slane %v5888_v56, %v8292_v49  ;;  %v9587_v42 = vld [vmem:[#allocation8] sm:$0xff]  ;;  %v9595_v56 = vld [vmem:[#allocation8 + $0x10] sm:$0xff] }
0x1c58   : > { %v5703_v58 = vpop.permute.xlu1 %5702 }
0x1c59   : > { %v5830_v17 = vcombine.low %v5813_v31, %v5821_v39  ;;  %v9592_v31 = vld [vmem:[#allocation8 + $0x18] sm:$0xff] }
0x1c5c   : > { %v5709_v10 = vpop.permute.xlu1 %5708 }
0x1c5d   : > { %v5847_v36 = vcombine.low %v5703_v58, %v5709_v10  ;;  %v5837_v10 = vrot.slane %v5830_v17, %v8298_v60 }
0x1c5f   : > { %v5854_v2 = vrot.slane %v5847_v36, %v8292_v49 }
0x1c60   : > { %v5716_v37 = vpop.permute.xlu1 %5715 }
0x1c61   : > { %v5855_v6 = vcombine.low %v9436_v59, %v5716_v37  ;;  %v5871_v37 = vcombine.low %v5846_v48, %v5854_v2  ;;  %v7681_v2 = vld [vmem:[%s8158_s15] ss:$0 sps:$4 sm:$0x88]  }
0x1c62   : > { %v6294_v48 = vshrl.u32 %v7681_v2, 16 }
0x1c63   : > { %v5862_v59 = vrot.slane %v5855_v6, %v8292_v49  ;;  %v5878_v11 = vrot.slane %v5871_v37, %v8298_v60 }
0x1c64   : > { %v5723_v47 = vpop.permute.xlu1 %5722 }
0x1c68   : > { %v5729_v19 = vpop.permute.xlu1 %5728 }
0x1c69   : > { %v5896_v41 = vcombine.low %v5723_v47, %v5729_v19 }
0x1c6b   : > { %v5903_v1 = vrot.slane %v5896_v41, %v8292_v49 }
0x1c6c   : > { %v5736_v53 = vpop.permute.xlu1 %5735 }
0x1c6d   : > { %v5904_v45 = vcombine.low %v9522_v50, %v5736_v53  ;;  %v5920_v57 = vcombine.low %v5895_v28, %v5903_v1 }
0x1c6f   : > { %v5911_v43 = vrot.slane %v5904_v45, %v8292_v49 }
0x1d0f   : > { %v6091_v24 = vpop.f32.mrf.mxu1 }
0x1d10   : > { %v6092_v7 = vadd.f32 %v9544_v21, %v6091_v24  ;;  %v5748_v24 = vrot.slane %v5741_v38, %v8292_v49 }
0x1d11   : > { %v7511_v32 = vpop.f32.mrf.mxu1 }
0x1d12   : > { %v6098_v0 = vrot.slane %v6092_v7, %v8338_v29  ;;  %6288 = vst.msk [vmem:[%s8173_s6 + $0x6] sm:$0x1] %vm1239_vm5, %v6092_v7  ;;  %v5756_v7 = vrot.slane %v5749_v54, %v8292_v49  ;;  %v5764_v32 = vrot.slane %v5757_v26, %v8292_v49 }
0x1d14   : > { %6104 = vbcast.lane.b32.xlu0 %v6098_v0, 264  ;;  %6100 = vbcast.lane.b32.xlu1 %v6098_v0, 256  ;;  %v5781_v33 = vcombine.low %v5764_v32, %v5772_v5  ;;  %v5773_v46 = vcombine.low %v5748_v24, %v5756_v7 }
0x1d16   : > { %v5788_v8 = vrot.slane %v5781_v33, %v8298_v60 }
0x1d18   : > { %6112 = vbcast.lane.b32.xlu0 %v6098_v0, 280  ;;  %6108 = vbcast.lane.b32.xlu1 %v6098_v0, 272  ;;  %v5863_v0 = vcombine.low %v5713_v12, %v5719_v18  ;;  %v5829_v12 = vrot.slane %v5822_v27, %v8298_v60  ;;  %v5780_v18 = vrot.slane %v5773_v46, %v8298_v60 }
0x1d1a   : > { %v5870_v51 = vrot.slane %v5863_v0, %v8292_v49  ;;  %v5789_v52 = vcombine.low %v5780_v18, %v5788_v8  ;;  %v5838_v47 = vcombine.low %v5829_v12, %v5837_v10 }
0x1d1c   : > { %6132 = vrot.lane.b32.xlu1 %v9470_v40, %s7961_s13  ;;  %v5733_v40 = vpop.permute.xlu0 %5732  ;;  %v5879_v44 = vcombine.low %v5862_v59, %v5870_v51  ;;  %v5938_v35 = vadd.f32 %v9584_v63, %v5838_v47  ;;  %v5937_v38 = vadd.f32 %v9587_v42, %v5789_v52 }
0x1d1e   : > { %v5886_v14 = vrot.slane %v5879_v44, %v8298_v60  ;;  %v6296_v44 = vrot.slane %v6294_v48, 3 }
0x1d20   : > { %v5739_v61 = vpop.permute.xlu0 %5738  ;;  %v5887_v26 = vcombine.low %v5878_v11, %v5886_v14  ;;  %7345 = vmatmul.mubr.msk.bf16.vlgmr.msra.gmra.mxu0 %vm399_vm1, %v6296_v44 }
0x1d21   : > { %v5912_v30 = vcombine.low %v5733_v40, %v5739_v61  ;;  %v5927_v40 = vrot.slane %v5920_v57, %v8298_v60  ;;  %6397 = vmatpush1.bf16.msra.mxu0 %v9399_v4  ;;  %6414 = vmatprep.mubr.bf16.mxu0 %v7951_v3 }
0x1d22   : > { %v5939_v41 = vadd.f32 %v9595_v56, %v5887_v26  ;;  %7517 = vmatprep.subr.bf16.mxu0 %v7952_v9 }
0x1d23   : > { %v5919_v50 = vrot.slane %v5912_v30, %v8292_v49 }
0x1d25   : > { %v5928_v58 = vcombine.low %v5911_v43, %v5919_v50 }
0x1d27   : > { %v5935_v19 = vrot.slane %v5928_v58, %v8298_v60 }
0x1d28   : > { %7347 = vmatmul.mubr.msk.bf16.vlgmr.msra.gmra.mxu0 %vm399_vm1, %v6296_v44 }
0x1d29   : > { %v5936_v54 = vcombine.low %v5927_v40, %v5935_v19  ;;  %7518 = vmatpush3.bf16.msra.mxu0 %v9409_v34  ;;  %7519 = vmatprep.mubr.msk.bf16.mxu0 %vm7953_vm2, %v7952_v9 }
0x1d2b   : > { %v5940_v6 = vadd.f32 %v9592_v31, %v5936_v54 }
0x1d30   : > { %7520 = vmatmul.mubr.msk.bf16.vlgmr.msra.gmra.mxu0 %vm399_vm1, %v6296_v44 }
0x1d86   : > { %v6105_v61 = vpop.permute.xlu0 %6104  ;;  %v6101_v53 = vpop.permute.xlu1 %6100 }
0x1d87   : > { %v6115_v62 = vmul.f32 %v6105_v61, %v5938_v35  ;;  %v6114_v55 = vmul.f32 %v6101_v53, %v5937_v38 }
0x1d89   : > { %v6119_v39 = vsel %vm1068_vm6, %v6115_v62, 0.0  ;;  %v6118_v5 = vsel %vm1068_vm6, %v6114_v55, 0.0 }
0x1d8a   : > { %v6113_v30 = vpop.permute.xlu0 %6112  ;;  %v6109_v45 = vpop.permute.xlu1 %6108  ;;  %v6120_v32 = vadd.f32 %v6119_v39, %v6118_v5 }
0x1d8b   : > { %v6117_v24 = vmul.f32 %v6113_v30, %v5940_v6  ;;  %v6116_v7 = vmul.f32 %v6109_v45, %v5939_v41 }
0x1d8d   : > { %v6121_v0 = vsel %vm1068_vm6, %v6116_v7, 0.0  ;;  %v6123_v36 = vsel %vm1068_vm6, %v6117_v24, 0.0 }
0x1d8e   : > { %v6122_v27 = vadd.f32 %v6121_v0, %v6120_v32  ;;  %v6133_v43 = vpop.permute.xlu1 %6132 }
0x1d90   : > { %v6124_v16 = vadd.f32 %v6123_v36, %v6122_v27 }
0x1d92   : > { %v6125_v33 = vrot.slane %v6124_v16, 4 }
0x1d94   : > { %v6126_v17 = vadd.f32 %v6125_v33, %v6124_v16 }
0x1d96   : > { %v6127_v59 = vrot.slane %v6126_v17, 2 }
0x1d98   : > { %v6128_v28 = vadd.f32 %v6127_v59, %v6126_v17 }
0x1d9a   : > { %v6129_v1 = vrot.slane %v6128_v28, 1 }
0x1d9c   : > { %v6130_v50 = vadd.f32 %v6129_v1, %v6128_v28 }
0x1d9e   : > { %v6135_v46 = vadd.f32 %v6133_v43, %v6130_v50 }
0x1da0   : > { %v6136_v51 = vmax.f32 %v6135_v46, 0.0 }
0x1da2   : > { %6141 = vrot.lane.b32.xlu1 %v6136_v51, %s7957_s20  ;;  %6138 = vrot.lane.b32.xlu0 %v6136_v51, %s7955_s12 }
0x1da6   : > { %6147 = vrot.lane.b32.xlu1 %v6136_v51, %s7956_s17  ;;  %6144 = vrot.lane.b32.xlu0 %v6136_v51, %s7954_s11 }
0x1daa   : > { %6153 = vrot.lane.b32.xlu1 %v6136_v51, %s7958_s8  ;;  %6150 = vrot.lane.b32.xlu0 %v6136_v51, %s7959_s29 }
0x1dae   : > { %6156 = vrot.lane.b32.xlu0 %v6136_v51, %s7960_s30 }
0x1de0   : > { %v9624_v62 = vpop.f32.mrf.mxu0 }
0x1de2   : > { %v9628_v55 = vpop.f32.mrf.mxu0 }
0x1de4   : > { %v6338_v39 = vpop.f32.mrf.mxu0 }
0x1de6   : > { %v6339_v5 = vpop.f32.mrf.mxu0 }
0x1de8   : > { %v9632_v6 = vpop.f32.mrf.mxu0 }
0x1dea   : > { %v9636_v41 = vpop.f32.mrf.mxu0 }
0x1dec   : > { %v6420_v30 = vpop.f32.mrf.mxu0 }
0x1dee   : > { %v6421_v45 = vpop.f32.mrf.mxu0 }
0x1df0   : > { %v6498_v24 = vpop.f32.mrf.mxu0 }
0x1df2   : > { %v7521_v7 = vpop.f32.mrf.mxu0 }
0x1df4   : > { %v6501_v32 = vpop.f32.mrf.mxu0 }
0x1df6   : > { %v7522_v0 = vpop.f32.mrf.mxu0 }
0x1e14   : > { %v6142_v8 = vpop.permute.xlu1 %6141  ;;  %v6139_v57 = vpop.permute.xlu0 %6138 }
0x1e15   : > { %v6159_v37 = vcombine.low %v6136_v51, %v6142_v8 }
0x1e17   : > { %v6166_v19 = vrot.slane %v6159_v37, %v8292_v49 }
0x1e18   : > { %v6148_v58 = vpop.permute.xlu1 %6147  ;;  %v6145_v12 = vpop.permute.xlu0 %6144 }
0x1e19   : > { %v6167_v10 = vcombine.low %v6139_v57, %v6145_v12 }
0x1e1b   : > { %v6174_v52 = vrot.slane %v6167_v10, %v8292_v49 }
0x1e1c   : > { %v6154_v18 = vpop.permute.xlu1 %6153  ;;  %v6151_v4 = vpop.permute.xlu0 %6150 }
0x1e1d   : > { %v6175_v47 = vcombine.low %v6148_v58, %v6154_v18  ;;  %v6191_v14 = vcombine.low %v6166_v19, %v6174_v52 }
0x1e1f   : > { %v6182_v11 = vrot.slane %v6175_v47, %v8292_v49  ;;  %v6198_v54 = vrot.slane %v6191_v14, %v8298_v60 }
0x1e20   : > { %v6157_v40 = vpop.permute.xlu0 %6156 }
0x1e21   : > { %v6183_v34 = vcombine.low %v6151_v4, %v6157_v40 }
0x1e23   : > { %v6190_v35 = vrot.slane %v6183_v34, %v8292_v49 }
0x1e25   : > { %v6199_v38 = vcombine.low %v6182_v11, %v6190_v35 }
0x1e27   : > { %v6206_v26 = vrot.slane %v6199_v38, %v8298_v60 }
0x1e29   : > { %v6207_v61 = vcombine.low %v6198_v54, %v6206_v26 }
0x1e2b   : > { %v6208_v53 = vsel %vm961_vm3, %v6207_v61, -inf }
0x1e2c   : > { %6209 = vmax.xlane.f32.xlu1 %v6208_v53 }
0x1e3d   : > { %6505 = vrot.lane.b32.xlu1 %v9624_v62, %s7961_s13 }
0x1e41   : > { %6508 = vrot.lane.b32.xlu1 %v9624_v62, %s7962_s16 }
0x1e45   : > { %6511 = vrot.lane.b32.xlu1 %v9624_v62, %s7963_s18 }
0x1e49   : > { %6515 = vrot.lane.b32.xlu1 %v9628_v55, %s7961_s13 }
0x1e4d   : > { %6521 = vrot.lane.b32.xlu1 %v9628_v55, %s7963_s18 }
0x1eb5   : > { %v6210_v27 = vpop.xlane.xlu1 %6209 }
0x1eb6   : > { %v6215_v36 = vrot.slane %v6210_v27, %v8325_v22 }
0x1eb8   : > { %7515 = vmatmul.mubr.msk.f32.vlgmr.msra.gmra.mxu1 %vm972_vm4, %v6215_v36 }
0x1eb9   : > { %6356 = vmatpush1.bf16.msra.mxu1 %v9444_v13  ;;  %6373 = vmatprep.mubr.bf16.mxu1 %v7951_v3  ;;  %v9657_v13 = vadd.f32 %v9467_v23, %v6498_v24  ;;  %v6506_v30 = vpop.permute.xlu1 %6505 }
0x1eba   : > { %6437 = vmatprep.subr.bf16.mxu1 %v9448_v20 }
0x1ebc   : > { %7346 = vmatmul.mubr.msk.bf16.vlgmr.msra.gmra.mxu1 %vm399_vm1, %v6296_v44 }
0x1ebd   : > { %6438 = vmatpush1.bf16.msra.mxu1 %v9453_v25  ;;  %6455 = vmatprep.mubr.bf16.mxu1 %v7951_v3 }
0x1ebe   : > { %7523 = vmatprep.subr.mxu1 %v7952_v9 }
0x1ec4   : > { %7348 = vmatmul.mubr.msk.bf16.vlgmr.msra.gmra.mxu1 %vm399_vm1, %v6296_v44 }
0x1ec5   : > { %7524 = vmatpush3.msra.mxu1 %v9536_v15  ;;  %7525 = vmatprep.mubr.msk.f32.mxu1 %vm7953_vm2, %v7952_v9 }
0x1ec6   : > { %7528 = vmatprep.subr.mxu1 %v7952_v9 }
0x1f78   : > { %v6284_v20 = vpop.f32.mrf.mxu1 }
0x1f79   : > { %v6285_v16 = vadd.f32 %v9544_v21, %v6284_v20 }
0x1f7a   : > { %v7516_v25 = vpop.f32.mrf.mxu1 }
0x1f7b   : > { %v6785_v3 = vadd.f32 %v9657_v13, %v6285_v16 }
0x1f7c   : > { %v9661_v33 = vpop.f32.mrf.mxu1 }
0x1f7d   : > { %v6786_v17 = vmax.f32 %v6785_v3, 0.0  ;;  %6525 = vrot.lane.b32.xlu1 %v9661_v33, %s7961_s13 }
0x1f7e   : > { %v9665_v59 = vpop.f32.mrf.mxu1 }
0x1f7f   : > { %6788 = vrot.lane.b32.xlu0 %v6786_v17, %s7955_s12 }
0x1f80   : > { %v6379_v28 = vpop.f32.mrf.mxu1 }
0x1f81   : > { %6528 = vrot.lane.b32.xlu1 %v9661_v33, %s7962_s16 }
0x1f82   : > { %v6380_v23 = vpop.f32.mrf.mxu1 }
0x1f83   : > { %6791 = vrot.lane.b32.xlu0 %v6786_v17, %s7957_s20 }
0x1f84   : > { %v9703_v14 = vpop.f32.mrf.mxu1 }
0x1f85   : > { %6531 = vrot.lane.b32.xlu1 %v9661_v33, %s7963_s18 }
0x1f86   : > { %v9707_v11 = vpop.f32.mrf.mxu1 }
0x1f87   : > { %6794 = vrot.lane.b32.xlu0 %v6786_v17, %s7954_s11 }
0x1f88   : > { %v6461_v35 = vpop.f32.mrf.mxu1 }
0x1f89   : > { %6535 = vrot.lane.b32.xlu1 %v9665_v59, %s7961_s13 }
0x1f8a   : > { %v6462_v38 = vpop.f32.mrf.mxu1 }
0x1f8b   : > { %6797 = vrot.lane.b32.xlu0 %v6786_v17, %s7956_s17 }
0x1f8d   : > { %6541 = vrot.lane.b32.xlu1 %v9665_v59, %s7963_s18 }
0x1f8f   : > { %6800 = vrot.lane.b32.xlu0 %v6786_v17, %s7959_s29 }
0x1f91   : > { %6548 = vrot.lane.b32.xlu1 %v9632_v6, %s7962_s16 }
0x1f93   : > { %6803 = vrot.lane.b32.xlu0 %v6786_v17, %s7958_s8 }
0x1f95   : > { %6555 = vrot.lane.b32.xlu1 %v9636_v41, %s7961_s13 }
0x1f97   : > { %6806 = vrot.lane.b32.xlu0 %v6786_v17, %s7960_s30 }
0x1f99   : > { %6561 = vrot.lane.b32.xlu1 %v9636_v41, %s7963_s18 }
0x1f9d   : > { %6568 = vrot.lane.b32.xlu1 %v9703_v14, %s7962_s16 }
0x1fa1   : > { %6575 = vrot.lane.b32.xlu1 %v9707_v11, %s7961_s13 }
0x1fa5   : > { %6581 = vrot.lane.b32.xlu1 %v9707_v11, %s7963_s18 }
0x1ff1   : > { %v6789_v1 = vpop.permute.xlu0 %6788 }
0x1ff5   : > { %v6792_v50 = vpop.permute.xlu0 %6791 }
0x1ff6   : > { %v6809_v44 = vcombine.low %v6786_v17, %v6792_v50 }
0x1ff8   : > { %v6816_v12 = vrot.slane %v6809_v44, %v8292_v49 }
0x1ff9   : > { %v6795_v43 = vpop.permute.xlu0 %6794 }
0x1ffa   : > { %v6817_v2 = vcombine.low %v6789_v1, %v6795_v43 }
0x1ffc   : > { %v6824_v8 = vrot.slane %v6817_v2, %v8292_v49 }
0x1ffd   : > { %v6798_v46 = vpop.permute.xlu0 %6797 }
0x1ffe   : > { %v6841_v18 = vcombine.low %v6816_v12, %v6824_v8 }
0x2000   : > { %v6848_v47 = vrot.slane %v6841_v18, %v8298_v60 }
0x2001   : > { %v6801_v51 = vpop.permute.xlu0 %6800 }
0x2005   : > { %v6804_v48 = vpop.permute.xlu0 %6803 }
0x2006   : > { %v6825_v57 = vcombine.low %v6798_v46, %v6804_v48 }
0x2008   : > { %v6832_v4 = vrot.slane %v6825_v57, %v8292_v49 }
0x2009   : > { %v6807_v58 = vpop.permute.xlu0 %6806 }
0x200a   : > { %v6833_v10 = vcombine.low %v6801_v51, %v6807_v58 }
0x200c   : > { %v6840_v37 = vrot.slane %v6833_v10, %v8292_v49 }
0x200e   : > { %v6849_v52 = vcombine.low %v6832_v4, %v6840_v37 }
0x2010   : > { %v6856_v40 = vrot.slane %v6849_v52, %v8298_v60 }
0x2012   : > { %v6857_v19 = vcombine.low %v6848_v47, %v6856_v40 }
0x2014   : > { %v6858_v34 = vsel %vm961_vm3, %v6857_v19, -inf }
0x2015   : > { %6859 = vmax.xlane.f32.xlu0 %v6858_v34 }
0x202b   : > { %6518 = vrot.lane.b32.xlu0 %v9628_v55, %s7962_s16 }
0x202f   : > { %6538 = vrot.lane.b32.xlu0 %v9665_v59, %s7962_s16 }
0x2033   : > { %6545 = vrot.lane.b32.xlu0 %v9632_v6, %s7961_s13 }
0x2037   : > { %6551 = vrot.lane.b32.xlu0 %v9632_v6, %s7963_s18 }
0x203b   : > { %6558 = vrot.lane.b32.xlu0 %v9636_v41, %s7962_s16 }
0x203f   : > { %6565 = vrot.lane.b32.xlu0 %v9703_v14, %s7961_s13 }
0x2043   : > { %6571 = vrot.lane.b32.xlu0 %v9703_v14, %s7963_s18 }
0x2047   : > { %6578 = vrot.lane.b32.xlu0 %v9707_v11, %s7962_s16  ;;  %s7134_s16 = scalar_lea.sflag [#allocation5], %s8154_s4 }
0x209e   : > { %v6860_v54 = vpop.xlane.xlu0 %6859 }
0x209f   : > { %v6865_v26 = vrot.slane %v6860_v54, %v8325_v22 }
0x20a1   : > { %7526 = vmatmul.mubr.msk.f32.vlgmr.msra.gmra.mxu1 %vm972_vm4, %v6865_v26 }
0x20a2   : > { %7529 = vmatpush3.msra.mxu1 %v9536_v15  ;;  %7530 = vmatprep.mubr.msk.f32.mxu1 %vm7953_vm2, %v7952_v9  ;;  %v6509_v15 = vpop.permute.xlu1 %6508  ;;  %v6519_v36 = vpop.permute.xlu0 %6518 }
0x20a3   : > { %v6600_v48 = vcombine.low %v9628_v55, %v6519_v36  ;;  %v6584_v8 = vcombine.low %v9624_v62, %v6509_v15 }
0x20a5   : > { %v6591_v19 = vrot.slane %v6584_v8, %v8292_v49 }
0x20a6   : > { %v6512_v45 = vpop.permute.xlu1 %6511  ;;  %v6539_v20 = vpop.permute.xlu0 %6538 }
0x20a7   : > { %v6649_v44 = vcombine.low %v9665_v59, %v6539_v20  ;;  %v6592_v57 = vcombine.low %v6506_v30, %v6512_v45 }
0x20a9   : > { %v6656_v52 = vrot.slane %v6649_v44, %v8292_v49  ;;  %v6599_v34 = vrot.slane %v6592_v57, %v8292_v49 }
0x20aa   : > { %v6516_v24 = vpop.permute.xlu1 %6515  ;;  %v6546_v25 = vpop.permute.xlu0 %6545 }
0x20ab   : > { %v6616_v15 = vcombine.low %v6591_v19, %v6599_v34 }
0x20ae   : > { %v6522_v9 = vpop.permute.xlu1 %6521  ;;  %v6552_v17 = vpop.permute.xlu0 %6551 }
0x20af   : > { %v6608_v58 = vcombine.low %v6516_v24, %v6522_v9  ;;  %v6690_v26 = vcombine.low %v6546_v25, %v6552_v17 }
0x20b1   : > { %v6615_v35 = vrot.slane %v6608_v58, %v8292_v49  ;;  %v6697_v24 = vrot.slane %v6690_v26, %v8292_v49 }
0x20b2   : > { %v6526_v7 = vpop.permute.xlu1 %6525  ;;  %v6559_v23 = vpop.permute.xlu0 %6558 }
0x20b3   : > { %v6698_v55 = vcombine.low %v9636_v41, %v6559_v23 }
0x20b5   : > { %v6705_v41 = vrot.slane %v6698_v55, %v8292_v49 }
0x20b6   : > { %v6529_v32 = vpop.permute.xlu1 %6528 }
0x20b7   : > { %v6633_v46 = vcombine.low %v9661_v33, %v6529_v32  ;;  %v6607_v33 = vrot.slane %v6600_v48, %v8292_v49 }
0x20b9   : > { %v6640_v18 = vrot.slane %v6633_v46, %v8292_v49 }
0x20ba   : > { %v6532_v0 = vpop.permute.xlu1 %6531 }
0x20bb   : > { %v6641_v51 = vcombine.low %v6526_v7, %v6532_v0 }
0x20bd   : > { %v6648_v4 = vrot.slane %v6641_v51, %v8292_v49 }
0x20be   : > { %v6536_v27 = vpop.permute.xlu1 %6535 }
0x20bf   : > { %v6665_v54 = vcombine.low %v6640_v18, %v6648_v4 }
0x2161   : > { %v6934_v61 = vpop.f32.mrf.mxu1 }
0x2162   : > { %v6935_v53 = vadd.f32 %v9544_v21, %v6934_v61 }
0x2163   : > { %v7527_v39 = vpop.f32.mrf.mxu1 }
0x2164   : > { %v6941_v5 = vrot.slane %v6935_v53, %v8338_v29  ;;  %7131 = vst.msk [vmem:[%s8173_s6 + $0x7] sm:$0x1] %vm1239_vm5, %v6935_v53  ;;  %v6542_v29 = vpop.permute.xlu1 %6541  ;;  %v6624_v53 = vcombine.low %v6607_v33, %v6615_v35 }
0x2165   : > { %v6657_v2 = vcombine.low %v6536_v27, %v6542_v29  ;;  %v6672_v27 = vrot.slane %v6665_v54, %v8298_v60  ;;  %v6623_v29 = vrot.slane %v6616_v15, %v8298_v60 }
0x2166   : > { %6947 = vbcast.lane.b32.xlu1 %v6941_v5, 264  ;;  %6943 = vbcast.lane.b32.xlu0 %v6941_v5, 256  ;;  %v6631_v7 = vrot.slane %v6624_v53, %v8298_v60 }
0x2167   : > { %v6664_v37 = vrot.slane %v6657_v2, %v8292_v49 }
0x2168   : > { %v6549_v16 = vpop.permute.xlu1 %6548 }
0x2169   : > { %v6682_v61 = vcombine.low %v9632_v6, %v6549_v16  ;;  %v6673_v39 = vcombine.low %v6656_v52, %v6664_v37  ;;  %v6632_v16 = vcombine.low %v6623_v29, %v6631_v7 }
0x216a   : > { %6955 = vbcast.lane.b32.xlu1 %v6941_v5, 280  ;;  %6951 = vbcast.lane.b32.xlu0 %v6941_v5, 272 }
0x216b   : > { %v6689_v9 = vrot.slane %v6682_v61, %v8292_v49  ;;  %v6680_v36 = vrot.slane %v6673_v39, %v8298_v60 }
0x216c   : > { %v6556_v3 = vpop.permute.xlu1 %6555 }
0x216d   : > { %v6714_v20 = vcombine.low %v6689_v9, %v6697_v24  ;;  %v6681_v25 = vcombine.low %v6672_v27, %v6680_v36 }
0x216e   : > { %6975 = vrot.lane.b32.xlu0 %v9657_v13, %s7961_s13  ;;  %v6566_v13 = vpop.permute.xlu0 %6565 }
0x216f   : > { %v6721_v23 = vrot.slane %v6714_v20, %v8298_v60 }
0x2170   : > { %v6562_v28 = vpop.permute.xlu1 %6561 }
0x2171   : > { %v6706_v38 = vcombine.low %v6556_v3, %v6562_v28 }
0x2172   : > { %v6572_v43 = vpop.permute.xlu0 %6571 }
0x2173   : > { %v6739_v47 = vcombine.low %v6566_v13, %v6572_v43  ;;  %v6713_v45 = vrot.slane %v6706_v38, %v8292_v49  ;;  %v6780_v13 = vadd.f32 %v9587_v42, %v6632_v16 }
0x2174   : > { %v6569_v1 = vpop.permute.xlu1 %6568 }
0x2175   : > { %v6731_v59 = vcombine.low %v9703_v14, %v6569_v1  ;;  %v6746_v5 = vrot.slane %v6739_v47, %v8292_v49  ;;  %v6722_v6 = vcombine.low %v6705_v41, %v6713_v45  ;;  %v6781_v1 = vadd.f32 %v9584_v63, %v6681_v25 }
0x2176   : > { %v6579_v10 = vpop.permute.xlu0 %6578 }
0x2177   : > { %v6747_v40 = vcombine.low %v9707_v11, %v6579_v10  ;;  %v6738_v14 = vrot.slane %v6731_v59, %v8292_v49  ;;  %v6729_v28 = vrot.slane %v6722_v6, %v8298_v60 }
0x2178   : > { %v6576_v50 = vpop.permute.xlu1 %6575 }
0x2179   : > { %v6754_v30 = vrot.slane %v6747_v40, %v8292_v49  ;;  %v6763_v32 = vcombine.low %v6738_v14, %v6746_v5  ;;  %v6730_v43 = vcombine.low %v6721_v23, %v6729_v28 }
0x217b   : > { %v6770_v3 = vrot.slane %v6763_v32, %v8298_v60  ;;  %v6782_v58 = vadd.f32 %v9595_v56, %v6730_v43 }
0x217c   : > { %v6582_v12 = vpop.permute.xlu1 %6581 }
0x217d   : > { %v6755_v62 = vcombine.low %v6576_v50, %v6582_v12 }
0x217f   : > { %v6762_v11 = vrot.slane %v6755_v62, %v8292_v49 }
0x2181   : > { %v6771_v0 = vcombine.low %v6754_v30, %v6762_v11 }
0x2183   : > { %v6778_v17 = vrot.slane %v6771_v0, %v8298_v60 }
0x2185   : > { %v6779_v50 = vcombine.low %v6770_v3, %v6778_v17 }
0x2187   : > { %v6783_v57 = vadd.f32 %v9592_v31, %v6779_v50 }
0x21d8   : > { %v6948_v46 = vpop.permute.xlu1 %6947  ;;  %v6944_v51 = vpop.permute.xlu0 %6943 }
0x21d9   : > { %v6958_v2 = vmul.f32 %v6948_v46, %v6781_v1  ;;  %v6957_v48 = vmul.f32 %v6944_v51, %v6780_v13 }
0x21db   : > { %v6962_v44 = vsel %vm1068_vm6, %v6958_v2, 0.0  ;;  %v6961_v8 = vsel %vm1068_vm6, %v6957_v48, 0.0 }
0x21dc   : > { %v6956_v12 = vpop.permute.xlu1 %6955  ;;  %v6952_v10 = vpop.permute.xlu0 %6951  ;;  %v6963_v4 = vadd.f32 %v6962_v44, %v6961_v8 }
0x21dd   : > { %v6960_v18 = vmul.f32 %v6956_v12, %v6783_v57  ;;  %v6959_v63 = vmul.f32 %v6952_v10, %v6782_v58 }
0x21df   : > { %v6964_v42 = vsel %vm1068_vm6, %v6959_v63, 0.0  ;;  %v6966_v33 = vsel %vm1068_vm6, %v6960_v18, 0.0 }
0x21e0   : > { %v6965_v37 = vadd.f32 %v6964_v42, %v6963_v4  ;;  %v6976_v31 = vpop.permute.xlu0 %6975 }
0x21e2   : > { %v6967_v52 = vadd.f32 %v6966_v33, %v6965_v37 }
0x21e4   : > { %v6968_v55 = vrot.slane %v6967_v52, 4 }
0x21e6   : > { %v6969_v59 = vadd.f32 %v6968_v55, %v6967_v52 }
0x21e8   : > { %v6970_v47 = vrot.slane %v6969_v59, 2 }
0x21ea   : > { %v6971_v62 = vadd.f32 %v6970_v47, %v6969_v59 }
0x21ec   : > { %v6972_v40 = vrot.slane %v6971_v62, 1 }
0x21ee   : > { %v6973_v19 = vadd.f32 %v6972_v40, %v6971_v62 }
0x21f0   : > { %v6978_v34 = vadd.f32 %v6976_v31, %v6973_v19 }
0x21f2   : > { %v6979_v56 = vmax.f32 %v6978_v34, 0.0 }
0x21f4   : > { %6984 = vrot.lane.b32.xlu0 %v6979_v56, %s7957_s20  ;;  %6981 = vrot.lane.b32.xlu1 %v6979_v56, %s7955_s12  ;;  %s7149_s20 = sshll.u32 %s8173_s6, 4  ;;  %s7150_s20 = int_to_ptr.vmem [resolvable:$true] %s7149_s20 }
0x21f5   : > { %s7836_s18 = scalar_lea.vmem %s7150_s20, 128  ;;  %p7843_p7 = scmp.lt.s32.totalorder %s7150_s20, %s7841_s1 }
0x21f6   : > { %p7837_p1 = scmp.ne.s32.totalorder %s7150_s20, %s7836_s18  ;;  %p7844_p9 = scmp.lt.s32.totalorder %s7842_s7, %s7836_s18 }
0x21f8   : > { %6990 = vrot.lane.b32.xlu0 %v6979_v56, %s7956_s17  ;;  %6987 = vrot.lane.b32.xlu1 %v6979_v56, %s7954_s11  ;;  %s7353_s11 = sshll.u32 %s7928_s25, 1  ;;  %p7838_p2 = pnand %p7837_p1, %p8117_p6 }
0x21f9   : > { %s7145_s12 = sadd.s32 %s7924_s24, %s7353_s11  ;;  %p7845_p12 = por %p7844_p9, %p7843_p7 }
0x21fa   : > { %s7354_s17 = sshll.u32 %s7145_s12, 7  ;;  %p7839_p4 = pneg %p7838_p2 }
0x21fc   : > { %6996 = vrot.lane.b32.xlu0 %v6979_v56, %s7958_s8  ;;  %6993 = vrot.lane.b32.xlu1 %v6979_v56, %s7959_s29  ;;  %p7846_p11 = pnand %p7845_p12, %p7839_p4 }
0x2200   : > { %6999 = vrot.lane.b32.xlu1 %v6979_v56, %s7960_s30  ;;  %s9876_s30 = sld [smem:[#allocation23_spill]] }
0x2206   : > { %s7147_s13 = scalar_lea.hbm %s9876_s30, %s7354_s17 }
0x2266   : > { %v6985_v35 = vpop.permute.xlu0 %6984  ;;  %v6982_v38 = vpop.permute.xlu1 %6981 }
0x2267   : > { %v7002_v41 = vcombine.low %v6979_v56, %v6985_v35 }
0x2269   : > { %v7009_v30 = vrot.slane %v7002_v41, %v8292_v49 }
0x226a   : > { %v6991_v54 = vpop.permute.xlu0 %6990  ;;  %v6988_v26 = vpop.permute.xlu1 %6987 }
0x226b   : > { %v7010_v61 = vcombine.low %v6982_v38, %v6988_v26 }
0x226d   : > { %v7017_v14 = vrot.slane %v7010_v61, %v8292_v49 }
0x226e   : > { %v6997_v53 = vpop.permute.xlu0 %6996  ;;  %v6994_v39 = vpop.permute.xlu1 %6993 }
0x226f   : > { %v7018_v5 = vcombine.low %v6991_v54, %v6997_v53  ;;  %v7034_v45 = vcombine.low %v7009_v30, %v7017_v14 }
0x2271   : > { %v7025_v24 = vrot.slane %v7018_v5, %v8292_v49  ;;  %v7041_v7 = vrot.slane %v7034_v45, %v8298_v60 }
0x2272   : > { %v7000_v11 = vpop.permute.xlu1 %6999 }
0x2273   : > { %v7026_v15 = vcombine.low %v6994_v39, %v7000_v11 }
0x2275   : > { %v7033_v9 = vrot.slane %v7026_v15, %v8292_v49 }
0x2277   : > { %v7042_v6 = vcombine.low %v7025_v24, %v7033_v9 }
0x2279   : > { %v7049_v32 = vrot.slane %v7042_v6, %v8298_v60 }
0x227b   : > { %v7050_v0 = vcombine.low %v7041_v7, %v7049_v32 }
0x227d   : > { %v7051_v27 = vsel %vm961_vm3, %v7050_v0, -inf }
0x227e   : > { %7052 = vmax.xlane.f32.xlu0 %v7051_v27 }
0x2307   : > { %v7053_v36 = vpop.xlane.xlu0 %7052 }
0x2308   : > { %v7058_v29 = vrot.slane %v7053_v36, %v8325_v22 }
0x230a   : > { %7531 = vmatmul.mubr.msk.f32.vlgmr.msra.gmra.mxu1 %vm972_vm4, %v7058_v29 }
0x230b   : > { %7849 = shalt.err (!%p7846_p11)
}
0x230c   : > { %s7850_s24 = scalar_lea.hbm %s7147_s13, 128  ;;  %s7854_s6 = scalar_lea.hbm %s9876_s30, 512 }
0x230d   : > { %p7851_p13 = scmp.ne.s32.totalorder %s7147_s13, %s7850_s24  ;;  %p7855_p10 = scmp.lt.s32.totalorder %s7147_s13, %s9876_s30 }
0x230e   : > { %p7856_p5 = scmp.lt.s32.totalorder %s7854_s6, %s7850_s24 }
0x230f   : > { %p7852_p3 = pnand %p7851_p13, %p8117_p6 }
0x2310   : > { %p7857_p8 = por %p7856_p5, %p7855_p10 }
0x2311   : > { %p7853_p0 = pneg %p7852_p3 }
0x2313   : > { %p7858_p1 = pnand %p7857_p8, %p7853_p0 }
0x2315   : > { %7861 = shalt.err (!%p7858_p1)
}
0x2316   : > { %7547 = dma.vmem_to_hbm [thread:$0]  (%p8117_p6), %s7150_s20, 128, %s7147_s13, %s7134_s16  }
0x23ca   : > { %v7127_v49 = vpop.f32.mrf.mxu1 }
0x23cb   : > { %v7128_v60 = vadd.f32 %v9544_v21, %v7127_v49 }
0x23cc   : > { %v7532_v22 = vpop.f32.mrf.mxu1 }
0x23cd   : > { %7132 = vst.msk [vmem:[#allocation2] sm:$0x1] %vm1239_vm5, %v7128_v60 }
0x23ce PF: > { %s9877_s21 = sld [smem:[#allocation16_spill]]  ;;  %p7574_p2 = scmp.ge.s32.totalorder %s7940_s28, 2 }
0x23cf   : > { %s9878_s11 = sld [smem:[#allocation17_spill]] }
0x23d4   : > { %s7161_s12 = sand.u32 1, %s9877_s21  }
0x23d5   : > { %p9879_p4 = scmp.ne.s32.totalorder %s9878_s11, 0  ;;  %s7162_s17 = scalar_lea.sflag [#allocation5], %s7161_s12 }
0x23d7   : > { %p7564_p7 = pnand %p7574_p2, %p9879_p4 }
0x23d9   : > { %p7565_p9 = pneg %p7564_p7 }
0x23db   : > { %7907 = dma.done.wait (%p7565_p9), %s7162_s17, 128  }
0x23dc   : > { %7909 = vsyncadd (%p7565_p9), %s7162_s17, 4294967168  ;;  %s24_s28 = sadd.s32 1, %s7940_s28   ;;  %s9880_s15 = sld [smem:[#allocation18_spill]] }
0x23dd   : > { %p21_p6 = scmp.ge.s32.totalorder %s24_s28, 6   ;;  %s9881_s21 = smov %s7916_s22 }
0x23de   : > { %s9882_s22 = smov %s7920_s23  ;;  %s9883_s23 = smov %s8134_s3 }
0x23df   : > { %s9884_s24 = smov %s7932_s26  ;;  %s9885_s25 = smov %s7936_s27 }
0x23e0   : > { %s9887_s27 = smov %s9893_s14  ;;  %23 = sbr.rel (!%p21_p6) target bundleno = 14 (0xe), region = 105 }
0x23e2   : > { %s9886_s26 = smov %s9880_s15 }
0x23e5   :  { %7167 = vsyncpa [#allocation4], 1 }
0x23e6   :  { %7169 = vsyncpa [#allocation4 + $0x1], 1 }
0x23e7   :  { %7170 = vsyncpa [#allocation7], 1 }
0x23e8   :  { %7171 = vsyncpa [#allocation10], 1 }
0x23e9   :  { %7172 = vsyncpa [#allocation5], 1 }
0x23ea   :  { %7174 = vsyncpa [#allocation5 + $0x1], 1 }

</bundles_post_ra>
